<compile_context>
chip_gen: v7x
topology: tpu7x:2x2x1
jax: 0.10.0
libtpu: 0.0.40
codegen_flags: <defaults>
</compile_context>

<pallas_src>
import functools
import math

import jax
import jax.numpy as jnp
import numpy as np
from jax.experimental import pallas as pl
from jax.experimental.pallas import tpu as pltpu

_CPAD = 8  # pad degenerate (==1) channel dims up to one sublane tile


# ---------------------------------------------------------------------------
# Static gather-matrix constants (numpy, built at trace time from shapes only)
# ---------------------------------------------------------------------------
def _conv_gather(hin, win, k, stride):
    """Conv2d (padding=0): G[t, si, so] = 1 iff input pixel si feeds output so at tap t."""
    ho = (hin - k) // stride + 1
    wo = (win - k) // stride + 1
    g = np.zeros((k * k, hin * win, ho * wo), np.float32)
    for dy in range(k):
        for dx in range(k):
            t = dy * k + dx
            for y in range(ho):
                for x in range(wo):
                    si = (y * stride + dy) * win + (x * stride + dx)
                    g[t, si, y * wo + x] = 1.0
    return g, ho, wo


def _convT_gather(hin, win, k, stride, padding):
    """ConvTranspose2d: out[y] += w[dy] * in[(y + p - dy)/s] when the index is valid."""
    ho = (hin - 1) * stride - 2 * padding + k
    wo = (win - 1) * stride - 2 * padding + k
    g = np.zeros((k * k, hin * win, ho * wo), np.float32)
    for dy in range(k):
        for dx in range(k):
            t = dy * k + dx
            for y in range(ho):
                for x in range(wo):
                    iy, ry = divmod(y + padding - dy, stride)
                    ix, rx = divmod(x + padding - dx, stride)
                    if ry == 0 and rx == 0 and 0 <= iy < hin and 0 <= ix < win:
                        g[t, iy * win + ix, y * wo + x] = 1.0
    return g, ho, wo


def _pool_gather(hin, win):
    """MaxPool2d(kernel=2, stride=1, padding=1) gather + validity mask."""
    ho, wo = hin + 1, win + 1
    g = np.zeros((4, hin * win, ho * wo), np.float32)
    m = np.zeros((4, 1, ho * wo), np.float32)
    for dy in range(2):
        for dx in range(2):
            t = dy * 2 + dx
            for y in range(ho):
                for x in range(wo):
                    iy, ix = y - 1 + dy, x - 1 + dx
                    if 0 <= iy < hin and 0 <= ix < win:
                        g[t, iy * win + ix, y * wo + x] = 1.0
                        m[t, 0, y * wo + x] = 1.0
    return g, m, ho, wo


# ---------------------------------------------------------------------------
# Weight packing: PyTorch layouts -> (taps, Cout, Cin) with channel padding
# ---------------------------------------------------------------------------
def _pad_channels(wt):
    _, co, ci = wt.shape
    return jnp.pad(wt, ((0, 0), (0, max(0, _CPAD - co)), (0, max(0, _CPAD - ci))))


def _pack_bias(b):
    b = jnp.pad(b, (0, max(0, _CPAD - b.shape[0])))
    return b.reshape(-1, 1).astype(jnp.float32)


def _pack_conv(w, b):
    """Conv2d weight (Cout, Cin, kh, kw) -> (kh*kw, Cout, Cin)."""
    co, ci, kh, kw = w.shape
    wt = jnp.transpose(w.reshape(co, ci, kh * kw), (2, 0, 1))
    return _pad_channels(wt), _pack_bias(b)


def _pack_convT(w, b):
    """ConvTranspose2d weight (Cin, Cout, kh, kw) -> (kh*kw, Cout, Cin)."""
    ci, co, kh, kw = w.shape
    wt = jnp.transpose(w.reshape(ci, co, kh * kw), (2, 1, 0))
    return _pad_channels(wt), _pack_bias(b)


# ---------------------------------------------------------------------------
# The fused Pallas kernel: one grid step = one batch sample
# ---------------------------------------------------------------------------
def _fused_autoencoder_kernel(*refs):
    (x_ref,
     w1, b1, g1, w2, b2, g2, w3, b3, g3,
     gp, mp,
     w4, b4, g4, w5, b5, g5, w6, b6, g6,
     out_ref) = refs

    def conv_like(a, w_ref, b_ref, g_ref, act):
        # a: (Cin, Sin) -> (Cout, Sout);  out = act(b + sum_t W_t @ (a @ G_t))
        acc = None
        for t in range(g_ref.shape[0]):
            ag = jnp.dot(a, g_ref[t], preferred_element_type=jnp.float32)
            c = jnp.dot(w_ref[t], ag, preferred_element_type=jnp.float32)
            acc = c if acc is None else acc + c
        acc = acc + b_ref[...]
        if act == "relu":
            return jnp.maximum(acc, 0.0)
        return jax.nn.sigmoid(acc)

    def max_pool(a, g_ref, m_ref):
        # MaxPool2d(2, stride=1, padding=1): 4 gathered taps, -inf where invalid.
        out = None
        for t in range(g_ref.shape[0]):
            v = jnp.dot(a, g_ref[t], preferred_element_type=jnp.float32)
            v = jnp.where(m_ref[t] > 0.5, v, -jnp.inf)
            out = v if out is None else jnp.maximum(out, v)
        return out

    a = x_ref[0]                                  # (_CPAD, H*W)
    # ---- encoder ----
    a = conv_like(a, w1, b1, g1, "relu")          # 16x16 -> 14x14, C=16
    a = conv_like(a, w2, b2, g2, "relu")          # 14x14 ->  6x6,  C=32
    a = conv_like(a, w3, b3, g3, "relu")          #  6x6  ->  2x2,  C=16
    # TODO(synk): Dropout(0.2) is identity in inference/eval mode; stochastic
    # training-mode masking is not implemented.
    a = max_pool(a, gp, mp)                       #  2x2  ->  3x3
    # ---- decoder ----
    a = conv_like(a, w4, b4, g4, "relu")          #  3x3  ->  5x5,  C=32
    a = conv_like(a, w5, b5, g5, "relu")          #  5x5  -> 11x11, C=16
    a = conv_like(a, w6, b6, g6, "sigmoid")       # 11x11 -> 13x13, C padded to 8
    out_ref[0] = a[0:1, :]                        # keep the single real channel


# ---------------------------------------------------------------------------
# Forward wrapper (matches ConvAutoencoder.forward)
# ---------------------------------------------------------------------------
def conv_autoencoder_forward(params, x):
    n, cin, hin, win = x.shape
    assert cin == 1

    # Static gather constants for the 16 -> 14 -> 6 -> 2 -> (pool)3 -> 5 -> 11 -> 13 chain.
    g1, h, w = _conv_gather(hin, win, 3, 1)
    g2, h, w = _conv_gather(h, w, 3, 2)
    g3, h, w = _conv_gather(h, w, 3, 2)
    gp, mp, h, w = _pool_gather(h, w)
    g4, h, w = _convT_gather(h, w, 3, 2, 1)
    g5, h, w = _convT_gather(h, w, 3, 2, 0)
    g6, h, w = _convT_gather(h, w, 3, 1, 0)
    sout = h * w

    w1, b1 = _pack_conv(*params["e1"])
    w2, b2 = _pack_conv(*params["e2"])
    w3, b3 = _pack_conv(*params["e3"])
    w4, b4 = _pack_convT(*params["d1"])
    w5, b5 = _pack_convT(*params["d2"])
    w6, b6 = _pack_convT(*params["d3"])

    xk = jnp.pad(x.reshape(n, 1, hin * win).astype(jnp.float32),
                 ((0, 0), (0, _CPAD - 1), (0, 0)))

    operands = [xk,
                w1, b1, jnp.asarray(g1), w2, b2, jnp.asarray(g2),
                w3, b3, jnp.asarray(g3),
                jnp.asarray(gp), jnp.asarray(mp),
                w4, b4, jnp.asarray(g4), w5, b5, jnp.asarray(g5),
                w6, b6, jnp.asarray(g6)]

    def _resident(a):
        # whole array in VMEM, same (constant) block for every grid step
        nd = a.ndim
        return pl.BlockSpec(a.shape, lambda i: (0,) * nd)

    in_specs = ([pl.BlockSpec((1, _CPAD, hin * win), lambda i: (i, 0, 0))] +
                [_resident(a) for a in operands[1:]])

    out = pl.pallas_call(
        _fused_autoencoder_kernel,
        out_shape=jax.ShapeDtypeStruct((n, 1, sout), jnp.float32),
        grid=(n,),
        in_specs=in_specs,
        out_specs=pl.BlockSpec((1, 1, sout), lambda i: (i, 0, 0)),
        compiler_params=pltpu.CompilerParams(
            dimension_semantics=("parallel",),
            vmem_limit_bytes=32 * 1024 * 1024),
    )(*operands)
    return out.reshape(n, 1, h, w)


# ---------------------------------------------------------------------------
# Parameters (PyTorch layouts / init bounds)
# ---------------------------------------------------------------------------
def make_params(key):
    def conv_p(k, cout, cin, ksz):
        k1, k2 = jax.random.split(k)
        bound = 1.0 / math.sqrt(cin * ksz * ksz)
        wgt = jax.random.uniform(k1, (cout, cin, ksz, ksz), jnp.float32, -bound, bound)
        b = jax.random.uniform(k2, (cout,), jnp.float32, -bound, bound)
        return wgt, b

    def convt_p(k, cin, cout, ksz):
        k1, k2 = jax.random.split(k)
        bound = 1.0 / math.sqrt(cout * ksz * ksz)
        wgt = jax.random.uniform(k1, (cin, cout, ksz, ksz), jnp.float32, -bound, bound)
        b = jax.random.uniform(k2, (cout,), jnp.float32, -bound, bound)
        return wgt, b

    keys = jax.random.split(key, 6)
    return {
        "e1": conv_p(keys[0], 16, 1, 3),    # Conv2d(1, 16, 3, stride=1)
        "e2": conv_p(keys[1], 32, 16, 3),   # Conv2d(16, 32, 3, stride=2)
        "e3": conv_p(keys[2], 16, 32, 3),   # Conv2d(32, 16, 3, stride=2)
        "d1": convt_p(keys[3], 16, 32, 3),  # ConvTranspose2d(16, 32, 3, s=2, p=1)
        "d2": convt_p(keys[4], 32, 16, 3),  # ConvTranspose2d(32, 16, 3, s=2)
        "d3": convt_p(keys[5], 16, 1, 3),   # ConvTranspose2d(16, 1, 3, s=1)
    }


# ---------------------------------------------------------------------------
# Pure-XLA reference (lax.conv / reduce_window) for in-script self-validation
# ---------------------------------------------------------------------------
def _reference_forward(params, x):
    dn = ("NCHW", "OIHW", "NCHW")
    hi = jax.lax.Precision.HIGHEST

    def conv(v, wgt, b, s):
        y = jax.lax.conv_general_dilated(v, wgt, (s, s), "VALID",
                                         dimension_numbers=dn, precision=hi)
        return y + b.reshape(1, -1, 1, 1)

    def convT(v, wgt, b, s, p):
        k = wgt.shape[-1]
        w2 = jnp.flip(wgt, (2, 3)).transpose(1, 0, 2, 3)
        y = jax.lax.conv_general_dilated(
            v, w2, (1, 1), [(k - 1 - p, k - 1 - p)] * 2,
            lhs_dilation=(s, s), dimension_numbers=dn, precision=hi)
        return y + b.reshape(1, -1, 1, 1)

    relu = lambda v: jnp.maximum(v, 0.0)
    v = relu(conv(x, *params["e1"], 1))
    v = relu(conv(v, *params["e2"], 2))
    v = relu(conv(v, *params["e3"], 2))
    v = jax.lax.reduce_window(v, -jnp.inf, jax.lax.max,
                              (1, 1, 2, 2), (1, 1, 1, 1),
                              ((0, 0), (0, 0), (1, 1), (1, 1)))
    v = relu(convT(v, *params["d1"], 2, 1))
    v = relu(convT(v, *params["d2"], 2, 0))
    v = jax.nn.sigmoid(convT(v, *params["d3"], 1, 0))
    return v


if __name__ == "__main__":
    key = jax.random.PRNGKey(0)
    pkey, xkey = jax.random.split(key)
    params = make_params(pkey)
    # PyODDataset reshapes flat vectors into (N, 1, sqrt(D), sqrt(D)); use 16x16.
    x = jax.random.uniform(xkey, (2, 1, 16, 16), jnp.float32)

    fwd = jax.jit(functools.partial(conv_autoencoder_forward, params))
    out = jax.block_until_ready(fwd(x))

    # 16x16 -> 14 -> 6 -> 2 -> pool 3 -> 5 -> 11 -> 13 (same as the PyTorch module)
    assert out.shape == (2, 1, 13, 13), out.shape
    assert out.dtype == jnp.float32
    assert bool(jnp.all((out >= 0.0) & (out <= 1.0)))  # sigmoid output range

    ref = _reference_forward(params, x)
    err = float(jnp.max(jnp.abs(out - ref)))
    # Loose enough to tolerate MXU f32 pass rounding, tight enough to catch
    # any gather/weight-orientation bug.
    assert err < 2e-2, err

    print("KERNEL_OK")
</pallas_src>

<mosaic_0001>
module attributes {stable_mosaic.version = 11 : i64} {
  func.func @_fused_autoencoder_kernel(%arg0: i32, %arg1: memref<1x8x256xf32, #tpu.memory_space<vmem>>, %arg2: memref<9x16x8xf32, #tpu.memory_space<vmem>>, %arg3: memref<16x1xf32, #tpu.memory_space<vmem>>, %arg4: memref<9x256x196xf32, #tpu.memory_space<vmem>>, %arg5: memref<9x32x16xf32, #tpu.memory_space<vmem>>, %arg6: memref<32x1xf32, #tpu.memory_space<vmem>>, %arg7: memref<9x196x36xf32, #tpu.memory_space<vmem>>, %arg8: memref<9x16x32xf32, #tpu.memory_space<vmem>>, %arg9: memref<16x1xf32, #tpu.memory_space<vmem>>, %arg10: memref<9x36x4xf32, #tpu.memory_space<vmem>>, %arg11: memref<4x4x9xf32, #tpu.memory_space<vmem>>, %arg12: memref<4x1x9xf32, #tpu.memory_space<vmem>>, %arg13: memref<9x32x16xf32, #tpu.memory_space<vmem>>, %arg14: memref<32x1xf32, #tpu.memory_space<vmem>>, %arg15: memref<9x9x25xf32, #tpu.memory_space<vmem>>, %arg16: memref<9x16x32xf32, #tpu.memory_space<vmem>>, %arg17: memref<16x1xf32, #tpu.memory_space<vmem>>, %arg18: memref<9x25x121xf32, #tpu.memory_space<vmem>>, %arg19: memref<9x8x16xf32, #tpu.memory_space<vmem>>, %arg20: memref<8x1xf32, #tpu.memory_space<vmem>>, %arg21: memref<9x121x169xf32, #tpu.memory_space<vmem>>, %arg22: memref<1x1x169xf32, #tpu.memory_space<vmem>>) attributes {dimension_semantics = [#tpu.dimension_semantics<parallel>], iteration_bounds = array<i64: 2>, scalar_prefetch = 0 : i64, scratch_operands = 0 : i64, tpu.core_type = #tpu.core_type<tc>, window_params = [{transform_indices = @transform_0, window_bounds = array<i64: 1, 8, 256>}, {pipeline_mode = #tpu.pipeline_mode<synchronous>, transform_indices = @transform_1, window_bounds = array<i64: 9, 16, 8>}, {pipeline_mode = #tpu.pipeline_mode<synchronous>, transform_indices = @transform_2, window_bounds = array<i64: 16, 1>}, {pipeline_mode = #tpu.pipeline_mode<synchronous>, transform_indices = @transform_3, window_bounds = array<i64: 9, 256, 196>}, {pipeline_mode = #tpu.pipeline_mode<synchronous>, transform_indices = @transform_4, window_bounds = array<i64: 9, 32, 16>}, {pipeline_mode = #tpu.pipeline_mode<synchronous>, transform_indices = @transform_5, window_bounds = array<i64: 32, 1>}, {pipeline_mode = #tpu.pipeline_mode<synchronous>, transform_indices = @transform_6, window_bounds = array<i64: 9, 196, 36>}, {pipeline_mode = #tpu.pipeline_mode<synchronous>, transform_indices = @transform_7, window_bounds = array<i64: 9, 16, 32>}, {pipeline_mode = #tpu.pipeline_mode<synchronous>, transform_indices = @transform_8, window_bounds = array<i64: 16, 1>}, {pipeline_mode = #tpu.pipeline_mode<synchronous>, transform_indices = @transform_9, window_bounds = array<i64: 9, 36, 4>}, {pipeline_mode = #tpu.pipeline_mode<synchronous>, transform_indices = @transform_10, window_bounds = array<i64: 4, 4, 9>}, {pipeline_mode = #tpu.pipeline_mode<synchronous>, transform_indices = @transform_11, window_bounds = array<i64: 4, 1, 9>}, {pipeline_mode = #tpu.pipeline_mode<synchronous>, transform_indices = @transform_12, window_bounds = array<i64: 9, 32, 16>}, {pipeline_mode = #tpu.pipeline_mode<synchronous>, transform_indices = @transform_13, window_bounds = array<i64: 32, 1>}, {pipeline_mode = #tpu.pipeline_mode<synchronous>, transform_indices = @transform_14, window_bounds = array<i64: 9, 9, 25>}, {pipeline_mode = #tpu.pipeline_mode<synchronous>, transform_indices = @transform_15, window_bounds = array<i64: 9, 16, 32>}, {pipeline_mode = #tpu.pipeline_mode<synchronous>, transform_indices = @transform_16, window_bounds = array<i64: 16, 1>}, {pipeline_mode = #tpu.pipeline_mode<synchronous>, transform_indices = @transform_17, window_bounds = array<i64: 9, 25, 121>}, {pipeline_mode = #tpu.pipeline_mode<synchronous>, transform_indices = @transform_18, window_bounds = array<i64: 9, 8, 16>}, {pipeline_mode = #tpu.pipeline_mode<synchronous>, transform_indices = @transform_19, window_bounds = array<i64: 8, 1>}, {pipeline_mode = #tpu.pipeline_mode<synchronous>, transform_indices = @transform_20, window_bounds = array<i64: 9, 121, 169>}, {transform_indices = @transform_21, window_bounds = array<i64: 1, 1, 169>}]} {
    %c0 = arith.constant 0 : index
    %c0_0 = arith.constant 0 : index
    %c0_1 = arith.constant 0 : index
    %0 = vector.load %arg1[%c0, %c0_0, %c0_1] : memref<1x8x256xf32, #tpu.memory_space<vmem>>, vector<1x8x256xf32>
    %1 = vector.shape_cast %0 : vector<1x8x256xf32> to vector<8x256xf32>
    %c0_2 = arith.constant 0 : index
    %c0_3 = arith.constant 0 : index
    %c0_4 = arith.constant 0 : index
    %2 = vector.load %arg4[%c0_2, %c0_3, %c0_4] : memref<9x256x196xf32, #tpu.memory_space<vmem>>, vector<1x256x196xf32>
    %3 = vector.shape_cast %2 : vector<1x256x196xf32> to vector<256x196xf32>
    %cst = arith.constant dense<0.000000e+00> : vector<8x196xf32>
    %4 = tpu.matmul %1, %3, %cst {dimension_numbers = #tpu.dot_dimension_numbers<[1], [0], [0], [1], [0, 0, 1, 1], [], []>} : vector<8x256xf32>, vector<256x196xf32>, vector<8x196xf32> -> vector<8x196xf32>
    %c0_5 = arith.constant 0 : index
    %c0_6 = arith.constant 0 : index
    %c0_7 = arith.constant 0 : index
    %5 = vector.load %arg2[%c0_5, %c0_6, %c0_7] : memref<9x16x8xf32, #tpu.memory_space<vmem>>, vector<1x16x8xf32>
    %6 = vector.shape_cast %5 : vector<1x16x8xf32> to vector<16x8xf32>
    %cst_8 = arith.constant dense<0.000000e+00> : vector<16x196xf32>
    %7 = tpu.matmul %6, %4, %cst_8 {dimension_numbers = #tpu.dot_dimension_numbers<[1], [0], [0], [1], [0, 0, 1, 1], [], []>} : vector<16x8xf32>, vector<8x196xf32>, vector<16x196xf32> -> vector<16x196xf32>
    %c1 = arith.constant 1 : index
    %c0_9 = arith.constant 0 : index
    %c0_10 = arith.constant 0 : index
    %8 = vector.load %arg4[%c1, %c0_9, %c0_10] : memref<9x256x196xf32, #tpu.memory_space<vmem>>, vector<1x256x196xf32>
    %9 = vector.shape_cast %8 : vector<1x256x196xf32> to vector<256x196xf32>
    %cst_11 = arith.constant dense<0.000000e+00> : vector<8x196xf32>
    %10 = tpu.matmul %1, %9, %cst_11 {dimension_numbers = #tpu.dot_dimension_numbers<[1], [0], [0], [1], [0, 0, 1, 1], [], []>} : vector<8x256xf32>, vector<256x196xf32>, vector<8x196xf32> -> vector<8x196xf32>
    %c1_12 = arith.constant 1 : index
    %c0_13 = arith.constant 0 : index
    %c0_14 = arith.constant 0 : index
    %11 = vector.load %arg2[%c1_12, %c0_13, %c0_14] : memref<9x16x8xf32, #tpu.memory_space<vmem>>, vector<1x16x8xf32>
    %12 = vector.shape_cast %11 : vector<1x16x8xf32> to vector<16x8xf32>
    %cst_15 = arith.constant dense<0.000000e+00> : vector<16x196xf32>
    %13 = tpu.matmul %12, %10, %cst_15 {dimension_numbers = #tpu.dot_dimension_numbers<[1], [0], [0], [1], [0, 0, 1, 1], [], []>} : vector<16x8xf32>, vector<8x196xf32>, vector<16x196xf32> -> vector<16x196xf32>
    %14 = arith.addf %7, %13 : vector<16x196xf32>
    %c2 = arith.constant 2 : index
    %c0_16 = arith.constant 0 : index
    %c0_17 = arith.constant 0 : index
    %15 = vector.load %arg4[%c2, %c0_16, %c0_17] : memref<9x256x196xf32, #tpu.memory_space<vmem>>, vector<1x256x196xf32>
    %16 = vector.shape_cast %15 : vector<1x256x196xf32> to vector<256x196xf32>
    %cst_18 = arith.constant dense<0.000000e+00> : vector<8x196xf32>
    %17 = tpu.matmul %1, %16, %cst_18 {dimension_numbers = #tpu.dot_dimension_numbers<[1], [0], [0], [1], [0, 0, 1, 1], [], []>} : vector<8x256xf32>, vector<256x196xf32>, vector<8x196xf32> -> vector<8x196xf32>
    %c2_19 = arith.constant 2 : index
    %c0_20 = arith.constant 0 : index
    %c0_21 = arith.constant 0 : index
    %18 = vector.load %arg2[%c2_19, %c0_20, %c0_21] : memref<9x16x8xf32, #tpu.memory_space<vmem>>, vector<1x16x8xf32>
    %19 = vector.shape_cast %18 : vector<1x16x8xf32> to vector<16x8xf32>
    %cst_22 = arith.constant dense<0.000000e+00> : vector<16x196xf32>
    %20 = tpu.matmul %19, %17, %cst_22 {dimension_numbers = #tpu.dot_dimension_numbers<[1], [0], [0], [1], [0, 0, 1, 1], [], []>} : vector<16x8xf32>, vector<8x196xf32>, vector<16x196xf32> -> vector<16x196xf32>
    %21 = arith.addf %14, %20 : vector<16x196xf32>
    %c3 = arith.constant 3 : index
    %c0_23 = arith.constant 0 : index
    %c0_24 = arith.constant 0 : index
    %22 = vector.load %arg4[%c3, %c0_23, %c0_24] : memref<9x256x196xf32, #tpu.memory_space<vmem>>, vector<1x256x196xf32>
    %23 = vector.shape_cast %22 : vector<1x256x196xf32> to vector<256x196xf32>
    %cst_25 = arith.constant dense<0.000000e+00> : vector<8x196xf32>
    %24 = tpu.matmul %1, %23, %cst_25 {dimension_numbers = #tpu.dot_dimension_numbers<[1], [0], [0], [1], [0, 0, 1, 1], [], []>} : vector<8x256xf32>, vector<256x196xf32>, vector<8x196xf32> -> vector<8x196xf32>
    %c3_26 = arith.constant 3 : index
    %c0_27 = arith.constant 0 : index
    %c0_28 = arith.constant 0 : index
    %25 = vector.load %arg2[%c3_26, %c0_27, %c0_28] : memref<9x16x8xf32, #tpu.memory_space<vmem>>, vector<1x16x8xf32>
    %26 = vector.shape_cast %25 : vector<1x16x8xf32> to vector<16x8xf32>
    %cst_29 = arith.constant dense<0.000000e+00> : vector<16x196xf32>
    %27 = tpu.matmul %26, %24, %cst_29 {dimension_numbers = #tpu.dot_dimension_numbers<[1], [0], [0], [1], [0, 0, 1, 1], [], []>} : vector<16x8xf32>, vector<8x196xf32>, vector<16x196xf32> -> vector<16x196xf32>
    %28 = arith.addf %21, %27 : vector<16x196xf32>
    %c4 = arith.constant 4 : index
    %c0_30 = arith.constant 0 : index
    %c0_31 = arith.constant 0 : index
    %29 = vector.load %arg4[%c4, %c0_30, %c0_31] : memref<9x256x196xf32, #tpu.memory_space<vmem>>, vector<1x256x196xf32>
    %30 = vector.shape_cast %29 : vector<1x256x196xf32> to vector<256x196xf32>
    %cst_32 = arith.constant dense<0.000000e+00> : vector<8x196xf32>
    %31 = tpu.matmul %1, %30, %cst_32 {dimension_numbers = #tpu.dot_dimension_numbers<[1], [0], [0], [1], [0, 0, 1, 1], [], []>} : vector<8x256xf32>, vector<256x196xf32>, vector<8x196xf32> -> vector<8x196xf32>
    %c4_33 = arith.constant 4 : index
    %c0_34 = arith.constant 0 : index
    %c0_35 = arith.constant 0 : index
    %32 = vector.load %arg2[%c4_33, %c0_34, %c0_35] : memref<9x16x8xf32, #tpu.memory_space<vmem>>, vector<1x16x8xf32>
    %33 = vector.shape_cast %32 : vector<1x16x8xf32> to vector<16x8xf32>
    %cst_36 = arith.constant dense<0.000000e+00> : vector<16x196xf32>
    %34 = tpu.matmul %33, %31, %cst_36 {dimension_numbers = #tpu.dot_dimension_numbers<[1], [0], [0], [1], [0, 0, 1, 1], [], []>} : vector<16x8xf32>, vector<8x196xf32>, vector<16x196xf32> -> vector<16x196xf32>
    %35 = arith.addf %28, %34 : vector<16x196xf32>
    %c5 = arith.constant 5 : index
    %c0_37 = arith.constant 0 : index
    %c0_38 = arith.constant 0 : index
    %36 = vector.load %arg4[%c5, %c0_37, %c0_38] : memref<9x256x196xf32, #tpu.memory_space<vmem>>, vector<1x256x196xf32>
    %37 = vector.shape_cast %36 : vector<1x256x196xf32> to vector<256x196xf32>
    %cst_39 = arith.constant dense<0.000000e+00> : vector<8x196xf32>
    %38 = tpu.matmul %1, %37, %cst_39 {dimension_numbers = #tpu.dot_dimension_numbers<[1], [0], [0], [1], [0, 0, 1, 1], [], []>} : vector<8x256xf32>, vector<256x196xf32>, vector<8x196xf32> -> vector<8x196xf32>
    %c5_40 = arith.constant 5 : index
    %c0_41 = arith.constant 0 : index
    %c0_42 = arith.constant 0 : index
    %39 = vector.load %arg2[%c5_40, %c0_41, %c0_42] : memref<9x16x8xf32, #tpu.memory_space<vmem>>, vector<1x16x8xf32>
    %40 = vector.shape_cast %39 : vector<1x16x8xf32> to vector<16x8xf32>
    %cst_43 = arith.constant dense<0.000000e+00> : vector<16x196xf32>
    %41 = tpu.matmul %40, %38, %cst_43 {dimension_numbers = #tpu.dot_dimension_numbers<[1], [0], [0], [1], [0, 0, 1, 1], [], []>} : vector<16x8xf32>, vector<8x196xf32>, vector<16x196xf32> -> vector<16x196xf32>
    %42 = arith.addf %35, %41 : vector<16x196xf32>
    %c6 = arith.constant 6 : index
    %c0_44 = arith.constant 0 : index
    %c0_45 = arith.constant 0 : index
    %43 = vector.load %arg4[%c6, %c0_44, %c0_45] : memref<9x256x196xf32, #tpu.memory_space<vmem>>, vector<1x256x196xf32>
    %44 = vector.shape_cast %43 : vector<1x256x196xf32> to vector<256x196xf32>
    %cst_46 = arith.constant dense<0.000000e+00> : vector<8x196xf32>
    %45 = tpu.matmul %1, %44, %cst_46 {dimension_numbers = #tpu.dot_dimension_numbers<[1], [0], [0], [1], [0, 0, 1, 1], [], []>} : vector<8x256xf32>, vector<256x196xf32>, vector<8x196xf32> -> vector<8x196xf32>
    %c6_47 = arith.constant 6 : index
    %c0_48 = arith.constant 0 : index
    %c0_49 = arith.constant 0 : index
    %46 = vector.load %arg2[%c6_47, %c0_48, %c0_49] : memref<9x16x8xf32, #tpu.memory_space<vmem>>, vector<1x16x8xf32>
    %47 = vector.shape_cast %46 : vector<1x16x8xf32> to vector<16x8xf32>
    %cst_50 = arith.constant dense<0.000000e+00> : vector<16x196xf32>
    %48 = tpu.matmul %47, %45, %cst_50 {dimension_numbers = #tpu.dot_dimension_numbers<[1], [0], [0], [1], [0, 0, 1, 1], [], []>} : vector<16x8xf32>, vector<8x196xf32>, vector<16x196xf32> -> vector<16x196xf32>
    %49 = arith.addf %42, %48 : vector<16x196xf32>
    %c7 = arith.constant 7 : index
    %c0_51 = arith.constant 0 : index
    %c0_52 = arith.constant 0 : index
    %50 = vector.load %arg4[%c7, %c0_51, %c0_52] : memref<9x256x196xf32, #tpu.memory_space<vmem>>, vector<1x256x196xf32>
    %51 = vector.shape_cast %50 : vector<1x256x196xf32> to vector<256x196xf32>
    %cst_53 = arith.constant dense<0.000000e+00> : vector<8x196xf32>
    %52 = tpu.matmul %1, %51, %cst_53 {dimension_numbers = #tpu.dot_dimension_numbers<[1], [0], [0], [1], [0, 0, 1, 1], [], []>} : vector<8x256xf32>, vector<256x196xf32>, vector<8x196xf32> -> vector<8x196xf32>
    %c7_54 = arith.constant 7 : index
    %c0_55 = arith.constant 0 : index
    %c0_56 = arith.constant 0 : index
    %53 = vector.load %arg2[%c7_54, %c0_55, %c0_56] : memref<9x16x8xf32, #tpu.memory_space<vmem>>, vector<1x16x8xf32>
    %54 = vector.shape_cast %53 : vector<1x16x8xf32> to vector<16x8xf32>
    %cst_57 = arith.constant dense<0.000000e+00> : vector<16x196xf32>
    %55 = tpu.matmul %54, %52, %cst_57 {dimension_numbers = #tpu.dot_dimension_numbers<[1], [0], [0], [1], [0, 0, 1, 1], [], []>} : vector<16x8xf32>, vector<8x196xf32>, vector<16x196xf32> -> vector<16x196xf32>
    %56 = arith.addf %49, %55 : vector<16x196xf32>
    %c8 = arith.constant 8 : index
    %c0_58 = arith.constant 0 : index
    %c0_59 = arith.constant 0 : index
    %57 = vector.load %arg4[%c8, %c0_58, %c0_59] : memref<9x256x196xf32, #tpu.memory_space<vmem>>, vector<1x256x196xf32>
    %58 = vector.shape_cast %57 : vector<1x256x196xf32> to vector<256x196xf32>
    %cst_60 = arith.constant dense<0.000000e+00> : vector<8x196xf32>
    %59 = tpu.matmul %1, %58, %cst_60 {dimension_numbers = #tpu.dot_dimension_numbers<[1], [0], [0], [1], [0, 0, 1, 1], [], []>} : vector<8x256xf32>, vector<256x196xf32>, vector<8x196xf32> -> vector<8x196xf32>
    %c8_61 = arith.constant 8 : index
    %c0_62 = arith.constant 0 : index
    %c0_63 = arith.constant 0 : index
    %60 = vector.load %arg2[%c8_61, %c0_62, %c0_63] : memref<9x16x8xf32, #tpu.memory_space<vmem>>, vector<1x16x8xf32>
    %61 = vector.shape_cast %60 : vector<1x16x8xf32> to vector<16x8xf32>
    %cst_64 = arith.constant dense<0.000000e+00> : vector<16x196xf32>
    %62 = tpu.matmul %61, %59, %cst_64 {dimension_numbers = #tpu.dot_dimension_numbers<[1], [0], [0], [1], [0, 0, 1, 1], [], []>} : vector<16x8xf32>, vector<8x196xf32>, vector<16x196xf32> -> vector<16x196xf32>
    %63 = arith.addf %56, %62 : vector<16x196xf32>
    %c0_65 = arith.constant 0 : index
    %c0_66 = arith.constant 0 : index
    %64 = vector.load %arg3[%c0_65, %c0_66] : memref<16x1xf32, #tpu.memory_space<vmem>>, vector<16x1xf32>
    %65 = vector.broadcast %64 : vector<16x1xf32> to vector<16x196xf32>
    %66 = arith.addf %63, %65 : vector<16x196xf32>
    %cst_67 = arith.constant 0.000000e+00 : f32
    %67 = vector.broadcast %cst_67 : f32 to vector<16x196xf32>
    %68 = arith.maximumf %66, %67 : vector<16x196xf32>
    %c0_68 = arith.constant 0 : index
    %c0_69 = arith.constant 0 : index
    %c0_70 = arith.constant 0 : index
    %69 = vector.load %arg7[%c0_68, %c0_69, %c0_70] : memref<9x196x36xf32, #tpu.memory_space<vmem>>, vector<1x196x36xf32>
    %70 = vector.shape_cast %69 : vector<1x196x36xf32> to vector<196x36xf32>
    %cst_71 = arith.constant dense<0.000000e+00> : vector<16x36xf32>
    %71 = tpu.matmul %68, %70, %cst_71 {dimension_numbers = #tpu.dot_dimension_numbers<[1], [0], [0], [1], [0, 0, 1, 1], [], []>} : vector<16x196xf32>, vector<196x36xf32>, vector<16x36xf32> -> vector<16x36xf32>
    %c0_72 = arith.constant 0 : index
    %c0_73 = arith.constant 0 : index
    %c0_74 = arith.constant 0 : index
    %72 = vector.load %arg5[%c0_72, %c0_73, %c0_74] : memref<9x32x16xf32, #tpu.memory_space<vmem>>, vector<1x32x16xf32>
    %73 = vector.shape_cast %72 : vector<1x32x16xf32> to vector<32x16xf32>
    %cst_75 = arith.constant dense<0.000000e+00> : vector<32x36xf32>
    %74 = tpu.matmul %73, %71, %cst_75 {dimension_numbers = #tpu.dot_dimension_numbers<[1], [0], [0], [1], [0, 0, 1, 1], [], []>} : vector<32x16xf32>, vector<16x36xf32>, vector<32x36xf32> -> vector<32x36xf32>
    %c1_76 = arith.constant 1 : index
    %c0_77 = arith.constant 0 : index
    %c0_78 = arith.constant 0 : index
    %75 = vector.load %arg7[%c1_76, %c0_77, %c0_78] : memref<9x196x36xf32, #tpu.memory_space<vmem>>, vector<1x196x36xf32>
    %76 = vector.shape_cast %75 : vector<1x196x36xf32> to vector<196x36xf32>
    %cst_79 = arith.constant dense<0.000000e+00> : vector<16x36xf32>
    %77 = tpu.matmul %68, %76, %cst_79 {dimension_numbers = #tpu.dot_dimension_numbers<[1], [0], [0], [1], [0, 0, 1, 1], [], []>} : vector<16x196xf32>, vector<196x36xf32>, vector<16x36xf32> -> vector<16x36xf32>
    %c1_80 = arith.constant 1 : index
    %c0_81 = arith.constant 0 : index
    %c0_82 = arith.constant 0 : index
    %78 = vector.load %arg5[%c1_80, %c0_81, %c0_82] : memref<9x32x16xf32, #tpu.memory_space<vmem>>, vector<1x32x16xf32>
    %79 = vector.shape_cast %78 : vector<1x32x16xf32> to vector<32x16xf32>
    %cst_83 = arith.constant dense<0.000000e+00> : vector<32x36xf32>
    %80 = tpu.matmul %79, %77, %cst_83 {dimension_numbers = #tpu.dot_dimension_numbers<[1], [0], [0], [1], [0, 0, 1, 1], [], []>} : vector<32x16xf32>, vector<16x36xf32>, vector<32x36xf32> -> vector<32x36xf32>
    %81 = arith.addf %74, %80 : vector<32x36xf32>
    %c2_84 = arith.constant 2 : index
    %c0_85 = arith.constant 0 : index
    %c0_86 = arith.constant 0 : index
    %82 = vector.load %arg7[%c2_84, %c0_85, %c0_86] : memref<9x196x36xf32, #tpu.memory_space<vmem>>, vector<1x196x36xf32>
    %83 = vector.shape_cast %82 : vector<1x196x36xf32> to vector<196x36xf32>
    %cst_87 = arith.constant dense<0.000000e+00> : vector<16x36xf32>
    %84 = tpu.matmul %68, %83, %cst_87 {dimension_numbers = #tpu.dot_dimension_numbers<[1], [0], [0], [1], [0, 0, 1, 1], [], []>} : vector<16x196xf32>, vector<196x36xf32>, vector<16x36xf32> -> vector<16x36xf32>
    %c2_88 = arith.constant 2 : index
    %c0_89 = arith.constant 0 : index
    %c0_90 = arith.constant 0 : index
    %85 = vector.load %arg5[%c2_88, %c0_89, %c0_90] : memref<9x32x16xf32, #tpu.memory_space<vmem>>, vector<1x32x16xf32>
    %86 = vector.shape_cast %85 : vector<1x32x16xf32> to vector<32x16xf32>
    %cst_91 = arith.constant dense<0.000000e+00> : vector<32x36xf32>
    %87 = tpu.matmul %86, %84, %cst_91 {dimension_numbers = #tpu.dot_dimension_numbers<[1], [0], [0], [1], [0, 0, 1, 1], [], []>} : vector<32x16xf32>, vector<16x36xf32>, vector<32x36xf32> -> vector<32x36xf32>
    %88 = arith.addf %81, %87 : vector<32x36xf32>
    %c3_92 = arith.constant 3 : index
    %c0_93 = arith.constant 0 : index
    %c0_94 = arith.constant 0 : index
    %89 = vector.load %arg7[%c3_92, %c0_93, %c0_94] : memref<9x196x36xf32, #tpu.memory_space<vmem>>, vector<1x196x36xf32>
    %90 = vector.shape_cast %89 : vector<1x196x36xf32> to vector<196x36xf32>
    %cst_95 = arith.constant dense<0.000000e+00> : vector<16x36xf32>
    %91 = tpu.matmul %68, %90, %cst_95 {dimension_numbers = #tpu.dot_dimension_numbers<[1], [0], [0], [1], [0, 0, 1, 1], [], []>} : vector<16x196xf32>, vector<196x36xf32>, vector<16x36xf32> -> vector<16x36xf32>
    %c3_96 = arith.constant 3 : index
    %c0_97 = arith.constant 0 : index
    %c0_98 = arith.constant 0 : index
    %92 = vector.load %arg5[%c3_96, %c0_97, %c0_98] : memref<9x32x16xf32, #tpu.memory_space<vmem>>, vector<1x32x16xf32>
    %93 = vector.shape_cast %92 : vector<1x32x16xf32> to vector<32x16xf32>
    %cst_99 = arith.constant dense<0.000000e+00> : vector<32x36xf32>
    %94 = tpu.matmul %93, %91, %cst_99 {dimension_numbers = #tpu.dot_dimension_numbers<[1], [0], [0], [1], [0, 0, 1, 1], [], []>} : vector<32x16xf32>, vector<16x36xf32>, vector<32x36xf32> -> vector<32x36xf32>
    %95 = arith.addf %88, %94 : vector<32x36xf32>
    %c4_100 = arith.constant 4 : index
    %c0_101 = arith.constant 0 : index
    %c0_102 = arith.constant 0 : index
    %96 = vector.load %arg7[%c4_100, %c0_101, %c0_102] : memref<9x196x36xf32, #tpu.memory_space<vmem>>, vector<1x196x36xf32>
    %97 = vector.shape_cast %96 : vector<1x196x36xf32> to vector<196x36xf32>
    %cst_103 = arith.constant dense<0.000000e+00> : vector<16x36xf32>
    %98 = tpu.matmul %68, %97, %cst_103 {dimension_numbers = #tpu.dot_dimension_numbers<[1], [0], [0], [1], [0, 0, 1, 1], [], []>} : vector<16x196xf32>, vector<196x36xf32>, vector<16x36xf32> -> vector<16x36xf32>
    %c4_104 = arith.constant 4 : index
    %c0_105 = arith.constant 0 : index
    %c0_106 = arith.constant 0 : index
    %99 = vector.load %arg5[%c4_104, %c0_105, %c0_106] : memref<9x32x16xf32, #tpu.memory_space<vmem>>, vector<1x32x16xf32>
    %100 = vector.shape_cast %99 : vector<1x32x16xf32> to vector<32x16xf32>
    %cst_107 = arith.constant dense<0.000000e+00> : vector<32x36xf32>
    %101 = tpu.matmul %100, %98, %cst_107 {dimension_numbers = #tpu.dot_dimension_numbers<[1], [0], [0], [1], [0, 0, 1, 1], [], []>} : vector<32x16xf32>, vector<16x36xf32>, vector<32x36xf32> -> vector<32x36xf32>
    %102 = arith.addf %95, %101 : vector<32x36xf32>
    %c5_108 = arith.constant 5 : index
    %c0_109 = arith.constant 0 : index
    %c0_110 = arith.constant 0 : index
    %103 = vector.load %arg7[%c5_108, %c0_109, %c0_110] : memref<9x196x36xf32, #tpu.memory_space<vmem>>, vector<1x196x36xf32>
    %104 = vector.shape_cast %103 : vector<1x196x36xf32> to vector<196x36xf32>
    %cst_111 = arith.constant dense<0.000000e+00> : vector<16x36xf32>
    %105 = tpu.matmul %68, %104, %cst_111 {dimension_numbers = #tpu.dot_dimension_numbers<[1], [0], [0], [1], [0, 0, 1, 1], [], []>} : vector<16x196xf32>, vector<196x36xf32>, vector<16x36xf32> -> vector<16x36xf32>
    %c5_112 = arith.constant 5 : index
    %c0_113 = arith.constant 0 : index
    %c0_114 = arith.constant 0 : index
    %106 = vector.load %arg5[%c5_112, %c0_113, %c0_114] : memref<9x32x16xf32, #tpu.memory_space<vmem>>, vector<1x32x16xf32>
    %107 = vector.shape_cast %106 : vector<1x32x16xf32> to vector<32x16xf32>
    %cst_115 = arith.constant dense<0.000000e+00> : vector<32x36xf32>
    %108 = tpu.matmul %107, %105, %cst_115 {dimension_numbers = #tpu.dot_dimension_numbers<[1], [0], [0], [1], [0, 0, 1, 1], [], []>} : vector<32x16xf32>, vector<16x36xf32>, vector<32x36xf32> -> vector<32x36xf32>
    %109 = arith.addf %102, %108 : vector<32x36xf32>
    %c6_116 = arith.constant 6 : index
    %c0_117 = arith.constant 0 : index
    %c0_118 = arith.constant 0 : index
    %110 = vector.load %arg7[%c6_116, %c0_117, %c0_118] : memref<9x196x36xf32, #tpu.memory_space<vmem>>, vector<1x196x36xf32>
    %111 = vector.shape_cast %110 : vector<1x196x36xf32> to vector<196x36xf32>
    %cst_119 = arith.constant dense<0.000000e+00> : vector<16x36xf32>
    %112 = tpu.matmul %68, %111, %cst_119 {dimension_numbers = #tpu.dot_dimension_numbers<[1], [0], [0], [1], [0, 0, 1, 1], [], []>} : vector<16x196xf32>, vector<196x36xf32>, vector<16x36xf32> -> vector<16x36xf32>
    %c6_120 = arith.constant 6 : index
    %c0_121 = arith.constant 0 : index
    %c0_122 = arith.constant 0 : index
    %113 = vector.load %arg5[%c6_120, %c0_121, %c0_122] : memref<9x32x16xf32, #tpu.memory_space<vmem>>, vector<1x32x16xf32>
    %114 = vector.shape_cast %113 : vector<1x32x16xf32> to vector<32x16xf32>
    %cst_123 = arith.constant dense<0.000000e+00> : vector<32x36xf32>
    %115 = tpu.matmul %114, %112, %cst_123 {dimension_numbers = #tpu.dot_dimension_numbers<[1], [0], [0], [1], [0, 0, 1, 1], [], []>} : vector<32x16xf32>, vector<16x36xf32>, vector<32x36xf32> -> vector<32x36xf32>
    %116 = arith.addf %109, %115 : vector<32x36xf32>
    %c7_124 = arith.constant 7 : index
    %c0_125 = arith.constant 0 : index
    %c0_126 = arith.constant 0 : index
    %117 = vector.load %arg7[%c7_124, %c0_125, %c0_126] : memref<9x196x36xf32, #tpu.memory_space<vmem>>, vector<1x196x36xf32>
    %118 = vector.shape_cast %117 : vector<1x196x36xf32> to vector<196x36xf32>
    %cst_127 = arith.constant dense<0.000000e+00> : vector<16x36xf32>
    %119 = tpu.matmul %68, %118, %cst_127 {dimension_numbers = #tpu.dot_dimension_numbers<[1], [0], [0], [1], [0, 0, 1, 1], [], []>} : vector<16x196xf32>, vector<196x36xf32>, vector<16x36xf32> -> vector<16x36xf32>
    %c7_128 = arith.constant 7 : index
    %c0_129 = arith.constant 0 : index
    %c0_130 = arith.constant 0 : index
    %120 = vector.load %arg5[%c7_128, %c0_129, %c0_130] : memref<9x32x16xf32, #tpu.memory_space<vmem>>, vector<1x32x16xf32>
    %121 = vector.shape_cast %120 : vector<1x32x16xf32> to vector<32x16xf32>
    %cst_131 = arith.constant dense<0.000000e+00> : vector<32x36xf32>
    %122 = tpu.matmul %121, %119, %cst_131 {dimension_numbers = #tpu.dot_dimension_numbers<[1], [0], [0], [1], [0, 0, 1, 1], [], []>} : vector<32x16xf32>, vector<16x36xf32>, vector<32x36xf32> -> vector<32x36xf32>
    %123 = arith.addf %116, %122 : vector<32x36xf32>
    %c8_132 = arith.constant 8 : index
    %c0_133 = arith.constant 0 : index
    %c0_134 = arith.constant 0 : index
    %124 = vector.load %arg7[%c8_132, %c0_133, %c0_134] : memref<9x196x36xf32, #tpu.memory_space<vmem>>, vector<1x196x36xf32>
    %125 = vector.shape_cast %124 : vector<1x196x36xf32> to vector<196x36xf32>
    %cst_135 = arith.constant dense<0.000000e+00> : vector<16x36xf32>
    %126 = tpu.matmul %68, %125, %cst_135 {dimension_numbers = #tpu.dot_dimension_numbers<[1], [0], [0], [1], [0, 0, 1, 1], [], []>} : vector<16x196xf32>, vector<196x36xf32>, vector<16x36xf32> -> vector<16x36xf32>
    %c8_136 = arith.constant 8 : index
    %c0_137 = arith.constant 0 : index
    %c0_138 = arith.constant 0 : index
    %127 = vector.load %arg5[%c8_136, %c0_137, %c0_138] : memref<9x32x16xf32, #tpu.memory_space<vmem>>, vector<1x32x16xf32>
    %128 = vector.shape_cast %127 : vector<1x32x16xf32> to vector<32x16xf32>
    %cst_139 = arith.constant dense<0.000000e+00> : vector<32x36xf32>
    %129 = tpu.matmul %128, %126, %cst_139 {dimension_numbers = #tpu.dot_dimension_numbers<[1], [0], [0], [1], [0, 0, 1, 1], [], []>} : vector<32x16xf32>, vector<16x36xf32>, vector<32x36xf32> -> vector<32x36xf32>
    %130 = arith.addf %123, %129 : vector<32x36xf32>
    %c0_140 = arith.constant 0 : index
    %c0_141 = arith.constant 0 : index
    %131 = vector.load %arg6[%c0_140, %c0_141] : memref<32x1xf32, #tpu.memory_space<vmem>>, vector<32x1xf32>
    %132 = vector.broadcast %131 : vector<32x1xf32> to vector<32x36xf32>
    %133 = arith.addf %130, %132 : vector<32x36xf32>
    %cst_142 = arith.constant 0.000000e+00 : f32
    %134 = vector.broadcast %cst_142 : f32 to vector<32x36xf32>
    %135 = arith.maximumf %133, %134 : vector<32x36xf32>
    %c0_143 = arith.constant 0 : index
    %c0_144 = arith.constant 0 : index
    %c0_145 = arith.constant 0 : index
    %136 = vector.load %arg10[%c0_143, %c0_144, %c0_145] : memref<9x36x4xf32, #tpu.memory_space<vmem>>, vector<1x36x4xf32>
    %137 = vector.shape_cast %136 : vector<1x36x4xf32> to vector<36x4xf32>
    %cst_146 = arith.constant dense<0.000000e+00> : vector<32x4xf32>
    %138 = tpu.matmul %135, %137, %cst_146 {dimension_numbers = #tpu.dot_dimension_numbers<[1], [0], [0], [1], [0, 0, 1, 1], [], []>} : vector<32x36xf32>, vector<36x4xf32>, vector<32x4xf32> -> vector<32x4xf32>
    %c0_147 = arith.constant 0 : index
    %c0_148 = arith.constant 0 : index
    %c0_149 = arith.constant 0 : index
    %139 = vector.load %arg8[%c0_147, %c0_148, %c0_149] : memref<9x16x32xf32, #tpu.memory_space<vmem>>, vector<1x16x32xf32>
    %140 = vector.shape_cast %139 : vector<1x16x32xf32> to vector<16x32xf32>
    %cst_150 = arith.constant dense<0.000000e+00> : vector<16x4xf32>
    %141 = tpu.matmul %140, %138, %cst_150 {dimension_numbers = #tpu.dot_dimension_numbers<[1], [0], [0], [1], [0, 0, 1, 1], [], []>} : vector<16x32xf32>, vector<32x4xf32>, vector<16x4xf32> -> vector<16x4xf32>
    %c1_151 = arith.constant 1 : index
    %c0_152 = arith.constant 0 : index
    %c0_153 = arith.constant 0 : index
    %142 = vector.load %arg10[%c1_151, %c0_152, %c0_153] : memref<9x36x4xf32, #tpu.memory_space<vmem>>, vector<1x36x4xf32>
    %143 = vector.shape_cast %142 : vector<1x36x4xf32> to vector<36x4xf32>
    %cst_154 = arith.constant dense<0.000000e+00> : vector<32x4xf32>
    %144 = tpu.matmul %135, %143, %cst_154 {dimension_numbers = #tpu.dot_dimension_numbers<[1], [0], [0], [1], [0, 0, 1, 1], [], []>} : vector<32x36xf32>, vector<36x4xf32>, vector<32x4xf32> -> vector<32x4xf32>
    %c1_155 = arith.constant 1 : index
    %c0_156 = arith.constant 0 : index
    %c0_157 = arith.constant 0 : index
    %145 = vector.load %arg8[%c1_155, %c0_156, %c0_157] : memref<9x16x32xf32, #tpu.memory_space<vmem>>, vector<1x16x32xf32>
    %146 = vector.shape_cast %145 : vector<1x16x32xf32> to vector<16x32xf32>
    %cst_158 = arith.constant dense<0.000000e+00> : vector<16x4xf32>
    %147 = tpu.matmul %146, %144, %cst_158 {dimension_numbers = #tpu.dot_dimension_numbers<[1], [0], [0], [1], [0, 0, 1, 1], [], []>} : vector<16x32xf32>, vector<32x4xf32>, vector<16x4xf32> -> vector<16x4xf32>
    %148 = arith.addf %141, %147 : vector<16x4xf32>
    %c2_159 = arith.constant 2 : index
    %c0_160 = arith.constant 0 : index
    %c0_161 = arith.constant 0 : index
    %149 = vector.load %arg10[%c2_159, %c0_160, %c0_161] : memref<9x36x4xf32, #tpu.memory_space<vmem>>, vector<1x36x4xf32>
    %150 = vector.shape_cast %149 : vector<1x36x4xf32> to vector<36x4xf32>
    %cst_162 = arith.constant dense<0.000000e+00> : vector<32x4xf32>
    %151 = tpu.matmul %135, %150, %cst_162 {dimension_numbers = #tpu.dot_dimension_numbers<[1], [0], [0], [1], [0, 0, 1, 1], [], []>} : vector<32x36xf32>, vector<36x4xf32>, vector<32x4xf32> -> vector<32x4xf32>
    %c2_163 = arith.constant 2 : index
    %c0_164 = arith.constant 0 : index
    %c0_165 = arith.constant 0 : index
    %152 = vector.load %arg8[%c2_163, %c0_164, %c0_165] : memref<9x16x32xf32, #tpu.memory_space<vmem>>, vector<1x16x32xf32>
    %153 = vector.shape_cast %152 : vector<1x16x32xf32> to vector<16x32xf32>
    %cst_166 = arith.constant dense<0.000000e+00> : vector<16x4xf32>
    %154 = tpu.matmul %153, %151, %cst_166 {dimension_numbers = #tpu.dot_dimension_numbers<[1], [0], [0], [1], [0, 0, 1, 1], [], []>} : vector<16x32xf32>, vector<32x4xf32>, vector<16x4xf32> -> vector<16x4xf32>
    %155 = arith.addf %148, %154 : vector<16x4xf32>
    %c3_167 = arith.constant 3 : index
    %c0_168 = arith.constant 0 : index
    %c0_169 = arith.constant 0 : index
    %156 = vector.load %arg10[%c3_167, %c0_168, %c0_169] : memref<9x36x4xf32, #tpu.memory_space<vmem>>, vector<1x36x4xf32>
    %157 = vector.shape_cast %156 : vector<1x36x4xf32> to vector<36x4xf32>
    %cst_170 = arith.constant dense<0.000000e+00> : vector<32x4xf32>
    %158 = tpu.matmul %135, %157, %cst_170 {dimension_numbers = #tpu.dot_dimension_numbers<[1], [0], [0], [1], [0, 0, 1, 1], [], []>} : vector<32x36xf32>, vector<36x4xf32>, vector<32x4xf32> -> vector<32x4xf32>
    %c3_171 = arith.constant 3 : index
    %c0_172 = arith.constant 0 : index
    %c0_173 = arith.constant 0 : index
    %159 = vector.load %arg8[%c3_171, %c0_172, %c0_173] : memref<9x16x32xf32, #tpu.memory_space<vmem>>, vector<1x16x32xf32>
    %160 = vector.shape_cast %159 : vector<1x16x32xf32> to vector<16x32xf32>
    %cst_174 = arith.constant dense<0.000000e+00> : vector<16x4xf32>
    %161 = tpu.matmul %160, %158, %cst_174 {dimension_numbers = #tpu.dot_dimension_numbers<[1], [0], [0], [1], [0, 0, 1, 1], [], []>} : vector<16x32xf32>, vector<32x4xf32>, vector<16x4xf32> -> vector<16x4xf32>
    %162 = arith.addf %155, %161 : vector<16x4xf32>
    %c4_175 = arith.constant 4 : index
    %c0_176 = arith.constant 0 : index
    %c0_177 = arith.constant 0 : index
    %163 = vector.load %arg10[%c4_175, %c0_176, %c0_177] : memref<9x36x4xf32, #tpu.memory_space<vmem>>, vector<1x36x4xf32>
    %164 = vector.shape_cast %163 : vector<1x36x4xf32> to vector<36x4xf32>
    %cst_178 = arith.constant dense<0.000000e+00> : vector<32x4xf32>
    %165 = tpu.matmul %135, %164, %cst_178 {dimension_numbers = #tpu.dot_dimension_numbers<[1], [0], [0], [1], [0, 0, 1, 1], [], []>} : vector<32x36xf32>, vector<36x4xf32>, vector<32x4xf32> -> vector<32x4xf32>
    %c4_179 = arith.constant 4 : index
    %c0_180 = arith.constant 0 : index
    %c0_181 = arith.constant 0 : index
    %166 = vector.load %arg8[%c4_179, %c0_180, %c0_181] : memref<9x16x32xf32, #tpu.memory_space<vmem>>, vector<1x16x32xf32>
    %167 = vector.shape_cast %166 : vector<1x16x32xf32> to vector<16x32xf32>
    %cst_182 = arith.constant dense<0.000000e+00> : vector<16x4xf32>
    %168 = tpu.matmul %167, %165, %cst_182 {dimension_numbers = #tpu.dot_dimension_numbers<[1], [0], [0], [1], [0, 0, 1, 1], [], []>} : vector<16x32xf32>, vector<32x4xf32>, vector<16x4xf32> -> vector<16x4xf32>
    %169 = arith.addf %162, %168 : vector<16x4xf32>
    %c5_183 = arith.constant 5 : index
    %c0_184 = arith.constant 0 : index
    %c0_185 = arith.constant 0 : index
    %170 = vector.load %arg10[%c5_183, %c0_184, %c0_185] : memref<9x36x4xf32, #tpu.memory_space<vmem>>, vector<1x36x4xf32>
    %171 = vector.shape_cast %170 : vector<1x36x4xf32> to vector<36x4xf32>
    %cst_186 = arith.constant dense<0.000000e+00> : vector<32x4xf32>
    %172 = tpu.matmul %135, %171, %cst_186 {dimension_numbers = #tpu.dot_dimension_numbers<[1], [0], [0], [1], [0, 0, 1, 1], [], []>} : vector<32x36xf32>, vector<36x4xf32>, vector<32x4xf32> -> vector<32x4xf32>
    %c5_187 = arith.constant 5 : index
    %c0_188 = arith.constant 0 : index
    %c0_189 = arith.constant 0 : index
    %173 = vector.load %arg8[%c5_187, %c0_188, %c0_189] : memref<9x16x32xf32, #tpu.memory_space<vmem>>, vector<1x16x32xf32>
    %174 = vector.shape_cast %173 : vector<1x16x32xf32> to vector<16x32xf32>
    %cst_190 = arith.constant dense<0.000000e+00> : vector<16x4xf32>
    %175 = tpu.matmul %174, %172, %cst_190 {dimension_numbers = #tpu.dot_dimension_numbers<[1], [0], [0], [1], [0, 0, 1, 1], [], []>} : vector<16x32xf32>, vector<32x4xf32>, vector<16x4xf32> -> vector<16x4xf32>
    %176 = arith.addf %169, %175 : vector<16x4xf32>
    %c6_191 = arith.constant 6 : index
    %c0_192 = arith.constant 0 : index
    %c0_193 = arith.constant 0 : index
    %177 = vector.load %arg10[%c6_191, %c0_192, %c0_193] : memref<9x36x4xf32, #tpu.memory_space<vmem>>, vector<1x36x4xf32>
    %178 = vector.shape_cast %177 : vector<1x36x4xf32> to vector<36x4xf32>
    %cst_194 = arith.constant dense<0.000000e+00> : vector<32x4xf32>
    %179 = tpu.matmul %135, %178, %cst_194 {dimension_numbers = #tpu.dot_dimension_numbers<[1], [0], [0], [1], [0, 0, 1, 1], [], []>} : vector<32x36xf32>, vector<36x4xf32>, vector<32x4xf32> -> vector<32x4xf32>
    %c6_195 = arith.constant 6 : index
    %c0_196 = arith.constant 0 : index
    %c0_197 = arith.constant 0 : index
    %180 = vector.load %arg8[%c6_195, %c0_196, %c0_197] : memref<9x16x32xf32, #tpu.memory_space<vmem>>, vector<1x16x32xf32>
    %181 = vector.shape_cast %180 : vector<1x16x32xf32> to vector<16x32xf32>
    %cst_198 = arith.constant dense<0.000000e+00> : vector<16x4xf32>
    %182 = tpu.matmul %181, %179, %cst_198 {dimension_numbers = #tpu.dot_dimension_numbers<[1], [0], [0], [1], [0, 0, 1, 1], [], []>} : vector<16x32xf32>, vector<32x4xf32>, vector<16x4xf32> -> vector<16x4xf32>
    %183 = arith.addf %176, %182 : vector<16x4xf32>
    %c7_199 = arith.constant 7 : index
    %c0_200 = arith.constant 0 : index
    %c0_201 = arith.constant 0 : index
    %184 = vector.load %arg10[%c7_199, %c0_200, %c0_201] : memref<9x36x4xf32, #tpu.memory_space<vmem>>, vector<1x36x4xf32>
    %185 = vector.shape_cast %184 : vector<1x36x4xf32> to vector<36x4xf32>
    %cst_202 = arith.constant dense<0.000000e+00> : vector<32x4xf32>
    %186 = tpu.matmul %135, %185, %cst_202 {dimension_numbers = #tpu.dot_dimension_numbers<[1], [0], [0], [1], [0, 0, 1, 1], [], []>} : vector<32x36xf32>, vector<36x4xf32>, vector<32x4xf32> -> vector<32x4xf32>
    %c7_203 = arith.constant 7 : index
    %c0_204 = arith.constant 0 : index
    %c0_205 = arith.constant 0 : index
    %187 = vector.load %arg8[%c7_203, %c0_204, %c0_205] : memref<9x16x32xf32, #tpu.memory_space<vmem>>, vector<1x16x32xf32>
    %188 = vector.shape_cast %187 : vector<1x16x32xf32> to vector<16x32xf32>
    %cst_206 = arith.constant dense<0.000000e+00> : vector<16x4xf32>
    %189 = tpu.matmul %188, %186, %cst_206 {dimension_numbers = #tpu.dot_dimension_numbers<[1], [0], [0], [1], [0, 0, 1, 1], [], []>} : vector<16x32xf32>, vector<32x4xf32>, vector<16x4xf32> -> vector<16x4xf32>
    %190 = arith.addf %183, %189 : vector<16x4xf32>
    %c8_207 = arith.constant 8 : index
    %c0_208 = arith.constant 0 : index
    %c0_209 = arith.constant 0 : index
    %191 = vector.load %arg10[%c8_207, %c0_208, %c0_209] : memref<9x36x4xf32, #tpu.memory_space<vmem>>, vector<1x36x4xf32>
    %192 = vector.shape_cast %191 : vector<1x36x4xf32> to vector<36x4xf32>
    %cst_210 = arith.constant dense<0.000000e+00> : vector<32x4xf32>
    %193 = tpu.matmul %135, %192, %cst_210 {dimension_numbers = #tpu.dot_dimension_numbers<[1], [0], [0], [1], [0, 0, 1, 1], [], []>} : vector<32x36xf32>, vector<36x4xf32>, vector<32x4xf32> -> vector<32x4xf32>
    %c8_211 = arith.constant 8 : index
    %c0_212 = arith.constant 0 : index
    %c0_213 = arith.constant 0 : index
    %194 = vector.load %arg8[%c8_211, %c0_212, %c0_213] : memref<9x16x32xf32, #tpu.memory_space<vmem>>, vector<1x16x32xf32>
    %195 = vector.shape_cast %194 : vector<1x16x32xf32> to vector<16x32xf32>
    %cst_214 = arith.constant dense<0.000000e+00> : vector<16x4xf32>
    %196 = tpu.matmul %195, %193, %cst_214 {dimension_numbers = #tpu.dot_dimension_numbers<[1], [0], [0], [1], [0, 0, 1, 1], [], []>} : vector<16x32xf32>, vector<32x4xf32>, vector<16x4xf32> -> vector<16x4xf32>
    %197 = arith.addf %190, %196 : vector<16x4xf32>
    %c0_215 = arith.constant 0 : index
    %c0_216 = arith.constant 0 : index
    %198 = vector.load %arg9[%c0_215, %c0_216] : memref<16x1xf32, #tpu.memory_space<vmem>>, vector<16x1xf32>
    %199 = vector.broadcast %198 : vector<16x1xf32> to vector<16x4xf32>
    %200 = arith.addf %197, %199 : vector<16x4xf32>
    %cst_217 = arith.constant 0.000000e+00 : f32
    %201 = vector.broadcast %cst_217 : f32 to vector<16x4xf32>
    %202 = arith.maximumf %200, %201 : vector<16x4xf32>
    %c0_218 = arith.constant 0 : index
    %c0_219 = arith.constant 0 : index
    %c0_220 = arith.constant 0 : index
    %203 = vector.load %arg11[%c0_218, %c0_219, %c0_220] : memref<4x4x9xf32, #tpu.memory_space<vmem>>, vector<1x4x9xf32>
    %204 = vector.shape_cast %203 : vector<1x4x9xf32> to vector<4x9xf32>
    %cst_221 = arith.constant dense<0.000000e+00> : vector<16x9xf32>
    %205 = tpu.matmul %202, %204, %cst_221 {dimension_numbers = #tpu.dot_dimension_numbers<[1], [0], [0], [1], [0, 0, 1, 1], [], []>} : vector<16x4xf32>, vector<4x9xf32>, vector<16x9xf32> -> vector<16x9xf32>
    %c0_222 = arith.constant 0 : index
    %c0_223 = arith.constant 0 : index
    %c0_224 = arith.constant 0 : index
    %206 = vector.load %arg12[%c0_222, %c0_223, %c0_224] : memref<4x1x9xf32, #tpu.memory_space<vmem>>, vector<1x1x9xf32>
    %207 = vector.shape_cast %206 : vector<1x1x9xf32> to vector<1x9xf32>
    %cst_225 = arith.constant 5.000000e-01 : f32
    %208 = vector.broadcast %cst_225 : f32 to vector<1x9xf32>
    %209 = arith.cmpf ogt, %207, %208 : vector<1x9xf32>
    %cst_226 = arith.constant 0xFF800000 : f32
    %210 = vector.shape_cast %209 : vector<1x9xi1> to vector<1x9xi1>
    %211 = vector.broadcast %210 : vector<1x9xi1> to vector<16x9xi1>
    %212 = vector.broadcast %cst_226 : f32 to vector<16x9xf32>
    %213 = arith.select %211, %205, %212 : vector<16x9xi1>, vector<16x9xf32>
    %c1_227 = arith.constant 1 : index
    %c0_228 = arith.constant 0 : index
    %c0_229 = arith.constant 0 : index
    %214 = vector.load %arg11[%c1_227, %c0_228, %c0_229] : memref<4x4x9xf32, #tpu.memory_space<vmem>>, vector<1x4x9xf32>
    %215 = vector.shape_cast %214 : vector<1x4x9xf32> to vector<4x9xf32>
    %cst_230 = arith.constant dense<0.000000e+00> : vector<16x9xf32>
    %216 = tpu.matmul %202, %215, %cst_230 {dimension_numbers = #tpu.dot_dimension_numbers<[1], [0], [0], [1], [0, 0, 1, 1], [], []>} : vector<16x4xf32>, vector<4x9xf32>, vector<16x9xf32> -> vector<16x9xf32>
    %c1_231 = arith.constant 1 : index
    %c0_232 = arith.constant 0 : index
    %c0_233 = arith.constant 0 : index
    %217 = vector.load %arg12[%c1_231, %c0_232, %c0_233] : memref<4x1x9xf32, #tpu.memory_space<vmem>>, vector<1x1x9xf32>
    %218 = vector.shape_cast %217 : vector<1x1x9xf32> to vector<1x9xf32>
    %cst_234 = arith.constant 5.000000e-01 : f32
    %219 = vector.broadcast %cst_234 : f32 to vector<1x9xf32>
    %220 = arith.cmpf ogt, %218, %219 : vector<1x9xf32>
    %cst_235 = arith.constant 0xFF800000 : f32
    %221 = vector.shape_cast %220 : vector<1x9xi1> to vector<1x9xi1>
    %222 = vector.broadcast %221 : vector<1x9xi1> to vector<16x9xi1>
    %223 = vector.broadcast %cst_235 : f32 to vector<16x9xf32>
    %224 = arith.select %222, %216, %223 : vector<16x9xi1>, vector<16x9xf32>
    %225 = arith.maximumf %213, %224 : vector<16x9xf32>
    %c2_236 = arith.constant 2 : index
    %c0_237 = arith.constant 0 : index
    %c0_238 = arith.constant 0 : index
    %226 = vector.load %arg11[%c2_236, %c0_237, %c0_238] : memref<4x4x9xf32, #tpu.memory_space<vmem>>, vector<1x4x9xf32>
    %227 = vector.shape_cast %226 : vector<1x4x9xf32> to vector<4x9xf32>
    %cst_239 = arith.constant dense<0.000000e+00> : vector<16x9xf32>
    %228 = tpu.matmul %202, %227, %cst_239 {dimension_numbers = #tpu.dot_dimension_numbers<[1], [0], [0], [1], [0, 0, 1, 1], [], []>} : vector<16x4xf32>, vector<4x9xf32>, vector<16x9xf32> -> vector<16x9xf32>
    %c2_240 = arith.constant 2 : index
    %c0_241 = arith.constant 0 : index
    %c0_242 = arith.constant 0 : index
    %229 = vector.load %arg12[%c2_240, %c0_241, %c0_242] : memref<4x1x9xf32, #tpu.memory_space<vmem>>, vector<1x1x9xf32>
    %230 = vector.shape_cast %229 : vector<1x1x9xf32> to vector<1x9xf32>
    %cst_243 = arith.constant 5.000000e-01 : f32
    %231 = vector.broadcast %cst_243 : f32 to vector<1x9xf32>
    %232 = arith.cmpf ogt, %230, %231 : vector<1x9xf32>
    %cst_244 = arith.constant 0xFF800000 : f32
    %233 = vector.shape_cast %232 : vector<1x9xi1> to vector<1x9xi1>
    %234 = vector.broadcast %233 : vector<1x9xi1> to vector<16x9xi1>
    %235 = vector.broadcast %cst_244 : f32 to vector<16x9xf32>
    %236 = arith.select %234, %228, %235 : vector<16x9xi1>, vector<16x9xf32>
    %237 = arith.maximumf %225, %236 : vector<16x9xf32>
    %c3_245 = arith.constant 3 : index
    %c0_246 = arith.constant 0 : index
    %c0_247 = arith.constant 0 : index
    %238 = vector.load %arg11[%c3_245, %c0_246, %c0_247] : memref<4x4x9xf32, #tpu.memory_space<vmem>>, vector<1x4x9xf32>
    %239 = vector.shape_cast %238 : vector<1x4x9xf32> to vector<4x9xf32>
    %cst_248 = arith.constant dense<0.000000e+00> : vector<16x9xf32>
    %240 = tpu.matmul %202, %239, %cst_248 {dimension_numbers = #tpu.dot_dimension_numbers<[1], [0], [0], [1], [0, 0, 1, 1], [], []>} : vector<16x4xf32>, vector<4x9xf32>, vector<16x9xf32> -> vector<16x9xf32>
    %c3_249 = arith.constant 3 : index
    %c0_250 = arith.constant 0 : index
    %c0_251 = arith.constant 0 : index
    %241 = vector.load %arg12[%c3_249, %c0_250, %c0_251] : memref<4x1x9xf32, #tpu.memory_space<vmem>>, vector<1x1x9xf32>
    %242 = vector.shape_cast %241 : vector<1x1x9xf32> to vector<1x9xf32>
    %cst_252 = arith.constant 5.000000e-01 : f32
    %243 = vector.broadcast %cst_252 : f32 to vector<1x9xf32>
    %244 = arith.cmpf ogt, %242, %243 : vector<1x9xf32>
    %cst_253 = arith.constant 0xFF800000 : f32
    %245 = vector.shape_cast %244 : vector<1x9xi1> to vector<1x9xi1>
    %246 = vector.broadcast %245 : vector<1x9xi1> to vector<16x9xi1>
    %247 = vector.broadcast %cst_253 : f32 to vector<16x9xf32>
    %248 = arith.select %246, %240, %247 : vector<16x9xi1>, vector<16x9xf32>
    %249 = arith.maximumf %237, %248 : vector<16x9xf32>
    %c0_254 = arith.constant 0 : index
    %c0_255 = arith.constant 0 : index
    %c0_256 = arith.constant 0 : index
    %250 = vector.load %arg15[%c0_254, %c0_255, %c0_256] : memref<9x9x25xf32, #tpu.memory_space<vmem>>, vector<1x9x25xf32>
    %251 = vector.shape_cast %250 : vector<1x9x25xf32> to vector<9x25xf32>
    %cst_257 = arith.constant dense<0.000000e+00> : vector<16x25xf32>
    %252 = tpu.matmul %249, %251, %cst_257 {dimension_numbers = #tpu.dot_dimension_numbers<[1], [0], [0], [1], [0, 0, 1, 1], [], []>} : vector<16x9xf32>, vector<9x25xf32>, vector<16x25xf32> -> vector<16x25xf32>
    %c0_258 = arith.constant 0 : index
    %c0_259 = arith.constant 0 : index
    %c0_260 = arith.constant 0 : index
    %253 = vector.load %arg13[%c0_258, %c0_259, %c0_260] : memref<9x32x16xf32, #tpu.memory_space<vmem>>, vector<1x32x16xf32>
    %254 = vector.shape_cast %253 : vector<1x32x16xf32> to vector<32x16xf32>
    %cst_261 = arith.constant dense<0.000000e+00> : vector<32x25xf32>
    %255 = tpu.matmul %254, %252, %cst_261 {dimension_numbers = #tpu.dot_dimension_numbers<[1], [0], [0], [1], [0, 0, 1, 1], [], []>} : vector<32x16xf32>, vector<16x25xf32>, vector<32x25xf32> -> vector<32x25xf32>
    %c1_262 = arith.constant 1 : index
    %c0_263 = arith.constant 0 : index
    %c0_264 = arith.constant 0 : index
    %256 = vector.load %arg15[%c1_262, %c0_263, %c0_264] : memref<9x9x25xf32, #tpu.memory_space<vmem>>, vector<1x9x25xf32>
    %257 = vector.shape_cast %256 : vector<1x9x25xf32> to vector<9x25xf32>
    %cst_265 = arith.constant dense<0.000000e+00> : vector<16x25xf32>
    %258 = tpu.matmul %249, %257, %cst_265 {dimension_numbers = #tpu.dot_dimension_numbers<[1], [0], [0], [1], [0, 0, 1, 1], [], []>} : vector<16x9xf32>, vector<9x25xf32>, vector<16x25xf32> -> vector<16x25xf32>
    %c1_266 = arith.constant 1 : index
    %c0_267 = arith.constant 0 : index
    %c0_268 = arith.constant 0 : index
    %259 = vector.load %arg13[%c1_266, %c0_267, %c0_268] : memref<9x32x16xf32, #tpu.memory_space<vmem>>, vector<1x32x16xf32>
    %260 = vector.shape_cast %259 : vector<1x32x16xf32> to vector<32x16xf32>
    %cst_269 = arith.constant dense<0.000000e+00> : vector<32x25xf32>
    %261 = tpu.matmul %260, %258, %cst_269 {dimension_numbers = #tpu.dot_dimension_numbers<[1], [0], [0], [1], [0, 0, 1, 1], [], []>} : vector<32x16xf32>, vector<16x25xf32>, vector<32x25xf32> -> vector<32x25xf32>
    %262 = arith.addf %255, %261 : vector<32x25xf32>
    %c2_270 = arith.constant 2 : index
    %c0_271 = arith.constant 0 : index
    %c0_272 = arith.constant 0 : index
    %263 = vector.load %arg15[%c2_270, %c0_271, %c0_272] : memref<9x9x25xf32, #tpu.memory_space<vmem>>, vector<1x9x25xf32>
    %264 = vector.shape_cast %263 : vector<1x9x25xf32> to vector<9x25xf32>
    %cst_273 = arith.constant dense<0.000000e+00> : vector<16x25xf32>
    %265 = tpu.matmul %249, %264, %cst_273 {dimension_numbers = #tpu.dot_dimension_numbers<[1], [0], [0], [1], [0, 0, 1, 1], [], []>} : vector<16x9xf32>, vector<9x25xf32>, vector<16x25xf32> -> vector<16x25xf32>
    %c2_274 = arith.constant 2 : index
    %c0_275 = arith.constant 0 : index
    %c0_276 = arith.constant 0 : index
    %266 = vector.load %arg13[%c2_274, %c0_275, %c0_276] : memref<9x32x16xf32, #tpu.memory_space<vmem>>, vector<1x32x16xf32>
    %267 = vector.shape_cast %266 : vector<1x32x16xf32> to vector<32x16xf32>
    %cst_277 = arith.constant dense<0.000000e+00> : vector<32x25xf32>
    %268 = tpu.matmul %267, %265, %cst_277 {dimension_numbers = #tpu.dot_dimension_numbers<[1], [0], [0], [1], [0, 0, 1, 1], [], []>} : vector<32x16xf32>, vector<16x25xf32>, vector<32x25xf32> -> vector<32x25xf32>
    %269 = arith.addf %262, %268 : vector<32x25xf32>
    %c3_278 = arith.constant 3 : index
    %c0_279 = arith.constant 0 : index
    %c0_280 = arith.constant 0 : index
    %270 = vector.load %arg15[%c3_278, %c0_279, %c0_280] : memref<9x9x25xf32, #tpu.memory_space<vmem>>, vector<1x9x25xf32>
    %271 = vector.shape_cast %270 : vector<1x9x25xf32> to vector<9x25xf32>
    %cst_281 = arith.constant dense<0.000000e+00> : vector<16x25xf32>
    %272 = tpu.matmul %249, %271, %cst_281 {dimension_numbers = #tpu.dot_dimension_numbers<[1], [0], [0], [1], [0, 0, 1, 1], [], []>} : vector<16x9xf32>, vector<9x25xf32>, vector<16x25xf32> -> vector<16x25xf32>
    %c3_282 = arith.constant 3 : index
    %c0_283 = arith.constant 0 : index
    %c0_284 = arith.constant 0 : index
    %273 = vector.load %arg13[%c3_282, %c0_283, %c0_284] : memref<9x32x16xf32, #tpu.memory_space<vmem>>, vector<1x32x16xf32>
    %274 = vector.shape_cast %273 : vector<1x32x16xf32> to vector<32x16xf32>
    %cst_285 = arith.constant dense<0.000000e+00> : vector<32x25xf32>
    %275 = tpu.matmul %274, %272, %cst_285 {dimension_numbers = #tpu.dot_dimension_numbers<[1], [0], [0], [1], [0, 0, 1, 1], [], []>} : vector<32x16xf32>, vector<16x25xf32>, vector<32x25xf32> -> vector<32x25xf32>
    %276 = arith.addf %269, %275 : vector<32x25xf32>
    %c4_286 = arith.constant 4 : index
    %c0_287 = arith.constant 0 : index
    %c0_288 = arith.constant 0 : index
    %277 = vector.load %arg15[%c4_286, %c0_287, %c0_288] : memref<9x9x25xf32, #tpu.memory_space<vmem>>, vector<1x9x25xf32>
    %278 = vector.shape_cast %277 : vector<1x9x25xf32> to vector<9x25xf32>
    %cst_289 = arith.constant dense<0.000000e+00> : vector<16x25xf32>
    %279 = tpu.matmul %249, %278, %cst_289 {dimension_numbers = #tpu.dot_dimension_numbers<[1], [0], [0], [1], [0, 0, 1, 1], [], []>} : vector<16x9xf32>, vector<9x25xf32>, vector<16x25xf32> -> vector<16x25xf32>
    %c4_290 = arith.constant 4 : index
    %c0_291 = arith.constant 0 : index
    %c0_292 = arith.constant 0 : index
    %280 = vector.load %arg13[%c4_290, %c0_291, %c0_292] : memref<9x32x16xf32, #tpu.memory_space<vmem>>, vector<1x32x16xf32>
    %281 = vector.shape_cast %280 : vector<1x32x16xf32> to vector<32x16xf32>
    %cst_293 = arith.constant dense<0.000000e+00> : vector<32x25xf32>
    %282 = tpu.matmul %281, %279, %cst_293 {dimension_numbers = #tpu.dot_dimension_numbers<[1], [0], [0], [1], [0, 0, 1, 1], [], []>} : vector<32x16xf32>, vector<16x25xf32>, vector<32x25xf32> -> vector<32x25xf32>
    %283 = arith.addf %276, %282 : vector<32x25xf32>
    %c5_294 = arith.constant 5 : index
    %c0_295 = arith.constant 0 : index
    %c0_296 = arith.constant 0 : index
    %284 = vector.load %arg15[%c5_294, %c0_295, %c0_296] : memref<9x9x25xf32, #tpu.memory_space<vmem>>, vector<1x9x25xf32>
    %285 = vector.shape_cast %284 : vector<1x9x25xf32> to vector<9x25xf32>
    %cst_297 = arith.constant dense<0.000000e+00> : vector<16x25xf32>
    %286 = tpu.matmul %249, %285, %cst_297 {dimension_numbers = #tpu.dot_dimension_numbers<[1], [0], [0], [1], [0, 0, 1, 1], [], []>} : vector<16x9xf32>, vector<9x25xf32>, vector<16x25xf32> -> vector<16x25xf32>
    %c5_298 = arith.constant 5 : index
    %c0_299 = arith.constant 0 : index
    %c0_300 = arith.constant 0 : index
    %287 = vector.load %arg13[%c5_298, %c0_299, %c0_300] : memref<9x32x16xf32, #tpu.memory_space<vmem>>, vector<1x32x16xf32>
    %288 = vector.shape_cast %287 : vector<1x32x16xf32> to vector<32x16xf32>
    %cst_301 = arith.constant dense<0.000000e+00> : vector<32x25xf32>
    %289 = tpu.matmul %288, %286, %cst_301 {dimension_numbers = #tpu.dot_dimension_numbers<[1], [0], [0], [1], [0, 0, 1, 1], [], []>} : vector<32x16xf32>, vector<16x25xf32>, vector<32x25xf32> -> vector<32x25xf32>
    %290 = arith.addf %283, %289 : vector<32x25xf32>
    %c6_302 = arith.constant 6 : index
    %c0_303 = arith.constant 0 : index
    %c0_304 = arith.constant 0 : index
    %291 = vector.load %arg15[%c6_302, %c0_303, %c0_304] : memref<9x9x25xf32, #tpu.memory_space<vmem>>, vector<1x9x25xf32>
    %292 = vector.shape_cast %291 : vector<1x9x25xf32> to vector<9x25xf32>
    %cst_305 = arith.constant dense<0.000000e+00> : vector<16x25xf32>
    %293 = tpu.matmul %249, %292, %cst_305 {dimension_numbers = #tpu.dot_dimension_numbers<[1], [0], [0], [1], [0, 0, 1, 1], [], []>} : vector<16x9xf32>, vector<9x25xf32>, vector<16x25xf32> -> vector<16x25xf32>
    %c6_306 = arith.constant 6 : index
    %c0_307 = arith.constant 0 : index
    %c0_308 = arith.constant 0 : index
    %294 = vector.load %arg13[%c6_306, %c0_307, %c0_308] : memref<9x32x16xf32, #tpu.memory_space<vmem>>, vector<1x32x16xf32>
    %295 = vector.shape_cast %294 : vector<1x32x16xf32> to vector<32x16xf32>
    %cst_309 = arith.constant dense<0.000000e+00> : vector<32x25xf32>
    %296 = tpu.matmul %295, %293, %cst_309 {dimension_numbers = #tpu.dot_dimension_numbers<[1], [0], [0], [1], [0, 0, 1, 1], [], []>} : vector<32x16xf32>, vector<16x25xf32>, vector<32x25xf32> -> vector<32x25xf32>
    %297 = arith.addf %290, %296 : vector<32x25xf32>
    %c7_310 = arith.constant 7 : index
    %c0_311 = arith.constant 0 : index
    %c0_312 = arith.constant 0 : index
    %298 = vector.load %arg15[%c7_310, %c0_311, %c0_312] : memref<9x9x25xf32, #tpu.memory_space<vmem>>, vector<1x9x25xf32>
    %299 = vector.shape_cast %298 : vector<1x9x25xf32> to vector<9x25xf32>
    %cst_313 = arith.constant dense<0.000000e+00> : vector<16x25xf32>
    %300 = tpu.matmul %249, %299, %cst_313 {dimension_numbers = #tpu.dot_dimension_numbers<[1], [0], [0], [1], [0, 0, 1, 1], [], []>} : vector<16x9xf32>, vector<9x25xf32>, vector<16x25xf32> -> vector<16x25xf32>
    %c7_314 = arith.constant 7 : index
    %c0_315 = arith.constant 0 : index
    %c0_316 = arith.constant 0 : index
    %301 = vector.load %arg13[%c7_314, %c0_315, %c0_316] : memref<9x32x16xf32, #tpu.memory_space<vmem>>, vector<1x32x16xf32>
    %302 = vector.shape_cast %301 : vector<1x32x16xf32> to vector<32x16xf32>
    %cst_317 = arith.constant dense<0.000000e+00> : vector<32x25xf32>
    %303 = tpu.matmul %302, %300, %cst_317 {dimension_numbers = #tpu.dot_dimension_numbers<[1], [0], [0], [1], [0, 0, 1, 1], [], []>} : vector<32x16xf32>, vector<16x25xf32>, vector<32x25xf32> -> vector<32x25xf32>
    %304 = arith.addf %297, %303 : vector<32x25xf32>
    %c8_318 = arith.constant 8 : index
    %c0_319 = arith.constant 0 : index
    %c0_320 = arith.constant 0 : index
    %305 = vector.load %arg15[%c8_318, %c0_319, %c0_320] : memref<9x9x25xf32, #tpu.memory_space<vmem>>, vector<1x9x25xf32>
    %306 = vector.shape_cast %305 : vector<1x9x25xf32> to vector<9x25xf32>
    %cst_321 = arith.constant dense<0.000000e+00> : vector<16x25xf32>
    %307 = tpu.matmul %249, %306, %cst_321 {dimension_numbers = #tpu.dot_dimension_numbers<[1], [0], [0], [1], [0, 0, 1, 1], [], []>} : vector<16x9xf32>, vector<9x25xf32>, vector<16x25xf32> -> vector<16x25xf32>
    %c8_322 = arith.constant 8 : index
    %c0_323 = arith.constant 0 : index
    %c0_324 = arith.constant 0 : index
    %308 = vector.load %arg13[%c8_322, %c0_323, %c0_324] : memref<9x32x16xf32, #tpu.memory_space<vmem>>, vector<1x32x16xf32>
    %309 = vector.shape_cast %308 : vector<1x32x16xf32> to vector<32x16xf32>
    %cst_325 = arith.constant dense<0.000000e+00> : vector<32x25xf32>
    %310 = tpu.matmul %309, %307, %cst_325 {dimension_numbers = #tpu.dot_dimension_numbers<[1], [0], [0], [1], [0, 0, 1, 1], [], []>} : vector<32x16xf32>, vector<16x25xf32>, vector<32x25xf32> -> vector<32x25xf32>
    %311 = arith.addf %304, %310 : vector<32x25xf32>
    %c0_326 = arith.constant 0 : index
    %c0_327 = arith.constant 0 : index
    %312 = vector.load %arg14[%c0_326, %c0_327] : memref<32x1xf32, #tpu.memory_space<vmem>>, vector<32x1xf32>
    %313 = vector.broadcast %312 : vector<32x1xf32> to vector<32x25xf32>
    %314 = arith.addf %311, %313 : vector<32x25xf32>
    %cst_328 = arith.constant 0.000000e+00 : f32
    %315 = vector.broadcast %cst_328 : f32 to vector<32x25xf32>
    %316 = arith.maximumf %314, %315 : vector<32x25xf32>
    %c0_329 = arith.constant 0 : index
    %c0_330 = arith.constant 0 : index
    %c0_331 = arith.constant 0 : index
    %317 = vector.load %arg18[%c0_329, %c0_330, %c0_331] : memref<9x25x121xf32, #tpu.memory_space<vmem>>, vector<1x25x121xf32>
    %318 = vector.shape_cast %317 : vector<1x25x121xf32> to vector<25x121xf32>
    %cst_332 = arith.constant dense<0.000000e+00> : vector<32x121xf32>
    %319 = tpu.matmul %316, %318, %cst_332 {dimension_numbers = #tpu.dot_dimension_numbers<[1], [0], [0], [1], [0, 0, 1, 1], [], []>} : vector<32x25xf32>, vector<25x121xf32>, vector<32x121xf32> -> vector<32x121xf32>
    %c0_333 = arith.constant 0 : index
    %c0_334 = arith.constant 0 : index
    %c0_335 = arith.constant 0 : index
    %320 = vector.load %arg16[%c0_333, %c0_334, %c0_335] : memref<9x16x32xf32, #tpu.memory_space<vmem>>, vector<1x16x32xf32>
    %321 = vector.shape_cast %320 : vector<1x16x32xf32> to vector<16x32xf32>
    %cst_336 = arith.constant dense<0.000000e+00> : vector<16x121xf32>
    %322 = tpu.matmul %321, %319, %cst_336 {dimension_numbers = #tpu.dot_dimension_numbers<[1], [0], [0], [1], [0, 0, 1, 1], [], []>} : vector<16x32xf32>, vector<32x121xf32>, vector<16x121xf32> -> vector<16x121xf32>
    %c1_337 = arith.constant 1 : index
    %c0_338 = arith.constant 0 : index
    %c0_339 = arith.constant 0 : index
    %323 = vector.load %arg18[%c1_337, %c0_338, %c0_339] : memref<9x25x121xf32, #tpu.memory_space<vmem>>, vector<1x25x121xf32>
    %324 = vector.shape_cast %323 : vector<1x25x121xf32> to vector<25x121xf32>
    %cst_340 = arith.constant dense<0.000000e+00> : vector<32x121xf32>
    %325 = tpu.matmul %316, %324, %cst_340 {dimension_numbers = #tpu.dot_dimension_numbers<[1], [0], [0], [1], [0, 0, 1, 1], [], []>} : vector<32x25xf32>, vector<25x121xf32>, vector<32x121xf32> -> vector<32x121xf32>
    %c1_341 = arith.constant 1 : index
    %c0_342 = arith.constant 0 : index
    %c0_343 = arith.constant 0 : index
    %326 = vector.load %arg16[%c1_341, %c0_342, %c0_343] : memref<9x16x32xf32, #tpu.memory_space<vmem>>, vector<1x16x32xf32>
    %327 = vector.shape_cast %326 : vector<1x16x32xf32> to vector<16x32xf32>
    %cst_344 = arith.constant dense<0.000000e+00> : vector<16x121xf32>
    %328 = tpu.matmul %327, %325, %cst_344 {dimension_numbers = #tpu.dot_dimension_numbers<[1], [0], [0], [1], [0, 0, 1, 1], [], []>} : vector<16x32xf32>, vector<32x121xf32>, vector<16x121xf32> -> vector<16x121xf32>
    %329 = arith.addf %322, %328 : vector<16x121xf32>
    %c2_345 = arith.constant 2 : index
    %c0_346 = arith.constant 0 : index
    %c0_347 = arith.constant 0 : index
    %330 = vector.load %arg18[%c2_345, %c0_346, %c0_347] : memref<9x25x121xf32, #tpu.memory_space<vmem>>, vector<1x25x121xf32>
    %331 = vector.shape_cast %330 : vector<1x25x121xf32> to vector<25x121xf32>
    %cst_348 = arith.constant dense<0.000000e+00> : vector<32x121xf32>
    %332 = tpu.matmul %316, %331, %cst_348 {dimension_numbers = #tpu.dot_dimension_numbers<[1], [0], [0], [1], [0, 0, 1, 1], [], []>} : vector<32x25xf32>, vector<25x121xf32>, vector<32x121xf32> -> vector<32x121xf32>
    %c2_349 = arith.constant 2 : index
    %c0_350 = arith.constant 0 : index
    %c0_351 = arith.constant 0 : index
    %333 = vector.load %arg16[%c2_349, %c0_350, %c0_351] : memref<9x16x32xf32, #tpu.memory_space<vmem>>, vector<1x16x32xf32>
    %334 = vector.shape_cast %333 : vector<1x16x32xf32> to vector<16x32xf32>
    %cst_352 = arith.constant dense<0.000000e+00> : vector<16x121xf32>
    %335 = tpu.matmul %334, %332, %cst_352 {dimension_numbers = #tpu.dot_dimension_numbers<[1], [0], [0], [1], [0, 0, 1, 1], [], []>} : vector<16x32xf32>, vector<32x121xf32>, vector<16x121xf32> -> vector<16x121xf32>
    %336 = arith.addf %329, %335 : vector<16x121xf32>
    %c3_353 = arith.constant 3 : index
    %c0_354 = arith.constant 0 : index
    %c0_355 = arith.constant 0 : index
    %337 = vector.load %arg18[%c3_353, %c0_354, %c0_355] : memref<9x25x121xf32, #tpu.memory_space<vmem>>, vector<1x25x121xf32>
    %338 = vector.shape_cast %337 : vector<1x25x121xf32> to vector<25x121xf32>
    %cst_356 = arith.constant dense<0.000000e+00> : vector<32x121xf32>
    %339 = tpu.matmul %316, %338, %cst_356 {dimension_numbers = #tpu.dot_dimension_numbers<[1], [0], [0], [1], [0, 0, 1, 1], [], []>} : vector<32x25xf32>, vector<25x121xf32>, vector<32x121xf32> -> vector<32x121xf32>
    %c3_357 = arith.constant 3 : index
    %c0_358 = arith.constant 0 : index
    %c0_359 = arith.constant 0 : index
    %340 = vector.load %arg16[%c3_357, %c0_358, %c0_359] : memref<9x16x32xf32, #tpu.memory_space<vmem>>, vector<1x16x32xf32>
    %341 = vector.shape_cast %340 : vector<1x16x32xf32> to vector<16x32xf32>
    %cst_360 = arith.constant dense<0.000000e+00> : vector<16x121xf32>
    %342 = tpu.matmul %341, %339, %cst_360 {dimension_numbers = #tpu.dot_dimension_numbers<[1], [0], [0], [1], [0, 0, 1, 1], [], []>} : vector<16x32xf32>, vector<32x121xf32>, vector<16x121xf32> -> vector<16x121xf32>
    %343 = arith.addf %336, %342 : vector<16x121xf32>
    %c4_361 = arith.constant 4 : index
    %c0_362 = arith.constant 0 : index
    %c0_363 = arith.constant 0 : index
    %344 = vector.load %arg18[%c4_361, %c0_362, %c0_363] : memref<9x25x121xf32, #tpu.memory_space<vmem>>, vector<1x25x121xf32>
    %345 = vector.shape_cast %344 : vector<1x25x121xf32> to vector<25x121xf32>
    %cst_364 = arith.constant dense<0.000000e+00> : vector<32x121xf32>
    %346 = tpu.matmul %316, %345, %cst_364 {dimension_numbers = #tpu.dot_dimension_numbers<[1], [0], [0], [1], [0, 0, 1, 1], [], []>} : vector<32x25xf32>, vector<25x121xf32>, vector<32x121xf32> -> vector<32x121xf32>
    %c4_365 = arith.constant 4 : index
    %c0_366 = arith.constant 0 : index
    %c0_367 = arith.constant 0 : index
    %347 = vector.load %arg16[%c4_365, %c0_366, %c0_367] : memref<9x16x32xf32, #tpu.memory_space<vmem>>, vector<1x16x32xf32>
    %348 = vector.shape_cast %347 : vector<1x16x32xf32> to vector<16x32xf32>
    %cst_368 = arith.constant dense<0.000000e+00> : vector<16x121xf32>
    %349 = tpu.matmul %348, %346, %cst_368 {dimension_numbers = #tpu.dot_dimension_numbers<[1], [0], [0], [1], [0, 0, 1, 1], [], []>} : vector<16x32xf32>, vector<32x121xf32>, vector<16x121xf32> -> vector<16x121xf32>
    %350 = arith.addf %343, %349 : vector<16x121xf32>
    %c5_369 = arith.constant 5 : index
    %c0_370 = arith.constant 0 : index
    %c0_371 = arith.constant 0 : index
    %351 = vector.load %arg18[%c5_369, %c0_370, %c0_371] : memref<9x25x121xf32, #tpu.memory_space<vmem>>, vector<1x25x121xf32>
    %352 = vector.shape_cast %351 : vector<1x25x121xf32> to vector<25x121xf32>
    %cst_372 = arith.constant dense<0.000000e+00> : vector<32x121xf32>
    %353 = tpu.matmul %316, %352, %cst_372 {dimension_numbers = #tpu.dot_dimension_numbers<[1], [0], [0], [1], [0, 0, 1, 1], [], []>} : vector<32x25xf32>, vector<25x121xf32>, vector<32x121xf32> -> vector<32x121xf32>
    %c5_373 = arith.constant 5 : index
    %c0_374 = arith.constant 0 : index
    %c0_375 = arith.constant 0 : index
    %354 = vector.load %arg16[%c5_373, %c0_374, %c0_375] : memref<9x16x32xf32, #tpu.memory_space<vmem>>, vector<1x16x32xf32>
    %355 = vector.shape_cast %354 : vector<1x16x32xf32> to vector<16x32xf32>
    %cst_376 = arith.constant dense<0.000000e+00> : vector<16x121xf32>
    %356 = tpu.matmul %355, %353, %cst_376 {dimension_numbers = #tpu.dot_dimension_numbers<[1], [0], [0], [1], [0, 0, 1, 1], [], []>} : vector<16x32xf32>, vector<32x121xf32>, vector<16x121xf32> -> vector<16x121xf32>
    %357 = arith.addf %350, %356 : vector<16x121xf32>
    %c6_377 = arith.constant 6 : index
    %c0_378 = arith.constant 0 : index
    %c0_379 = arith.constant 0 : index
    %358 = vector.load %arg18[%c6_377, %c0_378, %c0_379] : memref<9x25x121xf32, #tpu.memory_space<vmem>>, vector<1x25x121xf32>
    %359 = vector.shape_cast %358 : vector<1x25x121xf32> to vector<25x121xf32>
    %cst_380 = arith.constant dense<0.000000e+00> : vector<32x121xf32>
    %360 = tpu.matmul %316, %359, %cst_380 {dimension_numbers = #tpu.dot_dimension_numbers<[1], [0], [0], [1], [0, 0, 1, 1], [], []>} : vector<32x25xf32>, vector<25x121xf32>, vector<32x121xf32> -> vector<32x121xf32>
    %c6_381 = arith.constant 6 : index
    %c0_382 = arith.constant 0 : index
    %c0_383 = arith.constant 0 : index
    %361 = vector.load %arg16[%c6_381, %c0_382, %c0_383] : memref<9x16x32xf32, #tpu.memory_space<vmem>>, vector<1x16x32xf32>
    %362 = vector.shape_cast %361 : vector<1x16x32xf32> to vector<16x32xf32>
    %cst_384 = arith.constant dense<0.000000e+00> : vector<16x121xf32>
    %363 = tpu.matmul %362, %360, %cst_384 {dimension_numbers = #tpu.dot_dimension_numbers<[1], [0], [0], [1], [0, 0, 1, 1], [], []>} : vector<16x32xf32>, vector<32x121xf32>, vector<16x121xf32> -> vector<16x121xf32>
    %364 = arith.addf %357, %363 : vector<16x121xf32>
    %c7_385 = arith.constant 7 : index
    %c0_386 = arith.constant 0 : index
    %c0_387 = arith.constant 0 : index
    %365 = vector.load %arg18[%c7_385, %c0_386, %c0_387] : memref<9x25x121xf32, #tpu.memory_space<vmem>>, vector<1x25x121xf32>
    %366 = vector.shape_cast %365 : vector<1x25x121xf32> to vector<25x121xf32>
    %cst_388 = arith.constant dense<0.000000e+00> : vector<32x121xf32>
    %367 = tpu.matmul %316, %366, %cst_388 {dimension_numbers = #tpu.dot_dimension_numbers<[1], [0], [0], [1], [0, 0, 1, 1], [], []>} : vector<32x25xf32>, vector<25x121xf32>, vector<32x121xf32> -> vector<32x121xf32>
    %c7_389 = arith.constant 7 : index
    %c0_390 = arith.constant 0 : index
    %c0_391 = arith.constant 0 : index
    %368 = vector.load %arg16[%c7_389, %c0_390, %c0_391] : memref<9x16x32xf32, #tpu.memory_space<vmem>>, vector<1x16x32xf32>
    %369 = vector.shape_cast %368 : vector<1x16x32xf32> to vector<16x32xf32>
    %cst_392 = arith.constant dense<0.000000e+00> : vector<16x121xf32>
    %370 = tpu.matmul %369, %367, %cst_392 {dimension_numbers = #tpu.dot_dimension_numbers<[1], [0], [0], [1], [0, 0, 1, 1], [], []>} : vector<16x32xf32>, vector<32x121xf32>, vector<16x121xf32> -> vector<16x121xf32>
    %371 = arith.addf %364, %370 : vector<16x121xf32>
    %c8_393 = arith.constant 8 : index
    %c0_394 = arith.constant 0 : index
    %c0_395 = arith.constant 0 : index
    %372 = vector.load %arg18[%c8_393, %c0_394, %c0_395] : memref<9x25x121xf32, #tpu.memory_space<vmem>>, vector<1x25x121xf32>
    %373 = vector.shape_cast %372 : vector<1x25x121xf32> to vector<25x121xf32>
    %cst_396 = arith.constant dense<0.000000e+00> : vector<32x121xf32>
    %374 = tpu.matmul %316, %373, %cst_396 {dimension_numbers = #tpu.dot_dimension_numbers<[1], [0], [0], [1], [0, 0, 1, 1], [], []>} : vector<32x25xf32>, vector<25x121xf32>, vector<32x121xf32> -> vector<32x121xf32>
    %c8_397 = arith.constant 8 : index
    %c0_398 = arith.constant 0 : index
    %c0_399 = arith.constant 0 : index
    %375 = vector.load %arg16[%c8_397, %c0_398, %c0_399] : memref<9x16x32xf32, #tpu.memory_space<vmem>>, vector<1x16x32xf32>
    %376 = vector.shape_cast %375 : vector<1x16x32xf32> to vector<16x32xf32>
    %cst_400 = arith.constant dense<0.000000e+00> : vector<16x121xf32>
    %377 = tpu.matmul %376, %374, %cst_400 {dimension_numbers = #tpu.dot_dimension_numbers<[1], [0], [0], [1], [0, 0, 1, 1], [], []>} : vector<16x32xf32>, vector<32x121xf32>, vector<16x121xf32> -> vector<16x121xf32>
    %378 = arith.addf %371, %377 : vector<16x121xf32>
    %c0_401 = arith.constant 0 : index
    %c0_402 = arith.constant 0 : index
    %379 = vector.load %arg17[%c0_401, %c0_402] : memref<16x1xf32, #tpu.memory_space<vmem>>, vector<16x1xf32>
    %380 = vector.broadcast %379 : vector<16x1xf32> to vector<16x121xf32>
    %381 = arith.addf %378, %380 : vector<16x121xf32>
    %cst_403 = arith.constant 0.000000e+00 : f32
    %382 = vector.broadcast %cst_403 : f32 to vector<16x121xf32>
    %383 = arith.maximumf %381, %382 : vector<16x121xf32>
    %c0_404 = arith.constant 0 : index
    %c0_405 = arith.constant 0 : index
    %c0_406 = arith.constant 0 : index
    %384 = vector.load %arg21[%c0_404, %c0_405, %c0_406] : memref<9x121x169xf32, #tpu.memory_space<vmem>>, vector<1x121x169xf32>
    %385 = vector.shape_cast %384 : vector<1x121x169xf32> to vector<121x169xf32>
    %cst_407 = arith.constant dense<0.000000e+00> : vector<16x169xf32>
    %386 = tpu.matmul %383, %385, %cst_407 {dimension_numbers = #tpu.dot_dimension_numbers<[1], [0], [0], [1], [0, 0, 1, 1], [], []>} : vector<16x121xf32>, vector<121x169xf32>, vector<16x169xf32> -> vector<16x169xf32>
    %c0_408 = arith.constant 0 : index
    %c0_409 = arith.constant 0 : index
    %c0_410 = arith.constant 0 : index
    %387 = vector.load %arg19[%c0_408, %c0_409, %c0_410] : memref<9x8x16xf32, #tpu.memory_space<vmem>>, vector<1x8x16xf32>
    %388 = vector.shape_cast %387 : vector<1x8x16xf32> to vector<8x16xf32>
    %cst_411 = arith.constant dense<0.000000e+00> : vector<8x169xf32>
    %389 = tpu.matmul %388, %386, %cst_411 {dimension_numbers = #tpu.dot_dimension_numbers<[1], [0], [0], [1], [0, 0, 1, 1], [], []>} : vector<8x16xf32>, vector<16x169xf32>, vector<8x169xf32> -> vector<8x169xf32>
    %c1_412 = arith.constant 1 : index
    %c0_413 = arith.constant 0 : index
    %c0_414 = arith.constant 0 : index
    %390 = vector.load %arg21[%c1_412, %c0_413, %c0_414] : memref<9x121x169xf32, #tpu.memory_space<vmem>>, vector<1x121x169xf32>
    %391 = vector.shape_cast %390 : vector<1x121x169xf32> to vector<121x169xf32>
    %cst_415 = arith.constant dense<0.000000e+00> : vector<16x169xf32>
    %392 = tpu.matmul %383, %391, %cst_415 {dimension_numbers = #tpu.dot_dimension_numbers<[1], [0], [0], [1], [0, 0, 1, 1], [], []>} : vector<16x121xf32>, vector<121x169xf32>, vector<16x169xf32> -> vector<16x169xf32>
    %c1_416 = arith.constant 1 : index
    %c0_417 = arith.constant 0 : index
    %c0_418 = arith.constant 0 : index
    %393 = vector.load %arg19[%c1_416, %c0_417, %c0_418] : memref<9x8x16xf32, #tpu.memory_space<vmem>>, vector<1x8x16xf32>
    %394 = vector.shape_cast %393 : vector<1x8x16xf32> to vector<8x16xf32>
    %cst_419 = arith.constant dense<0.000000e+00> : vector<8x169xf32>
    %395 = tpu.matmul %394, %392, %cst_419 {dimension_numbers = #tpu.dot_dimension_numbers<[1], [0], [0], [1], [0, 0, 1, 1], [], []>} : vector<8x16xf32>, vector<16x169xf32>, vector<8x169xf32> -> vector<8x169xf32>
    %396 = arith.addf %389, %395 : vector<8x169xf32>
    %c2_420 = arith.constant 2 : index
    %c0_421 = arith.constant 0 : index
    %c0_422 = arith.constant 0 : index
    %397 = vector.load %arg21[%c2_420, %c0_421, %c0_422] : memref<9x121x169xf32, #tpu.memory_space<vmem>>, vector<1x121x169xf32>
    %398 = vector.shape_cast %397 : vector<1x121x169xf32> to vector<121x169xf32>
    %cst_423 = arith.constant dense<0.000000e+00> : vector<16x169xf32>
    %399 = tpu.matmul %383, %398, %cst_423 {dimension_numbers = #tpu.dot_dimension_numbers<[1], [0], [0], [1], [0, 0, 1, 1], [], []>} : vector<16x121xf32>, vector<121x169xf32>, vector<16x169xf32> -> vector<16x169xf32>
    %c2_424 = arith.constant 2 : index
    %c0_425 = arith.constant 0 : index
    %c0_426 = arith.constant 0 : index
    %400 = vector.load %arg19[%c2_424, %c0_425, %c0_426] : memref<9x8x16xf32, #tpu.memory_space<vmem>>, vector<1x8x16xf32>
    %401 = vector.shape_cast %400 : vector<1x8x16xf32> to vector<8x16xf32>
    %cst_427 = arith.constant dense<0.000000e+00> : vector<8x169xf32>
    %402 = tpu.matmul %401, %399, %cst_427 {dimension_numbers = #tpu.dot_dimension_numbers<[1], [0], [0], [1], [0, 0, 1, 1], [], []>} : vector<8x16xf32>, vector<16x169xf32>, vector<8x169xf32> -> vector<8x169xf32>
    %403 = arith.addf %396, %402 : vector<8x169xf32>
    %c3_428 = arith.constant 3 : index
    %c0_429 = arith.constant 0 : index
    %c0_430 = arith.constant 0 : index
    %404 = vector.load %arg21[%c3_428, %c0_429, %c0_430] : memref<9x121x169xf32, #tpu.memory_space<vmem>>, vector<1x121x169xf32>
    %405 = vector.shape_cast %404 : vector<1x121x169xf32> to vector<121x169xf32>
    %cst_431 = arith.constant dense<0.000000e+00> : vector<16x169xf32>
    %406 = tpu.matmul %383, %405, %cst_431 {dimension_numbers = #tpu.dot_dimension_numbers<[1], [0], [0], [1], [0, 0, 1, 1], [], []>} : vector<16x121xf32>, vector<121x169xf32>, vector<16x169xf32> -> vector<16x169xf32>
    %c3_432 = arith.constant 3 : index
    %c0_433 = arith.constant 0 : index
    %c0_434 = arith.constant 0 : index
    %407 = vector.load %arg19[%c3_432, %c0_433, %c0_434] : memref<9x8x16xf32, #tpu.memory_space<vmem>>, vector<1x8x16xf32>
    %408 = vector.shape_cast %407 : vector<1x8x16xf32> to vector<8x16xf32>
    %cst_435 = arith.constant dense<0.000000e+00> : vector<8x169xf32>
    %409 = tpu.matmul %408, %406, %cst_435 {dimension_numbers = #tpu.dot_dimension_numbers<[1], [0], [0], [1], [0, 0, 1, 1], [], []>} : vector<8x16xf32>, vector<16x169xf32>, vector<8x169xf32> -> vector<8x169xf32>
    %410 = arith.addf %403, %409 : vector<8x169xf32>
    %c4_436 = arith.constant 4 : index
    %c0_437 = arith.constant 0 : index
    %c0_438 = arith.constant 0 : index
    %411 = vector.load %arg21[%c4_436, %c0_437, %c0_438] : memref<9x121x169xf32, #tpu.memory_space<vmem>>, vector<1x121x169xf32>
    %412 = vector.shape_cast %411 : vector<1x121x169xf32> to vector<121x169xf32>
    %cst_439 = arith.constant dense<0.000000e+00> : vector<16x169xf32>
    %413 = tpu.matmul %383, %412, %cst_439 {dimension_numbers = #tpu.dot_dimension_numbers<[1], [0], [0], [1], [0, 0, 1, 1], [], []>} : vector<16x121xf32>, vector<121x169xf32>, vector<16x169xf32> -> vector<16x169xf32>
    %c4_440 = arith.constant 4 : index
    %c0_441 = arith.constant 0 : index
    %c0_442 = arith.constant 0 : index
    %414 = vector.load %arg19[%c4_440, %c0_441, %c0_442] : memref<9x8x16xf32, #tpu.memory_space<vmem>>, vector<1x8x16xf32>
    %415 = vector.shape_cast %414 : vector<1x8x16xf32> to vector<8x16xf32>
    %cst_443 = arith.constant dense<0.000000e+00> : vector<8x169xf32>
    %416 = tpu.matmul %415, %413, %cst_443 {dimension_numbers = #tpu.dot_dimension_numbers<[1], [0], [0], [1], [0, 0, 1, 1], [], []>} : vector<8x16xf32>, vector<16x169xf32>, vector<8x169xf32> -> vector<8x169xf32>
    %417 = arith.addf %410, %416 : vector<8x169xf32>
    %c5_444 = arith.constant 5 : index
    %c0_445 = arith.constant 0 : index
    %c0_446 = arith.constant 0 : index
    %418 = vector.load %arg21[%c5_444, %c0_445, %c0_446] : memref<9x121x169xf32, #tpu.memory_space<vmem>>, vector<1x121x169xf32>
    %419 = vector.shape_cast %418 : vector<1x121x169xf32> to vector<121x169xf32>
    %cst_447 = arith.constant dense<0.000000e+00> : vector<16x169xf32>
    %420 = tpu.matmul %383, %419, %cst_447 {dimension_numbers = #tpu.dot_dimension_numbers<[1], [0], [0], [1], [0, 0, 1, 1], [], []>} : vector<16x121xf32>, vector<121x169xf32>, vector<16x169xf32> -> vector<16x169xf32>
    %c5_448 = arith.constant 5 : index
    %c0_449 = arith.constant 0 : index
    %c0_450 = arith.constant 0 : index
    %421 = vector.load %arg19[%c5_448, %c0_449, %c0_450] : memref<9x8x16xf32, #tpu.memory_space<vmem>>, vector<1x8x16xf32>
    %422 = vector.shape_cast %421 : vector<1x8x16xf32> to vector<8x16xf32>
    %cst_451 = arith.constant dense<0.000000e+00> : vector<8x169xf32>
    %423 = tpu.matmul %422, %420, %cst_451 {dimension_numbers = #tpu.dot_dimension_numbers<[1], [0], [0], [1], [0, 0, 1, 1], [], []>} : vector<8x16xf32>, vector<16x169xf32>, vector<8x169xf32> -> vector<8x169xf32>
    %424 = arith.addf %417, %423 : vector<8x169xf32>
    %c6_452 = arith.constant 6 : index
    %c0_453 = arith.constant 0 : index
    %c0_454 = arith.constant 0 : index
    %425 = vector.load %arg21[%c6_452, %c0_453, %c0_454] : memref<9x121x169xf32, #tpu.memory_space<vmem>>, vector<1x121x169xf32>
    %426 = vector.shape_cast %425 : vector<1x121x169xf32> to vector<121x169xf32>
    %cst_455 = arith.constant dense<0.000000e+00> : vector<16x169xf32>
    %427 = tpu.matmul %383, %426, %cst_455 {dimension_numbers = #tpu.dot_dimension_numbers<[1], [0], [0], [1], [0, 0, 1, 1], [], []>} : vector<16x121xf32>, vector<121x169xf32>, vector<16x169xf32> -> vector<16x169xf32>
    %c6_456 = arith.constant 6 : index
    %c0_457 = arith.constant 0 : index
    %c0_458 = arith.constant 0 : index
    %428 = vector.load %arg19[%c6_456, %c0_457, %c0_458] : memref<9x8x16xf32, #tpu.memory_space<vmem>>, vector<1x8x16xf32>
    %429 = vector.shape_cast %428 : vector<1x8x16xf32> to vector<8x16xf32>
    %cst_459 = arith.constant dense<0.000000e+00> : vector<8x169xf32>
    %430 = tpu.matmul %429, %427, %cst_459 {dimension_numbers = #tpu.dot_dimension_numbers<[1], [0], [0], [1], [0, 0, 1, 1], [], []>} : vector<8x16xf32>, vector<16x169xf32>, vector<8x169xf32> -> vector<8x169xf32>
    %431 = arith.addf %424, %430 : vector<8x169xf32>
    %c7_460 = arith.constant 7 : index
    %c0_461 = arith.constant 0 : index
    %c0_462 = arith.constant 0 : index
    %432 = vector.load %arg21[%c7_460, %c0_461, %c0_462] : memref<9x121x169xf32, #tpu.memory_space<vmem>>, vector<1x121x169xf32>
    %433 = vector.shape_cast %432 : vector<1x121x169xf32> to vector<121x169xf32>
    %cst_463 = arith.constant dense<0.000000e+00> : vector<16x169xf32>
    %434 = tpu.matmul %383, %433, %cst_463 {dimension_numbers = #tpu.dot_dimension_numbers<[1], [0], [0], [1], [0, 0, 1, 1], [], []>} : vector<16x121xf32>, vector<121x169xf32>, vector<16x169xf32> -> vector<16x169xf32>
    %c7_464 = arith.constant 7 : index
    %c0_465 = arith.constant 0 : index
    %c0_466 = arith.constant 0 : index
    %435 = vector.load %arg19[%c7_464, %c0_465, %c0_466] : memref<9x8x16xf32, #tpu.memory_space<vmem>>, vector<1x8x16xf32>
    %436 = vector.shape_cast %435 : vector<1x8x16xf32> to vector<8x16xf32>
    %cst_467 = arith.constant dense<0.000000e+00> : vector<8x169xf32>
    %437 = tpu.matmul %436, %434, %cst_467 {dimension_numbers = #tpu.dot_dimension_numbers<[1], [0], [0], [1], [0, 0, 1, 1], [], []>} : vector<8x16xf32>, vector<16x169xf32>, vector<8x169xf32> -> vector<8x169xf32>
    %438 = arith.addf %431, %437 : vector<8x169xf32>
    %c8_468 = arith.constant 8 : index
    %c0_469 = arith.constant 0 : index
    %c0_470 = arith.constant 0 : index
    %439 = vector.load %arg21[%c8_468, %c0_469, %c0_470] : memref<9x121x169xf32, #tpu.memory_space<vmem>>, vector<1x121x169xf32>
    %440 = vector.shape_cast %439 : vector<1x121x169xf32> to vector<121x169xf32>
    %cst_471 = arith.constant dense<0.000000e+00> : vector<16x169xf32>
    %441 = tpu.matmul %383, %440, %cst_471 {dimension_numbers = #tpu.dot_dimension_numbers<[1], [0], [0], [1], [0, 0, 1, 1], [], []>} : vector<16x121xf32>, vector<121x169xf32>, vector<16x169xf32> -> vector<16x169xf32>
    %c8_472 = arith.constant 8 : index
    %c0_473 = arith.constant 0 : index
    %c0_474 = arith.constant 0 : index
    %442 = vector.load %arg19[%c8_472, %c0_473, %c0_474] : memref<9x8x16xf32, #tpu.memory_space<vmem>>, vector<1x8x16xf32>
    %443 = vector.shape_cast %442 : vector<1x8x16xf32> to vector<8x16xf32>
    %cst_475 = arith.constant dense<0.000000e+00> : vector<8x169xf32>
    %444 = tpu.matmul %443, %441, %cst_475 {dimension_numbers = #tpu.dot_dimension_numbers<[1], [0], [0], [1], [0, 0, 1, 1], [], []>} : vector<8x16xf32>, vector<16x169xf32>, vector<8x169xf32> -> vector<8x169xf32>
    %445 = arith.addf %438, %444 : vector<8x169xf32>
    %c0_476 = arith.constant 0 : index
    %c0_477 = arith.constant 0 : index
    %446 = vector.load %arg20[%c0_476, %c0_477] : memref<8x1xf32, #tpu.memory_space<vmem>>, vector<8x1xf32>
    %447 = vector.broadcast %446 : vector<8x1xf32> to vector<8x169xf32>
    %448 = arith.addf %445, %447 : vector<8x169xf32>
    %449 = arith.negf %448 : vector<8x169xf32>
    %450 = math.exp %449 : vector<8x169xf32>
    %cst_478 = arith.constant 1.000000e+00 : f32
    %451 = vector.broadcast %cst_478 : f32 to vector<8x169xf32>
    %452 = arith.addf %451, %450 : vector<8x169xf32>
    %453 = arith.divf %451, %452 : vector<8x169xf32>
    %454 = vector.extract_strided_slice %453 {offsets = [0, 0], sizes = [1, 169], strides = [1, 1]} : vector<8x169xf32> to vector<1x169xf32>
    %c0_479 = arith.constant 0 : index
    %c0_480 = arith.constant 0 : index
    %c0_481 = arith.constant 0 : index
    %455 = vector.load %arg22[%c0_479, %c0_480, %c0_481] : memref<1x1x169xf32, #tpu.memory_space<vmem>>, vector<1x1x169xf32>
    %456 = vector.shape_cast %455 : vector<1x1x169xf32> to vector<1x169xf32>
    %457 = vector.shape_cast %454 : vector<1x169xf32> to vector<1x1x169xf32>
    tpu.vector_store %arg22[%c0_479, %c0_480, %c0_481], %457 {strides = array<i32>} : memref<1x1x169xf32, #tpu.memory_space<vmem>>, vector<1x1x169xf32>,
    return
  }
  func.func @transform_0(%arg0: i32) -> (i32, i32, i32) {
    %c0_i32 = arith.constant 0 : i32
    %c0_i32_0 = arith.constant 0 : i32
    %c0_i32_1 = arith.constant 0 : i32
    return %arg0, %c0_i32, %c0_i32_0 : i32, i32, i32
  }
  func.func @transform_1(%arg0: i32) -> (i32, i32, i32) {
    %c0_i32 = arith.constant 0 : i32
    %c0_i32_0 = arith.constant 0 : i32
    %c0_i32_1 = arith.constant 0 : i32
    %c0_i32_2 = arith.constant 0 : i32
    return %c0_i32, %c0_i32_0, %c0_i32_1 : i32, i32, i32
  }
  func.func @transform_2(%arg0: i32) -> (i32, i32) {
    %c0_i32 = arith.constant 0 : i32
    %c0_i32_0 = arith.constant 0 : i32
    %c0_i32_1 = arith.constant 0 : i32
    return %c0_i32, %c0_i32_0 : i32, i32
  }
  func.func @transform_3(%arg0: i32) -> (i32, i32, i32) {
    %c0_i32 = arith.constant 0 : i32
    %c0_i32_0 = arith.constant 0 : i32
    %c0_i32_1 = arith.constant 0 : i32
    %c0_i32_2 = arith.constant 0 : i32
    return %c0_i32, %c0_i32_0, %c0_i32_1 : i32, i32, i32
  }
  func.func @transform_4(%arg0: i32) -> (i32, i32, i32) {
    %c0_i32 = arith.constant 0 : i32
    %c0_i32_0 = arith.constant 0 : i32
    %c0_i32_1 = arith.constant 0 : i32
    %c0_i32_2 = arith.constant 0 : i32
    return %c0_i32, %c0_i32_0, %c0_i32_1 : i32, i32, i32
  }
  func.func @transform_5(%arg0: i32) -> (i32, i32) {
    %c0_i32 = arith.constant 0 : i32
    %c0_i32_0 = arith.constant 0 : i32
    %c0_i32_1 = arith.constant 0 : i32
    return %c0_i32, %c0_i32_0 : i32, i32
  }
  func.func @transform_6(%arg0: i32) -> (i32, i32, i32) {
    %c0_i32 = arith.constant 0 : i32
    %c0_i32_0 = arith.constant 0 : i32
    %c0_i32_1 = arith.constant 0 : i32
    %c0_i32_2 = arith.constant 0 : i32
    return %c0_i32, %c0_i32_0, %c0_i32_1 : i32, i32, i32
  }
  func.func @transform_7(%arg0: i32) -> (i32, i32, i32) {
    %c0_i32 = arith.constant 0 : i32
    %c0_i32_0 = arith.constant 0 : i32
    %c0_i32_1 = arith.constant 0 : i32
    %c0_i32_2 = arith.constant 0 : i32
    return %c0_i32, %c0_i32_0, %c0_i32_1 : i32, i32, i32
  }
  func.func @transform_8(%arg0: i32) -> (i32, i32) {
    %c0_i32 = arith.constant 0 : i32
    %c0_i32_0 = arith.constant 0 : i32
    %c0_i32_1 = arith.constant 0 : i32
    return %c0_i32, %c0_i32_0 : i32, i32
  }
  func.func @transform_9(%arg0: i32) -> (i32, i32, i32) {
    %c0_i32 = arith.constant 0 : i32
    %c0_i32_0 = arith.constant 0 : i32
    %c0_i32_1 = arith.constant 0 : i32
    %c0_i32_2 = arith.constant 0 : i32
    return %c0_i32, %c0_i32_0, %c0_i32_1 : i32, i32, i32
  }
  func.func @transform_10(%arg0: i32) -> (i32, i32, i32) {
    %c0_i32 = arith.constant 0 : i32
    %c0_i32_0 = arith.constant 0 : i32
    %c0_i32_1 = arith.constant 0 : i32
    %c0_i32_2 = arith.constant 0 : i32
    return %c0_i32, %c0_i32_0, %c0_i32_1 : i32, i32, i32
  }
  func.func @transform_11(%arg0: i32) -> (i32, i32, i32) {
    %c0_i32 = arith.constant 0 : i32
    %c0_i32_0 = arith.constant 0 : i32
    %c0_i32_1 = arith.constant 0 : i32
    %c0_i32_2 = arith.constant 0 : i32
    return %c0_i32, %c0_i32_0, %c0_i32_1 : i32, i32, i32
  }
  func.func @transform_12(%arg0: i32) -> (i32, i32, i32) {
    %c0_i32 = arith.constant 0 : i32
    %c0_i32_0 = arith.constant 0 : i32
    %c0_i32_1 = arith.constant 0 : i32
    %c0_i32_2 = arith.constant 0 : i32
    return %c0_i32, %c0_i32_0, %c0_i32_1 : i32, i32, i32
  }
  func.func @transform_13(%arg0: i32) -> (i32, i32) {
    %c0_i32 = arith.constant 0 : i32
    %c0_i32_0 = arith.constant 0 : i32
    %c0_i32_1 = arith.constant 0 : i32
    return %c0_i32, %c0_i32_0 : i32, i32
  }
  func.func @transform_14(%arg0: i32) -> (i32, i32, i32) {
    %c0_i32 = arith.constant 0 : i32
    %c0_i32_0 = arith.constant 0 : i32
    %c0_i32_1 = arith.constant 0 : i32
    %c0_i32_2 = arith.constant 0 : i32
    return %c0_i32, %c0_i32_0, %c0_i32_1 : i32, i32, i32
  }
  func.func @transform_15(%arg0: i32) -> (i32, i32, i32) {
    %c0_i32 = arith.constant 0 : i32
    %c0_i32_0 = arith.constant 0 : i32
    %c0_i32_1 = arith.constant 0 : i32
    %c0_i32_2 = arith.constant 0 : i32
    return %c0_i32, %c0_i32_0, %c0_i32_1 : i32, i32, i32
  }
  func.func @transform_16(%arg0: i32) -> (i32, i32) {
    %c0_i32 = arith.constant 0 : i32
    %c0_i32_0 = arith.constant 0 : i32
    %c0_i32_1 = arith.constant 0 : i32
    return %c0_i32, %c0_i32_0 : i32, i32
  }
  func.func @transform_17(%arg0: i32) -> (i32, i32, i32) {
    %c0_i32 = arith.constant 0 : i32
    %c0_i32_0 = arith.constant 0 : i32
    %c0_i32_1 = arith.constant 0 : i32
    %c0_i32_2 = arith.constant 0 : i32
    return %c0_i32, %c0_i32_0, %c0_i32_1 : i32, i32, i32
  }
  func.func @transform_18(%arg0: i32) -> (i32, i32, i32) {
    %c0_i32 = arith.constant 0 : i32
    %c0_i32_0 = arith.constant 0 : i32
    %c0_i32_1 = arith.constant 0 : i32
    %c0_i32_2 = arith.constant 0 : i32
    return %c0_i32, %c0_i32_0, %c0_i32_1 : i32, i32, i32
  }
  func.func @transform_19(%arg0: i32) -> (i32, i32) {
    %c0_i32 = arith.constant 0 : i32
    %c0_i32_0 = arith.constant 0 : i32
    %c0_i32_1 = arith.constant 0 : i32
    return %c0_i32, %c0_i32_0 : i32, i32
  }
  func.func @transform_20(%arg0: i32) -> (i32, i32, i32) {
    %c0_i32 = arith.constant 0 : i32
    %c0_i32_0 = arith.constant 0 : i32
    %c0_i32_1 = arith.constant 0 : i32
    %c0_i32_2 = arith.constant 0 : i32
    return %c0_i32, %c0_i32_0, %c0_i32_1 : i32, i32, i32
  }
  func.func @transform_21(%arg0: i32) -> (i32, i32, i32) {
    %c0_i32 = arith.constant 0 : i32
    %c0_i32_0 = arith.constant 0 : i32
    %c0_i32_1 = arith.constant 0 : i32
    return %arg0, %c0_i32, %c0_i32_0 : i32, i32, i32
  }
}

</mosaic_0001>

<bundles_post_ra>
// kernel: conv_autoencoder_forward.1
= control target key start
LH: loop header
LB: loop body
LE: loop exit
PB: predicated region body
PF: predicated region fallthrough
CT: control target
= control target key end

     0   :  { %s18087_s0 = inlined_call_operand.vmem [shape: f32[2,8,256], index: 0, kind: input, shape index: {}]   ;;  %s18088_s1 = inlined_call_operand.hbm [shape: f32[9,16,8], index: 1, kind: input, shape index: {}]   ;;  %s18089_s2 = inlined_call_operand.hbm [shape: f32[16,1], index: 2, kind: input, shape index: {}]   ;;  %s18090_s3 = inlined_call_operand.hbm [shape: f32[9,256,196], index: 3, kind: input, shape index: {}]   ;;  %s18091_s4 = inlined_call_operand.hbm [shape: f32[9,32,16], index: 4, kind: input, shape index: {}]   ;;  %s18092_s5 = inlined_call_operand.hbm [shape: f32[32,1], index: 5, kind: input, shape index: {}]   ;;  %s18093_s6 = inlined_call_operand.hbm [shape: f32[9,196,36], index: 6, kind: input, shape index: {}]   ;;  %s18094_s7 = inlined_call_operand.hbm [shape: f32[9,16,32], index: 7, kind: input, shape index: {}]   ;;  %s18095_s8 = inlined_call_operand.hbm [shape: f32[16,1], index: 8, kind: input, shape index: {}]   ;;  %s18096_s9 = inlined_call_operand.hbm [shape: f32[9,36,4], index: 9, kind: input, shape index: {}]   ;;  %s18097_s10 = inlined_call_operand.hbm [shape: f32[4,4,9], index: 10, kind: input, shape index: {}]   ;;  %s18098_s11 = inlined_call_operand.hbm [shape: f32[4,1,9], index: 11, kind: input, shape index: {}]   ;;  %s18099_s12 = inlined_call_operand.hbm [shape: f32[9,32,16], index: 12, kind: input, shape index: {}]   ;;  %s18100_s13 = inlined_call_operand.hbm [shape: f32[32,1], index: 13, kind: input, shape index: {}]   ;;  %s18101_s14 = inlined_call_operand.hbm [shape: f32[9,9,25], index: 14, kind: input, shape index: {}]   ;;  %s18102_s15 = inlined_call_operand.hbm [shape: f32[9,16,32], index: 15, kind: input, shape index: {}]   ;;  %s18103_s16 = inlined_call_operand.hbm [shape: f32[16,1], index: 16, kind: input, shape index: {}]   ;;  %s18104_s17 = inlined_call_operand.hbm [shape: f32[9,25,121], index: 17, kind: input, shape index: {}]   ;;  %s18105_s18 = inlined_call_operand.hbm [shape: f32[9,8,16], index: 18, kind: input, shape index: {}]   ;;  %s18106_s19 = inlined_call_operand.hbm [shape: f32[8,1], index: 19, kind: input, shape index: {}]   ;;  %s18107_s20 = inlined_call_operand.hbm [shape: f32[9,121,169], index: 20, kind: input, shape index: {}]   ;;  %s18108_s21 = inlined_call_operand.vmem [shape: f32[2,1,169], index: 21, kind: output, shape index: {}]  }
   0x1   :  { %18129 = sst [smem:[#allocation47_spill]] %s18087_s0 }
   0x2   :  { %18130 = sst [smem:[#allocation48_spill]] %s18088_s1 }
   0x3   :  { %18131 = sst [smem:[#allocation49_spill]] %s18089_s2 }
   0x4   :  { %18132 = sst [smem:[#allocation50_spill]] %s18090_s3 }
   0x5   :  { %18133 = sst [smem:[#allocation51_spill]] %s18091_s4 }
   0x6   :  { %18134 = sst [smem:[#allocation52_spill]] %s18092_s5 }
   0x7   :  { %18135 = sst [smem:[#allocation53_spill]] %s18093_s6 }
   0x8   :  { %18136 = sst [smem:[#allocation54_spill]] %s18094_s7 }
   0x9   :  { %18137 = sst [smem:[#allocation55_spill]] %s18095_s8 }
   0xa   :  { %18138 = sst [smem:[#allocation56_spill]] %s18097_s10 }
   0xb   :  { %18139 = sst [smem:[#allocation57_spill]] %s18104_s17 }
   0xc   :  { %18140 = sst [smem:[#allocation58_spill]] %s18106_s19 }
   0xd   :  { %18141 = sst [smem:[#allocation59_spill]] %s18107_s20 }
   0xe   :  { %18142 = sst [smem:[#allocation60_spill]] %s18108_s21 }
   0xf   :  { %26 = vsyncpa [#allocation3], 0 }
  0x10   :  { %27 = vsyncpa [#allocation5], 0 }
  0x11   :  { %28 = vsyncpa [#allocation8], 0 }
  0x12   :  { %29 = vsyncpa [#allocation11], 0 }
  0x13   :  { %30 = vsyncpa [#allocation14], 0 }
  0x14   :  { %31 = vsyncpa [#allocation17], 0 }
  0x15   :  { %32 = vsyncpa [#allocation20], 0 }
  0x16   :  { %33 = vsyncpa [#allocation23], 0 }
  0x17   :  { %34 = vsyncpa [#allocation26], 0 }
  0x18   :  { %35 = vsyncpa [#allocation29], 0 }
  0x19   :  { %36 = vsyncpa [#allocation32], 0  ;;  %s16647_s2 = smov 0  }
  0x1a LB: > { %18143 = sst [smem:[#allocation44_spill]] %s16503_s2  ;;  %s16653_s25 = sadd.s32 4294967295, %s16503_s2   ;;  %s16503_s2 = sphi %s16647_s2, %s42_s2  }
  0x1b   : > { %18144 = sst [smem:[#allocation45_spill]] %s16653_s25  ;;  %p12316_p0 = scmp.ge.s32.totalorder %s16503_s2, 1 }
  0x1c   : > { %p519_p1 = scmp.lt.s32.totalorder %s16503_s2, 3  ;;  %p18121_p2 = scmp.eq.s32.totalorder %s16653_s25, 0 }
  0x1d   : > { %s16505_s27 = smov [#allocation4]   ;;  %s16506_s28 = smov [#allocation7]  }
  0x1e   : > { %p16658_p3 = pnand %p12316_p0, %p519_p1  ;;  %s544_s3 = sshll.u32 %s16505_s27, 4  ;;  %s16662_s3 = int_to_ptr.vmem [resolvable:$true] %s544_s3 }
  0x1f   : > { %s570_s29 = sshll.u32 %s16506_s28, 4  ;;  %s16507_s4 = smov [#allocation10]   ;;  %s16666_s29 = int_to_ptr.vmem [resolvable:$true] %s570_s29 }
  0x20   : > { %s18145_s26 = scalar_select %p16658_p3, 1, 0 }
  0x21   : > { %p15740_p4 = pneg %p16658_p3  ;;  %s596_s30 = sshll.u32 %s16507_s4, 4  ;;  %s16674_s30 = int_to_ptr.vmem [resolvable:$true] %s596_s30 }
  0x22   : > { %18146 = sst [smem:[#allocation46_spill]] %s18145_s26  ;;  %s16508_s5 = smov [#allocation13]  }
  0x23   : > { %p16670_p5 = pnand %p18121_p2, %p15740_p4  ;;  %s16676_s22 = sshll.u32 %s16508_s5, 4  ;;  %s623_s22 = int_to_ptr.vmem [resolvable:$true] %s16676_s22 }
  0x24   : > { %s18148_s24 = sld [smem:[#allocation49_spill]] }
  0x25   : > { %p16686_p7 = pneg %p16670_p5 }
  0x2a   : > { %s15893_s27 = scalar_lea.hbm %s18148_s24, 256 }
  0x2b   : > { %p15894_p6 = scmp.ne.s32.totalorder %s18148_s24, %s15893_s27  ;;  %p15900_p10 = scmp.lt.u32.totalorder %s15893_s27, %s18148_s24 }
  0x2d   : > { %p15896_p8 = pnand %p16686_p7, %p15894_p6 }
  0x2f   : > { %p15897_p9 = pneg %p15896_p8 }
  0x31   : > { %p15902_p11 = pnand %p15900_p10, %p15897_p9 }
  0x33   : > { %15905 = shalt.err (!%p15902_p11)
}
  0x34   : > { %s15906_s2 = scalar_lea.vmem %s16662_s3, 256  ;;  %p15914_p1 = scmp.lt.s32.totalorder %s16662_s3, %s16662_s3 }
  0x35   : > { %p15907_p12 = scmp.ne.s32.totalorder %s16662_s3, %s15906_s2  ;;  %p15915_p4 = scmp.lt.s32.totalorder %s15906_s2, %s15906_s2 }
  0x37   : > { %p15909_p13 = pnand %p15907_p12, %p16686_p7  ;;  %p15916_p6 = por %p15915_p4, %p15914_p1 }
  0x39   : > { %p15910_p0 = pneg %p15909_p13 }
  0x3b   : > { %p15917_p8 = pnand %p15916_p6, %p15910_p0 }
  0x3d   : > { %15920 = shalt.err (!%p15917_p8)
}
  0x3e   : > { %s18123_s23 = smov 128   ;;  %s18125_s1 = smov 8  }
  0x3f   : > { %15746 = dma.hbm_to_vmem [thread:$0]  (!%p16670_p5), %s18148_s24, 256, %s16662_s3, [#allocation5], %s18123_s23, %s18123_s23, %s18125_s1  }
  0x40   : > { %s18150_s25 = sld [smem:[#allocation51_spill]] }
  0x46   : > { %s15921_s2 = scalar_lea.hbm %s18150_s25, 4608 }
  0x47   : > { %p15922_p9 = scmp.ne.s32.totalorder %s18150_s25, %s15921_s2  ;;  %p15928_p12 = scmp.lt.u32.totalorder %s15921_s2, %s18150_s25 }
  0x49   : > { %p15924_p10 = pnand %p15922_p9, %p16686_p7 }
  0x4b   : > { %p15925_p11 = pneg %p15924_p10 }
  0x4d   : > { %p15930_p13 = pnand %p15928_p12, %p15925_p11 }
  0x4f   : > { %15933 = shalt.err (!%p15930_p13)
}
  0x50   : > { %s15934_s3 = scalar_lea.vmem %s16666_s29, 4608  ;;  %p15942_p6 = scmp.lt.s32.totalorder %s16666_s29, %s16666_s29 }
  0x51   : > { %p15935_p0 = scmp.ne.s32.totalorder %s16666_s29, %s15934_s3  ;;  %p15943_p8 = scmp.lt.s32.totalorder %s15934_s3, %s15934_s3 }
  0x53   : > { %p15937_p1 = pnand %p15935_p0, %p16686_p7  ;;  %p15944_p9 = por %p15943_p8, %p15942_p6 }
  0x55   : > { %p15938_p4 = pneg %p15937_p1 }
  0x57   : > { %p15945_p10 = pnand %p15944_p9, %p15938_p4 }
  0x59   : > { %15948 = shalt.err (!%p15945_p10)
}
  0x5a   : > { %15752 = dma.hbm_to_vmem [thread:$0]  (!%p16670_p5), %s18150_s25, 4608, %s16666_s29, [#allocation8], %s18123_s23, %s18123_s23, %s18125_s1  }
  0x5b   : > { %s18151_s6 = sld [smem:[#allocation53_spill]] }
  0x61   : > { %s15949_s27 = scalar_lea.hbm %s18151_s6, 28800 }
  0x62   : > { %p15950_p11 = scmp.ne.s32.totalorder %s18151_s6, %s15949_s27  ;;  %p15956_p0 = scmp.lt.u32.totalorder %s15949_s27, %s18151_s6 }
  0x64   : > { %p15952_p12 = pnand %p15950_p11, %p16686_p7 }
  0x66   : > { %p15953_p13 = pneg %p15952_p12 }
  0x68   : > { %p15958_p1 = pnand %p15956_p0, %p15953_p13 }
  0x6a   : > { %15961 = shalt.err (!%p15958_p1)
}
  0x6b   : > { %s15962_s29 = scalar_lea.vmem %s16674_s30, 28800  ;;  %p15970_p9 = scmp.lt.s32.totalorder %s16674_s30, %s16674_s30 }
  0x6c   : > { %p15963_p4 = scmp.ne.s32.totalorder %s16674_s30, %s15962_s29  ;;  %p15971_p10 = scmp.lt.s32.totalorder %s15962_s29, %s15962_s29 }
  0x6e   : > { %p15965_p6 = pnand %p15963_p4, %p16686_p7  ;;  %p15972_p11 = por %p15971_p10, %p15970_p9 }
  0x70   : > { %p15966_p8 = pneg %p15965_p6 }
  0x72   : > { %p15973_p12 = pnand %p15972_p11, %p15966_p8 }
  0x74   : > { %15976 = shalt.err (!%p15973_p12)
}
  0x75   : > { %15758 = dma.hbm_to_vmem [thread:$0]  (!%p16670_p5), %s18151_s6, 28800, %s16674_s30, [#allocation11], %s18123_s23, %s18123_s23, %s18125_s1  }
  0x76   : > { %s18152_s8 = sld [smem:[#allocation55_spill]] }
  0x7c   : > { %s15977_s26 = scalar_lea.hbm %s18152_s8, 256 }
  0x7d   : > { %p15978_p13 = scmp.ne.s32.totalorder %s18152_s8, %s15977_s26  ;;  %p15984_p4 = scmp.lt.u32.totalorder %s15977_s26, %s18152_s8 }
  0x7f   : > { %p15980_p0 = pnand %p15978_p13, %p16686_p7 }
  0x81   : > { %p15981_p1 = pneg %p15980_p0 }
  0x83   : > { %p15986_p6 = pnand %p15984_p4, %p15981_p1 }
  0x85   : > { %15989 = shalt.err (!%p15986_p6)
}
  0x86   : > { %s15990_s2 = scalar_lea.vmem %s623_s22, 256  ;;  %p15998_p11 = scmp.lt.s32.totalorder %s623_s22, %s623_s22 }
  0x87   : > { %p15991_p8 = scmp.ne.s32.totalorder %s623_s22, %s15990_s2  ;;  %p15999_p12 = scmp.lt.s32.totalorder %s15990_s2, %s15990_s2 }
  0x89   : > { %p15993_p9 = pnand %p15991_p8, %p16686_p7  ;;  %p16000_p2 = por %p15999_p12, %p15998_p11 }
  0x8b   : > { %p15994_p10 = pneg %p15993_p9 }
  0x8d   : > { %p16001_p3 = pnand %p16000_p2, %p15994_p10 }
  0x8f   : > { %16004 = shalt.err (!%p16001_p3)
}
  0x90   : > { %15764 = dma.hbm_to_vmem [thread:$0]  (!%p16670_p5), %s18152_s8, 256, %s623_s22, [#allocation14], %s18123_s23, %s18123_s23, %s18125_s1  }
  0x91   : > { %s16511_s3 = smov [#allocation16]   ;;  %s18153_s10 = sld [smem:[#allocation56_spill]] }
  0x92   : > { %s648_s17 = sshll.u32 %s16511_s3, 4  ;;  %s649_s17 = int_to_ptr.vmem [resolvable:$true] %s648_s17 }
  0x97   : > { %s16005_s26 = scalar_lea.hbm %s18153_s10, 256 }
  0x98   : > { %p16006_p2 = scmp.ne.s32.totalorder %s18153_s10, %s16005_s26  ;;  %p16012_p0 = scmp.lt.u32.totalorder %s16005_s26, %s18153_s10 }
  0x9a   : > { %p16008_p3 = pnand %p16006_p2, %p16686_p7 }
  0x9c   : > { %p16009_p13 = pneg %p16008_p3 }
  0x9e   : > { %p16014_p1 = pnand %p16012_p0, %p16009_p13 }
  0xa0   : > { %16017 = shalt.err (!%p16014_p1)
}
  0xa1   : > { %s16018_s22 = scalar_lea.vmem %s649_s17, 256  ;;  %p16026_p9 = scmp.lt.s32.totalorder %s649_s17, %s649_s17 }
  0xa2   : > { %p16019_p4 = scmp.ne.s32.totalorder %s649_s17, %s16018_s22  ;;  %p16027_p10 = scmp.lt.s32.totalorder %s16018_s22, %s16018_s22 }
  0xa4   : > { %p16021_p6 = pnand %p16019_p4, %p16686_p7  ;;  %p16028_p11 = por %p16027_p10, %p16026_p9 }
  0xa6   : > { %p16022_p8 = pneg %p16021_p6 }
  0xa8   : > { %p16029_p12 = pnand %p16028_p11, %p16022_p8 }
  0xaa   : > { %16032 = shalt.err (!%p16029_p12)
}
  0xab   : > { %s16512_s2 = smov 64   ;;  %s16513_s30 = smov 4  }
  0xac   : > { %15770 = dma.hbm_to_vmem [thread:$0]  (!%p16670_p5), %s18153_s10, 256, %s649_s17, [#allocation17], %s16512_s2, %s16512_s2, %s16513_s30  }
  0xad   : > { %s16514_s19 = smov [#allocation19]   ;;  %s16515_s26 = smov [#allocation22]  }
  0xae   : > { %s674_s20 = sshll.u32 %s16514_s19, 4  ;;  %s700_s27 = sshll.u32 %s16515_s26, 4  ;;  %s675_s20 = int_to_ptr.vmem [resolvable:$true] %s674_s20  ;;  %s16802_s27 = int_to_ptr.vmem [resolvable:$true] %s700_s27 }
  0xaf   : > { %s16033_s5 = scalar_lea.hbm %s18099_s12, 4608 }
  0xb0   : > { %p16034_p2 = scmp.ne.s32.totalorder %s18099_s12, %s16033_s5  ;;  %p16040_p0 = scmp.lt.u32.totalorder %s16033_s5, %s18099_s12 }
  0xb2   : > { %p16036_p3 = pnand %p16034_p2, %p16686_p7 }
  0xb4   : > { %p16037_p13 = pneg %p16036_p3 }
  0xb6   : > { %p16042_p1 = pnand %p16040_p0, %p16037_p13 }
  0xb8   : > { %16045 = shalt.err (!%p16042_p1)
}
  0xb9   : > { %s16046_s2 = scalar_lea.vmem %s675_s20, 4608  ;;  %p16054_p9 = scmp.lt.s32.totalorder %s675_s20, %s675_s20 }
  0xba   : > { %p16047_p4 = scmp.ne.s32.totalorder %s675_s20, %s16046_s2  ;;  %p16055_p10 = scmp.lt.s32.totalorder %s16046_s2, %s16046_s2 }
  0xbc   : > { %p16049_p6 = pnand %p16047_p4, %p16686_p7  ;;  %p16056_p11 = por %p16055_p10, %p16054_p9 }
  0xbe   : > { %p16050_p8 = pneg %p16049_p6 }
  0xc0   : > { %p16057_p12 = pnand %p16056_p11, %p16050_p8 }
  0xc2   : > { %16060 = shalt.err (!%p16057_p12)
}
  0xc3   : > { %s18154_s23 = smov 128   ;;  %s16061_s28 = scalar_lea.hbm %s18101_s14, 2304 }
  0xc4   : > { %15776 = dma.hbm_to_vmem [thread:$0]  (!%p16670_p5), %s18099_s12, 4608, %s675_s20, [#allocation20], %s18154_s23, %s18154_s23, %s18125_s1  }
  0xc5   : > { %p16062_p2 = scmp.ne.s32.totalorder %s18101_s14, %s16061_s28  ;;  %p16068_p0 = scmp.lt.u32.totalorder %s16061_s28, %s18101_s14 }
  0xc7   : > { %p16064_p3 = pnand %p16062_p2, %p16686_p7 }
  0xc9   : > { %p16065_p13 = pneg %p16064_p3 }
  0xcb   : > { %p16070_p1 = pnand %p16068_p0, %p16065_p13 }
  0xcd   : > { %16073 = shalt.err (!%p16070_p1)
}
  0xce   : > { %s16074_s20 = scalar_lea.vmem %s16802_s27, 2304  ;;  %p16082_p9 = scmp.lt.s32.totalorder %s16802_s27, %s16802_s27 }
  0xcf   : > { %p16075_p4 = scmp.ne.s32.totalorder %s16802_s27, %s16074_s20  ;;  %p16083_p10 = scmp.lt.s32.totalorder %s16074_s20, %s16074_s20 }
  0xd1   : > { %p16077_p6 = pnand %p16075_p4, %p16686_p7  ;;  %p16084_p11 = por %p16083_p10, %p16082_p9 }
  0xd3   : > { %p16078_p8 = pneg %p16077_p6 }
  0xd5   : > { %p16085_p12 = pnand %p16084_p11, %p16078_p8 }
  0xd7   : > { %16088 = shalt.err (!%p16085_p12)
}
  0xd8   : > { %15782 = dma.hbm_to_vmem [thread:$0]  (!%p16670_p5), %s18101_s14, 2304, %s16802_s27, [#allocation23], %s18154_s23, %s18154_s23, %s18125_s1  }
  0xd9   : > { %s16516_s30 = smov [#allocation25]   ;;  %s16517_s19 = smov [#allocation28]  }
  0xda   : > { %s726_s3 = sshll.u32 %s16516_s30, 4  ;;  %s752_s26 = sshll.u32 %s16517_s19, 4  ;;  %s727_s3 = int_to_ptr.vmem [resolvable:$true] %s726_s3  ;;  %s16851_s26 = int_to_ptr.vmem [resolvable:$true] %s752_s26 }
  0xdb   : > { %s16089_s5 = scalar_lea.hbm %s18103_s16, 256 }
  0xdc   : > { %p16090_p2 = scmp.ne.s32.totalorder %s18103_s16, %s16089_s5  ;;  %p16096_p0 = scmp.lt.u32.totalorder %s16089_s5, %s18103_s16 }
  0xde   : > { %p16092_p3 = pnand %p16090_p2, %p16686_p7 }
  0xe0   : > { %p16093_p13 = pneg %p16092_p3 }
  0xe2   : > { %p16098_p1 = pnand %p16096_p0, %p16093_p13 }
  0xe4   : > { %16101 = shalt.err (!%p16098_p1)
}
  0xe5   : > { %s16102_s17 = scalar_lea.vmem %s727_s3, 256  ;;  %p16110_p9 = scmp.lt.s32.totalorder %s727_s3, %s727_s3 }
  0xe6   : > { %p16103_p4 = scmp.ne.s32.totalorder %s727_s3, %s16102_s17  ;;  %p16111_p10 = scmp.lt.s32.totalorder %s16102_s17, %s16102_s17 }
  0xe8   : > { %p16105_p6 = pnand %p16103_p4, %p16686_p7  ;;  %p16112_p11 = por %p16111_p10, %p16110_p9 }
  0xea   : > { %p16106_p8 = pneg %p16105_p6 }
  0xec   : > { %p16113_p12 = pnand %p16112_p11, %p16106_p8 }
  0xee   : > { %16116 = shalt.err (!%p16113_p12)
}
  0xef   : > { %15788 = dma.hbm_to_vmem [thread:$0]  (!%p16670_p5), %s18103_s16, 256, %s727_s3, [#allocation26], %s18154_s23, %s18154_s23, %s18125_s1  }
  0xf0   : > { %s16117_s4 = scalar_lea.hbm %s18105_s18, 1152 }
  0xf1   : > { %p16118_p2 = scmp.ne.s32.totalorder %s18105_s18, %s16117_s4  ;;  %p16124_p0 = scmp.lt.u32.totalorder %s16117_s4, %s18105_s18 }
  0xf3   : > { %p16120_p3 = pnand %p16118_p2, %p16686_p7 }
  0xf5   : > { %p16121_p13 = pneg %p16120_p3 }
  0xf7   : > { %p16126_p1 = pnand %p16124_p0, %p16121_p13 }
  0xf9   : > { %16129 = shalt.err (!%p16126_p1)
}
  0xfa   : > { %s16130_s3 = scalar_lea.vmem %s16851_s26, 1152  ;;  %p16138_p9 = scmp.lt.s32.totalorder %s16851_s26, %s16851_s26 }
  0xfb   : > { %p16131_p4 = scmp.ne.s32.totalorder %s16851_s26, %s16130_s3  ;;  %p16139_p10 = scmp.lt.s32.totalorder %s16130_s3, %s16130_s3 }
  0xfd   : > { %p16133_p6 = pnand %p16131_p4, %p16686_p7  ;;  %p16140_p11 = por %p16139_p10, %p16138_p9 }
  0xff   : > { %p16134_p8 = pneg %p16133_p6 }
 0x101   : > { %p16141_p12 = pnand %p16140_p11, %p16134_p8 }
 0x103   : > { %16144 = shalt.err (!%p16141_p12)
}
 0x104   : > { %15794 = dma.hbm_to_vmem [thread:$0]  (!%p16670_p5), %s18105_s18, 1152, %s16851_s26, [#allocation29], %s18154_s23, %s18154_s23, %s18125_s1  }
 0x105   : > { %s16518_s2 = smov [#allocation2]   ;;  %s16519_s19 = smov [#allocation6]  }
 0x106   : > { %s531_s30 = sshll.u32 %s16518_s2, 4  ;;  %s557_s28 = sshll.u32 %s16519_s19, 4  ;;  %s532_s30 = int_to_ptr.vmem [resolvable:$true] %s531_s30  ;;  %s16900_s28 = int_to_ptr.vmem [resolvable:$true] %s557_s28 }
 0x107   : > { %s18155_s22 = sld [smem:[#allocation48_spill]] }
 0x10d   : > { %s16145_s29 = scalar_lea.hbm %s18155_s22, 2304 }
 0x10e   : > { %p16146_p2 = scmp.ne.s32.totalorder %s18155_s22, %s16145_s29  ;;  %p16152_p0 = scmp.lt.u32.totalorder %s16145_s29, %s18155_s22 }
 0x110   : > { %p16148_p3 = pnand %p16146_p2, %p16686_p7 }
 0x112   : > { %p16149_p13 = pneg %p16148_p3 }
 0x114   : > { %p16154_p1 = pnand %p16152_p0, %p16149_p13 }
 0x116   : > { %16157 = shalt.err (!%p16154_p1)
}
 0x117   : > { %s16158_s17 = scalar_lea.vmem %s532_s30, 2304  ;;  %p16166_p9 = scmp.lt.s32.totalorder %s532_s30, %s532_s30 }
 0x118   : > { %p16159_p4 = scmp.ne.s32.totalorder %s532_s30, %s16158_s17  ;;  %p16167_p10 = scmp.lt.s32.totalorder %s16158_s17, %s16158_s17 }
 0x11a   : > { %p16161_p6 = pnand %p16159_p4, %p16686_p7  ;;  %p16168_p11 = por %p16167_p10, %p16166_p9 }
 0x11c   : > { %p16162_p8 = pneg %p16161_p6 }
 0x11e   : > { %p16169_p12 = pnand %p16168_p11, %p16162_p8 }
 0x120   : > { %16172 = shalt.err (!%p16169_p12)
}
 0x121   : > { %15743 = dma.hbm_to_vmem [thread:$0]  (!%p16670_p5), %s18155_s22, 2304, %s532_s30, [#allocation3], %s18154_s23, %s18154_s23, %s18125_s1  }
 0x122   : > { %s18156_s29 = sld [smem:[#allocation50_spill]] }
 0x128   : > { %s16173_s20 = scalar_lea.hbm %s18156_s29, 73728 }
 0x129   : > { %p16174_p2 = scmp.ne.s32.totalorder %s18156_s29, %s16173_s20  ;;  %p16180_p0 = scmp.lt.u32.totalorder %s16173_s20, %s18156_s29 }
 0x12b   : > { %p16176_p3 = pnand %p16174_p2, %p16686_p7 }
 0x12d   : > { %p16177_p13 = pneg %p16176_p3 }
 0x12f   : > { %p16182_p1 = pnand %p16180_p0, %p16177_p13 }
 0x131   : > { %16185 = shalt.err (!%p16182_p1)
}
 0x132   : > { %s16186_s30 = scalar_lea.vmem %s16900_s28, 73728  ;;  %p16194_p9 = scmp.lt.s32.totalorder %s16900_s28, %s16900_s28 }
 0x133   : > { %p16187_p4 = scmp.ne.s32.totalorder %s16900_s28, %s16186_s30  ;;  %p16195_p10 = scmp.lt.s32.totalorder %s16186_s30, %s16186_s30 }
 0x135   : > { %p16189_p6 = pnand %p16187_p4, %p16686_p7  ;;  %p16196_p11 = por %p16195_p10, %p16194_p9 }
 0x137   : > { %p16190_p8 = pneg %p16189_p6 }
 0x139   : > { %p16197_p12 = pnand %p16196_p11, %p16190_p8 }
 0x13b   : > { %16200 = shalt.err (!%p16197_p12)
}
 0x13c   : > { %s18127_s2 = smov 256   ;;  %s16521_s19 = smov 16  }
 0x13d   : > { %15749 = dma.hbm_to_vmem [thread:$0]  (!%p16670_p5), %s18156_s29, 73728, %s16900_s28, [#allocation5], %s18127_s2, %s18127_s2, %s16521_s19  }
 0x13e   : > { %s16522_s20 = smov [#allocation9]   ;;  %s16523_s27 = smov [#allocation12]  }
 0x13f   : > { %s583_s3 = sshll.u32 %s16522_s20, 4  ;;  %s609_s26 = sshll.u32 %s16523_s27, 4  ;;  %s584_s3 = int_to_ptr.vmem [resolvable:$true] %s583_s3  ;;  %s16949_s26 = int_to_ptr.vmem [resolvable:$true] %s609_s26 }
 0x140   : > { %s18157_s1 = sld [smem:[#allocation52_spill]] }
 0x146   : > { %s16201_s6 = scalar_lea.hbm %s18157_s1, 512 }
 0x147   : > { %p16202_p2 = scmp.ne.s32.totalorder %s18157_s1, %s16201_s6  ;;  %p16208_p0 = scmp.lt.u32.totalorder %s16201_s6, %s18157_s1 }
 0x149   : > { %p16204_p3 = pnand %p16202_p2, %p16686_p7 }
 0x14b   : > { %p16205_p13 = pneg %p16204_p3 }
 0x14d   : > { %p16210_p1 = pnand %p16208_p0, %p16205_p13 }
 0x14f   : > { %16213 = shalt.err (!%p16210_p1)
}
 0x150   : > { %s16214_s5 = scalar_lea.vmem %s584_s3, 512  ;;  %p16222_p9 = scmp.lt.s32.totalorder %s584_s3, %s584_s3 }
 0x151   : > { %p16215_p4 = scmp.ne.s32.totalorder %s584_s3, %s16214_s5  ;;  %p16223_p10 = scmp.lt.s32.totalorder %s16214_s5, %s16214_s5 }
 0x153   : > { %p16217_p6 = pnand %p16215_p4, %p16686_p7  ;;  %p16224_p11 = por %p16223_p10, %p16222_p9 }
 0x155   : > { %p16218_p8 = pneg %p16217_p6 }
 0x157   : > { %p16225_p12 = pnand %p16224_p11, %p16218_p8 }
 0x159   : > { %16228 = shalt.err (!%p16225_p12)
}
 0x15a   : > { %s18158_s8 = smov 8   ;;  %s18159_s7 = sld [smem:[#allocation54_spill]] }
 0x15b   : > { %15755 = dma.hbm_to_vmem [thread:$0]  (!%p16670_p5), %s18157_s1, 512, %s584_s3, [#allocation8], %s18154_s23, %s18154_s23, %s18158_s8  }
 0x160   : > { %s16229_s17 = scalar_lea.hbm %s18159_s7, 2304 }
 0x161   : > { %p16230_p2 = scmp.ne.s32.totalorder %s18159_s7, %s16229_s17  ;;  %p16236_p0 = scmp.lt.u32.totalorder %s16229_s17, %s18159_s7 }
 0x163   : > { %p16232_p3 = pnand %p16230_p2, %p16686_p7 }
 0x165   : > { %p16233_p13 = pneg %p16232_p3 }
 0x167   : > { %p16238_p1 = pnand %p16236_p0, %p16233_p13 }
 0x169   : > { %16241 = shalt.err (!%p16238_p1)
}
 0x16a   : > { %s16242_s3 = scalar_lea.vmem %s16949_s26, 2304  ;;  %p16250_p9 = scmp.lt.s32.totalorder %s16949_s26, %s16949_s26 }
 0x16b   : > { %p16243_p4 = scmp.ne.s32.totalorder %s16949_s26, %s16242_s3  ;;  %p16251_p10 = scmp.lt.s32.totalorder %s16242_s3, %s16242_s3 }
 0x16d   : > { %p16245_p6 = pnand %p16243_p4, %p16686_p7  ;;  %p16252_p11 = por %p16251_p10, %p16250_p9 }
 0x16f   : > { %p16246_p8 = pneg %p16245_p6 }
 0x171   : > { %p16253_p12 = pnand %p16252_p11, %p16246_p8 }
 0x173   : > { %16256 = shalt.err (!%p16253_p12)
}
 0x174   : > { %15761 = dma.hbm_to_vmem [thread:$0]  (!%p16670_p5), %s18159_s7, 2304, %s16949_s26, [#allocation11], %s18154_s23, %s18154_s23, %s18158_s8  }
 0x175   : > { %s16524_s20 = smov [#allocation15]   ;;  %s16525_s17 = smov [#allocation18]  }
 0x176   : > { %s635_s27 = sshll.u32 %s16524_s20, 4  ;;  %s661_s30 = sshll.u32 %s16525_s17, 4  ;;  %s636_s27 = int_to_ptr.vmem [resolvable:$true] %s635_s27  ;;  %s16998_s30 = int_to_ptr.vmem [resolvable:$true] %s661_s30 }
 0x177   : > { %s16257_s5 = scalar_lea.hbm %s18096_s9, 5760 }
 0x178   : > { %p16258_p2 = scmp.ne.s32.totalorder %s18096_s9, %s16257_s5  ;;  %p16264_p0 = scmp.lt.u32.totalorder %s16257_s5, %s18096_s9 }
 0x17a   : > { %p16260_p3 = pnand %p16258_p2, %p16686_p7 }
 0x17c   : > { %p16261_p13 = pneg %p16260_p3 }
 0x17e   : > { %p16266_p1 = pnand %p16264_p0, %p16261_p13 }
 0x180   : > { %16269 = shalt.err (!%p16266_p1)
}
 0x181   : > { %s16270_s6 = scalar_lea.vmem %s636_s27, 5760  ;;  %p16278_p9 = scmp.lt.s32.totalorder %s636_s27, %s636_s27 }
 0x182   : > { %p16271_p4 = scmp.ne.s32.totalorder %s636_s27, %s16270_s6  ;;  %p16279_p10 = scmp.lt.s32.totalorder %s16270_s6, %s16270_s6 }
 0x184   : > { %p16273_p6 = pnand %p16271_p4, %p16686_p7  ;;  %p16280_p11 = por %p16279_p10, %p16278_p9 }
 0x186   : > { %p16274_p8 = pneg %p16273_p6 }
 0x188   : > { %p16281_p12 = pnand %p16280_p11, %p16274_p8 }
 0x18a   : > { %16284 = shalt.err (!%p16281_p12)
}
 0x18b   : > { %15767 = dma.hbm_to_vmem [thread:$0]  (!%p16670_p5), %s18096_s9, 5760, %s636_s27, [#allocation14], %s18154_s23, %s18154_s23, %s18158_s8  }
 0x18c   : > { %s16285_s28 = scalar_lea.hbm %s18098_s11, 64 }
 0x18d   : > { %p16286_p2 = scmp.ne.s32.totalorder %s18098_s11, %s16285_s28  ;;  %p16292_p0 = scmp.lt.u32.totalorder %s16285_s28, %s18098_s11 }
 0x18f   : > { %p16288_p3 = pnand %p16286_p2, %p16686_p7 }
 0x191   : > { %p16289_p13 = pneg %p16288_p3 }
 0x193   : > { %p16294_p1 = pnand %p16292_p0, %p16289_p13 }
 0x195   : > { %16297 = shalt.err (!%p16294_p1)
}
 0x196   : > { %s16298_s27 = scalar_lea.vmem %s16998_s30, 64  ;;  %p16306_p9 = scmp.lt.s32.totalorder %s16998_s30, %s16998_s30 }
 0x197   : > { %p16299_p4 = scmp.ne.s32.totalorder %s16998_s30, %s16298_s27  ;;  %p16307_p10 = scmp.lt.s32.totalorder %s16298_s27, %s16298_s27 }
 0x199   : > { %p16301_p6 = pnand %p16299_p4, %p16686_p7  ;;  %p16308_p11 = por %p16307_p10, %p16306_p9 }
 0x19b   : > { %p16302_p8 = pneg %p16301_p6 }
 0x19d   : > { %p16309_p12 = pnand %p16308_p11, %p16302_p8 }
 0x19f   : > { %16312 = shalt.err (!%p16309_p12)
}
 0x1a0   : > { %s16526_s6 = smov 1   ;;  %s16527_s17 = smov [#allocation21]  }
 0x1a1   : > { %15773 = dma.hbm_to_vmem [thread:$0]  (!%p16670_p5), %s18098_s11, 64, %s16998_s30, [#allocation17], %s16521_s19, %s16521_s19, %s16526_s6  }
 0x1a2   : > { %s687_s4 = sshll.u32 %s16527_s17, 4  ;;  %s16528_s28 = smov [#allocation24]   ;;  %s688_s4 = int_to_ptr.vmem [resolvable:$true] %s687_s4 }
 0x1a3   : > { %s713_s5 = sshll.u32 %s16528_s28, 4  ;;  %s16313_s26 = scalar_lea.hbm %s18100_s13, 512  ;;  %s714_s5 = int_to_ptr.vmem [resolvable:$true] %s713_s5 }
 0x1a4   : > { %p16314_p2 = scmp.ne.s32.totalorder %s18100_s13, %s16313_s26  ;;  %p16320_p0 = scmp.lt.u32.totalorder %s16313_s26, %s18100_s13 }
 0x1a6   : > { %p16316_p3 = pnand %p16314_p2, %p16686_p7 }
 0x1a8   : > { %p16317_p13 = pneg %p16316_p3 }
 0x1aa   : > { %p16322_p1 = pnand %p16320_p0, %p16317_p13 }
 0x1ac   : > { %16325 = shalt.err (!%p16322_p1)
}
 0x1ad   : > { %s16326_s30 = scalar_lea.vmem %s688_s4, 512  ;;  %p16334_p9 = scmp.lt.s32.totalorder %s688_s4, %s688_s4 }
 0x1ae   : > { %p16327_p4 = scmp.ne.s32.totalorder %s688_s4, %s16326_s30  ;;  %p16335_p10 = scmp.lt.s32.totalorder %s16326_s30, %s16326_s30 }
 0x1b0   : > { %p16329_p6 = pnand %p16327_p4, %p16686_p7  ;;  %p16336_p11 = por %p16335_p10, %p16334_p9 }
 0x1b2   : > { %p16330_p8 = pneg %p16329_p6 }
 0x1b4   : > { %p16337_p12 = pnand %p16336_p11, %p16330_p8 }
 0x1b6   : > { %16340 = shalt.err (!%p16337_p12)
}
 0x1b7   : > { %15779 = dma.hbm_to_vmem [thread:$0]  (!%p16670_p5), %s18100_s13, 512, %s688_s4, [#allocation20], %s18154_s23, %s18154_s23, %s18158_s8  }
 0x1b8   : > { %s16341_s17 = scalar_lea.hbm %s18102_s15, 2304 }
 0x1b9   : > { %p16342_p2 = scmp.ne.s32.totalorder %s18102_s15, %s16341_s17  ;;  %p16348_p0 = scmp.lt.u32.totalorder %s16341_s17, %s18102_s15 }
 0x1bb   : > { %p16344_p3 = pnand %p16342_p2, %p16686_p7 }
 0x1bd   : > { %p16345_p13 = pneg %p16344_p3 }
 0x1bf   : > { %p16350_p1 = pnand %p16348_p0, %p16345_p13 }
 0x1c1   : > { %16353 = shalt.err (!%p16350_p1)
}
 0x1c2   : > { %s16354_s27 = scalar_lea.vmem %s714_s5, 2304  ;;  %p16362_p9 = scmp.lt.s32.totalorder %s714_s5, %s714_s5 }
 0x1c3   : > { %p16355_p4 = scmp.ne.s32.totalorder %s714_s5, %s16354_s27  ;;  %p16363_p10 = scmp.lt.s32.totalorder %s16354_s27, %s16354_s27 }
 0x1c5   : > { %p16357_p6 = pnand %p16355_p4, %p16686_p7  ;;  %p16364_p11 = por %p16363_p10, %p16362_p9 }
 0x1c7   : > { %p16358_p8 = pneg %p16357_p6 }
 0x1c9   : > { %p16365_p12 = pnand %p16364_p11, %p16358_p8 }
 0x1cb   : > { %16368 = shalt.err (!%p16365_p12)
}
 0x1cc   : > { %15785 = dma.hbm_to_vmem [thread:$0]  (!%p16670_p5), %s18102_s15, 2304, %s714_s5, [#allocation23], %s18154_s23, %s18154_s23, %s18158_s8  }
 0x1cd   : > { %s16529_s30 = smov [#allocation27]   ;;  %s16530_s1 = smov [#allocation30]  }
 0x1ce   : > { %s739_s7 = sshll.u32 %s16529_s30, 4  ;;  %s766_s6 = sshll.u32 %s16530_s1, 4  ;;  %s740_s7 = int_to_ptr.vmem [resolvable:$true] %s739_s7  ;;  %s767_s6 = int_to_ptr.vmem [resolvable:$true] %s766_s6 }
 0x1cf   : > { %s18160_s28 = sld [smem:[#allocation57_spill]] }
 0x1d5   : > { %s16369_s3 = scalar_lea.hbm %s18160_s28, 4608 }
 0x1d6   : > { %p16370_p2 = scmp.ne.s32.totalorder %s18160_s28, %s16369_s3  ;;  %p16376_p0 = scmp.lt.u32.totalorder %s16369_s3, %s18160_s28 }
 0x1d8   : > { %p16372_p3 = pnand %p16370_p2, %p16686_p7 }
 0x1da   : > { %p16373_p13 = pneg %p16372_p3 }
 0x1dc   : > { %p16378_p1 = pnand %p16376_p0, %p16373_p13 }
 0x1de   : > { %16381 = shalt.err (!%p16378_p1)
}
 0x1df   : > { %s16382_s5 = scalar_lea.vmem %s740_s7, 4608  ;;  %p16390_p9 = scmp.lt.s32.totalorder %s740_s7, %s740_s7 }
 0x1e0   : > { %p16383_p4 = scmp.ne.s32.totalorder %s740_s7, %s16382_s5  ;;  %p16391_p10 = scmp.lt.s32.totalorder %s16382_s5, %s16382_s5 }
 0x1e2   : > { %p16385_p6 = pnand %p16383_p4, %p16686_p7  ;;  %p16392_p11 = por %p16391_p10, %p16390_p9 }
 0x1e4   : > { %p16386_p8 = pneg %p16385_p6 }
 0x1e6   : > { %p16393_p12 = pnand %p16392_p11, %p16386_p8 }
 0x1e8   : > { %16396 = shalt.err (!%p16393_p12)
}
 0x1e9   : > { %15791 = dma.hbm_to_vmem [thread:$0]  (!%p16670_p5), %s18160_s28, 4608, %s740_s7, [#allocation26], %s18154_s23, %s18154_s23, %s18158_s8  }
 0x1ea   : > { %s18161_s17 = sld [smem:[#allocation58_spill]] }
 0x1f0   : > { %s16397_s3 = scalar_lea.hbm %s18161_s17, 128 }
 0x1f1   : > { %p16398_p2 = scmp.ne.s32.totalorder %s18161_s17, %s16397_s3  ;;  %p16404_p0 = scmp.lt.u32.totalorder %s16397_s3, %s18161_s17 }
 0x1f3   : > { %p16400_p3 = pnand %p16398_p2, %p16686_p7 }
 0x1f5   : > { %p16401_p13 = pneg %p16400_p3 }
 0x1f7   : > { %p16406_p1 = pnand %p16404_p0, %p16401_p13 }
 0x1f9   : > { %16409 = shalt.err (!%p16406_p1)
}
 0x1fa   : > { %s16410_s5 = scalar_lea.vmem %s767_s6, 128  ;;  %p16418_p9 = scmp.lt.s32.totalorder %s767_s6, %s767_s6 }
 0x1fb   : > { %p16411_p4 = scmp.ne.s32.totalorder %s767_s6, %s16410_s5  ;;  %p16419_p10 = scmp.lt.s32.totalorder %s16410_s5, %s16410_s5 }
 0x1fd   : > { %p16413_p6 = pnand %p16411_p4, %p16686_p7  ;;  %p16420_p11 = por %p16419_p10, %p16418_p9 }
 0x1ff   : > { %p16414_p8 = pneg %p16413_p6 }
 0x201   : > { %p16421_p12 = pnand %p16420_p11, %p16414_p8 }
 0x203   : > { %16424 = shalt.err (!%p16421_p12)
}
 0x204   : > { %15797 = dma.hbm_to_vmem [thread:$0]  (!%p16670_p5), %s18161_s17, 128, %s767_s6, [#allocation29]  }
 0x205   : > { %s16531_s7 = smov [#allocation31]   ;;  %s18162_s20 = sld [smem:[#allocation59_spill]] }
 0x206   : > { %s776_s2 = sshll.u32 %s16531_s7, 4  ;;  %s777_s2 = int_to_ptr.vmem [resolvable:$true] %s776_s2 }
 0x20b   : > { %s16425_s3 = scalar_lea.hbm %s18162_s20, 36864 }
 0x20c   : > { %p16426_p2 = scmp.ne.s32.totalorder %s18162_s20, %s16425_s3  ;;  %p16432_p0 = scmp.lt.u32.totalorder %s16425_s3, %s18162_s20 }
 0x20e   : > { %p16428_p3 = pnand %p16426_p2, %p16686_p7 }
 0x210   : > { %p16429_p13 = pneg %p16428_p3 }
 0x212   : > { %p16434_p1 = pnand %p16432_p0, %p16429_p13 }
 0x214   : > { %16437 = shalt.err (!%p16434_p1)
}
 0x215   : > { %s16438_s6 = scalar_lea.vmem %s777_s2, 36864  ;;  %p16446_p9 = scmp.lt.s32.totalorder %s777_s2, %s777_s2 }
 0x216   : > { %p16439_p4 = scmp.ne.s32.totalorder %s777_s2, %s16438_s6  ;;  %p16447_p10 = scmp.lt.s32.totalorder %s16438_s6, %s16438_s6 }
 0x218   : > { %p16441_p6 = pnand %p16439_p4, %p16686_p7  ;;  %p16448_p11 = por %p16447_p10, %p16446_p9 }
 0x21a   : > { %p16442_p8 = pneg %p16441_p6 }
 0x21c   : > { %p16449_p12 = pnand %p16448_p11, %p16442_p8 }
 0x21e   : > { %16452 = shalt.err (!%p16449_p12)
}
 0x21f   : > { %s18163_s5 = smov 256   ;;  %s18164_s7 = sld [smem:[#allocation46_spill]] }
 0x220   : > { %15800 = dma.hbm_to_vmem [thread:$0]  (!%p16670_p5), %s18162_s20, 36864, %s777_s2, [#allocation32], %s18163_s5, %s18163_s5, %s16521_s19  }
 0x225   : > { %p18165_p2 = scmp.ne.s32.totalorder %s18164_s7, 0 }
 0x226   : > { %s18166_s21 = sld [smem:[#allocation45_spill]] (!%p18165_p2) }
 0x227   : > { %800 = sbr.rel (%p18165_p2) target bundleno = 6842 (0x1aba), region = 104 }
 0x22c   : > { %p18167_p7 = scmp.eq.s32.totalorder (!%p18165_p2), %s18166_s21, 0 }
 0x22e   : > { %16458 = dma.done.wait (%p18167_p7), [#allocation3], 2304   ;;  %p18168_p3 = pmov %p18167_p7 }
 0x230   : > { %16460 = vsyncadd (%p18168_p3), [#allocation3], 4294964992  ;;  %p18169_p13 = pmov %p18168_p3 }
 0x231   : > { %p18170_p0 = pmov %p18168_p3 }
 0x232   : > { %16462 = dma.done.wait (%p18169_p13), [#allocation5], 73984  }
 0x233   : > { %16464 = vsyncadd (%p18170_p0), [#allocation5], 4294893312  ;;  %p18171_p1 = pmov %p18170_p0 }
 0x234   : > { %p18172_p5 = pmov %p18170_p0 }
 0x235   : > { %16466 = dma.done.wait (%p18171_p1), [#allocation8], 5120  }
 0x236   : > { %16468 = vsyncadd (%p18172_p5), [#allocation8], 4294962176  ;;  %p18173_p4 = pmov %p18170_p0 }
 0x237   : > { %p18174_p6 = pmov %p18170_p0 }
 0x238   : > { %16470 = dma.done.wait (%p18173_p4), [#allocation11], 31104  }
 0x239   : > { %16472 = vsyncadd (%p18174_p6), [#allocation11], 4294936192  ;;  %p18175_p8 = pmov %p18170_p0 }
 0x23a   : > { %p18176_p9 = pmov %p18170_p0 }
 0x23b   : > { %16474 = dma.done.wait (%p18175_p8), [#allocation14], 6016  }
 0x23c   : > { %16476 = vsyncadd (%p18176_p9), [#allocation14], 4294961280  ;;  %p18177_p10 = pmov %p18170_p0 }
 0x23d   : > { %p18178_p11 = pmov %p18170_p0 }
 0x23e   : > { %16478 = dma.done.wait (%p18177_p10), [#allocation17], 320  }
 0x23f   : > { %16480 = vsyncadd (%p18178_p11), [#allocation17], 4294966976  ;;  %p18179_p12 = pmov %p18170_p0 }
 0x240   : > { %p18180_p2 = pmov %p18170_p0 }
 0x241   : > { %16482 = dma.done.wait (%p18179_p12), [#allocation20], 5120  }
 0x242   : > { %16484 = vsyncadd (%p18180_p2), [#allocation20], 4294962176  ;;  %p18181_p7 = pmov %p18170_p0 }
 0x243   : > { %p18182_p3 = pmov %p18170_p0 }
 0x244   : > { %16486 = dma.done.wait (%p18181_p7), [#allocation23], 4608  }
 0x245   : > { %16488 = vsyncadd (%p18182_p3), [#allocation23], 4294962688  ;;  %p18183_p13 = pmov %p18170_p0 }
 0x247   : > { %16490 = dma.done.wait (%p18183_p13), [#allocation26], 4864  }
 0x248   : > { %16492 = vsyncadd (%p18170_p0), [#allocation26], 4294962432  ;;  %p18184_p1 = pmov %p18170_p0 }
 0x249   : > { %p18185_p5 = pmov %p18170_p0 }
 0x24a   : > { %16494 = dma.done.wait (%p18184_p1), [#allocation29], 1280  }
 0x24b   : > { %16496 = vsyncadd (%p18185_p5), [#allocation29], 4294966016  ;;  %p18186_p4 = pmov %p18170_p0 }
 0x24c   : > { %p18187_p6 = pmov %p18170_p0 }
 0x24d   : > { %16498 = dma.done.wait (%p18186_p4), [#allocation32], 36864  }
 0x24e   : > { %16500 = vsyncadd (%p18187_p6), [#allocation32], 4294930432  ;;  %v1085_v0 = vld [vmem:[#allocation6 + $0x208] sm:$0xff]  ;;  %v1087_v1 = vld [vmem:[#allocation6 + $0x218] sm:$0xff]  ;;  %p935_p8 = scmp.lt.s32.totalorder %s18166_s21, 1  ;;  %s18188_s30 = sld [smem:[#allocation47_spill]] }
 0x24f   : > { %v1084_v2 = vld [vmem:[#allocation6 + $0x200] sm:$0xff]  ;;  %v13906_v3 = vpack.c.bf16 %v1087_v1, %v1085_v0  ;;  %v1086_v4 = vld [vmem:[#allocation6 + $0x210] sm:$0xff]  ;;  %v1089_v5 = vld [vmem:[#allocation6 + $0x228] sm:$0xff]  ;;  %vm1222_vm0 = vcmask 64512   ;;  %vm3023_vm1 = vcmask 1043456   ;;  %vm3016_vm2 = vcmask 556032  }
 0x250   : > { %v1091_v6 = vld [vmem:[#allocation6 + $0x238] sm:$0xff]  ;;  %v13908_v7 = vpack.c.bf16 %v1086_v4, %v1084_v2  ;;  %v1088_v9 = vld [vmem:[#allocation6 + $0x220] sm:$0xff]  ;;  %v1090_v10 = vld [vmem:[#allocation6 + $0x230] sm:$0xff]  ;;  %s18194_s21 = smov (!%p935_p8, %s18166_s21), 1  ;;  %vm3215_vm3 = vcmask 130048   ;;  %vm4917_vm4 = vcmask 293888  }
 0x251   : > { %v13910_v8 = vpack.c.bf16 %v1091_v6, %v1089_v5  ;;  %v1093_v11 = vld [vmem:[#allocation6 + $0x248] sm:$0xff]  ;;  %13907 = vmatprep.subr.bf16.mxu1 %v13906_v3  ;;  %v1095_v12 = vld [vmem:[#allocation6 + $0x258] sm:$0xff]  ;;  %v13912_v13 = vpack.c.bf16 %v1090_v10, %v1088_v9  ;;  %v1092_v15 = vld [vmem:[#allocation6 + $0x240] sm:$0xff]  ;;  %s12693_s0 = sshll.u32 %s18194_s21, 4  ;;  %vm5117_vm5 = vcmask 261120   ;;  %vm6557_vm6 = vcmask 31744  }
 0x252   : > { %13909 = vmatpush1.bf16.msra.mxu1 %v13908_v7  ;;  %v13914_v14 = vpack.c.bf16 %v1095_v12, %v1093_v11  ;;  %v1094_v16 = vld [vmem:[#allocation6 + $0x250] sm:$0xff]  ;;  %v1097_v17 = vld [vmem:[#allocation6 + $0x268] sm:$0xff]  ;;  %v1099_v18 = vld [vmem:[#allocation6 + $0x278] sm:$0xff]  ;;  %vm6940_vm7 = vcmask 1040384   ;;  %vm16535_vm8 = vmmov 1   ;;  %s12361_s3 = sshll.u32 %s18194_s21, 1 }
 0x253   : > { %13911 = vmatprep.subr.bf16.mxu1 %v13910_v8  ;;  %v13916_v19 = vpack.c.bf16 %v1094_v16, %v1092_v15  ;;  %v13918_v20 = vpack.c.bf16 %v1099_v18, %v1097_v17  ;;  %v1096_v21 = vld [vmem:[#allocation6 + $0x260] sm:$0xff]  ;;  %v1098_v22 = vld [vmem:[#allocation6 + $0x270] sm:$0xff]  ;;  %v1101_v23 = vld [vmem:[#allocation6 + $0x288] sm:$0xff]  ;;  %s18191_s27 = sld [smem:[#allocation60_spill]] }
 0x254   : > { %v1103_v24 = vld [vmem:[#allocation6 + $0x298] sm:$0xff]  ;;  %v13920_v25 = vpack.c.bf16 %v1098_v22, %v1096_v21  ;;  %v1100_v27 = vld [vmem:[#allocation6 + $0x280] sm:$0xff]  ;;  %v1102_v28 = vld [vmem:[#allocation6 + $0x290] sm:$0xff]  ;;  %s17202_s1 = scalar_lea.vmem %s18188_s30, %s12693_s0 }
 0x255   : > { %v13922_v26 = vpack.c.bf16 %v1103_v24, %v1101_v23  ;;  %v1105_v29 = vld [vmem:[#allocation6 + $0x2a8] sm:$0xff]  ;;  %v1107_v30 = vld [vmem:[#allocation6 + $0x2b8] sm:$0xff]  ;;  %v13924_v31 = vpack.c.bf16 %v1102_v28, %v1100_v27  ;;  %v1104_v33 = vld [vmem:[#allocation6 + $0x2a0] sm:$0xff] }
 0x256   : > { %13913 = vmatpush1.bf16.msra.mxu1 %v13912_v13  ;;  %v13926_v32 = vpack.c.bf16 %v1107_v30, %v1105_v29  ;;  %v1106_v34 = vld [vmem:[#allocation6 + $0x2b0] sm:$0xff]  ;;  %v1109_v35 = vld [vmem:[#allocation6 + $0x2c8] sm:$0xff]  ;;  %v1111_v36 = vld [vmem:[#allocation6 + $0x2d8] sm:$0xff] }
 0x257   : > { %13915 = vmatprep.subr.bf16.mxu1 %v13914_v14  ;;  %v947_v37 = vld [vmem:[#allocation6 + $0x8] sm:$0xff]  ;;  %v949_v38 = vld [vmem:[#allocation6 + $0x18] sm:$0xff]  ;;  %v946_v39 = vld [vmem:[#allocation6] sm:$0xff]  ;;  %v13928_v41 = vpack.c.bf16 %v1106_v34, %v1104_v33  ;;  %v13930_v46 = vpack.c.bf16 %v1111_v36, %v1109_v35 }
 0x258   : > { %v948_v40 = vld [vmem:[#allocation6 + $0x10] sm:$0xff]  ;;  %v1108_v42 = vld [vmem:[#allocation6 + $0x2c0] sm:$0xff]  ;;  %v13842_v44 = vpack.c.bf16 %v949_v38, %v947_v37  ;;  %v1113_v47 = vld [vmem:[#allocation6 + $0x2e8] sm:$0xff] }
 0x259   : > { %v1110_v43 = vld [vmem:[#allocation6 + $0x2d0] sm:$0xff]  ;;  %v13844_v45 = vpack.c.bf16 %v948_v40, %v946_v39  ;;  %v951_v48 = vld [vmem:[#allocation6 + $0x28] sm:$0xff]  ;;  %v953_v49 = vld [vmem:[#allocation6 + $0x38] sm:$0xff]  ;;  %s943_s4 = scalar_lea.vmem %s18191_s27, %s12361_s3 }
 0x25a   : > { %13917 = vmatpush1.bf16.msra.mxu1 %v13916_v19  ;;  %v1115_v50 = vld [vmem:[#allocation6 + $0x2f8] sm:$0xff]  ;;  %13843 = vmatprep.subr.bf16.mxu0 %v13842_v44  ;;  %v13846_v51 = vpack.c.bf16 %v953_v49, %v951_v48  ;;  %v950_v52 = vld [vmem:[#allocation6 + $0x20] sm:$0xff]  ;;  %v952_v53 = vld [vmem:[#allocation6 + $0x30] sm:$0xff]  ;;  %v13932_v56 = vpack.c.bf16 %v1110_v43, %v1108_v42 }
 0x25b   : > { %13919 = vmatprep.subr.bf16.mxu1 %v13918_v20  ;;  %v1112_v54 = vld [vmem:[#allocation6 + $0x2e0] sm:$0xff]  ;;  %13845 = vmatpush1.bf16.msra.mxu0 %v13844_v45  ;;  %v13848_v55 = vpack.c.bf16 %v952_v53, %v950_v52  ;;  %v955_v57 = vld [vmem:[#allocation6 + $0x48] sm:$0xff]  ;;  %v957_v58 = vld [vmem:[#allocation6 + $0x58] sm:$0xff]  ;;  %v13934_v60 = vpack.c.bf16 %v1115_v50, %v1113_v47 }
 0x25c   : > { %13847 = vmatprep.subr.bf16.mxu0 %v13846_v51  ;;  %v954_v59 = vld [vmem:[#allocation6 + $0x40] sm:$0xff]  ;;  %v1114_v61 = vld [vmem:[#allocation6 + $0x2f0] sm:$0xff]  ;;  %v13850_v62 = vpack.c.bf16 %v957_v58, %v955_v57  ;;  %v17205_v0 = vld [vmem:[%s17202_s1 + $0x8] sm:$0xff] }
 0x25d   : > { %v956_v63 = vld [vmem:[#allocation6 + $0x50] sm:$0xff]  ;;  %v1117_v1 = vld [vmem:[#allocation6 + $0x308] sm:$0xff]  ;;  %v1119_v2 = vld [vmem:[#allocation6 + $0x318] sm:$0xff]  ;;  %1212 = vmatprep.mubr.f32.mxu1 %v17205_v0  ;;  %1074 = vmatprep.mubr.f32.mxu0 %v17205_v0  ;;  %v13936_v6 = vpack.c.bf16 %v1114_v61, %v1112_v54 }
 0x25e   : > { %13921 = vmatpush1.bf16.msra.mxu1 %v13920_v25  ;;  %v13852_v3 = vpack.c.bf16 %v956_v63, %v954_v59  ;;  %v959_v4 = vld [vmem:[#allocation6 + $0x68] sm:$0xff]  ;;  %v961_v5 = vld [vmem:[#allocation6 + $0x78] sm:$0xff]  ;;  %v958_v8 = vld [vmem:[#allocation6 + $0x60] sm:$0xff]  ;;  %v13938_v10 = vpack.c.bf16 %v1119_v2, %v1117_v1 }
 0x25f   : > { %13923 = vmatprep.subr.bf16.mxu1 %v13922_v26  ;;  %13849 = vmatpush1.bf16.msra.mxu0 %v13848_v55  ;;  %v13854_v7 = vpack.c.bf16 %v961_v5, %v959_v4  ;;  %v960_v9 = vld [vmem:[#allocation6 + $0x70] sm:$0xff]  ;;  %v1116_v11 = vld [vmem:[#allocation6 + $0x300] sm:$0xff]  ;;  %v1121_v13 = vld [vmem:[#allocation6 + $0x328] sm:$0xff] }
 0x260   : > { %13851 = vmatprep.subr.bf16.mxu0 %v13850_v62  ;;  %v1118_v12 = vld [vmem:[#allocation6 + $0x310] sm:$0xff]  ;;  %v1123_v14 = vld [vmem:[#allocation6 + $0x338] sm:$0xff]  ;;  %v963_v15 = vld [vmem:[#allocation6 + $0x88] sm:$0xff]  ;;  %v13856_v17 = vpack.c.bf16 %v960_v9, %v958_v8 }
 0x261   : > { %v965_v16 = vld [vmem:[#allocation6 + $0x98] sm:$0xff]  ;;  %v13940_v18 = vpack.c.bf16 %v1118_v12, %v1116_v11  ;;  %v1120_v19 = vld [vmem:[#allocation6 + $0x320] sm:$0xff]  ;;  %v964_v22 = vld [vmem:[#allocation6 + $0x90] sm:$0xff]  ;;  %v13942_v23 = vpack.c.bf16 %v1123_v14, %v1121_v13 }
 0x262   : > { %13925 = vmatpush1.bf16.msra.mxu1 %v13924_v31  ;;  %v13858_v20 = vpack.c.bf16 %v965_v16, %v963_v15  ;;  %v962_v21 = vld [vmem:[#allocation6 + $0x80] sm:$0xff]  ;;  %v1122_v24 = vld [vmem:[#allocation6 + $0x330] sm:$0xff]  ;;  %v967_v25 = vld [vmem:[#allocation6 + $0xa8] sm:$0xff] }
 0x263   : > { %13927 = vmatprep.subr.bf16.mxu1 %v13926_v32  ;;  %13853 = vmatpush1.bf16.msra.mxu0 %v13852_v3  ;;  %v969_v26 = vld [vmem:[#allocation6 + $0xb8] sm:$0xff]  ;;  %v1125_v27 = vld [vmem:[#allocation6 + $0x348] sm:$0xff]  ;;  %v13860_v29 = vpack.c.bf16 %v964_v22, %v962_v21  ;;  %v13944_v30 = vpack.c.bf16 %v1122_v24, %v1120_v19  ;;  %v1124_v31 = vld [vmem:[#allocation6 + $0x340] sm:$0xff] }
 0x264   : > { %13855 = vmatprep.subr.bf16.mxu0 %v13854_v7  ;;  %v1127_v28 = vld [vmem:[#allocation6 + $0x358] sm:$0xff]  ;;  %v13862_v32 = vpack.c.bf16 %v969_v26, %v967_v25  ;;  %v966_v33 = vld [vmem:[#allocation6 + $0xa0] sm:$0xff]  ;;  %v968_v34 = vld [vmem:[#allocation6 + $0xb0] sm:$0xff] }
 0x265   : > { %v13946_v35 = vpack.c.bf16 %v1127_v28, %v1125_v27  ;;  %v1126_v36 = vld [vmem:[#allocation6 + $0x350] sm:$0xff]  ;;  %v971_v37 = vld [vmem:[#allocation6 + $0xc8] sm:$0xff]  ;;  %v973_v38 = vld [vmem:[#allocation6 + $0xd8] sm:$0xff] }
 0x266   : > { %13929 = vmatpush1.bf16.msra.mxu1 %v13928_v41  ;;  %v1129_v39 = vld [vmem:[#allocation6 + $0x368] sm:$0xff]  ;;  %v1131_v40 = vld [vmem:[#allocation6 + $0x378] sm:$0xff]  ;;  %v13864_v41 = vpack.c.bf16 %v968_v34, %v966_v33  ;;  %v13948_v42 = vpack.c.bf16 %v1126_v36, %v1124_v31  ;;  %v1128_v43 = vld [vmem:[#allocation6 + $0x360] sm:$0xff]  ;;  %v13866_v44 = vpack.c.bf16 %v973_v38, %v971_v37 }
 0x267   : > { %13931 = vmatprep.subr.bf16.mxu1 %v13930_v46  ;;  %13857 = vmatpush1.bf16.msra.mxu0 %v13856_v17  ;;  %v970_v45 = vld [vmem:[#allocation6 + $0xc0] sm:$0xff]  ;;  %v972_v46 = vld [vmem:[#allocation6 + $0xd0] sm:$0xff]  ;;  %v13950_v47 = vpack.c.bf16 %v1131_v40, %v1129_v39  ;;  %v975_v49 = vld [vmem:[#allocation6 + $0xe8] sm:$0xff] }
 0x268   : > { %13859 = vmatprep.subr.bf16.mxu0 %v13858_v20  ;;  %v1130_v48 = vld [vmem:[#allocation6 + $0x370] sm:$0xff]  ;;  %v977_v50 = vld [vmem:[#allocation6 + $0xf8] sm:$0xff]  ;;  %v1133_v51 = vld [vmem:[#allocation6 + $0x388] sm:$0xff]  ;;  %v13868_v53 = vpack.c.bf16 %v972_v46, %v970_v45 }
 0x269   : > { %v1135_v52 = vld [vmem:[#allocation6 + $0x398] sm:$0xff]  ;;  %v13952_v54 = vpack.c.bf16 %v1130_v48, %v1128_v43  ;;  %v1132_v55 = vld [vmem:[#allocation6 + $0x380] sm:$0xff]  ;;  %v976_v58 = vld [vmem:[#allocation6 + $0xf0] sm:$0xff] }
 0x26a   : > { %13933 = vmatpush1.bf16.msra.mxu1 %v13932_v56  ;;  %v13870_v56 = vpack.c.bf16 %v977_v50, %v975_v49  ;;  %v974_v57 = vld [vmem:[#allocation6 + $0xe0] sm:$0xff]  ;;  %v13954_v59 = vpack.c.bf16 %v1135_v52, %v1133_v51  ;;  %v979_v61 = vld [vmem:[#allocation6 + $0x108] sm:$0xff]  ;;  %v981_v62 = vld [vmem:[#allocation6 + $0x118] sm:$0xff] }
 0x26b   : > { %13935 = vmatprep.subr.bf16.mxu1 %v13934_v60  ;;  %13861 = vmatpush1.bf16.msra.mxu0 %v13860_v29  ;;  %v1134_v60 = vld [vmem:[#allocation6 + $0x390] sm:$0xff]  ;;  %v1137_v63 = vld [vmem:[#allocation6 + $0x3a8] sm:$0xff]  ;;  %v1139_v1 = vld [vmem:[#allocation6 + $0x3b8] sm:$0xff]  ;;  %v13872_v2 = vpack.c.bf16 %v976_v58, %v974_v57  ;;  %v13874_v5 = vpack.c.bf16 %v981_v62, %v979_v61 }
 0x26c   : > { %13863 = vmatprep.subr.bf16.mxu0 %v13862_v32  ;;  %v13956_v3 = vpack.c.bf16 %v1134_v60, %v1132_v55  ;;  %v1136_v4 = vld [vmem:[#allocation6 + $0x3a0] sm:$0xff]  ;;  %v980_v7 = vld [vmem:[#allocation6 + $0x110] sm:$0xff]  ;;  %v13958_v8 = vpack.c.bf16 %v1139_v1, %v1137_v63  ;;  %v985_v11 = vld [vmem:[#allocation6 + $0x138] sm:$0xff] }
 0x26d   : > { %v1138_v9 = vld [vmem:[#allocation6 + $0x3b0] sm:$0xff]  ;;  %v1141_v12 = vld [vmem:[#allocation6 + $0x3c8] sm:$0xff]  ;;  %v1143_v13 = vld [vmem:[#allocation6 + $0x3d8] sm:$0xff] }
 0x26e   : > { %13937 = vmatpush1.bf16.msra.mxu1 %v13936_v6  ;;  %v978_v6 = vld [vmem:[#allocation6 + $0x100] sm:$0xff]  ;;  %v13960_v15 = vpack.c.bf16 %v1138_v9, %v1136_v4  ;;  %v984_v19 = vld [vmem:[#allocation6 + $0x130] sm:$0xff]  ;;  %v13962_v20 = vpack.c.bf16 %v1143_v13, %v1141_v12  ;;  %v987_v22 = vld [vmem:[#allocation6 + $0x148] sm:$0xff] }
 0x26f   : > { %13939 = vmatprep.subr.bf16.mxu1 %v13938_v10  ;;  %13865 = vmatpush1.bf16.msra.mxu0 %v13864_v41  ;;  %v983_v10 = vld [vmem:[#allocation6 + $0x128] sm:$0xff]  ;;  %v13876_v14 = vpack.c.bf16 %v980_v7, %v978_v6  ;;  %v1140_v16 = vld [vmem:[#allocation6 + $0x3c0] sm:$0xff]  ;;  %v1142_v21 = vld [vmem:[#allocation6 + $0x3d0] sm:$0xff] }
 0x270   : > { %13867 = vmatprep.subr.bf16.mxu0 %v13866_v44  ;;  %v13878_v17 = vpack.c.bf16 %v985_v11, %v983_v10  ;;  %v1145_v24 = vld [vmem:[#allocation6 + $0x3e8] sm:$0xff]  ;;  %v1147_v25 = vld [vmem:[#allocation6 + $0x3f8] sm:$0xff]  ;;  %v13964_v27 = vpack.c.bf16 %v1142_v21, %v1140_v16  ;;  %v1144_v28 = vld [vmem:[#allocation6 + $0x3e0] sm:$0xff] }
 0x271   : > { %v988_v31 = vld [vmem:[#allocation6 + $0x150] sm:$0xff]  ;;  %v13966_v32 = vpack.c.bf16 %v1147_v25, %v1145_v24  ;;  %v991_v34 = vld [vmem:[#allocation6 + $0x168] sm:$0xff]  ;;  %v1393_v37 = vld [vmem:[#allocation6 + $0x418] sm:$0xff] }
 0x272   : > { %13941 = vmatpush1.bf16.msra.mxu1 %v13940_v18  ;;  %v982_v18 = vld [vmem:[#allocation6 + $0x120] sm:$0xff]  ;;  %v1146_v33 = vld [vmem:[#allocation6 + $0x3f0] sm:$0xff]  ;;  %v1391_v36 = vld [vmem:[#allocation6 + $0x408] sm:$0xff] }
 0x273   : > { %13943 = vmatprep.subr.bf16.mxu1 %v13942_v23  ;;  %13869 = vmatpush1.bf16.msra.mxu0 %v13868_v53  ;;  %v989_v23 = vld [vmem:[#allocation6 + $0x158] sm:$0xff]  ;;  %v13880_v26 = vpack.c.bf16 %v984_v19, %v982_v18  ;;  %v13968_v39 = vpack.c.bf16 %v1146_v33, %v1144_v28  ;;  %v1390_v40 = vld [vmem:[#allocation6 + $0x400] sm:$0xff]  ;;  %v992_v43 = vld [vmem:[#allocation6 + $0x170] sm:$0xff]  ;;  %v13970_v44 = vpack.c.bf16 %v1393_v37, %v1391_v36 }
 0x274   : > { %13871 = vmatprep.subr.bf16.mxu0 %v13870_v56  ;;  %v13882_v29 = vpack.c.bf16 %v989_v23, %v987_v22  ;;  %v1392_v45 = vld [vmem:[#allocation6 + $0x410] sm:$0xff]  ;;  %v995_v46 = vld [vmem:[#allocation6 + $0x188] sm:$0xff]  ;;  %v1397_v49 = vld [vmem:[#allocation6 + $0x438] sm:$0xff] }
 0x275   : > { %v1395_v48 = vld [vmem:[#allocation6 + $0x428] sm:$0xff]  ;;  %v17210_v50 = vld [vmem:[%s17202_s1] sm:$0xff]  ;;  %v13972_v52 = vpack.c.bf16 %v1392_v45, %v1390_v40  ;;  %v996_v56 = vld [vmem:[#allocation6 + $0x190] sm:$0xff] }
 0x276   : > { %13945 = vmatpush1.bf16.msra.mxu1 %v13944_v30  ;;  %v986_v30 = vld [vmem:[#allocation6 + $0x140] sm:$0xff]  ;;  %v13974_v57 = vpack.c.bf16 %v1397_v49, %v1395_v48  ;;  %v1396_v58 = vld [vmem:[#allocation6 + $0x430] sm:$0xff]  ;;  %v1001_v60 = vld [vmem:[#allocation6 + $0x1b8] sm:$0xff] }
 0x277   : > { %13947 = vmatprep.subr.bf16.mxu1 %v13946_v35  ;;  %13873 = vmatpush1.bf16.msra.mxu0 %v13872_v2  ;;  %v993_v35 = vld [vmem:[#allocation6 + $0x178] sm:$0xff]  ;;  %v13884_v38 = vpack.c.bf16 %v988_v31, %v986_v30  ;;  %v1394_v53 = vld [vmem:[#allocation6 + $0x420] sm:$0xff]  ;;  %v1399_v61 = vld [vmem:[#allocation6 + $0x448] sm:$0xff] }
 0x278   : > { %13875 = vmatprep.subr.bf16.mxu0 %v13874_v5  ;;  %v13886_v41 = vpack.c.bf16 %v993_v35, %v991_v34  ;;  %v994_v55 = vld [vmem:[#allocation6 + $0x180] sm:$0xff]  ;;  %v1401_v62 = vld [vmem:[#allocation6 + $0x458] sm:$0xff]  ;;  %v13976_v1 = vpack.c.bf16 %v1396_v58, %v1394_v53  ;;  %v1000_v5 = vld [vmem:[#allocation6 + $0x1b0] sm:$0xff] }
 0x279   : > { %v13892_v63 = vpack.c.bf16 %v996_v56, %v994_v55  ;;  %v1398_v2 = vld [vmem:[#allocation6 + $0x440] sm:$0xff]  ;;  %v13978_v6 = vpack.c.bf16 %v1401_v62, %v1399_v61  ;;  %v1400_v7 = vld [vmem:[#allocation6 + $0x450] sm:$0xff]  ;;  %v1005_v9 = vld [vmem:[#allocation6 + $0x1d8] sm:$0xff] }
 0x27a   : > { %13949 = vmatpush1.bf16.msra.mxu1 %v13948_v42  ;;  %v990_v42 = vld [vmem:[#allocation6 + $0x160] sm:$0xff]  ;;  %v1403_v10 = vld [vmem:[#allocation6 + $0x468] sm:$0xff]  ;;  %v1405_v11 = vld [vmem:[#allocation6 + $0x478] sm:$0xff]  ;;  %v13980_v13 = vpack.c.bf16 %v1400_v7, %v1398_v2 }
 0x27b   : > { %13951 = vmatprep.subr.bf16.mxu1 %v13950_v47  ;;  %13877 = vmatpush1.bf16.msra.mxu0 %v13876_v14  ;;  %v997_v47 = vld [vmem:[#allocation6 + $0x198] sm:$0xff]  ;;  %v13888_v51 = vpack.c.bf16 %v992_v43, %v990_v42  ;;  %v998_v4 = vld [vmem:[#allocation6 + $0x1a0] sm:$0xff]  ;;  %v13982_v18 = vpack.c.bf16 %v1405_v11, %v1403_v10  ;;  %v1404_v19 = vld [vmem:[#allocation6 + $0x470] sm:$0xff] }
 0x27c   : > { %13879 = vmatprep.subr.bf16.mxu0 %v13878_v17  ;;  %v13896_v12 = vpack.c.bf16 %v1000_v5, %v998_v4  ;;  %v1402_v14 = vld [vmem:[#allocation6 + $0x460] sm:$0xff]  ;;  %v1004_v17 = vld [vmem:[#allocation6 + $0x1d0] sm:$0xff]  ;;  %v1009_v21 = vld [vmem:[#allocation6 + $0x1f8] sm:$0xff] }
 0x27d   : > { %v1002_v16 = vld [vmem:[#allocation6 + $0x1c0] sm:$0xff]  ;;  %v1407_v22 = vld [vmem:[#allocation6 + $0x488] sm:$0xff]  ;;  %v1409_v23 = vld [vmem:[#allocation6 + $0x498] sm:$0xff]  ;;  %v13984_v25 = vpack.c.bf16 %v1404_v19, %v1402_v14 }
 0x27e   : > { %13953 = vmatpush1.bf16.msra.mxu1 %v13952_v54  ;;  %v13890_v54 = vpack.c.bf16 %v997_v47, %v995_v46  ;;  %v13900_v24 = vpack.c.bf16 %v1004_v17, %v1002_v16  ;;  %v1008_v28 = vld [vmem:[#allocation6 + $0x1f0] sm:$0xff]  ;;  %v1406_v30 = vld [vmem:[#allocation6 + $0x480] sm:$0xff]  ;;  %v1413_v33 = vld [vmem:[#allocation6 + $0x4b8] sm:$0xff] }
 0x27f   : > { %13955 = vmatprep.subr.bf16.mxu1 %v13954_v59  ;;  %13881 = vmatpush1.bf16.msra.mxu0 %v13880_v26  ;;  %v999_v59 = vld [vmem:[#allocation6 + $0x1a8] sm:$0xff]  ;;  %v1408_v31 = vld [vmem:[#allocation6 + $0x490] sm:$0xff]  ;;  %v1410_v37 = vld [vmem:[#allocation6 + $0x4a0] sm:$0xff] }
 0x280   : > { %13883 = vmatprep.subr.bf16.mxu0 %v13882_v29  ;;  %v13986_v29 = vpack.c.bf16 %v1409_v23, %v1407_v22  ;;  %v13988_v35 = vpack.c.bf16 %v1408_v31, %v1406_v30  ;;  %v1417_v40 = vld [vmem:[#allocation6 + $0x4d8] sm:$0xff]  ;;  %v1414_v43 = vld [vmem:[#allocation6 + $0x4c0] sm:$0xff]  ;;  %v1419_v45 = vld [vmem:[#allocation6 + $0x4e8] sm:$0xff] }
 0x281   : > { %v1421_v46 = vld [vmem:[#allocation6 + $0x4f8] sm:$0xff]  ;;  %v1418_v49 = vld [vmem:[#allocation6 + $0x4e0] sm:$0xff]  ;;  %v1427_v58 = vld [vmem:[#allocation6 + $0x528] sm:$0xff] }
 0x282   : > { %13957 = vmatpush1.bf16.msra.mxu1 %v13956_v3  ;;  %v13894_v3 = vpack.c.bf16 %v1001_v60, %v999_v59  ;;  %v13998_v48 = vpack.c.bf16 %v1421_v46, %v1419_v45  ;;  %v1425_v53 = vld [vmem:[#allocation6 + $0x518] sm:$0xff]  ;;  %v1422_v56 = vld [vmem:[#allocation6 + $0x500] sm:$0xff]  ;;  %v1435_v7 = vld [vmem:[#allocation6 + $0x568] sm:$0xff] }
 0x283   : > { %13959 = vmatprep.subr.bf16.mxu1 %v13958_v8  ;;  %13885 = vmatpush1.bf16.msra.mxu0 %v13884_v38  ;;  %v1003_v8 = vld [vmem:[#allocation6 + $0x1c8] sm:$0xff]  ;;  %v1412_v38 = vld [vmem:[#allocation6 + $0x4b0] sm:$0xff]  ;;  %v1429_v59 = vld [vmem:[#allocation6 + $0x538] sm:$0xff] }
 0x284   : > { %13887 = vmatprep.subr.bf16.mxu0 %v13886_v41  ;;  %v13992_v41 = vpack.c.bf16 %v1412_v38, %v1410_v37  ;;  %v14006_v61 = vpack.c.bf16 %v1429_v59, %v1427_v58  ;;  %v1426_v62 = vld [vmem:[#allocation6 + $0x520] sm:$0xff]  ;;  %v1433_v2 = vld [vmem:[#allocation6 + $0x558] sm:$0xff]  ;;  %v1443_v19 = vld [vmem:[#allocation6 + $0x5a8] sm:$0xff]  ;;  %v16532_v38 = vmov 0.0  }
 0x285   : > { %v1430_v5 = vld [vmem:[#allocation6 + $0x540] sm:$0xff]  ;;  %v1441_v14 = vld [vmem:[#allocation6 + $0x598] sm:$0xff]  ;;  %v1448_v30 = vld [vmem:[#allocation6 + $0x5d0] sm:$0xff] }
 0x286   : > { %13961 = vmatpush1.bf16.msra.mxu1 %v13960_v15  ;;  %v13898_v15 = vpack.c.bf16 %v1005_v9, %v1003_v8  ;;  %v1437_v8 = vld [vmem:[#allocation6 + $0x578] sm:$0xff]  ;;  %v1434_v11 = vld [vmem:[#allocation6 + $0x560] sm:$0xff]  ;;  %v1451_v31 = vld [vmem:[#allocation6 + $0x5e8] sm:$0xff] }
 0x287   : > { %13963 = vmatprep.subr.bf16.mxu1 %v13962_v20  ;;  %13889 = vmatpush1.bf16.msra.mxu0 %v13888_v51  ;;  %v1007_v20 = vld [vmem:[#allocation6 + $0x1e8] sm:$0xff]  ;;  %v1420_v51 = vld [vmem:[#allocation6 + $0x4f0] sm:$0xff]  ;;  %v14014_v10 = vpack.c.bf16 %v1437_v8, %v1435_v7  ;;  %v1438_v17 = vld [vmem:[#allocation6 + $0x580] sm:$0xff] }
 0x288   : > { %13891 = vmatprep.subr.bf16.mxu0 %v13890_v54  ;;  %v13902_v26 = vpack.c.bf16 %v1009_v21, %v1007_v20  ;;  %v14000_v54 = vpack.c.bf16 %v1420_v51, %v1418_v49  ;;  %v1445_v20 = vld [vmem:[#allocation6 + $0x5b8] sm:$0xff]  ;;  %v1442_v23 = vld [vmem:[#allocation6 + $0x5a0] sm:$0xff]  ;;  %v1847_v45 = vld [vmem:[#allocation6 + $0x828] sm:$0xff] }
 0x289   : > { %v14022_v22 = vpack.c.bf16 %v1445_v20, %v1443_v19  ;;  %v1849_v46 = vld [vmem:[#allocation6 + $0x838] sm:$0xff]  ;;  %v1855_v58 = vld [vmem:[#allocation6 + $0x868] sm:$0xff]  ;;  %vm17646_vm9 = vmpackc.low %vm6940_vm7, %vm16535_vm8 }
 0x28a   : > { %13965 = vmatpush1.bf16.msra.mxu1 %v13964_v27  ;;  %v1006_v27 = vld [vmem:[#allocation6 + $0x1e0] sm:$0xff]  ;;  %v14102_v49 = vpack.c.bf16 %v1849_v46, %v1847_v45  ;;  %v1857_v59 = vld [vmem:[#allocation6 + $0x878] sm:$0xff]  ;;  %v1863_v7 = vld [vmem:[#allocation6 + $0x8a8] sm:$0xff] }
 0x28b   : > { %13967 = vmatprep.subr.bf16.mxu1 %v13966_v32  ;;  %13893 = vmatpush1.bf16.msra.mxu0 %v13892_v63  ;;  %v1411_v32 = vld [vmem:[#allocation6 + $0x4a8] sm:$0xff]  ;;  %v13904_v34 = vpack.c.bf16 %v1008_v28, %v1006_v27  ;;  %v1428_v63 = vld [vmem:[#allocation6 + $0x530] sm:$0xff]  ;;  %v1865_v8 = vld [vmem:[#allocation6 + $0x8b8] sm:$0xff] }
 0x28c   : > { %13895 = vmatprep.subr.bf16.mxu0 %v13894_v3  ;;  %v13990_v36 = vpack.c.bf16 %v1413_v33, %v1411_v32  ;;  %v14008_v3 = vpack.c.bf16 %v1428_v63, %v1426_v62  ;;  %v1453_v32 = vld [vmem:[#allocation6 + $0x5f8] sm:$0xff]  ;;  %v14110_v62 = vpack.c.bf16 %v1857_v59, %v1855_v58  ;;  %v1871_v19 = vld [vmem:[#allocation6 + $0x8e8] sm:$0xff]  ;;  %v1886_v46 = vld [vmem:[#allocation6 + $0x960] sm:$0xff] }
 0x28d   : > { %v1873_v20 = vld [vmem:[#allocation6 + $0x8f8] sm:$0xff]  ;;  %v1894_v59 = vld [vmem:[#allocation6 + $0x9a0] sm:$0xff] }
 0x28e   : > { %13969 = vmatpush1.bf16.msra.mxu1 %v13968_v39  ;;  %v1415_v39 = vld [vmem:[#allocation6 + $0x4c8] sm:$0xff]  ;;  %v1889_v45 = vld [vmem:[#allocation6 + $0x978] sm:$0xff] }
 0x28f   : > { %13971 = vmatprep.subr.bf16.mxu1 %v13970_v44  ;;  %13897 = vmatpush1.bf16.msra.mxu0 %v13896_v12  ;;  %v13994_v42 = vpack.c.bf16 %v1417_v40, %v1415_v39  ;;  %v1416_v44 = vld [vmem:[#allocation6 + $0x4d0] sm:$0xff]  ;;  %v1843_v39 = vld [vmem:[#allocation6 + $0x808] sm:$0xff]  ;;  %v1845_v40 = vld [vmem:[#allocation6 + $0x818] sm:$0xff] }
 0x290   : > { %13899 = vmatprep.subr.bf16.mxu0 %v13898_v15  ;;  %v13996_v47 = vpack.c.bf16 %v1416_v44, %v1414_v43  ;;  %v1436_v12 = vld [vmem:[#allocation6 + $0x570] sm:$0xff]  ;;  %v14098_v43 = vpack.c.bf16 %v1845_v40, %v1843_v39  ;;  %v1885_v39 = vld [vmem:[#allocation6 + $0x958] sm:$0xff]  ;;  %v1882_v40 = vld [vmem:[#allocation6 + $0x940] sm:$0xff] }
 0x291   : > { %1213 = vmatmul.mubr.f32.vlgmr.msra.gmra.mrb[0].mxu1 %v17210_v50  ;;  %v14016_v15 = vpack.c.bf16 %v1436_v12, %v1434_v11  ;;  %v14118_v11 = vpack.c.bf16 %v1865_v8, %v1863_v7  ;;  %v1897_v58 = vld [vmem:[#allocation6 + $0x9b8] sm:$0xff]  ;;  %v1220_v8 = vld [vmem:[#allocation2 + $0x10] sm:$0xff] }
 0x292   : > { %13973 = vmatpush1.bf16.msra.mxu1 %v13972_v52  ;;  %1518 = vmatprep.mubr.f32.mxu1 %v17205_v0  ;;  %v1423_v52 = vld [vmem:[#allocation6 + $0x508] sm:$0xff] }
 0x293   : > { %13975 = vmatprep.subr.bf16.mxu1 %v13974_v57  ;;  %13901 = vmatpush1.bf16.msra.mxu0 %v13900_v24  ;;  %v14002_v55 = vpack.c.bf16 %v1425_v53, %v1423_v52  ;;  %v1424_v57 = vld [vmem:[#allocation6 + $0x510] sm:$0xff]  ;;  %v1851_v52 = vld [vmem:[#allocation6 + $0x848] sm:$0xff]  ;;  %v1853_v53 = vld [vmem:[#allocation6 + $0x858] sm:$0xff] }
 0x294   : > { %13903 = vmatprep.subr.bf16.mxu0 %v13902_v26  ;;  %v14004_v60 = vpack.c.bf16 %v1424_v57, %v1422_v56  ;;  %v1444_v24 = vld [vmem:[#allocation6 + $0x5b0] sm:$0xff]  ;;  %v1449_v26 = vld [vmem:[#allocation6 + $0x5d8] sm:$0xff]  ;;  %v14106_v56 = vpack.c.bf16 %v1853_v53, %v1851_v52  ;;  %v1890_v53 = vld [vmem:[#allocation6 + $0x980] sm:$0xff] }
 0x295   : > { %v14024_v27 = vpack.c.bf16 %v1444_v24, %v1442_v23  ;;  %v14126_v23 = vpack.c.bf16 %v1873_v20, %v1871_v19  ;;  %v1893_v52 = vld [vmem:[#allocation6 + $0x998] sm:$0xff]  ;;  %v1082_v19 = vld [vmem:[#allocation2 + $0x8] sm:$0xff] }
 0x296   : > { %13977 = vmatpush1.bf16.msra.mxu1 %v13976_v1  ;;  %v1431_v1 = vld [vmem:[#allocation6 + $0x548] sm:$0xff] }
 0x297   : > { %13979 = vmatprep.subr.bf16.mxu1 %v13978_v6  ;;  %13905 = vmatpush1.bf16.msra.mxu0 %v13904_v34  ;;  %v14010_v4 = vpack.c.bf16 %v1433_v2, %v1431_v1  ;;  %v1432_v6 = vld [vmem:[#allocation6 + $0x550] sm:$0xff]  ;;  %v14030_v34 = vpack.c.bf16 %v1453_v32, %v1451_v31  ;;  %v1859_v1 = vld [vmem:[#allocation6 + $0x888] sm:$0xff]  ;;  %v1861_v2 = vld [vmem:[#allocation6 + $0x898] sm:$0xff] }
 0x298   : > { %v14012_v9 = vpack.c.bf16 %v1432_v6, %v1430_v5  ;;  %v14114_v5 = vpack.c.bf16 %v1861_v2, %v1859_v1  ;;  %v1879_v31 = vld [vmem:[#allocation6 + $0x928] sm:$0xff]  ;;  %v1881_v32 = vld [vmem:[#allocation6 + $0x938] sm:$0xff]  ;;  %v1898_v2 = vld [vmem:[#allocation6 + $0x9c0] sm:$0xff] }
 0x299   : > { %v1901_v1 = vld [vmem:[#allocation6 + $0x9d8] sm:$0xff]  ;;  %v1617_v20 = vld [vmem:[#allocation6 + $0x608] sm:$0xff] }
 0x29a   : > { %13981 = vmatpush1.bf16.msra.mxu1 %v13980_v13  ;;  %1075 = vmatmul.mubr.f32.vlgmr.msra.gmra.mrb[0].mxu0 %v17210_v50  ;;  %v1439_v13 = vld [vmem:[#allocation6 + $0x588] sm:$0xff] }
 0x29b   : > { %13983 = vmatprep.subr.bf16.mxu1 %v13982_v18  ;;  %v14018_v16 = vpack.c.bf16 %v1441_v14, %v1439_v13  ;;  %v1440_v18 = vld [vmem:[#allocation6 + $0x590] sm:$0xff]  ;;  %1293 = vmatprep.mubr.f32.mxu0 %v16532_v38  ;;  %v1867_v13 = vld [vmem:[#allocation6 + $0x8c8] sm:$0xff]  ;;  %v1869_v14 = vld [vmem:[#allocation6 + $0x8d8] sm:$0xff] }
 0x29c   : > { %v14020_v21 = vpack.c.bf16 %v1440_v18, %v1438_v17  ;;  %v14122_v17 = vpack.c.bf16 %v1869_v14, %v1867_v13  ;;  %v1904_v13 = vld [vmem:[#allocation6 + $0x9f0] sm:$0xff] }
 0x29e   : > { %13985 = vmatpush1.bf16.msra.mxu1 %v13984_v25  ;;  %v1447_v25 = vld [vmem:[#allocation6 + $0x5c8] sm:$0xff] }
 0x29f   : > { %13987 = vmatprep.subr.bf16.mxu1 %v13986_v29  ;;  %v14026_v28 = vpack.c.bf16 %v1449_v26, %v1447_v25  ;;  %v1446_v29 = vld [vmem:[#allocation6 + $0x5c0] sm:$0xff]  ;;  %v1875_v25 = vld [vmem:[#allocation6 + $0x908] sm:$0xff]  ;;  %v1877_v26 = vld [vmem:[#allocation6 + $0x918] sm:$0xff] }
 0x2a0   : > { %v14028_v33 = vpack.c.bf16 %v1448_v30, %v1446_v29  ;;  %v14130_v29 = vpack.c.bf16 %v1877_v26, %v1875_v25  ;;  %v1623_v25 = vld [vmem:[#allocation6 + $0x638] sm:$0xff] }
 0x2a2   : > { %13989 = vmatpush1.bf16.msra.mxu1 %v13988_v35  ;;  %v1450_v35 = vld [vmem:[#allocation6 + $0x5e0] sm:$0xff] }
 0x2a3   : > { %13991 = vmatprep.subr.bf16.mxu1 %v13990_v36  ;;  %v1452_v36 = vld [vmem:[#allocation6 + $0x5f0] sm:$0xff] }
 0x2a4   : > { %v14032_v37 = vpack.c.bf16 %v1452_v36, %v1450_v35  ;;  %v14134_v35 = vpack.c.bf16 %v1881_v32, %v1879_v31  ;;  %v1620_v32 = vld [vmem:[#allocation6 + $0x620] sm:$0xff] }
 0x2a6   : > { %13993 = vmatpush1.bf16.msra.mxu1 %v13992_v41  ;;  %v1842_v41 = vld [vmem:[#allocation6 + $0x800] sm:$0xff] }
 0x2a7   : > { %13995 = vmatprep.subr.bf16.mxu1 %v13994_v42  ;;  %v1844_v42 = vld [vmem:[#allocation6 + $0x810] sm:$0xff] }
 0x2a8   : > { %v14100_v44 = vpack.c.bf16 %v1844_v42, %v1842_v41  ;;  %v1884_v41 = vld [vmem:[#allocation6 + $0x950] sm:$0xff] }
 0x2aa   : > { %13997 = vmatpush1.bf16.msra.mxu1 %v13996_v47  ;;  %v1846_v47 = vld [vmem:[#allocation6 + $0x820] sm:$0xff] }
 0x2ab   : > { %13999 = vmatprep.subr.bf16.mxu1 %v13998_v48  ;;  %v1848_v48 = vld [vmem:[#allocation6 + $0x830] sm:$0xff] }
 0x2ac   : > { %v14104_v51 = vpack.c.bf16 %v1848_v48, %v1846_v47  ;;  %v1888_v47 = vld [vmem:[#allocation6 + $0x970] sm:$0xff] }
 0x2ae   : > { %14001 = vmatpush1.bf16.msra.mxu1 %v14000_v54  ;;  %v1850_v54 = vld [vmem:[#allocation6 + $0x840] sm:$0xff] }
 0x2af   : > { %14003 = vmatprep.subr.bf16.mxu1 %v14002_v55  ;;  %v1852_v55 = vld [vmem:[#allocation6 + $0x850] sm:$0xff] }
 0x2b0   : > { %v14108_v57 = vpack.c.bf16 %v1852_v55, %v1850_v54  ;;  %v1892_v54 = vld [vmem:[#allocation6 + $0x990] sm:$0xff] }
 0x2b2   : > { %14005 = vmatpush1.bf16.msra.mxu1 %v14004_v60  ;;  %v1854_v60 = vld [vmem:[#allocation6 + $0x860] sm:$0xff] }
 0x2b3   : > { %14007 = vmatprep.subr.bf16.mxu1 %v14006_v61  ;;  %v1856_v61 = vld [vmem:[#allocation6 + $0x870] sm:$0xff] }
 0x2b4   : > { %v14112_v63 = vpack.c.bf16 %v1856_v61, %v1854_v60  ;;  %v1896_v60 = vld [vmem:[#allocation6 + $0x9b0] sm:$0xff] }
 0x2b6   : > { %14009 = vmatpush1.bf16.msra.mxu1 %v14008_v3  ;;  %v1858_v3 = vld [vmem:[#allocation6 + $0x880] sm:$0xff] }
 0x2b7   : > { %14011 = vmatprep.subr.bf16.mxu1 %v14010_v4  ;;  %v1860_v4 = vld [vmem:[#allocation6 + $0x890] sm:$0xff] }
 0x2b8   : > { %v14116_v6 = vpack.c.bf16 %v1860_v4, %v1858_v3  ;;  %v1900_v3 = vld [vmem:[#allocation6 + $0x9d0] sm:$0xff] }
 0x2ba   : > { %14013 = vmatpush1.bf16.msra.mxu1 %v14012_v9  ;;  %v1862_v9 = vld [vmem:[#allocation6 + $0x8a0] sm:$0xff] }
 0x2bb   : > { %14015 = vmatprep.subr.bf16.mxu1 %v14014_v10  ;;  %v1864_v10 = vld [vmem:[#allocation6 + $0x8b0] sm:$0xff] }
 0x2bc   : > { %v14120_v12 = vpack.c.bf16 %v1864_v10, %v1862_v9  ;;  %v1903_v9 = vld [vmem:[#allocation6 + $0x9e8] sm:$0xff]  ;;  %v1905_v10 = vld [vmem:[#allocation6 + $0x9f8] sm:$0xff] }
 0x2be   : > { %14017 = vmatpush1.bf16.msra.mxu1 %v14016_v15  ;;  %v1866_v15 = vld [vmem:[#allocation6 + $0x8c0] sm:$0xff] }
 0x2bf   : > { %14019 = vmatprep.subr.bf16.mxu1 %v14018_v16  ;;  %v1868_v16 = vld [vmem:[#allocation6 + $0x8d0] sm:$0xff] }
 0x2c0   : > { %v14124_v18 = vpack.c.bf16 %v1868_v16, %v1866_v15  ;;  %v1221_v15 = vld [vmem:[#allocation2 + $0x18] sm:$0xff] }
 0x2c2   : > { %14021 = vmatpush1.bf16.msra.mxu1 %v14020_v21  ;;  %v1870_v21 = vld [vmem:[#allocation6 + $0x8e0] sm:$0xff] }
 0x2c3   : > { %14023 = vmatprep.subr.bf16.mxu1 %v14022_v22  ;;  %v1872_v22 = vld [vmem:[#allocation6 + $0x8f0] sm:$0xff] }
 0x2c4   : > { %v14128_v24 = vpack.c.bf16 %v1872_v22, %v1870_v21  ;;  %v1619_v21 = vld [vmem:[#allocation6 + $0x618] sm:$0xff]  ;;  %v1616_v22 = vld [vmem:[#allocation6 + $0x600] sm:$0xff] }
 0x2c6   : > { %14025 = vmatpush1.bf16.msra.mxu1 %v14024_v27  ;;  %v1874_v27 = vld [vmem:[#allocation6 + $0x900] sm:$0xff] }
 0x2c7   : > { %14027 = vmatprep.subr.bf16.mxu1 %v14026_v28  ;;  %v1876_v28 = vld [vmem:[#allocation6 + $0x910] sm:$0xff] }
 0x2c8   : > { %v14132_v30 = vpack.c.bf16 %v1876_v28, %v1874_v27  ;;  %v14034_v27 = vpack.c.bf16 %v1619_v21, %v1617_v20  ;;  %v1654_v20 = vld [vmem:[#allocation6 + $0x730] sm:$0xff]  ;;  %v1657_v21 = vld [vmem:[#allocation6 + $0x748] sm:$0xff] }
 0x2ca   : > { %14029 = vmatpush1.bf16.msra.mxu1 %v14028_v33  ;;  %v1878_v33 = vld [vmem:[#allocation6 + $0x920] sm:$0xff] }
 0x2cb   : > { %14031 = vmatprep.subr.bf16.mxu1 %v14030_v34  ;;  %v1880_v34 = vld [vmem:[#allocation6 + $0x930] sm:$0xff] }
 0x2cc   : > { %v14136_v36 = vpack.c.bf16 %v1880_v34, %v1878_v33  ;;  %v1622_v33 = vld [vmem:[#allocation6 + $0x630] sm:$0xff]  ;;  %v1625_v34 = vld [vmem:[#allocation6 + $0x648] sm:$0xff] }
 0x2ce   : > { %14033 = vmatpush1.bf16.msra.mxu1 %v14032_v37  ;;  %v1883_v37 = vld [vmem:[#allocation6 + $0x948] sm:$0xff] }
 0x2cf   : > { %14099 = vmatprep.subr.bf16.mxu1 %v14098_v43  ;;  %v14138_v42 = vpack.c.bf16 %v1885_v39, %v1883_v37  ;;  %v14140_v43 = vpack.c.bf16 %v1884_v41, %v1882_v40  ;;  %v1527_v37 = vld [vmem:[#allocation2 + $0x28] sm:$0xff]  ;;  %v1624_v40 = vld [vmem:[#allocation6 + $0x640] sm:$0xff]  ;;  %v1626_v41 = vld [vmem:[#allocation6 + $0x650] sm:$0xff] }
 0x2d1   : > { %1519 = vmatmul.mubr.f32.vlgmr.msra.gmra.mrb[2].mxu1 %v17210_v50 }
 0x2d2   : > { %1970 = vmatprep.mubr.f32.mxu1 %v17205_v0  ;;  %14101 = vmatpush1.bf16.msra.mxu1 %v14100_v44  ;;  %v1887_v44 = vld [vmem:[#allocation6 + $0x968] sm:$0xff] }
 0x2d3   : > { %14103 = vmatprep.subr.bf16.mxu1 %v14102_v49  ;;  %v14142_v48 = vpack.c.bf16 %v1889_v45, %v1887_v44  ;;  %v14144_v49 = vpack.c.bf16 %v1888_v47, %v1886_v46  ;;  %v14044_v44 = vpack.c.bf16 %v1626_v41, %v1624_v40  ;;  %v1628_v46 = vld [vmem:[#allocation6 + $0x660] sm:$0xff]  ;;  %v1630_v47 = vld [vmem:[#allocation6 + $0x670] sm:$0xff]  ;;  %v1669_v40 = vld [vmem:[#allocation6 + $0x7a8] sm:$0xff] }
 0x2d4   : > { %v1671_v41 = vld [vmem:[#allocation6 + $0x7b8] sm:$0xff] }
 0x2d6   : > { %14105 = vmatpush1.bf16.msra.mxu1 %v14104_v51  ;;  %v1891_v51 = vld [vmem:[#allocation6 + $0x988] sm:$0xff] }
 0x2d7   : > { %14107 = vmatprep.subr.bf16.mxu1 %v14106_v56  ;;  %v14146_v55 = vpack.c.bf16 %v1893_v52, %v1891_v51  ;;  %v14148_v56 = vpack.c.bf16 %v1892_v54, %v1890_v53  ;;  %v14048_v51 = vpack.c.bf16 %v1630_v47, %v1628_v46  ;;  %v1632_v53 = vld [vmem:[#allocation6 + $0x680] sm:$0xff]  ;;  %v1634_v54 = vld [vmem:[#allocation6 + $0x690] sm:$0xff]  ;;  %v1673_v46 = vld [vmem:[#allocation6 + $0x7c8] sm:$0xff] }
 0x2d8   : > { %v1675_v47 = vld [vmem:[#allocation6 + $0x7d8] sm:$0xff] }
 0x2da   : > { %14109 = vmatpush1.bf16.msra.mxu1 %v14108_v57  ;;  %v1895_v57 = vld [vmem:[#allocation6 + $0x9a8] sm:$0xff] }
 0x2db   : > { %14111 = vmatprep.subr.bf16.mxu1 %v14110_v62  ;;  %v14150_v61 = vpack.c.bf16 %v1897_v58, %v1895_v57  ;;  %v14152_v62 = vpack.c.bf16 %v1896_v60, %v1894_v59  ;;  %v14052_v57 = vpack.c.bf16 %v1634_v54, %v1632_v53  ;;  %v1636_v59 = vld [vmem:[#allocation6 + $0x6a0] sm:$0xff]  ;;  %v1641_v60 = vld [vmem:[#allocation6 + $0x6c8] sm:$0xff]  ;;  %v1679_v54 = vld [vmem:[#allocation6 + $0x7f8] sm:$0xff] }
 0x2dc   : > { %v1677_v53 = vld [vmem:[#allocation6 + $0x7e8] sm:$0xff] }
 0x2de   : > { %14113 = vmatpush1.bf16.msra.mxu1 %v14112_v63  ;;  %v1899_v63 = vld [vmem:[#allocation6 + $0x9c8] sm:$0xff] }
 0x2df   : > { %14115 = vmatprep.subr.bf16.mxu1 %v14114_v5  ;;  %v14154_v5 = vpack.c.bf16 %v1901_v1, %v1899_v63  ;;  %v1640_v1 = vld [vmem:[#allocation6 + $0x6c0] sm:$0xff] }
 0x2e2   : > { %14117 = vmatpush1.bf16.msra.mxu1 %v14116_v6  ;;  %v14156_v6 = vpack.c.bf16 %v1900_v3, %v1898_v2  ;;  %v1642_v2 = vld [vmem:[#allocation6 + $0x6d0] sm:$0xff]  ;;  %v1645_v3 = vld [vmem:[#allocation6 + $0x6e8] sm:$0xff] }
 0x2e3   : > { %14119 = vmatprep.subr.bf16.mxu1 %v14118_v11  ;;  %v14158_v11 = vpack.c.bf16 %v1905_v10, %v1903_v9  ;;  %v1649_v9 = vld [vmem:[#allocation6 + $0x708] sm:$0xff]  ;;  %v1651_v10 = vld [vmem:[#allocation6 + $0x718] sm:$0xff] }
 0x2e6   : > { %14121 = vmatpush1.bf16.msra.mxu1 %v14120_v12  ;;  %v1902_v12 = vld [vmem:[#allocation6 + $0x9e0] sm:$0xff] }
 0x2e7   : > { %14123 = vmatprep.subr.bf16.mxu1 %v14122_v17  ;;  %v14160_v14 = vpack.c.bf16 %v1904_v13, %v1902_v12  ;;  %v14066_v12 = vpack.c.bf16 %v1651_v10, %v1649_v9  ;;  %v1648_v13 = vld [vmem:[#allocation6 + $0x700] sm:$0xff]  ;;  %v2303_v9 = vld [vmem:[#allocation6 + $0xc48] sm:$0xff]  ;;  %v2305_v10 = vld [vmem:[#allocation6 + $0xc58] sm:$0xff] }
 0x2ea   : > { %14125 = vmatpush1.bf16.msra.mxu1 %v14124_v18  ;;  %v1081_v18 = vld [vmem:[#allocation2] sm:$0xff] }
 0x2eb   : > { %14127 = vmatprep.subr.bf16.mxu1 %v14126_v23  ;;  %v1618_v23 = vld [vmem:[#allocation6 + $0x610] sm:$0xff] }
 0x2ee   : > { %14129 = vmatpush1.bf16.msra.mxu1 %v14128_v24  ;;  %v1621_v24 = vld [vmem:[#allocation6 + $0x628] sm:$0xff] }
 0x2ef   : > { %14131 = vmatprep.subr.bf16.mxu1 %v14130_v29  ;;  %v1526_v29 = vld [vmem:[#allocation2 + $0x20] sm:$0xff]  ;;  %v14038_v31 = vpack.c.bf16 %v1623_v25, %v1621_v24 }
 0x2f0   : > { %v1656_v25 = vld [vmem:[#allocation6 + $0x740] sm:$0xff] }
 0x2f2   : > { %14133 = vmatpush1.bf16.msra.mxu1 %v14132_v30  ;;  %v14036_v30 = vpack.c.bf16 %v1618_v23, %v1616_v22  ;;  %v1659_v22 = vld [vmem:[#allocation6 + $0x758] sm:$0xff] }
 0x2f3   : > { %14135 = vmatprep.subr.bf16.mxu1 %v14134_v35  ;;  %v1627_v35 = vld [vmem:[#allocation6 + $0x658] sm:$0xff]  ;;  %v14074_v24 = vpack.c.bf16 %v1659_v22, %v1657_v21  ;;  %v2311_v21 = vld [vmem:[#allocation6 + $0xc88] sm:$0xff] }
 0x2f4   : > { %v14042_v39 = vpack.c.bf16 %v1627_v35, %v1625_v34  ;;  %v1667_v34 = vld [vmem:[#allocation6 + $0x798] sm:$0xff] }
 0x2f5   : > { %v2313_v22 = vld [vmem:[#allocation6 + $0xc98] sm:$0xff] }
 0x2f6   : > { %14137 = vmatpush1.bf16.msra.mxu1 %v14136_v36  ;;  %v14040_v36 = vpack.c.bf16 %v1622_v33, %v1620_v32  ;;  %v1662_v32 = vld [vmem:[#allocation6 + $0x770] sm:$0xff]  ;;  %v1665_v33 = vld [vmem:[#allocation6 + $0x788] sm:$0xff] }
 0x2f7   : > { %14139 = vmatprep.subr.bf16.mxu1 %v14138_v42  ;;  %v1629_v42 = vld [vmem:[#allocation6 + $0x668] sm:$0xff] }
 0x2fa   : > { %14141 = vmatpush1.bf16.msra.mxu1 %v14140_v43  ;;  %v1631_v43 = vld [vmem:[#allocation6 + $0x678] sm:$0xff] }
 0x2fb   : > { %14143 = vmatprep.subr.bf16.mxu1 %v14142_v48  ;;  %v14046_v45 = vpack.c.bf16 %v1631_v43, %v1629_v42  ;;  %v1633_v48 = vld [vmem:[#allocation6 + $0x688] sm:$0xff]  ;;  %v14086_v43 = vpack.c.bf16 %v1671_v41, %v1669_v40  ;;  %v2325_v41 = vld [vmem:[#allocation6 + $0xcf8] sm:$0xff] }
 0x2fc   : > { %v2323_v40 = vld [vmem:[#allocation6 + $0xce8] sm:$0xff] }
 0x2fe   : > { %14145 = vmatpush1.bf16.msra.mxu1 %v14144_v49  ;;  %v1635_v49 = vld [vmem:[#allocation6 + $0x698] sm:$0xff] }
 0x2ff   : > { %14147 = vmatprep.subr.bf16.mxu1 %v14146_v55  ;;  %v14050_v52 = vpack.c.bf16 %v1635_v49, %v1633_v48  ;;  %v1637_v55 = vld [vmem:[#allocation6 + $0x6a8] sm:$0xff]  ;;  %v14090_v49 = vpack.c.bf16 %v1675_v47, %v1673_v46  ;;  %v2329_v47 = vld [vmem:[#allocation6 + $0xd18] sm:$0xff] }
 0x300   : > { %v2327_v46 = vld [vmem:[#allocation6 + $0xd08] sm:$0xff] }
 0x302   : > { %14149 = vmatpush1.bf16.msra.mxu1 %v14148_v56  ;;  %v1639_v56 = vld [vmem:[#allocation6 + $0x6b8] sm:$0xff] }
 0x303   : > { %14151 = vmatprep.subr.bf16.mxu1 %v14150_v61  ;;  %v14054_v58 = vpack.c.bf16 %v1639_v56, %v1637_v55  ;;  %v1643_v61 = vld [vmem:[#allocation6 + $0x6d8] sm:$0xff]  ;;  %v14094_v56 = vpack.c.bf16 %v1679_v54, %v1677_v53  ;;  %v2331_v53 = vld [vmem:[#allocation6 + $0xd28] sm:$0xff] }
 0x304   : > { %v14058_v63 = vpack.c.bf16 %v1643_v61, %v1641_v60  ;;  %v2295_v61 = vld [vmem:[#allocation6 + $0xc08] sm:$0xff]  ;;  %v2333_v54 = vld [vmem:[#allocation6 + $0xd38] sm:$0xff] }
 0x306   : > { %14153 = vmatpush1.bf16.msra.mxu1 %v14152_v62 }
 0x307   : > { %14155 = vmatprep.subr.bf16.mxu1 %v14154_v5  ;;  %v14060_v5 = vpack.c.bf16 %v1642_v2, %v1640_v1  ;;  %v2296_v1 = vld [vmem:[#allocation6 + $0xc10] sm:$0xff] }
 0x30a   : > { %14157 = vmatpush1.bf16.msra.mxu1 %v14156_v6 }
 0x30b   : > { %14159 = vmatprep.subr.bf16.mxu1 %v14158_v11 }
 0x30e   : > { %14161 = vmatpush1.bf16.msra.mxu1 %v14160_v14  ;;  %v1650_v14 = vld [vmem:[#allocation6 + $0x710] sm:$0xff] }
 0x311   : > { %1971 = vmatmul.mubr.f32.vlgmr.msra.gmra.mrb[4].mxu1 %v17210_v50 }
 0x312   : > { %2422 = vmatprep.mubr.f32.mxu1 %v17205_v0 }
 0x364   : > { %v1214_v4 = vpop.f32.mrb[0].mxu1 }
 0x365   : > { %v1216_v7 = vpop.f32.mrb[1].mxu1 }
 0x366   : > { %1229 = vmatprep.subr.mxu0 %v1216_v7  ;;  %v1644_v7 = vld [vmem:[#allocation6 + $0x6e0] sm:$0xff] }
 0x367   : > { %1230 = vmatpush1.msra.mxu0 %v1214_v4  ;;  %v1647_v4 = vld [vmem:[#allocation6 + $0x6f8] sm:$0xff] }
 0x368   : > { %12362 = vmatmul.mubr.msk.f32.vlgmr.msra.gmra.mrb[2].mxu0 %vm1222_vm0, %v1220_v8  ;;  %v14062_v6 = vpack.c.bf16 %v1647_v4, %v1645_v3  ;;  %v1646_v8 = vld [vmem:[#allocation6 + $0x6f0] sm:$0xff]  ;;  %v2299_v4 = vld [vmem:[#allocation6 + $0xc28] sm:$0xff] }
 0x369   : > { %1299 = vmatprep.mubr.f32.mxu0 %v16532_v38  ;;  %v14064_v11 = vpack.c.bf16 %v1646_v8, %v1644_v7  ;;  %v2300_v7 = vld [vmem:[#allocation6 + $0xc30] sm:$0xff] }
 0x36c   : > { %12363 = vmatmul.mubr.msk.f32.gmra.mrb[4].mxu0 %vm1222_vm0, %v1221_v15  ;;  %v1653_v15 = vld [vmem:[#allocation6 + $0x728] sm:$0xff] }
 0x36d   : > { %1376 = vmatprep.mubr.f32.mxu0 %v16532_v38  ;;  %v1076_v16 = vpop.f32.mrb[0].mxu0 }
 0x36e   : > { %v1078_v17 = vpop.f32.mrb[1].mxu0 }
 0x36f   : > { %1312 = vmatprep.subr.mxu0 %v1078_v17  ;;  %v14068_v17 = vpack.c.bf16 %v1650_v14, %v1648_v13  ;;  %v14234_v13 = vpack.c.bf16 %v2305_v10, %v2303_v9  ;;  %v2345_v9 = vld [vmem:[#allocation6 + $0xd98] sm:$0xff]  ;;  %v2342_v10 = vld [vmem:[#allocation6 + $0xd80] sm:$0xff] }
 0x370   : > { %1313 = vmatpush1.msra.mxu0 %v1076_v16  ;;  %v1655_v16 = vld [vmem:[#allocation6 + $0x738] sm:$0xff] }
 0x371   : > { %12364 = vmatmul.mubr.msk.f32.vlgmr.msra.gmra.mrb[2].mxu0 %vm1222_vm0, %v1081_v18  ;;  %v14070_v18 = vpack.c.bf16 %v1655_v16, %v1653_v15  ;;  %v2307_v15 = vld [vmem:[#allocation6 + $0xc68] sm:$0xff]  ;;  %v2309_v16 = vld [vmem:[#allocation6 + $0xc78] sm:$0xff] }
 0x372   : > { %1382 = vmatprep.mubr.f32.mxu0 %v16532_v38 }
 0x375   : > { %12365 = vmatmul.mubr.msk.f32.gmra.mrb[4].mxu0 %vm1222_vm0, %v1082_v19  ;;  %v1652_v19 = vld [vmem:[#allocation6 + $0x720] sm:$0xff] }
 0x376   : > { %1598 = vmatprep.mubr.f32.mxu0 %v16532_v38  ;;  %v14072_v23 = vpack.c.bf16 %v1654_v20, %v1652_v19  ;;  %v14238_v19 = vpack.c.bf16 %v2309_v16, %v2307_v15  ;;  %v2349_v15 = vld [vmem:[#allocation6 + $0xdb8] sm:$0xff]  ;;  %v2346_v16 = vld [vmem:[#allocation6 + $0xda0] sm:$0xff] }
 0x3a4   : > { %v1520_v26 = vpop.f32.mrb[2].mxu1 }
 0x3a5   : > { %v1522_v28 = vpop.f32.mrb[3].mxu1 }
 0x3a6   : > { %1534 = vmatprep.subr.mxu0 %v1522_v28  ;;  %v1663_v28 = vld [vmem:[#allocation6 + $0x778] sm:$0xff] }
 0x3a7   : > { %1535 = vmatpush1.msra.mxu0 %v1520_v26  ;;  %v1658_v26 = vld [vmem:[#allocation6 + $0x750] sm:$0xff] }
 0x3a8   : > { %14035 = vmatprep.subr.bf16.mxu0 %v14034_v27  ;;  %12366 = vmatmul.mubr.msk.f32.vlgmr.msra.gmra.mrb[2].mxu0 %vm1222_vm0, %v1526_v29  ;;  %v1661_v27 = vld [vmem:[#allocation6 + $0x768] sm:$0xff]  ;;  %v14076_v29 = vpack.c.bf16 %v1658_v26, %v1656_v25  ;;  %v14242_v25 = vpack.c.bf16 %v2313_v22, %v2311_v21  ;;  %v2353_v21 = vld [vmem:[#allocation6 + $0xdd8] sm:$0xff]  ;;  %v2350_v22 = vld [vmem:[#allocation6 + $0xdc0] sm:$0xff] }
 0x3a9   : > { %14037 = vmatpush1.bf16.msra.mxu0 %v14036_v30  ;;  %1604 = vmatprep.mubr.f32.mxu0 %v16532_v38  ;;  %v14078_v30 = vpack.c.bf16 %v1663_v28, %v1661_v27  ;;  %v2315_v27 = vld [vmem:[#allocation6 + $0xca8] sm:$0xff]  ;;  %v2317_v28 = vld [vmem:[#allocation6 + $0xcb8] sm:$0xff] }
 0x3aa   : > { %14039 = vmatprep.subr.bf16.mxu0 %v14038_v31  ;;  %v1660_v31 = vld [vmem:[#allocation6 + $0x760] sm:$0xff] }
 0x3ab   : > { %v14080_v35 = vpack.c.bf16 %v1662_v32, %v1660_v31  ;;  %v14246_v31 = vpack.c.bf16 %v2317_v28, %v2315_v27  ;;  %v2357_v27 = vld [vmem:[#allocation6 + $0xdf8] sm:$0xff] }
 0x3ac   : > { %12367 = vmatmul.mubr.msk.f32.gmra.mrb[4].mxu0 %vm1222_vm0, %v1527_v37  ;;  %v1664_v37 = vld [vmem:[#allocation6 + $0x780] sm:$0xff] }
 0x3ad   : > { %14041 = vmatpush1.bf16.msra.mxu0 %v14040_v36  ;;  %1744 = vmatprep.mubr.f32.mxu0 %v17205_v0  ;;  %v1638_v0 = vld [vmem:[#allocation6 + $0x6b0] sm:$0xff]  ;;  %v14082_v36 = vpack.c.bf16 %v1667_v34, %v1665_v33  ;;  %v2319_v33 = vld [vmem:[#allocation6 + $0xcc8] sm:$0xff]  ;;  %v2321_v34 = vld [vmem:[#allocation6 + $0xcd8] sm:$0xff] }
 0x3ae   : > { %14043 = vmatprep.subr.bf16.mxu0 %v14042_v39  ;;  %v14056_v62 = vpack.c.bf16 %v1638_v0, %v1636_v59  ;;  %v1666_v39 = vld [vmem:[#allocation6 + $0x790] sm:$0xff] }
 0x3af   : > { %v14084_v42 = vpack.c.bf16 %v1666_v39, %v1664_v37  ;;  %v14250_v37 = vpack.c.bf16 %v2321_v34, %v2319_v33  ;;  %v17243_v33 = vld [vmem:[%s17202_s1 + $0x8] sm:$0xff] }
 0x3b0   : > { %v2069_v34 = vld [vmem:[#allocation6 + $0xa08] sm:$0xff] }
 0x3b1   : > { %14045 = vmatpush1.bf16.msra.mxu0 %v14044_v44  ;;  %v1668_v44 = vld [vmem:[#allocation6 + $0x7a0] sm:$0xff] }
 0x3b2   : > { %14047 = vmatprep.subr.bf16.mxu0 %v14046_v45  ;;  %v1670_v45 = vld [vmem:[#allocation6 + $0x7b0] sm:$0xff] }
 0x3b3   : > { %v14088_v48 = vpack.c.bf16 %v1670_v45, %v1668_v44  ;;  %v14254_v44 = vpack.c.bf16 %v2325_v41, %v2323_v40  ;;  %v1753_v41 = vld [vmem:[#allocation2 + $0x38] sm:$0xff] }
 0x3b5   : > { %14049 = vmatpush1.bf16.msra.mxu0 %v14048_v51  ;;  %v1672_v51 = vld [vmem:[#allocation6 + $0x7c0] sm:$0xff] }
 0x3b6   : > { %14051 = vmatprep.subr.bf16.mxu0 %v14050_v52  ;;  %v1674_v52 = vld [vmem:[#allocation6 + $0x7d0] sm:$0xff] }
 0x3b7   : > { %v14092_v55 = vpack.c.bf16 %v1674_v52, %v1672_v51  ;;  %v14258_v51 = vpack.c.bf16 %v2329_v47, %v2327_v46  ;;  %v1978_v46 = vld [vmem:[#allocation2 + $0x40] sm:$0xff] }
 0x3b9   : > { %14053 = vmatpush1.bf16.msra.mxu0 %v14052_v57  ;;  %v1676_v57 = vld [vmem:[#allocation6 + $0x7e0] sm:$0xff] }
 0x3ba   : > { %14055 = vmatprep.subr.bf16.mxu0 %v14054_v58  ;;  %v1678_v58 = vld [vmem:[#allocation6 + $0x7f0] sm:$0xff] }
 0x3bb   : > { %v14096_v59 = vpack.c.bf16 %v1678_v58, %v1676_v57  ;;  %v14262_v57 = vpack.c.bf16 %v2333_v54, %v2331_v53  ;;  %v1979_v53 = vld [vmem:[#allocation2 + $0x48] sm:$0xff] }
 0x3bd   : > { %14057 = vmatpush1.bf16.msra.mxu0 %v14056_v62  ;;  %v2297_v62 = vld [vmem:[#allocation6 + $0xc18] sm:$0xff] }
 0x3be   : > { %14059 = vmatprep.subr.bf16.mxu0 %v14058_v63  ;;  %v2294_v63 = vld [vmem:[#allocation6 + $0xc00] sm:$0xff]  ;;  %v14226_v2 = vpack.c.bf16 %v2297_v62, %v2295_v61  ;;  %v2337_v61 = vld [vmem:[#allocation6 + $0xd58] sm:$0xff] }
 0x3bf   : > { %v14228_v3 = vpack.c.bf16 %v2296_v1, %v2294_v63  ;;  %v2334_v62 = vld [vmem:[#allocation6 + $0xd40] sm:$0xff]  ;;  %v2336_v63 = vld [vmem:[#allocation6 + $0xd50] sm:$0xff] }
 0x3c0   : > { %14227 = vmatprep.subr.bf16.mxu1 %v14226_v2  ;;  %v14268_v2 = vpack.c.bf16 %v2336_v63, %v2334_v62  ;;  %v2080_v62 = vld [vmem:[#allocation6 + $0xa60] sm:$0xff]  ;;  %v2082_v63 = vld [vmem:[#allocation6 + $0xa70] sm:$0xff] }
 0x3c1   : > { %14061 = vmatpush1.bf16.msra.mxu0 %v14060_v5  ;;  %14229 = vmatpush1.bf16.msra.mxu1 %v14228_v3  ;;  %v2301_v5 = vld [vmem:[#allocation6 + $0xc38] sm:$0xff]  ;;  %v2339_v3 = vld [vmem:[#allocation6 + $0xd68] sm:$0xff] }
 0x3c2   : > { %14063 = vmatprep.subr.bf16.mxu0 %v14062_v6  ;;  %v2298_v6 = vld [vmem:[#allocation6 + $0xc20] sm:$0xff]  ;;  %v14230_v8 = vpack.c.bf16 %v2301_v5, %v2299_v4  ;;  %v2341_v4 = vld [vmem:[#allocation6 + $0xd78] sm:$0xff] }
 0x3c3   : > { %v2338_v5 = vld [vmem:[#allocation6 + $0xd60] sm:$0xff] }
 0x3c4   : > { %14231 = vmatprep.subr.bf16.mxu1 %v14230_v8 }
 0x3c5   : > { %14065 = vmatpush1.bf16.msra.mxu0 %v14064_v11  ;;  %v2302_v11 = vld [vmem:[#allocation6 + $0xc40] sm:$0xff] }
 0x3c6   : > { %14067 = vmatprep.subr.bf16.mxu0 %v14066_v12  ;;  %v2304_v12 = vld [vmem:[#allocation6 + $0xc50] sm:$0xff] }
 0x3c7   : > { %v14236_v14 = vpack.c.bf16 %v2304_v12, %v2302_v11  ;;  %v2344_v11 = vld [vmem:[#allocation6 + $0xd90] sm:$0xff] }
 0x3c9   : > { %14069 = vmatpush1.bf16.msra.mxu0 %v14068_v17  ;;  %v2306_v17 = vld [vmem:[#allocation6 + $0xc60] sm:$0xff] }
 0x3ca   : > { %14071 = vmatprep.subr.bf16.mxu0 %v14070_v18  ;;  %v2308_v18 = vld [vmem:[#allocation6 + $0xc70] sm:$0xff] }
 0x3cb   : > { %v14240_v20 = vpack.c.bf16 %v2308_v18, %v2306_v17  ;;  %v2348_v17 = vld [vmem:[#allocation6 + $0xdb0] sm:$0xff] }
 0x3cd   : > { %14073 = vmatpush1.bf16.msra.mxu0 %v14072_v23  ;;  %v2310_v23 = vld [vmem:[#allocation6 + $0xc80] sm:$0xff] }
 0x3ce   : > { %14075 = vmatprep.subr.bf16.mxu0 %v14074_v24  ;;  %v2312_v24 = vld [vmem:[#allocation6 + $0xc90] sm:$0xff] }
 0x3cf   : > { %v14244_v26 = vpack.c.bf16 %v2312_v24, %v2310_v23  ;;  %v2352_v23 = vld [vmem:[#allocation6 + $0xdd0] sm:$0xff] }
 0x3d1   : > { %14077 = vmatpush1.bf16.msra.mxu0 %v14076_v29  ;;  %v2314_v29 = vld [vmem:[#allocation6 + $0xca0] sm:$0xff] }
 0x3d2   : > { %14079 = vmatprep.subr.bf16.mxu0 %v14078_v30  ;;  %v2316_v30 = vld [vmem:[#allocation6 + $0xcb0] sm:$0xff] }
 0x3d3   : > { %v14248_v32 = vpack.c.bf16 %v2316_v30, %v2314_v29  ;;  %v2354_v29 = vld [vmem:[#allocation6 + $0xde0] sm:$0xff]  ;;  %v2356_v30 = vld [vmem:[#allocation6 + $0xdf0] sm:$0xff] }
 0x3d5   : > { %14081 = vmatpush1.bf16.msra.mxu0 %v14080_v35  ;;  %v2318_v35 = vld [vmem:[#allocation6 + $0xcc0] sm:$0xff] }
 0x3d6   : > { %14083 = vmatprep.subr.bf16.mxu0 %v14082_v36  ;;  %v2320_v36 = vld [vmem:[#allocation6 + $0xcd0] sm:$0xff] }
 0x3d7   : > { %v14252_v39 = vpack.c.bf16 %v2320_v36, %v2318_v35  ;;  %v2071_v35 = vld [vmem:[#allocation6 + $0xa18] sm:$0xff] }
 0x3d8   : > { %v14162_v40 = vpack.c.bf16 %v2071_v35, %v2069_v34 }
 0x3d9   : > { %14085 = vmatpush1.bf16.msra.mxu0 %v14084_v42  ;;  %v2322_v42 = vld [vmem:[#allocation6 + $0xce0] sm:$0xff] }
 0x3da   : > { %14087 = vmatprep.subr.bf16.mxu0 %v14086_v43  ;;  %v2324_v43 = vld [vmem:[#allocation6 + $0xcf0] sm:$0xff] }
 0x3db   : > { %v14256_v45 = vpack.c.bf16 %v2324_v43, %v2322_v42  ;;  %v2068_v42 = vld [vmem:[#allocation6 + $0xa00] sm:$0xff]  ;;  %v2070_v43 = vld [vmem:[#allocation6 + $0xa10] sm:$0xff] }
 0x3dc   : > { %v14164_v47 = vpack.c.bf16 %v2070_v43, %v2068_v42  ;;  %v2108_v43 = vld [vmem:[#allocation6 + $0xb40] sm:$0xff] }
 0x3dd   : > { %14089 = vmatpush1.bf16.msra.mxu0 %v14088_v48  ;;  %v2326_v48 = vld [vmem:[#allocation6 + $0xd00] sm:$0xff] }
 0x3de   : > { %14091 = vmatprep.subr.bf16.mxu0 %v14090_v49  ;;  %v2328_v49 = vld [vmem:[#allocation6 + $0xd10] sm:$0xff] }
 0x3df   : > { %v14260_v52 = vpack.c.bf16 %v2328_v49, %v2326_v48  ;;  %v2072_v49 = vld [vmem:[#allocation6 + $0xa20] sm:$0xff] }
 0x3e1   : > { %14093 = vmatpush1.bf16.msra.mxu0 %v14092_v55  ;;  %v2330_v55 = vld [vmem:[#allocation6 + $0xd20] sm:$0xff] }
 0x3e2   : > { %14095 = vmatprep.subr.bf16.mxu0 %v14094_v56  ;;  %v2332_v56 = vld [vmem:[#allocation6 + $0xd30] sm:$0xff] }
 0x3e3   : > { %v14264_v58 = vpack.c.bf16 %v2332_v56, %v2330_v55  ;;  %v2076_v55 = vld [vmem:[#allocation6 + $0xa40] sm:$0xff]  ;;  %v2078_v56 = vld [vmem:[#allocation6 + $0xa50] sm:$0xff] }
 0x3e4   : > { %v17234_v0 = vpop.f32.mrb[4].mxu1 }
 0x3e5   : > { %14097 = vmatpush1.bf16.msra.mxu0 %v14096_v59  ;;  %v17236_v60 = vpop.f32.mrb[5].mxu1  ;;  %v2335_v59 = vld [vmem:[#allocation6 + $0xd48] sm:$0xff] }
 0x3e6   : > { %v14266_v1 = vpack.c.bf16 %v2337_v61, %v2335_v59  ;;  %v14172_v59 = vpack.c.bf16 %v2078_v56, %v2076_v55  ;;  %v2118_v55 = vld [vmem:[#allocation6 + $0xb90] sm:$0xff]  ;;  %v2121_v56 = vld [vmem:[#allocation6 + $0xba8] sm:$0xff] }
 0x3e8   : > { %1745 = vmatmul.mubr.f32.vlgmr.msra.gmra.mrb[6].mxu0 %v17210_v50  ;;  %v14232_v50 = vpack.c.bf16 %v2300_v7, %v2298_v6  ;;  %v2340_v6 = vld [vmem:[#allocation6 + $0xd70] sm:$0xff]  ;;  %v14270_v7 = vpack.c.bf16 %v2341_v4, %v2339_v3  ;;  %v14176_v3 = vpack.c.bf16 %v2082_v63, %v2080_v62  ;;  %v2125_v63 = vld [vmem:[#allocation6 + $0xbc8] sm:$0xff] }
 0x3e9   : > { %1824 = vmatprep.mubr.f32.mxu0 %v16532_v38  ;;  %v14272_v8 = vpack.c.bf16 %v2340_v6, %v2338_v5  ;;  %v2084_v5 = vld [vmem:[#allocation6 + $0xa80] sm:$0xff]  ;;  %v2086_v6 = vld [vmem:[#allocation6 + $0xa90] sm:$0xff] }
 0x3ea   : > { %14233 = vmatpush1.bf16.msra.mxu1 %v14232_v50  ;;  %v2343_v50 = vld [vmem:[#allocation6 + $0xd88] sm:$0xff]  ;;  %v2122_v62 = vld [vmem:[#allocation6 + $0xbb0] sm:$0xff] }
 0x3eb   : > { %14235 = vmatprep.subr.bf16.mxu1 %v14234_v13  ;;  %v14274_v12 = vpack.c.bf16 %v2345_v9, %v2343_v50  ;;  %v14276_v13 = vpack.c.bf16 %v2344_v11, %v2342_v10  ;;  %v14180_v50 = vpack.c.bf16 %v2086_v6, %v2084_v5  ;;  %v2088_v10 = vld [vmem:[#allocation6 + $0xaa0] sm:$0xff]  ;;  %v2090_v11 = vld [vmem:[#allocation6 + $0xab0] sm:$0xff]  ;;  %v2129_v6 = vld [vmem:[#allocation6 + $0xbe8] sm:$0xff] }
 0x3ec   : > { %v2126_v5 = vld [vmem:[#allocation6 + $0xbd0] sm:$0xff] }
 0x3ee   : > { %14237 = vmatpush1.bf16.msra.mxu1 %v14236_v14  ;;  %v2347_v14 = vld [vmem:[#allocation6 + $0xda8] sm:$0xff] }
 0x3ef   : > { %14239 = vmatprep.subr.bf16.mxu1 %v14238_v19  ;;  %v14278_v18 = vpack.c.bf16 %v2349_v15, %v2347_v14  ;;  %v14280_v19 = vpack.c.bf16 %v2348_v17, %v2346_v16  ;;  %v14184_v14 = vpack.c.bf16 %v2090_v11, %v2088_v10  ;;  %v2092_v16 = vld [vmem:[#allocation6 + $0xac0] sm:$0xff]  ;;  %v2094_v17 = vld [vmem:[#allocation6 + $0xad0] sm:$0xff] }
 0x3f0   : > { %v2130_v10 = vld [vmem:[#allocation6 + $0xbf0] sm:$0xff] }
 0x3f2   : > { %14241 = vmatpush1.bf16.msra.mxu1 %v14240_v20  ;;  %v2351_v20 = vld [vmem:[#allocation6 + $0xdc8] sm:$0xff] }
 0x3f3   : > { %14243 = vmatprep.subr.bf16.mxu1 %v14242_v25  ;;  %v14282_v24 = vpack.c.bf16 %v2353_v21, %v2351_v20  ;;  %v14284_v25 = vpack.c.bf16 %v2352_v23, %v2350_v22  ;;  %v14188_v20 = vpack.c.bf16 %v2094_v17, %v2092_v16  ;;  %v2096_v22 = vld [vmem:[#allocation6 + $0xae0] sm:$0xff]  ;;  %v2098_v23 = vld [vmem:[#allocation6 + $0xaf0] sm:$0xff] }
 0x3f4   : > { %v2746_v17 = vld [vmem:[#allocation6 + $0x1000] sm:$0xff] }
 0x3f6   : > { %14245 = vmatpush1.bf16.msra.mxu1 %v14244_v26  ;;  %v2355_v26 = vld [vmem:[#allocation6 + $0xde8] sm:$0xff] }
 0x3f7   : > { %14247 = vmatprep.subr.bf16.mxu1 %v14246_v31  ;;  %v14286_v28 = vpack.c.bf16 %v2357_v27, %v2355_v26  ;;  %v14288_v31 = vpack.c.bf16 %v2356_v30, %v2354_v29  ;;  %v14192_v26 = vpack.c.bf16 %v2098_v23, %v2096_v22  ;;  %v2102_v29 = vld [vmem:[#allocation6 + $0xb10] sm:$0xff]  ;;  %v2105_v30 = vld [vmem:[#allocation6 + $0xb28] sm:$0xff]  ;;  %v2750_v23 = vld [vmem:[#allocation6 + $0x1020] sm:$0xff] }
 0x3fa   : > { %14249 = vmatpush1.bf16.msra.mxu1 %v14248_v32  ;;  %v17239_v32 = vld [vmem:[%s17202_s1] sm:$0xff] }
 0x3fb   : > { %14251 = vmatprep.subr.bf16.mxu1 %v14250_v37 }
 0x3fe   : > { %14253 = vmatpush1.bf16.msra.mxu1 %v14252_v39  ;;  %v1752_v39 = vld [vmem:[#allocation2 + $0x30] sm:$0xff] }
 0x3ff   : > { %14255 = vmatprep.subr.bf16.mxu1 %v14254_v44  ;;  %v2073_v44 = vld [vmem:[#allocation6 + $0xa28] sm:$0xff] }
 0x402   : > { %14257 = vmatpush1.bf16.msra.mxu1 %v14256_v45  ;;  %v2075_v45 = vld [vmem:[#allocation6 + $0xa38] sm:$0xff] }
 0x403   : > { %14259 = vmatprep.subr.bf16.mxu1 %v14258_v51  ;;  %v14166_v48 = vpack.c.bf16 %v2075_v45, %v2073_v44  ;;  %v2074_v51 = vld [vmem:[#allocation6 + $0xa30] sm:$0xff]  ;;  %v2113_v45 = vld [vmem:[#allocation6 + $0xb68] sm:$0xff] }
 0x404   : > { %v2110_v44 = vld [vmem:[#allocation6 + $0xb50] sm:$0xff] }
 0x406   : > { %14261 = vmatpush1.bf16.msra.mxu1 %v14260_v52  ;;  %v2079_v52 = vld [vmem:[#allocation6 + $0xa58] sm:$0xff] }
 0x407   : > { %14263 = vmatprep.subr.bf16.mxu1 %v14262_v57  ;;  %v2081_v57 = vld [vmem:[#allocation6 + $0xa68] sm:$0xff] }
 0x40a   : > { %14265 = vmatpush1.bf16.msra.mxu1 %v14264_v58  ;;  %v2083_v58 = vld [vmem:[#allocation6 + $0xa78] sm:$0xff] }
 0x40b   : > { %14267 = vmatprep.subr.bf16.mxu1 %v14266_v1  ;;  %v14174_v61 = vpack.c.bf16 %v2083_v58, %v2081_v57  ;;  %v2085_v1 = vld [vmem:[#allocation6 + $0xa88] sm:$0xff]  ;;  %v2123_v57 = vld [vmem:[#allocation6 + $0xbb8] sm:$0xff] }
 0x40e   : > { %14269 = vmatpush1.bf16.msra.mxu1 %v14268_v2  ;;  %v2087_v2 = vld [vmem:[#allocation6 + $0xa98] sm:$0xff] }
 0x40f   : > { %14271 = vmatprep.subr.bf16.mxu1 %v14270_v7  ;;  %v14178_v4 = vpack.c.bf16 %v2087_v2, %v2085_v1  ;;  %v2089_v7 = vld [vmem:[#allocation6 + $0xaa8] sm:$0xff]  ;;  %v2127_v1 = vld [vmem:[#allocation6 + $0xbd8] sm:$0xff] }
 0x412   : > { %14273 = vmatpush1.bf16.msra.mxu1 %v14272_v8  ;;  %v2091_v8 = vld [vmem:[#allocation6 + $0xab8] sm:$0xff] }
 0x413   : > { %14275 = vmatprep.subr.bf16.mxu1 %v14274_v12  ;;  %v14182_v9 = vpack.c.bf16 %v2091_v8, %v2089_v7  ;;  %v2093_v12 = vld [vmem:[#allocation6 + $0xac8] sm:$0xff]  ;;  %v2131_v7 = vld [vmem:[#allocation6 + $0xbf8] sm:$0xff] }
 0x416   : > { %14277 = vmatpush1.bf16.msra.mxu1 %v14276_v13  ;;  %v2095_v13 = vld [vmem:[#allocation6 + $0xad8] sm:$0xff] }
 0x417   : > { %14279 = vmatprep.subr.bf16.mxu1 %v14278_v18  ;;  %v14186_v15 = vpack.c.bf16 %v2095_v13, %v2093_v12  ;;  %v2097_v18 = vld [vmem:[#allocation6 + $0xae8] sm:$0xff] }
 0x41a   : > { %14281 = vmatpush1.bf16.msra.mxu1 %v14280_v19  ;;  %v2099_v19 = vld [vmem:[#allocation6 + $0xaf8] sm:$0xff] }
 0x41b   : > { %14283 = vmatprep.subr.bf16.mxu1 %v14282_v24  ;;  %v14190_v21 = vpack.c.bf16 %v2099_v19, %v2097_v18  ;;  %v2101_v24 = vld [vmem:[#allocation6 + $0xb08] sm:$0xff]  ;;  %v2748_v18 = vld [vmem:[#allocation6 + $0x1010] sm:$0xff] }
 0x41c   : > { %v14356_v19 = vpack.c.bf16 %v2748_v18, %v2746_v17  ;;  %v2786_v18 = vld [vmem:[#allocation6 + $0x1140] sm:$0xff] }
 0x41e   : > { %14285 = vmatpush1.bf16.msra.mxu1 %v14284_v25  ;;  %v2103_v25 = vld [vmem:[#allocation6 + $0xb18] sm:$0xff] }
 0x41f   : > { %14287 = vmatprep.subr.bf16.mxu1 %v14286_v28  ;;  %v14194_v27 = vpack.c.bf16 %v2103_v25, %v2101_v24  ;;  %v2100_v28 = vld [vmem:[#allocation6 + $0xb00] sm:$0xff]  ;;  %v2752_v24 = vld [vmem:[#allocation6 + $0x1030] sm:$0xff] }
 0x420   : > { %v14196_v34 = vpack.c.bf16 %v2102_v29, %v2100_v28  ;;  %v14360_v25 = vpack.c.bf16 %v2752_v24, %v2750_v23  ;;  %v2754_v29 = vld [vmem:[#allocation6 + $0x1040] sm:$0xff] }
 0x421   : > { %v2790_v24 = vld [vmem:[#allocation6 + $0x1160] sm:$0xff] }
 0x422   : > { %14289 = vmatpush1.bf16.msra.mxu1 %v14288_v31  ;;  %v2107_v31 = vld [vmem:[#allocation6 + $0xb38] sm:$0xff] }
 0x423   : > { %v14198_v35 = vpack.c.bf16 %v2107_v31, %v2105_v30  ;;  %v2756_v30 = vld [vmem:[#allocation6 + $0x1050] sm:$0xff] }
 0x424   : > { %v14364_v31 = vpack.c.bf16 %v2756_v30, %v2754_v29  ;;  %v2794_v30 = vld [vmem:[#allocation6 + $0x1180] sm:$0xff] }
 0x425   : > { %2423 = vmatmul.mubr.f32.vlgmr.msra.gmra.mrb[6].mxu1 %v17239_v32 }
 0x426   : > { %2874 = vmatprep.mubr.f32.mxu1 %v17243_v33 }
 0x4bb   : > { %v1746_v36 = vpop.f32.mrb[6].mxu0 }
 0x4bc   : > { %v1748_v37 = vpop.f32.mrb[7].mxu0 }
 0x4bd   : > { %1760 = vmatprep.subr.mxu0 %v1748_v37  ;;  %v2106_v37 = vld [vmem:[#allocation6 + $0xb30] sm:$0xff] }
 0x4be   : > { %1761 = vmatpush1.msra.mxu0 %v1746_v36  ;;  %v2104_v36 = vld [vmem:[#allocation6 + $0xb20] sm:$0xff] }
 0x4bf   : > { %12368 = vmatmul.mubr.msk.f32.vlgmr.msra.gmra.mrb[2].mxu0 %vm1222_vm0, %v1752_v39  ;;  %1986 = vmatprep.subr.mxu0 %v17236_v60  ;;  %v2077_v60 = vld [vmem:[#allocation6 + $0xa48] sm:$0xff] }
 0x4c0   : > { %1830 = vmatprep.mubr.f32.mxu0 %v16532_v38  ;;  %1987 = vmatpush1.msra.mxu0 %v17234_v0  ;;  %v14168_v0 = vpack.c.bf16 %v2074_v51, %v2072_v49  ;;  %v14170_v54 = vpack.c.bf16 %v2079_v52, %v2077_v60  ;;  %v2109_v39 = vld [vmem:[#allocation6 + $0xb48] sm:$0xff]  ;;  %v2112_v49 = vld [vmem:[#allocation6 + $0xb60] sm:$0xff]  ;;  %v2114_v51 = vld [vmem:[#allocation6 + $0xb70] sm:$0xff] }
 0x4c1   : > { %14163 = vmatprep.subr.bf16.mxu0 %v14162_v40  ;;  %v2111_v40 = vld [vmem:[#allocation6 + $0xb58] sm:$0xff]  ;;  %v2117_v60 = vld [vmem:[#allocation6 + $0xb88] sm:$0xff] }
 0x4c2   : > { %v14202_v42 = vpack.c.bf16 %v2111_v40, %v2109_v39  ;;  %v2119_v52 = vld [vmem:[#allocation6 + $0xb98] sm:$0xff]  ;;  %v2760_v39 = vld [vmem:[#allocation6 + $0x1070] sm:$0xff] }
 0x4c3   : > { %12369 = vmatmul.mubr.msk.f32.gmra.mrb[4].mxu0 %vm1222_vm0, %v1753_v41  ;;  %v14200_v41 = vpack.c.bf16 %v2106_v37, %v2104_v36  ;;  %v2758_v37 = vld [vmem:[#allocation6 + $0x1060] sm:$0xff] }
 0x4c4   : > { %2050 = vmatprep.mubr.f32.mxu0 %v16532_v38  ;;  %v14368_v40 = vpack.c.bf16 %v2760_v39, %v2758_v37  ;;  %v2798_v39 = vld [vmem:[#allocation6 + $0x11a0] sm:$0xff] }
 0x4c7   : > { %12370 = vmatmul.mubr.msk.f32.vlgmr.msra.gmra.mrb[2].mxu0 %vm1222_vm0, %v1978_v46  ;;  %v2115_v46 = vld [vmem:[#allocation6 + $0xb78] sm:$0xff] }
 0x4c8   : > { %14165 = vmatpush1.bf16.msra.mxu0 %v14164_v47  ;;  %2056 = vmatprep.mubr.f32.mxu0 %v16532_v38  ;;  %v14204_v47 = vpack.c.bf16 %v2110_v44, %v2108_v43  ;;  %v2762_v44 = vld [vmem:[#allocation6 + $0x1080] sm:$0xff] }
 0x4c9   : > { %14167 = vmatprep.subr.bf16.mxu0 %v14166_v48  ;;  %v14206_v48 = vpack.c.bf16 %v2115_v46, %v2113_v45  ;;  %v2764_v45 = vld [vmem:[#allocation6 + $0x1090] sm:$0xff] }
 0x4ca   : > { %v14372_v46 = vpack.c.bf16 %v2764_v45, %v2762_v44  ;;  %v2802_v45 = vld [vmem:[#allocation6 + $0x11c0] sm:$0xff] }
 0x4cb   : > { %12371 = vmatmul.mubr.msk.f32.gmra.mrb[4].mxu0 %vm1222_vm0, %v1979_v53  ;;  %v14210_v53 = vpack.c.bf16 %v2119_v52, %v2117_v60  ;;  %v2768_v60 = vld [vmem:[#allocation6 + $0x10b0] sm:$0xff] }
 0x4cc   : > { %14169 = vmatpush1.bf16.msra.mxu0 %v14168_v0  ;;  %2196 = vmatprep.mubr.f32.mxu0 %v17243_v33  ;;  %v14208_v0 = vpack.c.bf16 %v2114_v51, %v2112_v49  ;;  %v2766_v51 = vld [vmem:[#allocation6 + $0x10a0] sm:$0xff] }
 0x4cd   : > { %14171 = vmatprep.subr.bf16.mxu0 %v14170_v54  ;;  %v2116_v54 = vld [vmem:[#allocation6 + $0xb80] sm:$0xff]  ;;  %v14376_v52 = vpack.c.bf16 %v2768_v60, %v2766_v51 }
 0x4ce   : > { %v14212_v58 = vpack.c.bf16 %v2118_v55, %v2116_v54  ;;  %v2770_v55 = vld [vmem:[#allocation6 + $0x10c0] sm:$0xff] }
 0x4cf   : > { %v2806_v60 = vld [vmem:[#allocation6 + $0x11e0] sm:$0xff] }
 0x4d0   : > { %14173 = vmatpush1.bf16.msra.mxu0 %v14172_v59  ;;  %v14214_v59 = vpack.c.bf16 %v2123_v57, %v2121_v56  ;;  %v2772_v56 = vld [vmem:[#allocation6 + $0x10d0] sm:$0xff] }
 0x4d1   : > { %14175 = vmatprep.subr.bf16.mxu0 %v14174_v61  ;;  %v2120_v61 = vld [vmem:[#allocation6 + $0xba0] sm:$0xff]  ;;  %v14380_v57 = vpack.c.bf16 %v2772_v56, %v2770_v55 }
 0x4d2   : > { %v14216_v2 = vpack.c.bf16 %v2122_v62, %v2120_v61  ;;  %v2774_v62 = vld [vmem:[#allocation6 + $0x10e0] sm:$0xff] }
 0x4d4   : > { %14177 = vmatpush1.bf16.msra.mxu0 %v14176_v3  ;;  %v14218_v3 = vpack.c.bf16 %v2127_v1, %v2125_v63  ;;  %v2776_v63 = vld [vmem:[#allocation6 + $0x10f0] sm:$0xff] }
 0x4d5   : > { %14179 = vmatprep.subr.bf16.mxu0 %v14178_v4  ;;  %v2124_v4 = vld [vmem:[#allocation6 + $0xbc0] sm:$0xff]  ;;  %v14384_v1 = vpack.c.bf16 %v2776_v63, %v2774_v62  ;;  %v2522_v62 = vld [vmem:[#allocation6 + $0xe10] sm:$0xff]  ;;  %v2525_v63 = vld [vmem:[#allocation6 + $0xe28] sm:$0xff] }
 0x4d6   : > { %v14220_v8 = vpack.c.bf16 %v2126_v5, %v2124_v4  ;;  %v2778_v5 = vld [vmem:[#allocation6 + $0x1100] sm:$0xff] }
 0x4d8   : > { %14181 = vmatpush1.bf16.msra.mxu0 %v14180_v50  ;;  %v14222_v50 = vpack.c.bf16 %v2131_v7, %v2129_v6  ;;  %v2780_v6 = vld [vmem:[#allocation6 + $0x1110] sm:$0xff] }
 0x4d9   : > { %14183 = vmatprep.subr.bf16.mxu0 %v14182_v9  ;;  %v2128_v9 = vld [vmem:[#allocation6 + $0xbe0] sm:$0xff]  ;;  %v14388_v7 = vpack.c.bf16 %v2780_v6, %v2778_v5  ;;  %v2526_v6 = vld [vmem:[#allocation6 + $0xe30] sm:$0xff] }
 0x4da   : > { %v14224_v11 = vpack.c.bf16 %v2130_v10, %v2128_v9  ;;  %v2782_v10 = vld [vmem:[#allocation6 + $0x1120] sm:$0xff] }
 0x4db   : > { %v2524_v5 = vld [vmem:[#allocation6 + $0xe20] sm:$0xff] }
 0x4dc   : > { %14185 = vmatpush1.bf16.msra.mxu0 %v14184_v14  ;;  %v2747_v14 = vld [vmem:[#allocation6 + $0x1008] sm:$0xff] }
 0x4dd   : > { %14187 = vmatprep.subr.bf16.mxu0 %v14186_v15  ;;  %v2749_v15 = vld [vmem:[#allocation6 + $0x1018] sm:$0xff] }
 0x4de   : > { %v14354_v16 = vpack.c.bf16 %v2749_v15, %v2747_v14  ;;  %v2787_v15 = vld [vmem:[#allocation6 + $0x1148] sm:$0xff] }
 0x4e0   : > { %14189 = vmatpush1.bf16.msra.mxu0 %v14188_v20  ;;  %14355 = vmatprep.subr.bf16.mxu1 %v14354_v16  ;;  %v2751_v20 = vld [vmem:[#allocation6 + $0x1028] sm:$0xff]  ;;  %v2789_v16 = vld [vmem:[#allocation6 + $0x1158] sm:$0xff] }
 0x4e1   : > { %14191 = vmatprep.subr.bf16.mxu0 %v14190_v21  ;;  %14357 = vmatpush1.bf16.msra.mxu1 %v14356_v19  ;;  %v2753_v21 = vld [vmem:[#allocation6 + $0x1038] sm:$0xff]  ;;  %v14394_v17 = vpack.c.bf16 %v2789_v16, %v2787_v15  ;;  %v2788_v19 = vld [vmem:[#allocation6 + $0x1150] sm:$0xff] }
 0x4e2   : > { %v14358_v22 = vpack.c.bf16 %v2753_v21, %v2751_v20  ;;  %v14396_v20 = vpack.c.bf16 %v2788_v19, %v2786_v18  ;;  %v2791_v21 = vld [vmem:[#allocation6 + $0x1168] sm:$0xff]  ;;  %v2534_v18 = vld [vmem:[#allocation6 + $0xe70] sm:$0xff] }
 0x4e3   : > { %v2537_v19 = vld [vmem:[#allocation6 + $0xe88] sm:$0xff] }
 0x4e4   : > { %14193 = vmatpush1.bf16.msra.mxu0 %v14192_v26  ;;  %14359 = vmatprep.subr.bf16.mxu1 %v14358_v22  ;;  %v2755_v26 = vld [vmem:[#allocation6 + $0x1048] sm:$0xff]  ;;  %v2793_v22 = vld [vmem:[#allocation6 + $0x1178] sm:$0xff] }
 0x4e5   : > { %14195 = vmatprep.subr.bf16.mxu0 %v14194_v27  ;;  %14361 = vmatpush1.bf16.msra.mxu1 %v14360_v25  ;;  %v2757_v27 = vld [vmem:[#allocation6 + $0x1058] sm:$0xff]  ;;  %v14398_v23 = vpack.c.bf16 %v2793_v22, %v2791_v21  ;;  %v2792_v25 = vld [vmem:[#allocation6 + $0x1170] sm:$0xff] }
 0x4e6   : > { %v14362_v28 = vpack.c.bf16 %v2757_v27, %v2755_v26  ;;  %v14400_v26 = vpack.c.bf16 %v2792_v25, %v2790_v24  ;;  %v2795_v27 = vld [vmem:[#allocation6 + $0x1188] sm:$0xff]  ;;  %v2538_v24 = vld [vmem:[#allocation6 + $0xe90] sm:$0xff] }
 0x4e7   : > { %v2541_v25 = vld [vmem:[#allocation6 + $0xea8] sm:$0xff] }
 0x4e8   : > { %14197 = vmatpush1.bf16.msra.mxu0 %v14196_v34  ;;  %14363 = vmatprep.subr.bf16.mxu1 %v14362_v28  ;;  %v2759_v34 = vld [vmem:[#allocation6 + $0x1068] sm:$0xff]  ;;  %v2797_v28 = vld [vmem:[#allocation6 + $0x1198] sm:$0xff] }
 0x4e9   : > { %14199 = vmatprep.subr.bf16.mxu0 %v14198_v35  ;;  %14365 = vmatpush1.bf16.msra.mxu1 %v14364_v31  ;;  %v2761_v35 = vld [vmem:[#allocation6 + $0x1078] sm:$0xff]  ;;  %v14402_v29 = vpack.c.bf16 %v2797_v28, %v2795_v27  ;;  %v2796_v31 = vld [vmem:[#allocation6 + $0x1190] sm:$0xff] }
 0x4ea   : > { %v14366_v36 = vpack.c.bf16 %v2761_v35, %v2759_v34  ;;  %v14404_v34 = vpack.c.bf16 %v2796_v31, %v2794_v30  ;;  %v2799_v35 = vld [vmem:[#allocation6 + $0x11a8] sm:$0xff]  ;;  %v2547_v31 = vld [vmem:[#allocation6 + $0xed8] sm:$0xff] }
 0x4eb   : > { %v2545_v30 = vld [vmem:[#allocation6 + $0xec8] sm:$0xff] }
 0x4ec   : > { %14201 = vmatpush1.bf16.msra.mxu0 %v14200_v41  ;;  %14367 = vmatprep.subr.bf16.mxu1 %v14366_v36  ;;  %v2763_v41 = vld [vmem:[#allocation6 + $0x1088] sm:$0xff]  ;;  %v2801_v36 = vld [vmem:[#allocation6 + $0x11b8] sm:$0xff] }
 0x4ed   : > { %14203 = vmatprep.subr.bf16.mxu0 %v14202_v42  ;;  %14369 = vmatpush1.bf16.msra.mxu1 %v14368_v40  ;;  %v2765_v42 = vld [vmem:[#allocation6 + $0x1098] sm:$0xff]  ;;  %v14406_v37 = vpack.c.bf16 %v2801_v36, %v2799_v35  ;;  %v2800_v40 = vld [vmem:[#allocation6 + $0x11b0] sm:$0xff]  ;;  %v14314_v35 = vpack.c.bf16 %v2547_v31, %v2545_v30  ;;  %v2544_v36 = vld [vmem:[#allocation6 + $0xec0] sm:$0xff] }
 0x4ee   : > { %v14370_v43 = vpack.c.bf16 %v2765_v42, %v2763_v41  ;;  %v14408_v41 = vpack.c.bf16 %v2800_v40, %v2798_v39  ;;  %v2803_v42 = vld [vmem:[#allocation6 + $0x11c8] sm:$0xff]  ;;  %v2551_v40 = vld [vmem:[#allocation6 + $0xef8] sm:$0xff]  ;;  %v2971_v31 = vld [vmem:[#allocation4] sm:$0xff] }
 0x4ef   : > { %v2549_v39 = vld [vmem:[#allocation6 + $0xee8] sm:$0xff] }
 0x4f0   : > { %14205 = vmatpush1.bf16.msra.mxu0 %v14204_v47  ;;  %14371 = vmatprep.subr.bf16.mxu1 %v14370_v43  ;;  %v2767_v47 = vld [vmem:[#allocation6 + $0x10a8] sm:$0xff]  ;;  %v2805_v43 = vld [vmem:[#allocation6 + $0x11d8] sm:$0xff] }
 0x4f1   : > { %14207 = vmatprep.subr.bf16.mxu0 %v14206_v48  ;;  %14373 = vmatpush1.bf16.msra.mxu1 %v14372_v46  ;;  %v2769_v48 = vld [vmem:[#allocation6 + $0x10b8] sm:$0xff]  ;;  %v14410_v44 = vpack.c.bf16 %v2805_v43, %v2803_v42  ;;  %v2804_v46 = vld [vmem:[#allocation6 + $0x11d0] sm:$0xff]  ;;  %v14318_v42 = vpack.c.bf16 %v2551_v40, %v2549_v39  ;;  %v2548_v43 = vld [vmem:[#allocation6 + $0xee0] sm:$0xff] }
 0x4f2   : > { %v14374_v49 = vpack.c.bf16 %v2769_v48, %v2767_v47  ;;  %v14412_v47 = vpack.c.bf16 %v2804_v46, %v2802_v45  ;;  %v2807_v48 = vld [vmem:[#allocation6 + $0x11e8] sm:$0xff]  ;;  %v2555_v46 = vld [vmem:[#allocation6 + $0xf18] sm:$0xff]  ;;  %v3108_v39 = vld [vmem:[#allocation10 + $0xd0] sm:$0xff] }
 0x4f3   : > { %v2553_v45 = vld [vmem:[#allocation6 + $0xf08] sm:$0xff]  ;;  %v3109_v40 = vld [vmem:[#allocation10 + $0xd8] sm:$0xff] }
 0x4f4   : > { %14209 = vmatpush1.bf16.msra.mxu0 %v14208_v0  ;;  %14375 = vmatprep.subr.bf16.mxu1 %v14374_v49  ;;  %v2771_v0 = vld [vmem:[#allocation6 + $0x10c8] sm:$0xff]  ;;  %v2809_v49 = vld [vmem:[#allocation6 + $0x11f8] sm:$0xff] }
 0x4f5   : > { %14211 = vmatprep.subr.bf16.mxu0 %v14210_v53  ;;  %14377 = vmatpush1.bf16.msra.mxu1 %v14376_v52  ;;  %v2773_v53 = vld [vmem:[#allocation6 + $0x10d8] sm:$0xff]  ;;  %v14414_v51 = vpack.c.bf16 %v2809_v49, %v2807_v48  ;;  %v2808_v52 = vld [vmem:[#allocation6 + $0x11f0] sm:$0xff]  ;;  %v14322_v48 = vpack.c.bf16 %v2555_v46, %v2553_v45  ;;  %v2552_v49 = vld [vmem:[#allocation6 + $0xf00] sm:$0xff] }
 0x4f6   : > { %v14378_v54 = vpack.c.bf16 %v2773_v53, %v2771_v0  ;;  %v14416_v0 = vpack.c.bf16 %v2808_v52, %v2806_v60  ;;  %v2521_v53 = vld [vmem:[#allocation6 + $0xe08] sm:$0xff]  ;;  %v2559_v52 = vld [vmem:[#allocation6 + $0xf38] sm:$0xff]  ;;  %v3112_v45 = vld [vmem:[#allocation10 + $0xf0] sm:$0xff] }
 0x4f7   : > { %v2557_v60 = vld [vmem:[#allocation6 + $0xf28] sm:$0xff] }
 0x4f8   : > { %14213 = vmatpush1.bf16.msra.mxu0 %v14212_v58  ;;  %v17258_v12 = vpop.f32.mrb[6].mxu1  ;;  %14379 = vmatprep.subr.bf16.mxu1 %v14378_v54  ;;  %v2775_v58 = vld [vmem:[#allocation6 + $0x10e8] sm:$0xff]  ;;  %v2523_v54 = vld [vmem:[#allocation6 + $0xe18] sm:$0xff] }
 0x4f9   : > { %14215 = vmatprep.subr.bf16.mxu0 %v14214_v59  ;;  %v17260_v13 = vpop.f32.mrb[7].mxu1  ;;  %14381 = vmatpush1.bf16.msra.mxu1 %v14380_v57  ;;  %v2777_v59 = vld [vmem:[#allocation6 + $0x10f8] sm:$0xff]  ;;  %v2204_v57 = vld [vmem:[#allocation2 + $0x50] sm:$0xff] }
 0x4fa   : > { %v14382_v61 = vpack.c.bf16 %v2777_v59, %v2775_v58  ;;  %v14290_v58 = vpack.c.bf16 %v2523_v54, %v2521_v53  ;;  %v2205_v59 = vld [vmem:[#allocation2 + $0x58] sm:$0xff]  ;;  %v14326_v53 = vpack.c.bf16 %v2559_v52, %v2557_v60  ;;  %v2556_v54 = vld [vmem:[#allocation6 + $0xf20] sm:$0xff]  ;;  %v3115_v52 = vld [vmem:[#allocation10 + $0x108] sm:$0xff] }
 0x4fb   : > { %v8612_v60 = vld [vmem:[#allocation21] sm:$0xff] }
 0x4fc   : > { %14217 = vmatpush1.bf16.msra.mxu0 %v14216_v2  ;;  %14383 = vmatprep.subr.bf16.mxu1 %v14382_v61  ;;  %v2779_v2 = vld [vmem:[#allocation6 + $0x1108] sm:$0xff]  ;;  %v2520_v61 = vld [vmem:[#allocation6 + $0xe00] sm:$0xff] }
 0x4fd   : > { %14219 = vmatprep.subr.bf16.mxu0 %v14218_v3  ;;  %14385 = vmatpush1.bf16.msra.mxu1 %v14384_v1  ;;  %v2781_v3 = vld [vmem:[#allocation6 + $0x1118] sm:$0xff] }
 0x4fe   : > { %v14386_v4 = vpack.c.bf16 %v2781_v3, %v2779_v2  ;;  %v2527_v1 = vld [vmem:[#allocation6 + $0xe38] sm:$0xff]  ;;  %v2430_v2 = vld [vmem:[#allocation2 + $0x60] sm:$0xff]  ;;  %v14292_v3 = vpack.c.bf16 %v2522_v62, %v2520_v61  ;;  %v2562_v62 = vld [vmem:[#allocation6 + $0xf50] sm:$0xff] }
 0x4ff   : > { %v2560_v61 = vld [vmem:[#allocation6 + $0xf40] sm:$0xff] }
 0x500   : > { %14221 = vmatpush1.bf16.msra.mxu0 %v14220_v8  ;;  %14387 = vmatprep.subr.bf16.mxu1 %v14386_v4  ;;  %v2783_v8 = vld [vmem:[#allocation6 + $0x1128] sm:$0xff]  ;;  %v14294_v4 = vpack.c.bf16 %v2527_v1, %v2525_v63  ;;  %v2567_v1 = vld [vmem:[#allocation6 + $0xf78] sm:$0xff] }
 0x501   : > { %14223 = vmatprep.subr.bf16.mxu0 %v14222_v50  ;;  %14389 = vmatpush1.bf16.msra.mxu1 %v14388_v7  ;;  %v2785_v50 = vld [vmem:[#allocation6 + $0x1138] sm:$0xff]  ;;  %v2565_v63 = vld [vmem:[#allocation6 + $0xf68] sm:$0xff] }
 0x502   : > { %v14390_v9 = vpack.c.bf16 %v2785_v50, %v2783_v8  ;;  %v2531_v7 = vld [vmem:[#allocation6 + $0xe58] sm:$0xff]  ;;  %v2431_v8 = vld [vmem:[#allocation2 + $0x68] sm:$0xff] }
 0x504   : > { %14225 = vmatpush1.bf16.msra.mxu0 %v14224_v11  ;;  %v2784_v11 = vld [vmem:[#allocation6 + $0x1130] sm:$0xff]  ;;  %14391 = vmatprep.subr.bf16.mxu1 %v14390_v9  ;;  %v2528_v9 = vld [vmem:[#allocation6 + $0xe40] sm:$0xff] }
 0x505   : > { %v14392_v14 = vpack.c.bf16 %v2784_v11, %v2782_v10  ;;  %v2530_v10 = vld [vmem:[#allocation6 + $0xe50] sm:$0xff]  ;;  %v2533_v11 = vld [vmem:[#allocation6 + $0xe68] sm:$0xff] }
 0x506   : > { %v14300_v15 = vpack.c.bf16 %v2530_v10, %v2528_v9  ;;  %v2573_v9 = vld [vmem:[#allocation6 + $0xfa8] sm:$0xff]  ;;  %v2575_v10 = vld [vmem:[#allocation6 + $0xfb8] sm:$0xff] }
 0x507   : > { %2197 = vmatmul.mubr.f32.vlgmr.msra.gmra.mrb[8].mxu0 %v17239_v32  ;;  %14393 = vmatpush1.bf16.msra.mxu1 %v14392_v14  ;;  %v2535_v14 = vld [vmem:[#allocation6 + $0xe78] sm:$0xff] }
 0x508   : > { %2276 = vmatprep.mubr.f32.mxu0 %v16532_v38  ;;  %14395 = vmatprep.subr.bf16.mxu1 %v14394_v17  ;;  %v14302_v16 = vpack.c.bf16 %v2535_v14, %v2533_v11  ;;  %v2532_v17 = vld [vmem:[#allocation6 + $0xe60] sm:$0xff]  ;;  %v14342_v14 = vpack.c.bf16 %v2575_v10, %v2573_v9 }
 0x509   : > { %v14304_v21 = vpack.c.bf16 %v2534_v18, %v2532_v17  ;;  %v2577_v17 = vld [vmem:[#allocation6 + $0xfc8] sm:$0xff]  ;;  %v2579_v18 = vld [vmem:[#allocation6 + $0xfd8] sm:$0xff] }
 0x50b   : > { %14397 = vmatpush1.bf16.msra.mxu1 %v14396_v20  ;;  %v2539_v20 = vld [vmem:[#allocation6 + $0xe98] sm:$0xff] }
 0x50c   : > { %14399 = vmatprep.subr.bf16.mxu1 %v14398_v23  ;;  %v14306_v22 = vpack.c.bf16 %v2539_v20, %v2537_v19  ;;  %v2536_v23 = vld [vmem:[#allocation6 + $0xe80] sm:$0xff]  ;;  %v14346_v20 = vpack.c.bf16 %v2579_v18, %v2577_v17  ;;  %v2992_v17 = vld [vmem:[#allocation10 + $0x8] sm:$0xff] }
 0x50d   : > { %v14308_v27 = vpack.c.bf16 %v2538_v24, %v2536_v23  ;;  %v2581_v23 = vld [vmem:[#allocation6 + $0xfe8] sm:$0xff]  ;;  %v2583_v24 = vld [vmem:[#allocation6 + $0xff8] sm:$0xff]  ;;  %v2882_v18 = vld [vmem:[#allocation2 + $0x80] sm:$0xff] }
 0x50f   : > { %14401 = vmatpush1.bf16.msra.mxu1 %v14400_v26  ;;  %v2543_v26 = vld [vmem:[#allocation6 + $0xeb8] sm:$0xff] }
 0x510   : > { %14403 = vmatprep.subr.bf16.mxu1 %v14402_v29  ;;  %v14310_v28 = vpack.c.bf16 %v2543_v26, %v2541_v25  ;;  %v2540_v29 = vld [vmem:[#allocation6 + $0xea0] sm:$0xff]  ;;  %v14350_v26 = vpack.c.bf16 %v2583_v24, %v2581_v23 }
 0x511   : > { %v2995_v24 = vld [vmem:[#allocation10 + $0x20] sm:$0xff] }
 0x513   : > { %14405 = vmatpush1.bf16.msra.mxu1 %v14404_v34 }
 0x514   : > { %14407 = vmatprep.subr.bf16.mxu1 %v14406_v37  ;;  %v2546_v37 = vld [vmem:[#allocation6 + $0xed0] sm:$0xff] }
 0x517   : > { %14409 = vmatpush1.bf16.msra.mxu1 %v14408_v41  ;;  %v14316_v41 = vpack.c.bf16 %v2546_v37, %v2544_v36  ;;  %v3107_v36 = vld [vmem:[#allocation10 + $0xc8] sm:$0xff]  ;;  %v2972_v37 = vld [vmem:[#allocation4 + $0x8] sm:$0xff] }
 0x518   : > { %14411 = vmatprep.subr.bf16.mxu1 %v14410_v44  ;;  %v2550_v44 = vld [vmem:[#allocation6 + $0xef0] sm:$0xff] }
 0x51b   : > { %14413 = vmatpush1.bf16.msra.mxu1 %v14412_v47  ;;  %v14320_v47 = vpack.c.bf16 %v2550_v44, %v2548_v43  ;;  %v4882_v43 = vld [vmem:[#allocation9 + $0x10] sm:$0xff]  ;;  %v3111_v44 = vld [vmem:[#allocation10 + $0xe8] sm:$0xff] }
 0x51c   : > { %14415 = vmatprep.subr.bf16.mxu1 %v14414_v51  ;;  %v2554_v51 = vld [vmem:[#allocation6 + $0xf10] sm:$0xff]  ;;  %v14461_v46 = vpack.c.bf16 %v3112_v45, %v3111_v44  ;;  %v3007_v45 = vld [vmem:[#allocation10 + $0x80] sm:$0xff] }
 0x51f   : > { %14417 = vmatpush1.bf16.msra.mxu1 %v14416_v0  ;;  %v14324_v0 = vpack.c.bf16 %v2554_v51, %v2552_v49  ;;  %v3114_v49 = vld [vmem:[#allocation10 + $0x100] sm:$0xff] }
 0x522   : > { %2875 = vmatmul.mubr.f32.vlgmr.msra.gmra.mrb[8].mxu1 %v17239_v32 }
 0x5da   : > { %v2198_v55 = vpop.f32.mrb[8].mxu0 }
 0x5db   : > { %v2200_v56 = vpop.f32.mrb[9].mxu0 }
 0x5dc   : > { %2212 = vmatprep.subr.mxu0 %v2200_v56  ;;  %v2561_v56 = vld [vmem:[#allocation6 + $0xf48] sm:$0xff] }
 0x5dd   : > { %2213 = vmatpush1.msra.mxu0 %v2198_v55  ;;  %v2558_v55 = vld [vmem:[#allocation6 + $0xf30] sm:$0xff] }
 0x5de   : > { %12372 = vmatmul.mubr.msk.f32.vlgmr.msra.gmra.mrb[2].mxu0 %vm1222_vm0, %v2204_v57  ;;  %2438 = vmatprep.subr.mxu0 %v17260_v13  ;;  %v2529_v13 = vld [vmem:[#allocation6 + $0xe48] sm:$0xff]  ;;  %v2563_v57 = vld [vmem:[#allocation6 + $0xf58] sm:$0xff] }
 0x5df   : > { %2282 = vmatprep.mubr.f32.mxu0 %v16532_v38  ;;  %2439 = vmatpush1.msra.mxu0 %v17258_v12  ;;  %v14296_v12 = vpack.c.bf16 %v2526_v6, %v2524_v5  ;;  %v14298_v50 = vpack.c.bf16 %v2531_v7, %v2529_v13  ;;  %v2566_v5 = vld [vmem:[#allocation6 + $0xf70] sm:$0xff]  ;;  %v2569_v6 = vld [vmem:[#allocation6 + $0xf88] sm:$0xff]  ;;  %v2571_v13 = vld [vmem:[#allocation6 + $0xf98] sm:$0xff] }
 0x5e0   : > { %14291 = vmatprep.subr.bf16.mxu0 %v14290_v58  ;;  %v14328_v58 = vpack.c.bf16 %v2558_v55, %v2556_v54  ;;  %v8614_v54 = vld [vmem:[#allocation21 + $0x10] sm:$0xff] }
 0x5e1   : > { %v3117_v55 = vld [vmem:[#allocation10 + $0x118] sm:$0xff] }
 0x5e2   : > { %12373 = vmatmul.mubr.msk.f32.gmra.mrb[4].mxu0 %vm1222_vm0, %v2205_v59  ;;  %v14330_v59 = vpack.c.bf16 %v2563_v57, %v2561_v56  ;;  %v3118_v56 = vld [vmem:[#allocation10 + $0x120] sm:$0xff] }
 0x5e3   : > { %2502 = vmatprep.mubr.f32.mxu0 %v16532_v38  ;;  %v14470_v57 = vpack.c.bf16 %v3118_v56, %v3117_v55  ;;  %v3013_v56 = vld [vmem:[#allocation10 + $0xb0] sm:$0xff] }
 0x5e6   : > { %12374 = vmatmul.mubr.msk.f32.vlgmr.msra.gmra.mrb[2].mxu0 %vm1222_vm0, %v2430_v2  ;;  %v14332_v2 = vpack.c.bf16 %v2562_v62, %v2560_v61  ;;  %v3120_v61 = vld [vmem:[#allocation10 + $0x130] sm:$0xff] }
 0x5e7   : > { %14293 = vmatpush1.bf16.msra.mxu0 %v14292_v3  ;;  %2508 = vmatprep.mubr.f32.mxu0 %v16532_v38  ;;  %v14334_v3 = vpack.c.bf16 %v2567_v1, %v2565_v63  ;;  %v12025_v63 = vld [vmem:[#allocation30] sm:$0xff] }
 0x5e8   : > { %14295 = vmatprep.subr.bf16.mxu0 %v14294_v4  ;;  %v2564_v4 = vld [vmem:[#allocation6 + $0xf60] sm:$0xff]  ;;  %v3121_v1 = vld [vmem:[#allocation10 + $0x138] sm:$0xff] }
 0x5e9   : > { %v14336_v7 = vpack.c.bf16 %v2566_v5, %v2564_v4  ;;  %v3123_v4 = vld [vmem:[#allocation10 + $0x148] sm:$0xff]  ;;  %v3124_v5 = vld [vmem:[#allocation10 + $0x150] sm:$0xff] }
 0x5ea   : > { %12375 = vmatmul.mubr.msk.f32.gmra.mrb[4].mxu0 %vm1222_vm0, %v2431_v8  ;;  %v2568_v8 = vld [vmem:[#allocation6 + $0xf80] sm:$0xff] }
 0x5eb   : > { %14297 = vmatpush1.bf16.msra.mxu0 %v14296_v12  ;;  %2648 = vmatprep.mubr.f32.mxu0 %v17243_v33  ;;  %v2542_v33 = vld [vmem:[#allocation6 + $0xeb0] sm:$0xff]  ;;  %v14338_v12 = vpack.c.bf16 %v2571_v13, %v2569_v6  ;;  %v14479_v6 = vpack.c.bf16 %v3124_v5, %v3123_v4  ;;  %v3125_v13 = vld [vmem:[#allocation10 + $0x158] sm:$0xff] }
 0x5ec   : > { %14299 = vmatprep.subr.bf16.mxu0 %v14298_v50  ;;  %v14312_v34 = vpack.c.bf16 %v2542_v33, %v2540_v29  ;;  %v2570_v50 = vld [vmem:[#allocation6 + $0xf90] sm:$0xff]  ;;  %v3412_v4 = vld [vmem:[#allocation10 + $0x198] sm:$0xff] }
 0x5ed   : > { %v14340_v11 = vpack.c.bf16 %v2570_v50, %v2568_v8  ;;  %v3127_v8 = vld [vmem:[#allocation10 + $0x168] sm:$0xff]  ;;  %v3128_v50 = vld [vmem:[#allocation10 + $0x170] sm:$0xff] }
 0x5ee   : > { %v14485_v9 = vpack.c.bf16 %v3128_v50, %v3127_v8 }
 0x5ef   : > { %14301 = vmatpush1.bf16.msra.mxu0 %v14300_v15  ;;  %v2572_v15 = vld [vmem:[#allocation6 + $0xfa0] sm:$0xff] }
 0x5f0   : > { %14303 = vmatprep.subr.bf16.mxu0 %v14302_v16  ;;  %v2574_v16 = vld [vmem:[#allocation6 + $0xfb0] sm:$0xff] }
 0x5f1   : > { %v14344_v19 = vpack.c.bf16 %v2574_v16, %v2572_v15  ;;  %v2657_v15 = vld [vmem:[#allocation2 + $0x78] sm:$0xff]  ;;  %v2991_v16 = vld [vmem:[#allocation10] sm:$0xff] }
 0x5f3   : > { %14305 = vmatpush1.bf16.msra.mxu0 %v14304_v21  ;;  %v2576_v21 = vld [vmem:[#allocation6 + $0xfc0] sm:$0xff] }
 0x5f4   : > { %14307 = vmatprep.subr.bf16.mxu0 %v14306_v22  ;;  %v2578_v22 = vld [vmem:[#allocation6 + $0xfd0] sm:$0xff] }
 0x5f5   : > { %v14348_v25 = vpack.c.bf16 %v2578_v22, %v2576_v21  ;;  %v17275_v33 = vpop.f32.mrb[8].mxu1  ;;  %v2994_v21 = vld [vmem:[#allocation10 + $0x18] sm:$0xff]  ;;  %v2883_v22 = vld [vmem:[#allocation2 + $0x88] sm:$0xff] }
 0x5f6   : > { %v17277_v30 = vpop.f32.mrb[9].mxu1 }
 0x5f7   : > { %14309 = vmatpush1.bf16.msra.mxu0 %v14308_v27  ;;  %v2580_v27 = vld [vmem:[#allocation6 + $0xfe0] sm:$0xff] }
 0x5f8   : > { %14311 = vmatprep.subr.bf16.mxu0 %v14310_v28  ;;  %v2582_v28 = vld [vmem:[#allocation6 + $0xff0] sm:$0xff] }
 0x5f9   : > { %v14352_v29 = vpack.c.bf16 %v2582_v28, %v2580_v27  ;;  %v2997_v27 = vld [vmem:[#allocation10 + $0x30] sm:$0xff]  ;;  %v2998_v28 = vld [vmem:[#allocation10 + $0x38] sm:$0xff] }
 0x5fb   : > { %14313 = vmatpush1.bf16.msra.mxu0 %v14312_v34  ;;  %v16533_v34 = vmov 0  }
 0x5fc   : > { %14315 = vmatprep.subr.bf16.mxu0 %v14314_v35  ;;  %15881 = vset.pattern.permute.xlu0 %v16533_v34  ;;  %v16534_v35 = vmov 0.0|0.0  }
 0x5fd   : > { %14454 = vmatprep.subr.bf16.mxu1 %v16534_v35  ;;  %2975 = vperm.xlu0 %15881, %v2971_v31  }
 0x5fe   : > { %15882 = vset.pattern.permute.xlu1 %v16533_v34 }
 0x5ff   : > { %14317 = vmatpush1.bf16.msra.mxu0 %v14316_v41  ;;  %v3110_v41 = vld [vmem:[#allocation10 + $0xe0] sm:$0xff] }
 0x600   : > { %14319 = vmatprep.subr.bf16.mxu0 %v14318_v42  ;;  %v14458_v42 = vpack.c.bf16 %v3110_v41, %v3109_v40  ;;  %v3004_v40 = vld [vmem:[#allocation10 + $0x68] sm:$0xff] }
 0x601   : > { %2980 = vperm.xlu0 %15881, %v2972_v37   ;;  %v3002_v37 = vld [vmem:[#allocation10 + $0x58] sm:$0xff] }
 0x603   : > { %14321 = vmatpush1.bf16.msra.mxu0 %v14320_v47  ;;  %v6540_v47 = vld [vmem:[#allocation13] sm:$0xff] }
 0x604   : > { %14323 = vmatprep.subr.bf16.mxu0 %v14322_v48  ;;  %v3113_v48 = vld [vmem:[#allocation10 + $0xf8] sm:$0xff] }
 0x605   : > { %4896 = vperm.xlu0 %15881, %v4882_v43   ;;  %v14464_v51 = vpack.c.bf16 %v3114_v49, %v3113_v48  ;;  %v3006_v43 = vld [vmem:[#allocation10 + $0x78] sm:$0xff]  ;;  %v3009_v48 = vld [vmem:[#allocation10 + $0x90] sm:$0xff] }
 0x606   : > { %v3010_v49 = vld [vmem:[#allocation10 + $0x98] sm:$0xff] }
 0x607   : > { %14325 = vmatpush1.bf16.msra.mxu0 %v14324_v0  ;;  %v3116_v0 = vld [vmem:[#allocation10 + $0x110] sm:$0xff] }
 0x608   : > { %14327 = vmatprep.subr.bf16.mxu0 %v14326_v53  ;;  %v14467_v53 = vpack.c.bf16 %v3116_v0, %v3115_v52  ;;  %v3012_v52 = vld [vmem:[#allocation10 + $0xa8] sm:$0xff] }
 0x609   : > { %6544 = vperm.xlu0 %15881, %v6540_v47  }
 0x60b   : > { %14329 = vmatpush1.bf16.msra.mxu0 %v14328_v58  ;;  %v10262_v58 = vld [vmem:[#allocation25] sm:$0xff] }
 0x60c   : > { %14331 = vmatprep.subr.bf16.mxu0 %v14330_v59  ;;  %v3119_v59 = vld [vmem:[#allocation10 + $0x128] sm:$0xff] }
 0x60d   : > { %8618 = vperm.xlu0 %15881, %v8612_v60   ;;  %v14473_v62 = vpack.c.bf16 %v3120_v61, %v3119_v59  ;;  %v3011_v60 = vld [vmem:[#allocation10 + $0xa0] sm:$0xff]  ;;  %v3131_v59 = vld [vmem:[#allocation10 + $0x188] sm:$0xf] }
 0x60e   : > { %v14449_v0 = vpack.c.bf16 %v3012_v52, %v3011_v60  ;;  %v3015_v61 = vld [vmem:[#allocation10 + $0xc0] sm:$0xf]  ;;  %v3832_v52 = vld [vmem:[#allocation10 + $0x328] sm:$0xff] }
 0x60f   : > { %14333 = vmatpush1.bf16.msra.mxu0 %v14332_v2  ;;  %v3122_v2 = vld [vmem:[#allocation10 + $0x140] sm:$0xff] }
 0x610   : > { %14335 = vmatprep.subr.bf16.mxu0 %v14334_v3  ;;  %v14476_v3 = vpack.c.bf16 %v3122_v2, %v3121_v1  ;;  %v3831_v60 = vld [vmem:[#allocation10 + $0x320] sm:$0xff] }
 0x611   : > { %8628 = vperm.xlu0 %15881, %v8614_v54   ;;  %v3130_v54 = vld [vmem:[#allocation10 + $0x180] sm:$0xff] }
 0x613   : > { %14337 = vmatpush1.bf16.msra.mxu0 %v14336_v7  ;;  %v3126_v7 = vld [vmem:[#allocation10 + $0x160] sm:$0xff] }
 0x614   : > { %14339 = vmatprep.subr.bf16.mxu0 %v14338_v12  ;;  %v14482_v12 = vpack.c.bf16 %v3126_v7, %v3125_v13 }
 0x615   : > { %10266 = vperm.xlu0 %15881, %v10262_v58  }
 0x617   : > { %14341 = vmatpush1.bf16.msra.mxu0 %v14340_v11 }
 0x618   : > { %14343 = vmatprep.subr.bf16.mxu0 %v14342_v14  ;;  %v2656_v14 = vld [vmem:[#allocation2 + $0x70] sm:$0xff] }
 0x619   : > { %12028 = vperm.xlu0 %15881, %v12025_v63  }
 0x61b   : > { %14345 = vmatpush1.bf16.msra.mxu0 %v14344_v19  ;;  %v14419_v19 = vpack.c.bf16 %v2992_v17, %v2991_v16 }
 0x61c   : > { %14347 = vmatprep.subr.bf16.mxu0 %v14346_v20  ;;  %v2993_v20 = vld [vmem:[#allocation10 + $0x10] sm:$0xff] }
 0x61d   : > { %v14422_v23 = vpack.c.bf16 %v2994_v21, %v2993_v20  ;;  %v3417_v21 = vld [vmem:[#allocation10 + $0x1c0] sm:$0xff] }
 0x61f   : > { %14349 = vmatpush1.bf16.msra.mxu0 %v14348_v25  ;;  %v2996_v25 = vld [vmem:[#allocation10 + $0x28] sm:$0xff] }
 0x620   : > { %14351 = vmatprep.subr.bf16.mxu0 %v14350_v26  ;;  %v14425_v26 = vpack.c.bf16 %v2996_v25, %v2995_v24  ;;  %v3419_v24 = vld [vmem:[#allocation10 + $0x1d0] sm:$0xff]  ;;  %v3420_v25 = vld [vmem:[#allocation10 + $0x1d8] sm:$0xff] }
 0x623   : > { %14353 = vmatpush1.bf16.msra.mxu0 %v14352_v29  ;;  %v14428_v29 = vpack.c.bf16 %v2998_v28, %v2997_v27  ;;  %v3421_v27 = vld [vmem:[#allocation10 + $0x1e0] sm:$0xff]  ;;  %v3422_v28 = vld [vmem:[#allocation10 + $0x1e8] sm:$0xff] }
 0x626   : > { %2649 = vmatmul.mubr.f32.vlgmr.msra.gmra.mrb[10].mxu0 %v17239_v32  ;;  %v14455_v32 = vpack.c.bf16 %v3108_v39, %v3107_v36  ;;  %v3001_v36 = vld [vmem:[#allocation10 + $0x50] sm:$0xff] }
 0x627   : > { %2728 = vmatprep.mubr.f32.mxu0 %v16532_v38  ;;  %v14434_v39 = vpack.c.bf16 %v3002_v37, %v3001_v36  ;;  %v3425_v36 = vld [vmem:[#allocation10 + $0x200] sm:$0xff]  ;;  %v3426_v37 = vld [vmem:[#allocation10 + $0x208] sm:$0xff] }
 0x628   : > { %14456 = vmatpush1.bf16.msra.mxu1 %v14455_v32  ;;  %v3003_v32 = vld [vmem:[#allocation10 + $0x60] sm:$0xff] }
 0x629   : > { %14457 = vmatprep.subr.bf16.mxu1 %v16534_v35  ;;  %v14437_v41 = vpack.c.bf16 %v3004_v40, %v3003_v32  ;;  %v3427_v32 = vld [vmem:[#allocation10 + $0x210] sm:$0xff]  ;;  %v3428_v40 = vld [vmem:[#allocation10 + $0x218] sm:$0xff] }
 0x62c   : > { %14459 = vmatpush1.bf16.msra.mxu1 %v14458_v42  ;;  %v3005_v42 = vld [vmem:[#allocation10 + $0x70] sm:$0xff] }
 0x62d   : > { %14460 = vmatprep.subr.bf16.mxu1 %v16534_v35  ;;  %v14440_v44 = vpack.c.bf16 %v3006_v43, %v3005_v42  ;;  %v3429_v42 = vld [vmem:[#allocation10 + $0x220] sm:$0xff]  ;;  %v3430_v43 = vld [vmem:[#allocation10 + $0x228] sm:$0xff] }
 0x630   : > { %14462 = vmatpush1.bf16.msra.mxu1 %v14461_v46  ;;  %v3008_v46 = vld [vmem:[#allocation10 + $0x88] sm:$0xff] }
 0x631   : > { %14463 = vmatprep.subr.bf16.mxu1 %v16534_v35  ;;  %v14443_v47 = vpack.c.bf16 %v3008_v46, %v3007_v45  ;;  %v3431_v45 = vld [vmem:[#allocation10 + $0x230] sm:$0xff]  ;;  %v3432_v46 = vld [vmem:[#allocation10 + $0x238] sm:$0xff] }
 0x634   : > { %14465 = vmatpush1.bf16.msra.mxu1 %v14464_v51  ;;  %v14446_v51 = vpack.c.bf16 %v3010_v49, %v3009_v48  ;;  %v3433_v48 = vld [vmem:[#allocation10 + $0x240] sm:$0xff]  ;;  %v3434_v49 = vld [vmem:[#allocation10 + $0x248] sm:$0xff] }
 0x635   : > { %14466 = vmatprep.subr.bf16.mxu1 %v16534_v35 }
 0x638   : > { %14468 = vmatpush1.bf16.msra.mxu1 %v14467_v53  ;;  %v3129_v53 = vld [vmem:[#allocation10 + $0x178] sm:$0xff] }
 0x639   : > { %14469 = vmatprep.subr.bf16.mxu1 %v16534_v35  ;;  %v14488_v55 = vpack.c.bf16 %v3130_v54, %v3129_v53  ;;  %v14579_v53 = vpack.c.bf16 %v3832_v52, %v3831_v60  ;;  %v3833_v54 = vld [vmem:[#allocation10 + $0x330] sm:$0xff]  ;;  %v4264_v52 = vld [vmem:[#allocation10 + $0x518] sm:$0xff] }
 0x63a   : > { %v4263_v60 = vld [vmem:[#allocation10 + $0x510] sm:$0xff] }
 0x63c   : > { %14471 = vmatpush1.bf16.msra.mxu1 %v14470_v57  ;;  %v3014_v57 = vld [vmem:[#allocation10 + $0xb8] sm:$0xff] }
 0x63d   : > { %14472 = vmatprep.subr.bf16.mxu1 %v16534_v35  ;;  %v14452_v58 = vpack.c.bf16 %v3014_v57, %v3013_v56  ;;  %v3835_v57 = vld [vmem:[#allocation10 + $0x340] sm:$0xff] }
 0x640   : > { %14474 = vmatpush1.bf16.msra.mxu1 %v14473_v62 }
 0x641   : > { %14475 = vmatprep.subr.bf16.mxu1 %v16534_v35 }
 0x644   : > { %14477 = vmatpush1.bf16.msra.mxu1 %v14476_v3  ;;  %v3411_v3 = vld [vmem:[#allocation10 + $0x190] sm:$0xff] }
 0x645   : > { %14478 = vmatprep.subr.bf16.mxu1 %v16534_v35 }
 0x648   : > { %14480 = vmatpush1.bf16.msra.mxu1 %v14479_v6 }
 0x649   : > { %14481 = vmatprep.subr.bf16.mxu1 %v16534_v35 }
 0x64c   : > { %14483 = vmatpush1.bf16.msra.mxu1 %v14482_v12  ;;  %v14499_v12 = vpack.c.bf16 %v3412_v4, %v3411_v3  ;;  %v3841_v4 = vld [vmem:[#allocation10 + $0x370] sm:$0xff] }
 0x64d   : > { %14484 = vmatprep.subr.bf16.mxu1 %v16534_v35 }
 0x650   : > { %14486 = vmatpush1.bf16.msra.mxu1 %v14485_v9 }
 0x651   : > { %14487 = vmatprep.subr.bf16.mxu1 %v16534_v35 }
 0x654   : > { %14489 = vmatpush1.bf16.msra.mxu1 %v14488_v55  ;;  %v3834_v55 = vld [vmem:[#allocation10 + $0x338] sm:$0xff] }
 0x655   : > { %3183 = vmatprep.subr.mxu1 %v16532_v38  ;;  %v14582_v56 = vpack.c.bf16 %v3834_v55, %v3833_v54  ;;  %v4266_v54 = vld [vmem:[#allocation10 + $0x528] sm:$0xff] }
 0x658   : > { %12383 = vmatpush1.msk.msra.mxu1 %vm3023_vm1, %v3131_v59 }
 0x659   : > { %14498 = vmatprep.subr.bf16.mxu1 %v16534_v35 }
 0x67c   : > { %v2976_v62 = vpop.permute.xlu0 %2975 }
 0x680   : > { %v2981_v6 = vpop.permute.xlu0 %2980 }
 0x6f9   : > { %v2650_v10 = vpop.f32.mrb[10].mxu0 }
 0x6fa   : > { %v2652_v11 = vpop.f32.mrb[11].mxu0 }
 0x6fb   : > { %2664 = vmatprep.subr.mxu0 %v2652_v11  ;;  %v3414_v11 = vld [vmem:[#allocation10 + $0x1a8] sm:$0xff] }
 0x6fc   : > { %2665 = vmatpush1.msra.mxu0 %v2650_v10  ;;  %v3413_v10 = vld [vmem:[#allocation10 + $0x1a0] sm:$0xff] }
 0x6fd   : > { %12376 = vmatmul.mubr.msk.f32.vlgmr.msra.gmra.mrb[2].mxu0 %vm1222_vm0, %v2656_v14  ;;  %2890 = vmatprep.subr.mxu0 %v17277_v30  ;;  %v3000_v30 = vld [vmem:[#allocation10 + $0x48] sm:$0xff]  ;;  %v14502_v16 = vpack.c.bf16 %v3414_v11, %v3413_v10  ;;  %v3846_v10 = vld [vmem:[#allocation10 + $0x398] sm:$0xff] }
 0x6fe   : > { %2734 = vmatprep.mubr.f32.mxu0 %v16532_v38  ;;  %2891 = vmatpush1.msra.mxu0 %v17275_v33  ;;  %v2999_v33 = vld [vmem:[#allocation10 + $0x40] sm:$0xff] }
 0x6ff   : > { %14418 = vmatprep.subr.bf16.mxu0 %v16534_v35  ;;  %v14431_v31 = vpack.c.bf16 %v3000_v30, %v2999_v33  ;;  %v3423_v33 = vld [vmem:[#allocation10 + $0x1f0] sm:$0xff]  ;;  %v3424_v30 = vld [vmem:[#allocation10 + $0x1f8] sm:$0xff] }
 0x701   : > { %12377 = vmatmul.mubr.msk.f32.gmra.mrb[4].mxu0 %vm1222_vm0, %v2657_v15 }
 0x702   : > { %2954 = vmatprep.mubr.f32.mxu0 %v16532_v38 }
 0x705   : > { %12378 = vmatmul.mubr.msk.f32.vlgmr.msra.gmra.mrb[2].mxu0 %vm1222_vm0, %v2882_v18  ;;  %v3415_v18 = vld [vmem:[#allocation10 + $0x1b0] sm:$0xff] }
 0x706   : > { %2960 = vmatprep.mubr.f32.mxu0 %v16532_v38  ;;  %14420 = vmatpush1.bf16.msra.mxu0 %v14419_v19  ;;  %v3416_v19 = vld [vmem:[#allocation10 + $0x1b8] sm:$0xff] }
 0x707   : > { %14421 = vmatprep.subr.bf16.mxu0 %v16534_v35  ;;  %v14505_v20 = vpack.c.bf16 %v3416_v19, %v3415_v18  ;;  %v3849_v19 = vld [vmem:[#allocation10 + $0x3b0] sm:$0xff] }
 0x709   : > { %12379 = vmatmul.mubr.msk.f32.gmra.mrb[4].mxu0 %vm1222_vm0, %v2883_v22  ;;  %v3418_v22 = vld [vmem:[#allocation10 + $0x1c8] sm:$0xff] }
 0x70a   : > { %14423 = vmatpush1.bf16.msra.mxu0 %v14422_v23  ;;  %v14508_v23 = vpack.c.bf16 %v3418_v22, %v3417_v21  ;;  %v3851_v22 = vld [vmem:[#allocation10 + $0x3c0] sm:$0xff] }
 0x70b   : > { %14424 = vmatprep.subr.bf16.mxu0 %v16534_v35 }
 0x70e   : > { %14426 = vmatpush1.bf16.msra.mxu0 %v14425_v26  ;;  %v14511_v26 = vpack.c.bf16 %v3420_v25, %v3419_v24  ;;  %v3853_v25 = vld [vmem:[#allocation10 + $0x3d0] sm:$0xff] }
 0x70f   : > { %14427 = vmatprep.subr.bf16.mxu0 %v16534_v35 }
 0x712   : > { %14429 = vmatpush1.bf16.msra.mxu0 %v14428_v29  ;;  %v14514_v29 = vpack.c.bf16 %v3422_v28, %v3421_v27  ;;  %v3211_v28 = vld [vmem:[#allocation7 + $0x20] sm:$0xff] }
 0x713   : > { %14430 = vmatprep.subr.bf16.mxu0 %v16534_v35 }
 0x716   : > { %14432 = vmatpush1.bf16.msra.mxu0 %v14431_v31  ;;  %v14517_v31 = vpack.c.bf16 %v3424_v30, %v3423_v33  ;;  %v4252_v33 = vld [vmem:[#allocation10 + $0x4b8] sm:$0xff]  ;;  %v3855_v30 = vld [vmem:[#allocation10 + $0x3e0] sm:$0xf] }
 0x717   : > { %14433 = vmatprep.subr.bf16.mxu0 %v16534_v35 }
 0x71a   : > { %14435 = vmatpush1.bf16.msra.mxu0 %v14434_v39  ;;  %v14520_v39 = vpack.c.bf16 %v3426_v37, %v3425_v36  ;;  %v4253_v36 = vld [vmem:[#allocation10 + $0x4c0] sm:$0xff]  ;;  %v4254_v37 = vld [vmem:[#allocation10 + $0x4c8] sm:$0xff] }
 0x71b   : > { %14436 = vmatprep.subr.bf16.mxu0 %v16534_v35 }
 0x71e   : > { %14438 = vmatpush1.bf16.msra.mxu0 %v14437_v41  ;;  %v14523_v41 = vpack.c.bf16 %v3428_v40, %v3427_v32  ;;  %v4255_v32 = vld [vmem:[#allocation10 + $0x4d0] sm:$0xff]  ;;  %v4256_v40 = vld [vmem:[#allocation10 + $0x4d8] sm:$0xff] }
 0x71f   : > { %14439 = vmatprep.subr.bf16.mxu0 %v16534_v35 }
 0x722   : > { %14441 = vmatpush1.bf16.msra.mxu0 %v14440_v44  ;;  %v14526_v44 = vpack.c.bf16 %v3430_v43, %v3429_v42  ;;  %v4257_v42 = vld [vmem:[#allocation10 + $0x4e0] sm:$0xff]  ;;  %v4258_v43 = vld [vmem:[#allocation10 + $0x4e8] sm:$0xff] }
 0x723   : > { %14442 = vmatprep.subr.bf16.mxu0 %v16534_v35 }
 0x726   : > { %14444 = vmatpush1.bf16.msra.mxu0 %v14443_v47  ;;  %v14529_v47 = vpack.c.bf16 %v3432_v46, %v3431_v45  ;;  %v4259_v45 = vld [vmem:[#allocation10 + $0x4f0] sm:$0xff]  ;;  %v4260_v46 = vld [vmem:[#allocation10 + $0x4f8] sm:$0xff] }
 0x727   : > { %14445 = vmatprep.subr.bf16.mxu0 %v16534_v35 }
 0x72a   : > { %14447 = vmatpush1.bf16.msra.mxu0 %v14446_v51  ;;  %v14532_v51 = vpack.c.bf16 %v3434_v49, %v3433_v48  ;;  %v4261_v48 = vld [vmem:[#allocation10 + $0x500] sm:$0xff]  ;;  %v4262_v49 = vld [vmem:[#allocation10 + $0x508] sm:$0xff] }
 0x72b   : > { %14448 = vmatprep.subr.bf16.mxu0 %v16534_v35 }
 0x72e   : > { %14450 = vmatpush1.bf16.msra.mxu0 %v14449_v0  ;;  %v3435_v0 = vld [vmem:[#allocation10 + $0x250] sm:$0xf] }
 0x72f   : > { %14451 = vmatprep.subr.bf16.mxu0 %v16534_v35 }
 0x732   : > { %14453 = vmatpush1.bf16.msra.mxu0 %v14452_v58  ;;  %v3836_v58 = vld [vmem:[#allocation10 + $0x348] sm:$0xff] }
 0x733   : > { %3075 = vmatprep.subr.mxu0 %v16532_v38  ;;  %v14585_v59 = vpack.c.bf16 %v3836_v58, %v3835_v57  ;;  %v4268_v57 = vld [vmem:[#allocation10 + $0x538] sm:$0xff] }
 0x736   : > { %12380 = vmatpush1.msk.msra.mxu0 %vm3023_vm1, %v3015_v61  ;;  %v3837_v61 = vld [vmem:[#allocation10 + $0x350] sm:$0xff] }
 0x7d8   : > { %v2956_v63 = vpop.f32.mrb[2].mxu0 }
 0x7d9   : > { %v2983_v1 = vadd.f32 %v2976_v62, %v2956_v63  ;;  %v2958_v2 = vpop.f32.mrb[3].mxu0 }
 0x7da   : > { %v2984_v5 = vadd.f32 %v2976_v62, %v2958_v2  ;;  %v3838_v62 = vld [vmem:[#allocation10 + $0x358] sm:$0xff]  ;;  %v3840_v2 = vld [vmem:[#allocation10 + $0x368] sm:$0xff] }
 0x7db   : > { %v17321_v8 = vmax.f32 %v2983_v1, 0.0  ;;  %v14588_v63 = vpack.c.bf16 %v3838_v62, %v3837_v61  ;;  %v3839_v1 = vld [vmem:[#allocation10 + $0x360] sm:$0xff]  ;;  %v4270_v61 = vld [vmem:[#allocation10 + $0x548] sm:$0xff] }
 0x7dc   : > { %v17319_v13 = vmax.f32 %v2984_v5, 0.0  ;;  %v2962_v7 = vpop.f32.mrb[4].mxu0  ;;  %v14591_v3 = vpack.c.bf16 %v3840_v2, %v3839_v1  ;;  %v3842_v5 = vld [vmem:[#allocation10 + $0x378] sm:$0xff] }
 0x7dd   : > { %v2985_v50 = vadd.f32 %v2981_v6, %v2962_v7  ;;  %v2964_v9 = vpop.f32.mrb[5].mxu0  ;;  %v3843_v7 = vld [vmem:[#allocation10 + $0x380] sm:$0xff]  ;;  %v4272_v1 = vld [vmem:[#allocation10 + $0x558] sm:$0xff] }
 0x7de   : > { %v2986_v14 = vadd.f32 %v2981_v6, %v2964_v9  ;;  %12381 = vmatprep.mubr.msk.f32.mxu0 %vm3016_vm2, %v17319_v13  ;;  %12384 = vmatprep.mubr.msk.f32.mxu1 %vm3016_vm2, %v17319_v13  ;;  %v14594_v6 = vpack.c.bf16 %v3842_v5, %v3841_v4  ;;  %v3845_v9 = vld [vmem:[#allocation10 + $0x390] sm:$0xff]  ;;  %v4274_v4 = vld [vmem:[#allocation10 + $0x568] sm:$0xff] }
 0x7df   : > { %3092 = vmatmul.mubr.f32.vlgmr.msra.gmra.mrb[12].mxu0 %v17321_v8  ;;  %3200 = vmatmul.mubr.f32.vlgmr.msra.gmra.mrb[10].mxu1 %v17321_v8  ;;  %v17331_v17 = vmax.f32 %v2985_v50, 0.0  ;;  %v14600_v11 = vpack.c.bf16 %v3846_v10, %v3845_v9  ;;  %v4673_v9 = vld [vmem:[#allocation10 + $0x650] sm:$0xff]  ;;  %v4674_v10 = vld [vmem:[#allocation10 + $0x658] sm:$0xff] }
 0x7e0   : > { %v17329_v15 = vmax.f32 %v2986_v14, 0.0  ;;  %14500 = vmatpush1.bf16.msra.mxu1 %v14499_v12  ;;  %v3844_v12 = vld [vmem:[#allocation10 + $0x388] sm:$0xff]  ;;  %v3847_v14 = vld [vmem:[#allocation10 + $0x3a0] sm:$0xff] }
 0x7e1   : > { %14501 = vmatprep.subr.bf16.mxu1 %v16534_v35  ;;  %v14597_v50 = vpack.c.bf16 %v3844_v12, %v3843_v7  ;;  %v4672_v7 = vld [vmem:[#allocation10 + $0x648] sm:$0xff]  ;;  %v4275_v12 = vld [vmem:[#allocation10 + $0x570] sm:$0xf] }
 0x7e2   : > { %12382 = vmatprep.mubr.msk.f32.mxu0 %vm3016_vm2, %v17329_v15  ;;  %12385 = vmatprep.mubr.msk.f32.mxu1 %vm3016_vm2, %v17329_v15 }
 0x7e3   : > { %3097 = vmatmul.mubr.f32.gmra.mrb[14].mxu0 %v17331_v17  ;;  %3205 = vmatmul.mubr.f32.gmra.mrb[12].mxu1 %v17331_v17 }
 0x7e4   : > { %14503 = vmatpush1.bf16.msra.mxu1 %v14502_v16  ;;  %12395 = vmatprep.mubr.msk.f32.mxu1 %vm3016_vm2, %v17319_v13  ;;  %v3848_v16 = vld [vmem:[#allocation10 + $0x3a8] sm:$0xff] }
 0x7e5   : > { %14504 = vmatprep.subr.bf16.mxu1 %v16534_v35  ;;  %v14603_v18 = vpack.c.bf16 %v3848_v16, %v3847_v14  ;;  %13115 = vmatprep.mubr.msk.f32.mxu0 %vm3215_vm3, %v3211_v28  ;;  %v4675_v14 = vld [vmem:[#allocation10 + $0x660] sm:$0xff]  ;;  %v4676_v16 = vld [vmem:[#allocation10 + $0x668] sm:$0xff] }
 0x7e6   : > { %v4683_v28 = vld [vmem:[#allocation10 + $0x6a0] sm:$0xff] }
 0x7e8   : > { %14506 = vmatpush1.bf16.msra.mxu1 %v14505_v20  ;;  %v3850_v20 = vld [vmem:[#allocation10 + $0x3b8] sm:$0xff] }
 0x7e9   : > { %14507 = vmatprep.subr.bf16.mxu1 %v16534_v35  ;;  %v14606_v21 = vpack.c.bf16 %v3850_v20, %v3849_v19  ;;  %v4677_v19 = vld [vmem:[#allocation10 + $0x670] sm:$0xff]  ;;  %v4678_v20 = vld [vmem:[#allocation10 + $0x678] sm:$0xff] }
 0x7ec   : > { %14509 = vmatpush1.bf16.msra.mxu1 %v14508_v23  ;;  %v3852_v23 = vld [vmem:[#allocation10 + $0x3c8] sm:$0xff] }
 0x7ed   : > { %14510 = vmatprep.subr.bf16.mxu1 %v16534_v35  ;;  %v14609_v24 = vpack.c.bf16 %v3852_v23, %v3851_v22  ;;  %v4679_v22 = vld [vmem:[#allocation10 + $0x680] sm:$0xff]  ;;  %v4680_v23 = vld [vmem:[#allocation10 + $0x688] sm:$0xff] }
 0x7f0   : > { %14512 = vmatpush1.bf16.msra.mxu1 %v14511_v26  ;;  %v3854_v26 = vld [vmem:[#allocation10 + $0x3d8] sm:$0xff] }
 0x7f1   : > { %14513 = vmatprep.subr.bf16.mxu1 %v16534_v35  ;;  %v14612_v27 = vpack.c.bf16 %v3854_v26, %v3853_v25  ;;  %v4681_v25 = vld [vmem:[#allocation10 + $0x690] sm:$0xff]  ;;  %v4682_v26 = vld [vmem:[#allocation10 + $0x698] sm:$0xff] }
 0x7f4   : > { %14515 = vmatpush1.bf16.msra.mxu1 %v14514_v29  ;;  %v4251_v29 = vld [vmem:[#allocation10 + $0x4b0] sm:$0xff] }
 0x7f5   : > { %14516 = vmatprep.subr.bf16.mxu1 %v16534_v35 }
 0x7f8   : > { %14518 = vmatpush1.bf16.msra.mxu1 %v14517_v31  ;;  %v14659_v31 = vpack.c.bf16 %v4252_v33, %v4251_v29  ;;  %v4684_v29 = vld [vmem:[#allocation10 + $0x6a8] sm:$0xff] }
 0x7f9   : > { %14519 = vmatprep.subr.bf16.mxu1 %v16534_v35  ;;  %v14757_v33 = vpack.c.bf16 %v4684_v29, %v4683_v28  ;;  %v3629_v28 = vld [vmem:[#allocation10 + $0x298] sm:$0xff]  ;;  %v3630_v29 = vld [vmem:[#allocation10 + $0x2a0] sm:$0xff] }
 0x7fc   : > { %14521 = vmatpush1.bf16.msra.mxu1 %v14520_v39  ;;  %v14662_v39 = vpack.c.bf16 %v4254_v37, %v4253_v36  ;;  %v4687_v37 = vld [vmem:[#allocation10 + $0x6c0] sm:$0xff] }
 0x7fd   : > { %14522 = vmatprep.subr.bf16.mxu1 %v16534_v35 }
 0x800   : > { %14524 = vmatpush1.bf16.msra.mxu1 %v14523_v41  ;;  %v14665_v41 = vpack.c.bf16 %v4256_v40, %v4255_v32  ;;  %v4689_v40 = vld [vmem:[#allocation10 + $0x6d0] sm:$0xff] }
 0x801   : > { %14525 = vmatprep.subr.bf16.mxu1 %v16534_v35 }
 0x804   : > { %14527 = vmatpush1.bf16.msra.mxu1 %v14526_v44  ;;  %v14668_v44 = vpack.c.bf16 %v4258_v43, %v4257_v42  ;;  %v4691_v43 = vld [vmem:[#allocation10 + $0x6e0] sm:$0xff] }
 0x805   : > { %14528 = vmatprep.subr.bf16.mxu1 %v16534_v35 }
 0x808   : > { %14530 = vmatpush1.bf16.msra.mxu1 %v14529_v47  ;;  %v14671_v47 = vpack.c.bf16 %v4260_v46, %v4259_v45  ;;  %v4693_v46 = vld [vmem:[#allocation10 + $0x6f0] sm:$0xff] }
 0x809   : > { %14531 = vmatprep.subr.bf16.mxu1 %v16534_v35 }
 0x80c   : > { %14533 = vmatpush1.bf16.msra.mxu1 %v14532_v51  ;;  %v14674_v51 = vpack.c.bf16 %v4262_v49, %v4261_v48  ;;  %v4695_v49 = vld [vmem:[#allocation10 + $0x700] sm:$0xf] }
 0x80d   : > { %3487 = vmatprep.subr.mxu1 %v16532_v38 }
 0x810   : > { %12394 = vmatpush1.msk.msra.mxu1 %vm3023_vm1, %v3435_v0  ;;  %v14677_v0 = vpack.c.bf16 %v4264_v52, %v4263_v60 }
 0x811   : > { %3504 = vmatmul.mubr.f32.vlgmr.msra.gmra.mrb[14].mxu1 %v17321_v8  ;;  %14578 = vmatprep.subr.bf16.mxu1 %v16534_v35 }
 0x812   : > { %12396 = vmatprep.mubr.msk.f32.mxu1 %vm3016_vm2, %v17329_v15  ;;  %14580 = vmatpush1.bf16.msra.mxu1 %v14579_v53  ;;  %v4265_v53 = vld [vmem:[#allocation10 + $0x520] sm:$0xff] }
 0x813   : > { %14581 = vmatprep.subr.bf16.mxu1 %v16534_v35  ;;  %v14680_v55 = vpack.c.bf16 %v4266_v54, %v4265_v53 }
 0x815   : > { %3509 = vmatmul.mubr.f32.gmra.mrb[16].mxu1 %v17331_v17 }
 0x816   : > { %14583 = vmatpush1.bf16.msra.mxu1 %v14582_v56  ;;  %12409 = vmatprep.mubr.msk.f32.mxu1 %vm3016_vm2, %v17319_v13  ;;  %v4267_v56 = vld [vmem:[#allocation10 + $0x530] sm:$0xff] }
 0x817   : > { %14584 = vmatprep.subr.bf16.mxu1 %v16534_v35  ;;  %v14683_v58 = vpack.c.bf16 %v4268_v57, %v4267_v56 }
 0x81a   : > { %14586 = vmatpush1.bf16.msra.mxu1 %v14585_v59  ;;  %v4269_v59 = vld [vmem:[#allocation10 + $0x540] sm:$0xff] }
 0x81b   : > { %14587 = vmatprep.subr.bf16.mxu1 %v16534_v35  ;;  %v14686_v62 = vpack.c.bf16 %v4270_v61, %v4269_v59  ;;  %v3212_v59 = vld [vmem:[#allocation7 + $0x28] sm:$0xff]  ;;  %v3213_v61 = vld [vmem:[#allocation7 + $0x30] sm:$0xff] }
 0x81e   : > { %14589 = vmatpush1.bf16.msra.mxu1 %v14588_v63  ;;  %v4271_v63 = vld [vmem:[#allocation10 + $0x550] sm:$0xff] }
 0x81f   : > { %14590 = vmatprep.subr.bf16.mxu1 %v16534_v35  ;;  %v14689_v2 = vpack.c.bf16 %v4272_v1, %v4271_v63  ;;  %v3102_v63 = vld [vmem:[#allocation7] sm:$0xff]  ;;  %v3103_v1 = vld [vmem:[#allocation7 + $0x8] sm:$0xff] }
 0x822   : > { %14592 = vmatpush1.bf16.msra.mxu1 %v14591_v3  ;;  %v4273_v3 = vld [vmem:[#allocation10 + $0x560] sm:$0xff] }
 0x823   : > { %14593 = vmatprep.subr.bf16.mxu1 %v16534_v35  ;;  %v14692_v5 = vpack.c.bf16 %v4274_v4, %v4273_v3  ;;  %v3105_v3 = vld [vmem:[#allocation7 + $0x18] sm:$0xff]  ;;  %v3515_v4 = vld [vmem:[#allocation7 + $0x40] sm:$0xff] }
 0x826   : > { %14595 = vmatpush1.bf16.msra.mxu1 %v14594_v6  ;;  %v4671_v6 = vld [vmem:[#allocation10 + $0x640] sm:$0xff] }
 0x827   : > { %14596 = vmatprep.subr.bf16.mxu1 %v16534_v35 }
 0x82a   : > { %14598 = vmatpush1.bf16.msra.mxu1 %v14597_v50  ;;  %v14739_v50 = vpack.c.bf16 %v4672_v7, %v4671_v6 }
 0x82b   : > { %14599 = vmatprep.subr.bf16.mxu1 %v16534_v35 }
 0x82e   : > { %14601 = vmatpush1.bf16.msra.mxu1 %v14600_v11  ;;  %v14742_v11 = vpack.c.bf16 %v4674_v10, %v4673_v9  ;;  %v3621_v9 = vld [vmem:[#allocation10 + $0x258] sm:$0xff]  ;;  %v3622_v10 = vld [vmem:[#allocation10 + $0x260] sm:$0xff] }
 0x82f   : > { %14602 = vmatprep.subr.bf16.mxu1 %v16534_v35 }
 0x832   : > { %14604 = vmatpush1.bf16.msra.mxu1 %v14603_v18  ;;  %v14745_v18 = vpack.c.bf16 %v4676_v16, %v4675_v14  ;;  %v14539_v14 = vpack.c.bf16 %v3622_v10, %v3621_v9  ;;  %v3517_v16 = vld [vmem:[#allocation7 + $0x50] sm:$0xff] }
 0x833   : > { %14605 = vmatprep.subr.bf16.mxu1 %v16534_v35 }
 0x836   : > { %14607 = vmatpush1.bf16.msra.mxu1 %v14606_v21  ;;  %v14748_v21 = vpack.c.bf16 %v4678_v20, %v4677_v19  ;;  %v3624_v19 = vld [vmem:[#allocation10 + $0x270] sm:$0xff]  ;;  %v3518_v20 = vld [vmem:[#allocation7 + $0x58] sm:$0xff] }
 0x837   : > { %14608 = vmatprep.subr.bf16.mxu1 %v16534_v35 }
 0x83a   : > { %14610 = vmatpush1.bf16.msra.mxu1 %v14609_v24  ;;  %v14751_v24 = vpack.c.bf16 %v4680_v23, %v4679_v22  ;;  %v3625_v22 = vld [vmem:[#allocation10 + $0x278] sm:$0xff]  ;;  %v3626_v23 = vld [vmem:[#allocation10 + $0x280] sm:$0xff] }
 0x83b   : > { %14611 = vmatprep.subr.bf16.mxu1 %v16534_v35 }
 0x83e   : > { %14613 = vmatpush1.bf16.msra.mxu1 %v14612_v27  ;;  %v14754_v27 = vpack.c.bf16 %v4682_v26, %v4681_v25  ;;  %v3627_v25 = vld [vmem:[#allocation10 + $0x288] sm:$0xff]  ;;  %v3628_v26 = vld [vmem:[#allocation10 + $0x290] sm:$0xff] }
 0x83f   : > { %3907 = vmatprep.subr.mxu1 %v16532_v38 }
 0x842   : > { %12408 = vmatpush1.msk.msra.mxu1 %vm3023_vm1, %v3855_v30  ;;  %v4685_v30 = vld [vmem:[#allocation10 + $0x6b0] sm:$0xff] }
 0x843   : > { %3924 = vmatmul.mubr.f32.vlgmr.msra.gmra.mrb[18].mxu1 %v17321_v8  ;;  %14658 = vmatprep.subr.bf16.mxu1 %v16534_v35 }
 0x844   : > { %12410 = vmatprep.mubr.msk.f32.mxu1 %vm3016_vm2, %v17329_v15  ;;  %14660 = vmatpush1.bf16.msra.mxu1 %v14659_v31  ;;  %v4686_v31 = vld [vmem:[#allocation10 + $0x6b8] sm:$0xff] }
 0x845   : > { %14661 = vmatprep.subr.bf16.mxu1 %v16534_v35  ;;  %v14760_v36 = vpack.c.bf16 %v4686_v31, %v4685_v30  ;;  %v3631_v30 = vld [vmem:[#allocation10 + $0x2a8] sm:$0xff]  ;;  %v3632_v31 = vld [vmem:[#allocation10 + $0x2b0] sm:$0xff] }
 0x847   : > { %3929 = vmatmul.mubr.f32.gmra.mrb[20].mxu1 %v17331_v17 }
 0x848   : > { %14663 = vmatpush1.bf16.msra.mxu1 %v14662_v39  ;;  %12423 = vmatprep.mubr.msk.f32.mxu1 %vm3016_vm2, %v17319_v13  ;;  %v4688_v39 = vld [vmem:[#allocation10 + $0x6c8] sm:$0xff] }
 0x849   : > { %14664 = vmatprep.subr.bf16.mxu1 %v16534_v35  ;;  %v14763_v32 = vpack.c.bf16 %v4688_v39, %v4687_v37  ;;  %v3633_v37 = vld [vmem:[#allocation10 + $0x2b8] sm:$0xff]  ;;  %v3634_v39 = vld [vmem:[#allocation10 + $0x2c0] sm:$0xff] }
 0x84c   : > { %14666 = vmatpush1.bf16.msra.mxu1 %v14665_v41  ;;  %v4690_v41 = vld [vmem:[#allocation10 + $0x6d8] sm:$0xff] }
 0x84d   : > { %14667 = vmatprep.subr.bf16.mxu1 %v16534_v35  ;;  %v14766_v42 = vpack.c.bf16 %v4690_v41, %v4689_v40  ;;  %v3635_v40 = vld [vmem:[#allocation10 + $0x2c8] sm:$0xff]  ;;  %v3636_v41 = vld [vmem:[#allocation10 + $0x2d0] sm:$0xff] }
 0x850   : > { %14669 = vmatpush1.bf16.msra.mxu1 %v14668_v44  ;;  %v4692_v44 = vld [vmem:[#allocation10 + $0x6e8] sm:$0xff] }
 0x851   : > { %14670 = vmatprep.subr.bf16.mxu1 %v16534_v35  ;;  %v14769_v45 = vpack.c.bf16 %v4692_v44, %v4691_v43  ;;  %v3637_v43 = vld [vmem:[#allocation10 + $0x2d8] sm:$0xff]  ;;  %v3638_v44 = vld [vmem:[#allocation10 + $0x2e0] sm:$0xff] }
 0x854   : > { %14672 = vmatpush1.bf16.msra.mxu1 %v14671_v47  ;;  %v4694_v47 = vld [vmem:[#allocation10 + $0x6f8] sm:$0xff] }
 0x855   : > { %14673 = vmatprep.subr.bf16.mxu1 %v16534_v35  ;;  %v14772_v48 = vpack.c.bf16 %v4694_v47, %v4693_v46  ;;  %v3639_v46 = vld [vmem:[#allocation10 + $0x2e8] sm:$0xff]  ;;  %v3640_v47 = vld [vmem:[#allocation10 + $0x2f0] sm:$0xff] }
 0x858   : > { %14675 = vmatpush1.bf16.msra.mxu1 %v14674_v51 }
 0x859   : > { %14676 = vmatprep.subr.bf16.mxu1 %v16534_v35 }
 0x85c   : > { %14678 = vmatpush1.bf16.msra.mxu1 %v14677_v0 }
 0x85d   : > { %14679 = vmatprep.subr.bf16.mxu1 %v16534_v35 }
 0x860   : > { %14681 = vmatpush1.bf16.msra.mxu1 %v14680_v55 }
 0x861   : > { %14682 = vmatprep.subr.bf16.mxu1 %v16534_v35 }
 0x864   : > { %14684 = vmatpush1.bf16.msra.mxu1 %v14683_v58 }
 0x865   : > { %14685 = vmatprep.subr.bf16.mxu1 %v16534_v35 }
 0x868   : > { %14687 = vmatpush1.bf16.msra.mxu1 %v14686_v62  ;;  %v3214_v62 = vld [vmem:[#allocation7 + $0x38] sm:$0xff] }
 0x869   : > { %14688 = vmatprep.subr.bf16.mxu1 %v16534_v35 }
 0x86c   : > { %14690 = vmatpush1.bf16.msra.mxu1 %v14689_v2  ;;  %v3104_v2 = vld [vmem:[#allocation7 + $0x10] sm:$0xff] }
 0x86d   : > { %14691 = vmatprep.subr.bf16.mxu1 %v16534_v35 }
 0x870   : > { %14693 = vmatpush1.bf16.msra.mxu1 %v14692_v5 }
 0x871   : > { %4327 = vmatprep.subr.mxu1 %v16532_v38 }
 0x874   : > { %12422 = vmatpush1.msk.msra.mxu1 %vm3023_vm1, %v4275_v12 }
 0x875   : > { %4344 = vmatmul.mubr.f32.vlgmr.msra.gmra.mrb[22].mxu1 %v17321_v8  ;;  %14738 = vmatprep.subr.bf16.mxu1 %v16534_v35 }
 0x876   : > { %12424 = vmatprep.mubr.msk.f32.mxu1 %vm3016_vm2, %v17329_v15  ;;  %14740 = vmatpush1.bf16.msra.mxu1 %v14739_v50 }
 0x877   : > { %14741 = vmatprep.subr.bf16.mxu1 %v16534_v35 }
 0x879   : > { %4349 = vmatmul.mubr.f32.gmra.mrb[24].mxu1 %v17331_v17 }
 0x87a   : > { %14743 = vmatpush1.bf16.msra.mxu1 %v14742_v11  ;;  %12437 = vmatprep.mubr.msk.f32.mxu1 %vm3016_vm2, %v17319_v13  ;;  %v3516_v11 = vld [vmem:[#allocation7 + $0x48] sm:$0xff] }
 0x87b   : > { %14744 = vmatprep.subr.bf16.mxu1 %v16534_v35 }
 0x87e   : > { %14746 = vmatpush1.bf16.msra.mxu1 %v14745_v18  ;;  %v3623_v18 = vld [vmem:[#allocation10 + $0x268] sm:$0xff] }
 0x87f   : > { %14747 = vmatprep.subr.bf16.mxu1 %v16534_v35 }
 0x882   : > { %14749 = vmatpush1.bf16.msra.mxu1 %v14748_v21  ;;  %v14542_v21 = vpack.c.bf16 %v3624_v19, %v3623_v18  ;;  %v3727_v18 = vld [vmem:[#allocation7 + $0x70] sm:$0xff]  ;;  %v3728_v19 = vld [vmem:[#allocation7 + $0x78] sm:$0xff] }
 0x883   : > { %14750 = vmatprep.subr.bf16.mxu1 %v16534_v35 }
 0x886   : > { %14752 = vmatpush1.bf16.msra.mxu1 %v14751_v24  ;;  %v14545_v24 = vpack.c.bf16 %v3626_v23, %v3625_v22  ;;  %v4042_v22 = vld [vmem:[#allocation10 + $0x3f0] sm:$0xff]  ;;  %v3936_v23 = vld [vmem:[#allocation7 + $0x88] sm:$0xff] }
 0x887   : > { %14753 = vmatprep.subr.bf16.mxu1 %v16534_v35 }
 0x88a   : > { %14755 = vmatpush1.bf16.msra.mxu1 %v14754_v27  ;;  %v14548_v27 = vpack.c.bf16 %v3628_v26, %v3627_v25  ;;  %v3937_v25 = vld [vmem:[#allocation7 + $0x90] sm:$0xff]  ;;  %v4043_v26 = vld [vmem:[#allocation10 + $0x3f8] sm:$0xff] }
 0x88b   : > { %14756 = vmatprep.subr.bf16.mxu1 %v16534_v35 }
 0x88e   : > { %14758 = vmatpush1.bf16.msra.mxu1 %v14757_v33  ;;  %v14551_v33 = vpack.c.bf16 %v3630_v29, %v3629_v28  ;;  %v3938_v28 = vld [vmem:[#allocation7 + $0x98] sm:$0xff] }
 0x88f   : > { %14759 = vmatprep.subr.bf16.mxu1 %v16534_v35 }
 0x892   : > { %14761 = vmatpush1.bf16.msra.mxu1 %v14760_v36  ;;  %v14554_v36 = vpack.c.bf16 %v3632_v31, %v3631_v30  ;;  %v4046_v30 = vld [vmem:[#allocation10 + $0x410] sm:$0xff] }
 0x893   : > { %14762 = vmatprep.subr.bf16.mxu1 %v16534_v35 }
 0x896   : > { %14764 = vmatpush1.bf16.msra.mxu1 %v14763_v32  ;;  %v14557_v32 = vpack.c.bf16 %v3634_v39, %v3633_v37  ;;  %v4048_v37 = vld [vmem:[#allocation10 + $0x420] sm:$0xff] }
 0x897   : > { %14765 = vmatprep.subr.bf16.mxu1 %v16534_v35 }
 0x89a   : > { %14767 = vmatpush1.bf16.msra.mxu1 %v14766_v42  ;;  %v14560_v42 = vpack.c.bf16 %v3636_v41, %v3635_v40  ;;  %v4050_v40 = vld [vmem:[#allocation10 + $0x430] sm:$0xff] }
 0x89b   : > { %14768 = vmatprep.subr.bf16.mxu1 %v16534_v35 }
 0x89e   : > { %14770 = vmatpush1.bf16.msra.mxu1 %v14769_v45  ;;  %v14563_v45 = vpack.c.bf16 %v3638_v44, %v3637_v43  ;;  %v4052_v43 = vld [vmem:[#allocation10 + $0x440] sm:$0xff] }
 0x89f   : > { %14771 = vmatprep.subr.bf16.mxu1 %v16534_v35 }
 0x8a2   : > { %14773 = vmatpush1.bf16.msra.mxu1 %v14772_v48  ;;  %v14566_v48 = vpack.c.bf16 %v3640_v47, %v3639_v46  ;;  %v4054_v46 = vld [vmem:[#allocation10 + $0x450] sm:$0xff] }
 0x8a3   : > { %4747 = vmatprep.subr.mxu1 %v16532_v38 }
 0x8a6   : > { %12436 = vmatpush1.msk.msra.mxu1 %vm3023_vm1, %v4695_v49  ;;  %v3641_v49 = vld [vmem:[#allocation10 + $0x2f8] sm:$0xff] }
 0x8a7   : > { %4764 = vmatmul.mubr.f32.vlgmr.msra.gmra.mrb[26].mxu1 %v17321_v8 }
 0x8a8   : > { %12438 = vmatprep.mubr.msk.f32.mxu1 %vm3016_vm2, %v17329_v15 }
 0x8ab   : > { %4769 = vmatmul.mubr.f32.gmra.mrb[28].mxu1 %v17331_v17 }
 0x8b2   : > { %v3093_v51 = vpop.f32.mrb[12].mxu0  ;;  %v3201_v60 = vpop.f32.mrb[10].mxu1 }
 0x8b3   : > { %v3095_v52 = vpop.f32.mrb[13].mxu0  ;;  %v3203_v0 = vpop.f32.mrb[11].mxu1 }
 0x8b4   : > { %v3643_v52 = vld [vmem:[#allocation10 + $0x308] sm:$0xff]  ;;  %v3644_v0 = vld [vmem:[#allocation10 + $0x310] sm:$0xff] }
 0x8b6   : > { %v3098_v53 = vpop.f32.mrb[14].mxu0  ;;  %v3206_v54 = vpop.f32.mrb[12].mxu1 }
 0x8b7   : > { %v14494_v55 = vpack.c.bf16 %v3098_v53, %v3093_v51  ;;  %v14490_v56 = vpack.c.bf16 %v3206_v54, %v3201_v60  ;;  %v3100_v57 = vpop.f32.mrb[15].mxu0  ;;  %v3208_v58 = vpop.f32.mrb[13].mxu1  ;;  %v3642_v51 = vld [vmem:[#allocation10 + $0x300] sm:$0xff] }
 0x8b8   : > { %v14569_v60 = vpack.c.bf16 %v3642_v51, %v3641_v49  ;;  %v4056_v49 = vld [vmem:[#allocation10 + $0x460] sm:$0xff] }
 0x8b9   : > { %14491 = vmatprep.subr.bf16.mxu0 %v14490_v56 }
 0x8ba   : > { %14493 = vmatpush3.bf16.msra.mxu0 %v14490_v56 }
 0x8bb   : > { %14495 = vmatprep.subr.bf16.mxu0 %v14494_v55 }
 0x8bd   : > { %13116 = vmatmul.mubr.msk.f32.vlgmr.msra.gmra.mrb[16].mxu0 %vm3215_vm3, %v3212_v59  ;;  %v3645_v59 = vld [vmem:[#allocation10 + $0x318] sm:$0xf] }
 0x8be   : > { %14497 = vmatpush3.bf16.msra.mxu0 %v14494_v55  ;;  %13118 = vmatprep.mubr.msk.f32.mxu0 %vm3215_vm3, %v3213_v61  ;;  %v14572_v55 = vpack.c.bf16 %v3644_v0, %v3643_v52  ;;  %v4058_v52 = vld [vmem:[#allocation10 + $0x470] sm:$0xff] }
 0x8c1   : > { %13119 = vmatmul.mubr.msk.f32.gmra.mrb[18].mxu0 %vm3215_vm3, %v3214_v62 }
 0x8c2   : > { %13125 = vmatprep.mubr.msk.f32.mxu0 %vm3215_vm3, %v3102_v63 }
 0x8c5   : > { %13126 = vmatmul.mubr.msk.f32.vlgmr.msra.gmra.mrb[16].mxu0 %vm3215_vm3, %v3103_v1 }
 0x8c6   : > { %13128 = vmatprep.mubr.msk.f32.mxu0 %vm3215_vm3, %v3104_v2 }
 0x8c9   : > { %13129 = vmatmul.mubr.msk.f32.gmra.mrb[18].mxu0 %vm3215_vm3, %v3105_v3 }
 0x8ca   : > { %13135 = vmatprep.mubr.msk.f32.mxu0 %vm3215_vm3, %v3515_v4 }
 0x8e4   : > { %v3505_v5 = vpop.f32.mrb[14].mxu1 }
 0x8e5   : > { %v3507_v6 = vpop.f32.mrb[15].mxu1 }
 0x8e8   : > { %v3510_v7 = vpop.f32.mrb[16].mxu1 }
 0x8e9   : > { %v14534_v12 = vpack.c.bf16 %v3510_v7, %v3505_v5  ;;  %v3512_v50 = vpop.f32.mrb[17].mxu1  ;;  %v3725_v5 = vld [vmem:[#allocation7 + $0x60] sm:$0xff] }
 0x8eb   : > { %14535 = vmatprep.subr.bf16.mxu0 %v14534_v12 }
 0x8ec   : > { %14537 = vmatpush3.bf16.msra.mxu0 %v14534_v12 }
 0x8ed   : > { %14538 = vmatprep.subr.bf16.mxu0 %v16534_v35 }
 0x8ef   : > { %13136 = vmatmul.mubr.msk.f32.vlgmr.msra.gmra.mrb[16].mxu0 %vm3215_vm3, %v3516_v11 }
 0x8f0   : > { %14540 = vmatpush1.bf16.msra.mxu0 %v14539_v14  ;;  %13138 = vmatprep.mubr.msk.f32.mxu0 %vm3215_vm3, %v3517_v16  ;;  %v3726_v16 = vld [vmem:[#allocation7 + $0x68] sm:$0xff] }
 0x8f1   : > { %14541 = vmatprep.subr.bf16.mxu0 %v16534_v35 }
 0x8f3   : > { %13139 = vmatmul.mubr.msk.f32.gmra.mrb[18].mxu0 %vm3215_vm3, %v3518_v20  ;;  %v3935_v20 = vld [vmem:[#allocation7 + $0x80] sm:$0xff] }
 0x8f4   : > { %14543 = vmatpush1.bf16.msra.mxu0 %v14542_v21  ;;  %12402 = vmatprep.mubr.msk.f32.mxu0 %vm3016_vm2, %v17319_v13  ;;  %v4041_v21 = vld [vmem:[#allocation10 + $0x3e8] sm:$0xff] }
 0x8f5   : > { %14544 = vmatprep.subr.bf16.mxu0 %v16534_v35 }
 0x8f8   : > { %14546 = vmatpush1.bf16.msra.mxu0 %v14545_v24  ;;  %v14619_v24 = vpack.c.bf16 %v4042_v22, %v4041_v21  ;;  %v4463_v21 = vld [vmem:[#allocation10 + $0x588] sm:$0xff]  ;;  %v4464_v22 = vld [vmem:[#allocation10 + $0x590] sm:$0xff] }
 0x8f9   : > { %14547 = vmatprep.subr.bf16.mxu0 %v16534_v35 }
 0x8fc   : > { %14549 = vmatpush1.bf16.msra.mxu0 %v14548_v27  ;;  %v4044_v27 = vld [vmem:[#allocation10 + $0x400] sm:$0xff] }
 0x8fd   : > { %14550 = vmatprep.subr.bf16.mxu0 %v16534_v35  ;;  %v14622_v29 = vpack.c.bf16 %v4044_v27, %v4043_v26  ;;  %v4467_v27 = vld [vmem:[#allocation10 + $0x5a8] sm:$0xff] }
 0x900   : > { %14552 = vmatpush1.bf16.msra.mxu0 %v14551_v33  ;;  %v4045_v33 = vld [vmem:[#allocation10 + $0x408] sm:$0xff] }
 0x901   : > { %14553 = vmatprep.subr.bf16.mxu0 %v16534_v35  ;;  %v14625_v31 = vpack.c.bf16 %v4046_v30, %v4045_v33  ;;  %v4469_v33 = vld [vmem:[#allocation10 + $0x5b8] sm:$0xff]  ;;  %v4470_v30 = vld [vmem:[#allocation10 + $0x5c0] sm:$0xff] }
 0x904   : > { %14555 = vmatpush1.bf16.msra.mxu0 %v14554_v36  ;;  %v4047_v36 = vld [vmem:[#allocation10 + $0x418] sm:$0xff] }
 0x905   : > { %14556 = vmatprep.subr.bf16.mxu0 %v16534_v35  ;;  %v14628_v39 = vpack.c.bf16 %v4048_v37, %v4047_v36  ;;  %v4471_v36 = vld [vmem:[#allocation10 + $0x5c8] sm:$0xff]  ;;  %v4472_v37 = vld [vmem:[#allocation10 + $0x5d0] sm:$0xff] }
 0x908   : > { %14558 = vmatpush1.bf16.msra.mxu0 %v14557_v32  ;;  %v4049_v32 = vld [vmem:[#allocation10 + $0x428] sm:$0xff] }
 0x909   : > { %14559 = vmatprep.subr.bf16.mxu0 %v16534_v35  ;;  %v14631_v41 = vpack.c.bf16 %v4050_v40, %v4049_v32  ;;  %v4474_v32 = vld [vmem:[#allocation10 + $0x5e0] sm:$0xff] }
 0x90c   : > { %14561 = vmatpush1.bf16.msra.mxu0 %v14560_v42  ;;  %v4051_v42 = vld [vmem:[#allocation10 + $0x438] sm:$0xff] }
 0x90d   : > { %14562 = vmatprep.subr.bf16.mxu0 %v16534_v35  ;;  %v14634_v44 = vpack.c.bf16 %v4052_v43, %v4051_v42  ;;  %v4476_v42 = vld [vmem:[#allocation10 + $0x5f0] sm:$0xff] }
 0x910   : > { %14564 = vmatpush1.bf16.msra.mxu0 %v14563_v45  ;;  %v4053_v45 = vld [vmem:[#allocation10 + $0x448] sm:$0xff] }
 0x911   : > { %14565 = vmatprep.subr.bf16.mxu0 %v16534_v35  ;;  %v14637_v47 = vpack.c.bf16 %v4054_v46, %v4053_v45  ;;  %v4478_v45 = vld [vmem:[#allocation10 + $0x600] sm:$0xff] }
 0x914   : > { %14567 = vmatpush1.bf16.msra.mxu0 %v14566_v48  ;;  %v4055_v48 = vld [vmem:[#allocation10 + $0x458] sm:$0xff] }
 0x915   : > { %14568 = vmatprep.subr.bf16.mxu0 %v16534_v35  ;;  %v14640_v51 = vpack.c.bf16 %v4056_v49, %v4055_v48  ;;  %v4480_v48 = vld [vmem:[#allocation10 + $0x610] sm:$0xff] }
 0x916   : > { %v3925_v53 = vpop.f32.mrb[18].mxu1 }
 0x917   : > { %v3927_v54 = vpop.f32.mrb[19].mxu1 }
 0x918   : > { %14570 = vmatpush1.bf16.msra.mxu0 %v14569_v60  ;;  %v4057_v60 = vld [vmem:[#allocation10 + $0x468] sm:$0xff]  ;;  %v4060_v54 = vld [vmem:[#allocation10 + $0x480] sm:$0xff] }
 0x919   : > { %14571 = vmatprep.subr.bf16.mxu0 %v16534_v35  ;;  %v14643_v0 = vpack.c.bf16 %v4058_v52, %v4057_v60  ;;  %v4482_v60 = vld [vmem:[#allocation10 + $0x620] sm:$0xff] }
 0x91a   : > { %v3930_v56 = vpop.f32.mrb[20].mxu1 }
 0x91b   : > { %v14614_v57 = vpack.c.bf16 %v3930_v56, %v3925_v53  ;;  %v3932_v58 = vpop.f32.mrb[21].mxu1  ;;  %v4059_v53 = vld [vmem:[#allocation10 + $0x478] sm:$0xff]  ;;  %v4061_v56 = vld [vmem:[#allocation10 + $0x488] sm:$0xff] }
 0x91c   : > { %14573 = vmatpush1.bf16.msra.mxu0 %v14572_v55  ;;  %v14646_v55 = vpack.c.bf16 %v4060_v54, %v4059_v53  ;;  %v4484_v53 = vld [vmem:[#allocation10 + $0x630] sm:$0xff] }
 0x91d   : > { %3697 = vmatprep.subr.mxu0 %v16532_v38 }
 0x920   : > { %12401 = vmatpush1.msk.msra.mxu0 %vm3023_vm1, %v3645_v59  ;;  %v4063_v59 = vld [vmem:[#allocation10 + $0x498] sm:$0xff] }
 0x921   : > { %3714 = vmatmul.mubr.f32.vlgmr.msra.gmra.mrb[20].mxu0 %v17321_v8 }
 0x922   : > { %12403 = vmatprep.mubr.msk.f32.mxu0 %vm3016_vm2, %v17329_v15 }
 0x925   : > { %3719 = vmatmul.mubr.f32.gmra.mrb[22].mxu0 %v17331_v17 }
 0x926   : > { %13145 = vmatprep.mubr.msk.f32.mxu0 %vm3215_vm3, %v3725_v5 }
 0x948   : > { %v4345_v61 = vpop.f32.mrb[22].mxu1 }
 0x949   : > { %v4347_v62 = vpop.f32.mrb[23].mxu1 }
 0x94c   : > { %v4350_v63 = vpop.f32.mrb[24].mxu1 }
 0x94d   : > { %v17450_v1 = vpack.c.bf16 %v4350_v63, %v4345_v61  ;;  %v4352_v2 = vpop.f32.mrb[25].mxu1  ;;  %v4064_v61 = vld [vmem:[#allocation10 + $0x4a0] sm:$0xff]  ;;  %v4065_v63 = vld [vmem:[#allocation10 + $0x4a8] sm:$0xf] }
 0x94e   : > { %v14652_v62 = vpack.c.bf16 %v4064_v61, %v4063_v59  ;;  %v4145_v2 = vld [vmem:[#allocation7 + $0xa0] sm:$0xff]  ;;  %v8613_v61 = vld [vmem:[#allocation21 + $0x8] sm:$0xff] }
 0x94f   : > { %v6541_v59 = vld [vmem:[#allocation13 + $0x8] sm:$0xff] }
 0x97a   : > { %v4765_v3 = vpop.f32.mrb[26].mxu1 }
 0x97b   : > { %v4767_v4 = vpop.f32.mrb[27].mxu1 }
 0x97e   : > { %v4770_v6 = vpop.f32.mrb[28].mxu1 }
 0x97f   : > { %v17453_v7 = vpack.c.bf16 %v4770_v6, %v4765_v3  ;;  %v4772_v12 = vpop.f32.mrb[29].mxu1 }
 0x9f4   : > { %v3715_v50 = vpop.f32.mrb[20].mxu0 }
 0x9f5   : > { %v3717_v9 = vpop.f32.mrb[21].mxu0 }
 0x9f6   : > { %v4147_v9 = vld [vmem:[#allocation7 + $0xb0] sm:$0xff] }
 0x9f8   : > { %v3720_v10 = vpop.f32.mrb[22].mxu0 }
 0x9f9   : > { %v14574_v11 = vpack.c.bf16 %v3720_v10, %v3715_v50  ;;  %v3722_v14 = vpop.f32.mrb[23].mxu0  ;;  %v4146_v50 = vld [vmem:[#allocation7 + $0xa8] sm:$0xff]  ;;  %v4148_v10 = vld [vmem:[#allocation7 + $0xb8] sm:$0xff] }
 0x9fa   : > { %v4461_v14 = vld [vmem:[#allocation10 + $0x578] sm:$0xff] }
 0x9fb   : > { %14575 = vmatprep.subr.bf16.mxu0 %v14574_v11 }
 0x9fc   : > { %14577 = vmatpush3.bf16.msra.mxu0 %v14574_v11  ;;  %v4355_v11 = vld [vmem:[#allocation7 + $0xc0] sm:$0xff] }
 0x9fd   : > { %14615 = vmatprep.subr.bf16.mxu0 %v14614_v57 }
 0x9ff   : > { %13146 = vmatmul.mubr.msk.f32.vlgmr.msra.gmra.mrb[16].mxu0 %vm3215_vm3, %v3726_v16  ;;  %v4462_v16 = vld [vmem:[#allocation10 + $0x580] sm:$0xff] }
 0xa00   : > { %14617 = vmatpush3.bf16.msra.mxu0 %v14614_v57  ;;  %13148 = vmatprep.mubr.msk.f32.mxu0 %vm3215_vm3, %v3727_v18  ;;  %v4062_v57 = vld [vmem:[#allocation10 + $0x490] sm:$0xff]  ;;  %v4356_v18 = vld [vmem:[#allocation7 + $0xc8] sm:$0xff] }
 0xa01   : > { %14618 = vmatprep.subr.bf16.mxu0 %v16534_v35  ;;  %v14649_v58 = vpack.c.bf16 %v4062_v57, %v4061_v56  ;;  %v4565_v56 = vld [vmem:[#allocation7 + $0xe0] sm:$0xff] }
 0xa02   : > { %v4880_v57 = vld [vmem:[#allocation9] sm:$0xff] }
 0xa03   : > { %13149 = vmatmul.mubr.msk.f32.gmra.mrb[18].mxu0 %vm3215_vm3, %v3728_v19  ;;  %v14699_v19 = vpack.c.bf16 %v4462_v16, %v4461_v14  ;;  %4886 = vperm.xlu1 %15882, %v4880_v57   ;;  %v4777_v14 = vld [vmem:[#allocation7 + $0x110] sm:$0xff]  ;;  %v4778_v16 = vld [vmem:[#allocation7 + $0x118] sm:$0xff]  ;;  %v5465_v57 = vld [vmem:[#allocation15 + $0x98] sm:$0xf] }
 0xa04   : > { %13155 = vmatprep.mubr.msk.f32.mxu0 %vm3215_vm3, %v3935_v20  ;;  %v4357_v20 = vld [vmem:[#allocation7 + $0xd0] sm:$0xff] }
 0xa07   : > { %13156 = vmatmul.mubr.msk.f32.vlgmr.msra.gmra.mrb[16].mxu0 %vm3215_vm3, %v3936_v23  ;;  %v14702_v23 = vpack.c.bf16 %v4464_v22, %v4463_v21  ;;  %v5021_v21 = vld [vmem:[#allocation15 + $0x28] sm:$0xff]  ;;  %v5022_v22 = vld [vmem:[#allocation15 + $0x30] sm:$0xff] }
 0xa08   : > { %14620 = vmatpush1.bf16.msra.mxu0 %v14619_v24  ;;  %13158 = vmatprep.mubr.msk.f32.mxu0 %vm3215_vm3, %v3937_v25  ;;  %v4465_v24 = vld [vmem:[#allocation10 + $0x598] sm:$0xff]  ;;  %v4466_v25 = vld [vmem:[#allocation10 + $0x5a0] sm:$0xff] }
 0xa09   : > { %14621 = vmatprep.subr.bf16.mxu0 %v16534_v35  ;;  %v14705_v26 = vpack.c.bf16 %v4466_v25, %v4465_v24 }
 0xa0b   : > { %13159 = vmatmul.mubr.msk.f32.gmra.mrb[18].mxu0 %vm3215_vm3, %v3938_v28  ;;  %v4468_v28 = vld [vmem:[#allocation10 + $0x5b0] sm:$0xff] }
 0xa0c   : > { %14623 = vmatpush1.bf16.msra.mxu0 %v14622_v29  ;;  %12416 = vmatprep.mubr.msk.f32.mxu0 %vm3016_vm2, %v17319_v13  ;;  %v14708_v29 = vpack.c.bf16 %v4468_v28, %v4467_v27 }
 0xa0d   : > { %14624 = vmatprep.subr.bf16.mxu0 %v16534_v35 }
 0xa10   : > { %14626 = vmatpush1.bf16.msra.mxu0 %v14625_v31  ;;  %v14711_v31 = vpack.c.bf16 %v4470_v30, %v4469_v33  ;;  %v5024_v33 = vld [vmem:[#allocation15 + $0x40] sm:$0xff] }
 0xa11   : > { %14627 = vmatprep.subr.bf16.mxu0 %v16534_v35 }
 0xa14   : > { %14629 = vmatpush1.bf16.msra.mxu0 %v14628_v39  ;;  %v14714_v39 = vpack.c.bf16 %v4472_v37, %v4471_v36  ;;  %v4897_v37 = vpop.permute.xlu0 %4896 }
 0xa15   : > { %14630 = vmatprep.subr.bf16.mxu0 %v16534_v35 }
 0xa18   : > { %14632 = vmatpush1.bf16.msra.mxu0 %v14631_v41  ;;  %v4475_v41 = vld [vmem:[#allocation10 + $0x5e8] sm:$0xff] }
 0xa19   : > { %14633 = vmatprep.subr.bf16.mxu0 %v16534_v35  ;;  %v14720_v43 = vpack.c.bf16 %v4476_v42, %v4475_v41 }
 0xa1c   : > { %14635 = vmatpush1.bf16.msra.mxu0 %v14634_v44  ;;  %v4477_v44 = vld [vmem:[#allocation10 + $0x5f8] sm:$0xff] }
 0xa1d   : > { %14636 = vmatprep.subr.bf16.mxu0 %v16534_v35  ;;  %v14723_v46 = vpack.c.bf16 %v4478_v45, %v4477_v44  ;;  %v5025_v44 = vld [vmem:[#allocation15 + $0x48] sm:$0xf]  ;;  %v5281_v45 = vld [vmem:[#allocation15 + $0x50] sm:$0xff] }
 0xa20   : > { %14638 = vmatpush1.bf16.msra.mxu0 %v14637_v47  ;;  %v4479_v47 = vld [vmem:[#allocation10 + $0x608] sm:$0xff] }
 0xa21   : > { %14639 = vmatprep.subr.bf16.mxu0 %v16534_v35  ;;  %v14726_v49 = vpack.c.bf16 %v4480_v48, %v4479_v47  ;;  %v5283_v47 = vld [vmem:[#allocation15 + $0x60] sm:$0xff]  ;;  %v5284_v48 = vld [vmem:[#allocation15 + $0x68] sm:$0xff] }
 0xa24   : > { %14641 = vmatpush1.bf16.msra.mxu0 %v14640_v51  ;;  %v4481_v51 = vld [vmem:[#allocation10 + $0x618] sm:$0xff] }
 0xa25   : > { %14642 = vmatprep.subr.bf16.mxu0 %v16534_v35  ;;  %v14729_v52 = vpack.c.bf16 %v4482_v60, %v4481_v51  ;;  %v14814_v51 = vpack.c.bf16 %v5284_v48, %v5283_v47  ;;  %v5285_v60 = vld [vmem:[#allocation15 + $0x70] sm:$0xf] }
 0xa28   : > { %14644 = vmatpush1.bf16.msra.mxu0 %v14643_v0  ;;  %v4483_v0 = vld [vmem:[#allocation10 + $0x628] sm:$0xff] }
 0xa29   : > { %14645 = vmatprep.subr.bf16.mxu0 %v16534_v35  ;;  %v14732_v54 = vpack.c.bf16 %v4484_v53, %v4483_v0  ;;  %v5462_v0 = vld [vmem:[#allocation15 + $0x80] sm:$0xff]  ;;  %v5463_v53 = vld [vmem:[#allocation15 + $0x88] sm:$0xff] }
 0xa2c   : > { %14647 = vmatpush1.bf16.msra.mxu0 %v14646_v55  ;;  %v4485_v55 = vld [vmem:[#allocation10 + $0x638] sm:$0xf] }
 0xa2d   : > { %14648 = vmatprep.subr.bf16.mxu0 %v16534_v35 }
 0xa30   : > { %14650 = vmatpush1.bf16.msra.mxu0 %v14649_v58  ;;  %v4881_v58 = vld [vmem:[#allocation9 + $0x8] sm:$0xff] }
 0xa31   : > { %14651 = vmatprep.subr.bf16.mxu0 %v16534_v35  ;;  %4891 = vperm.xlu1 %15882, %v4881_v58   ;;  %v5641_v58 = vld [vmem:[#allocation15 + $0xa0] sm:$0xff] }
 0xa34   : > { %14653 = vmatpush1.bf16.msra.mxu0 %v14652_v62  ;;  %v8615_v62 = vld [vmem:[#allocation21 + $0x18] sm:$0xff] }
 0xa35   : > { %4117 = vmatprep.subr.mxu0 %v16532_v38 }
 0xa38   : > { %12415 = vmatpush1.msk.msra.mxu0 %vm3023_vm1, %v4065_v63  ;;  %v4913_v63 = vld [vmem:[#allocation15 + $0x8] sm:$0xff] }
 0xa39   : > { %4134 = vmatmul.mubr.f32.vlgmr.msra.gmra.mrb[24].mxu0 %v17321_v8 }
 0xa3a   : > { %12417 = vmatprep.mubr.msk.f32.mxu0 %vm3016_vm2, %v17329_v15 }
 0xa3d   : > { %4139 = vmatmul.mubr.f32.gmra.mrb[26].mxu0 %v17331_v17 }
 0xa3e   : > { %13165 = vmatprep.mubr.msk.f32.mxu0 %vm3215_vm3, %v4145_v2  ;;  %v10263_v2 = vld [vmem:[#allocation25 + $0x8] sm:$0xff] }
 0xb0c   : > { %v4135_v3 = vpop.f32.mrb[24].mxu0 }
 0xb0d   : > { %v4137_v4 = vpop.f32.mrb[25].mxu0 }
 0xb10   : > { %v4140_v5 = vpop.f32.mrb[26].mxu0 }
 0xb11   : > { %v14654_v6 = vpack.c.bf16 %v4140_v5, %v4135_v3  ;;  %v4142_v12 = vpop.f32.mrb[27].mxu0 }
 0xb12   : > { %v4566_v12 = vld [vmem:[#allocation7 + $0xe8] sm:$0xff] }
 0xb13   : > { %14655 = vmatprep.subr.bf16.mxu0 %v14654_v6 }
 0xb14   : > { %14657 = vmatpush3.bf16.msra.mxu0 %v14654_v6 }
 0xb15   : > { %14695 = vmatprep.subr.bf16.mxu0 %v17450_v1 }
 0xb17   : > { %13166 = vmatmul.mubr.msk.f32.vlgmr.msra.gmra.mrb[16].mxu0 %vm3215_vm3, %v4146_v50  ;;  %v4567_v50 = vld [vmem:[#allocation7 + $0xf0] sm:$0xff] }
 0xb18   : > { %14697 = vmatpush3.bf16.msra.mxu0 %v17450_v1  ;;  %13168 = vmatprep.mubr.msk.f32.mxu0 %vm3215_vm3, %v4147_v9  ;;  %v4358_v1 = vld [vmem:[#allocation7 + $0xd8] sm:$0xff] }
 0xb19   : > { %14698 = vmatprep.subr.bf16.mxu0 %v16534_v35  ;;  %v4568_v9 = vld [vmem:[#allocation7 + $0xf8] sm:$0xff] }
 0xb1b   : > { %13169 = vmatmul.mubr.msk.f32.gmra.mrb[18].mxu0 %vm3215_vm3, %v4148_v10  ;;  %v4775_v10 = vld [vmem:[#allocation7 + $0x100] sm:$0xff] }
 0xb1c   : > { %13175 = vmatprep.mubr.msk.f32.mxu0 %vm3215_vm3, %v4355_v11  ;;  %v4776_v11 = vld [vmem:[#allocation7 + $0x108] sm:$0xff] }
 0xb1f   : > { %13176 = vmatmul.mubr.msk.f32.vlgmr.msra.gmra.mrb[16].mxu0 %vm3215_vm3, %v4356_v18  ;;  %v4914_v18 = vld [vmem:[#allocation15 + $0x10] sm:$0xff] }
 0xb20   : > { %14700 = vmatpush1.bf16.msra.mxu0 %v14699_v19  ;;  %13178 = vmatprep.mubr.msk.f32.mxu0 %vm3215_vm3, %v4357_v20  ;;  %v4915_v19 = vld [vmem:[#allocation15 + $0x18] sm:$0xff]  ;;  %v4916_v20 = vld [vmem:[#allocation15 + $0x20] sm:$0xf] }
 0xb21   : > { %14701 = vmatprep.subr.bf16.mxu0 %v16534_v35 }
 0xb23   : > { %13179 = vmatmul.mubr.msk.f32.gmra.mrb[18].mxu0 %vm3215_vm3, %v4358_v1  ;;  %v14786_v1 = vpack.c.bf16 %v5022_v22, %v5021_v21 }
 0xb24   : > { %14703 = vmatpush1.bf16.msra.mxu0 %v14702_v23  ;;  %12430 = vmatprep.mubr.msk.f32.mxu0 %vm3016_vm2, %v17319_v13  ;;  %v4473_v13 = vld [vmem:[#allocation10 + $0x5d8] sm:$0xff]  ;;  %v4887_v23 = vpop.permute.xlu1 %4886 }
 0xb25   : > { %14704 = vmatprep.subr.bf16.mxu0 %v16534_v35  ;;  %v14717_v40 = vpack.c.bf16 %v4474_v32, %v4473_v13 }
 0xb28   : > { %14706 = vmatpush1.bf16.msra.mxu0 %v14705_v26  ;;  %v4892_v24 = vpop.permute.xlu1 %4891 }
 0xb29   : > { %14707 = vmatprep.subr.bf16.mxu0 %v16534_v35 }
 0xb2c   : > { %14709 = vmatpush1.bf16.msra.mxu0 %v14708_v29  ;;  %v5023_v29 = vld [vmem:[#allocation15 + $0x38] sm:$0xff] }
 0xb2d   : > { %14710 = vmatprep.subr.bf16.mxu0 %v16534_v35 }
 0xb30   : > { %14712 = vmatpush1.bf16.msra.mxu0 %v14711_v31 }
 0xb31   : > { %14713 = vmatprep.subr.bf16.mxu0 %v16534_v35 }
 0xb34   : > { %14715 = vmatpush1.bf16.msra.mxu0 %v14714_v39 }
 0xb35   : > { %14716 = vmatprep.subr.bf16.mxu0 %v16534_v35 }
 0xb38   : > { %14718 = vmatpush1.bf16.msra.mxu0 %v14717_v40  ;;  %v14790_v40 = vpack.c.bf16 %v5024_v33, %v5023_v29 }
 0xb39   : > { %14719 = vmatprep.subr.bf16.mxu0 %v16534_v35 }
 0xb3c   : > { %14721 = vmatpush1.bf16.msra.mxu0 %v14720_v43 }
 0xb3d   : > { %14722 = vmatprep.subr.bf16.mxu0 %v16534_v35 }
 0xb40   : > { %14724 = vmatpush1.bf16.msra.mxu0 %v14723_v46  ;;  %v5282_v46 = vld [vmem:[#allocation15 + $0x58] sm:$0xff] }
 0xb41   : > { %14725 = vmatprep.subr.bf16.mxu0 %v16534_v35 }
 0xb44   : > { %14727 = vmatpush1.bf16.msra.mxu0 %v14726_v49  ;;  %v14810_v49 = vpack.c.bf16 %v5282_v46, %v5281_v45 }
 0xb45   : > { %14728 = vmatprep.subr.bf16.mxu0 %v16534_v35 }
 0xb48   : > { %14730 = vmatpush1.bf16.msra.mxu0 %v14729_v52  ;;  %v5461_v52 = vld [vmem:[#allocation15 + $0x78] sm:$0xff] }
 0xb49   : > { %14731 = vmatprep.subr.bf16.mxu0 %v16534_v35  ;;  %v4883_v35 = vld [vmem:[#allocation9 + $0x18] sm:$0xff] }
 0xb4a   : > { %4901 = vperm.xlu1 %15882, %v4883_v35   ;;  %v5642_v35 = vld [vmem:[#allocation15 + $0xa8] sm:$0xff] }
 0xb4c   : > { %14733 = vmatpush1.bf16.msra.mxu0 %v14732_v54  ;;  %v5464_v54 = vld [vmem:[#allocation15 + $0x90] sm:$0xff] }
 0xb4d   : > { %4537 = vmatprep.subr.mxu0 %v16532_v38 }
 0xb4e   : > { %6549 = vperm.xlu1 %15882, %v6541_v59   ;;  %v5643_v59 = vld [vmem:[#allocation15 + $0xb0] sm:$0xff] }
 0xb50   : > { %12429 = vmatpush1.msk.msra.mxu0 %vm3023_vm1, %v4485_v55  ;;  %v14826_v55 = vpack.c.bf16 %v5462_v0, %v5461_v52 }
 0xb51   : > { %4554 = vmatmul.mubr.f32.vlgmr.msra.gmra.mrb[28].mxu0 %v17321_v8  ;;  %v4912_v8 = vld [vmem:[#allocation15] sm:$0xff] }
 0xb52   : > { %12431 = vmatprep.mubr.msk.f32.mxu0 %vm3016_vm2, %v17329_v15  ;;  %8623 = vperm.xlu1 %15882, %v8613_v61   ;;  %v14778_v15 = vpack.c.bf16 %v4913_v63, %v4912_v8  ;;  %v5644_v61 = vld [vmem:[#allocation15 + $0xb8] sm:$0xff]  ;;  %v5645_v63 = vld [vmem:[#allocation15 + $0xc0] sm:$0xf]  ;;  %vm6933_vm2 = vcmask 72704  }
 0xb53   : > { %v14846_v8 = vpack.c.bf16 %v5644_v61, %v5643_v59 }
 0xb54   : > { %14779 = vmatprep.subr.bf16.mxu1 %v14778_v15 }
 0xb55   : > { %4559 = vmatmul.mubr.f32.gmra.mrb[30].mxu0 %v17331_v17  ;;  %14781 = vmatpush3.bf16.msra.mxu1 %v14778_v15  ;;  %v5821_v15 = vld [vmem:[#allocation15 + $0xc8] sm:$0xff] }
 0xb56   : > { %13185 = vmatprep.mubr.msk.f32.mxu0 %vm3215_vm3, %v4565_v56  ;;  %8633 = vperm.xlu1 %15882, %v8615_v62   ;;  %v14830_v56 = vpack.c.bf16 %v5464_v54, %v5463_v53  ;;  %v14842_v62 = vpack.c.bf16 %v5642_v35, %v5641_v58  ;;  %v5555_v58 = vld [vmem:[#allocation12 + $0x30] sm:$0xff] }
 0xb5a   : > { %10271 = vperm.xlu1 %15882, %v10263_v2   ;;  %v5822_v2 = vld [vmem:[#allocation15 + $0xd0] sm:$0xff] }
 0xbc9   : > { %v4902_v30 = vpop.permute.xlu1 %4901 }
 0xc24   : > { %v4555_v17 = vpop.f32.mrb[28].mxu0 }
 0xc25   : > { %v4557_v3 = vpop.f32.mrb[29].mxu0 }
 0xc26   : > { %v5824_v3 = vld [vmem:[#allocation15 + $0xe0] sm:$0xff] }
 0xc28   : > { %v4560_v4 = vpop.f32.mrb[30].mxu0 }
 0xc29   : > { %v14734_v5 = vpack.c.bf16 %v4560_v4, %v4555_v17  ;;  %v4562_v6 = vpop.f32.mrb[31].mxu0  ;;  %v5823_v17 = vld [vmem:[#allocation15 + $0xd8] sm:$0xff]  ;;  %v14858_v4 = vpack.c.bf16 %v5822_v2, %v5821_v15 }
 0xc2a   : > { %v5825_v6 = vld [vmem:[#allocation15 + $0xe8] sm:$0xf] }
 0xc2b   : > { %14735 = vmatprep.subr.bf16.mxu0 %v14734_v5 }
 0xc2c   : > { %14737 = vmatpush3.bf16.msra.mxu0 %v14734_v5  ;;  %v14862_v5 = vpack.c.bf16 %v5824_v3, %v5823_v17 }
 0xc2d   : > { %14775 = vmatprep.subr.bf16.mxu0 %v17453_v7 }
 0xc2f   : > { %13186 = vmatmul.mubr.msk.f32.vlgmr.msra.gmra.mrb[16].mxu0 %vm3215_vm3, %v4566_v12  ;;  %v6001_v12 = vld [vmem:[#allocation15 + $0xf0] sm:$0xff] }
 0xc30   : > { %14777 = vmatpush3.bf16.msra.mxu0 %v17453_v7  ;;  %13188 = vmatprep.mubr.msk.f32.mxu0 %vm3215_vm3, %v4567_v50  ;;  %v14782_v7 = vpack.c.bf16 %v4915_v19, %v4914_v18  ;;  %v6002_v50 = vld [vmem:[#allocation15 + $0xf8] sm:$0xff]  ;;  %v6361_v18 = vld [vmem:[#allocation15 + $0x140] sm:$0xff]  ;;  %v6362_v19 = vld [vmem:[#allocation15 + $0x148] sm:$0xff] }
 0xc31   : > { %v14906_v21 = vpack.c.bf16 %v6362_v19, %v6361_v18  ;;  %v6181_v19 = vld [vmem:[#allocation15 + $0x118] sm:$0xff] }
 0xc32   : > { %14783 = vmatprep.subr.bf16.mxu1 %v14782_v7 }
 0xc33   : > { %13189 = vmatmul.mubr.msk.f32.gmra.mrb[18].mxu0 %vm3215_vm3, %v4568_v9  ;;  %14785 = vmatpush3.bf16.msra.mxu1 %v14782_v7  ;;  %v6003_v9 = vld [vmem:[#allocation15 + $0x100] sm:$0xff]  ;;  %v6363_v7 = vld [vmem:[#allocation15 + $0x150] sm:$0xff] }
 0xc34   : > { %13195 = vmatprep.mubr.msk.f32.mxu0 %vm3215_vm3, %v4775_v10  ;;  %13209 = vmatprep.subr.msk.mxu1 %vm3023_vm1, %v4916_v20  ;;  %v6004_v10 = vld [vmem:[#allocation15 + $0x108] sm:$0xff] }
 0xc37   : > { %13196 = vmatmul.mubr.msk.f32.vlgmr.msra.gmra.mrb[16].mxu0 %vm3215_vm3, %v4776_v11  ;;  %13210 = vmatpush3.msk.msra.mxu1 %vm3023_vm1, %v4916_v20  ;;  %v14874_v11 = vpack.c.bf16 %v6002_v50, %v6001_v12  ;;  %v6364_v20 = vld [vmem:[#allocation15 + $0x158] sm:$0xff] }
 0xc38   : > { %13198 = vmatprep.mubr.msk.f32.mxu0 %vm3215_vm3, %v4777_v14  ;;  %14787 = vmatprep.subr.bf16.mxu1 %v14786_v1  ;;  %v14878_v14 = vpack.c.bf16 %v6004_v10, %v6003_v9  ;;  %v14910_v22 = vpack.c.bf16 %v6364_v20, %v6363_v7  ;;  %v5916_v10 = vld [vmem:[#allocation12 + $0x58] sm:$0xff]  ;;  %v6182_v7 = vld [vmem:[#allocation15 + $0x120] sm:$0xff] }
 0xc3b   : > { %13199 = vmatmul.mubr.msk.f32.gmra.mrb[18].mxu0 %vm3215_vm3, %v4778_v16  ;;  %v6005_v16 = vld [vmem:[#allocation15 + $0x110] sm:$0xf] }
 0xd0a   : > { %v13197_v25 = vpop.f32.mrb[16].mxu0 }
 0xd0b   : > { %v4905_v26 = vadd.f32 %v13197_v25, %v4892_v24  ;;  %v4857_v27 = vpop.f32.mrb[17].mxu0 }
 0xd0c   : > { %v4904_v28 = vadd.f32 %v4887_v23, %v4857_v27  ;;  %v5115_v23 = vld [vmem:[#allocation12 + $0x10] sm:$0xff] }
 0xd0d   : > { %v17526_v39 = vmax.f32 %v4905_v26, 0.0  ;;  %13241 = vmatprep.mubr.msk.f32.mxu0 %vm5117_vm5, %v5115_v23  ;;  %v6183_v23 = vld [vmem:[#allocation15 + $0x128] sm:$0xff] }
 0xd0e   : > { %v17524_v31 = vmax.f32 %v4904_v28, 0.0  ;;  %v13200_v36 = vpop.f32.mrb[18].mxu0 }
 0xd0f   : > { %v4907_v13 = vadd.f32 %v13200_v36, %v4902_v30  ;;  %v4867_v32 = vpop.f32.mrb[19].mxu0 }
 0xd10   : > { %v4906_v41 = vadd.f32 %v4897_v37, %v4867_v32  ;;  %13211 = vmatprep.mubr.msk.f32.mxu1 %vm4917_vm4, %v17524_v31 }
 0xd11   : > { %13212 = vmatmul.mubr.msk.f32.vlgmr.msra.gmra.mrb[30].mxu1 %vm4917_vm4, %v17526_v39  ;;  %v17534_v43 = vmax.f32 %v4907_v13, 0.0 }
 0xd12   : > { %v17532_v42 = vmax.f32 %v4906_v41, 0.0  ;;  %14789 = vmatpush3.bf16.msra.mxu1 %v14786_v1  ;;  %v6365_v1 = vld [vmem:[#allocation15 + $0x160] sm:$0xf] }
 0xd13   : > { %14791 = vmatprep.subr.bf16.mxu1 %v14790_v40 }
 0xd14   : > { %13214 = vmatprep.mubr.msk.f32.mxu1 %vm4917_vm4, %v17532_v42 }
 0xd15   : > { %13215 = vmatmul.mubr.msk.f32.gmra.mrb[32].mxu1 %vm4917_vm4, %v17534_v43 }
 0xd16   : > { %14793 = vmatpush3.bf16.msra.mxu1 %v14790_v40  ;;  %13227 = vmatprep.mubr.msk.f32.mxu1 %vm4917_vm4, %v17524_v31  ;;  %v5116_v40 = vld [vmem:[#allocation12 + $0x18] sm:$0xff] }
 0xd17   : > { %13225 = vmatprep.subr.msk.mxu1 %vm3023_vm1, %v5025_v44 }
 0xd1a   : > { %13226 = vmatpush3.msk.msra.mxu1 %vm3023_vm1, %v5025_v44  ;;  %v5018_v44 = vld [vmem:[#allocation12] sm:$0xff] }
 0xd1b   : > { %13228 = vmatmul.mubr.msk.f32.vlgmr.msra.gmra.mrb[34].mxu1 %vm4917_vm4, %v17526_v39  ;;  %14811 = vmatprep.subr.bf16.mxu1 %v14810_v49 }
 0xd1c   : > { %13230 = vmatprep.mubr.msk.f32.mxu1 %vm4917_vm4, %v17532_v42  ;;  %14813 = vmatpush3.bf16.msra.mxu1 %v14810_v49 }
 0xd1d   : > { %14815 = vmatprep.subr.bf16.mxu1 %v14814_v51 }
 0xd1f   : > { %13231 = vmatmul.mubr.msk.f32.gmra.mrb[36].mxu1 %vm4917_vm4, %v17534_v43 }
 0xd20   : > { %14817 = vmatpush3.bf16.msra.mxu1 %v14814_v51  ;;  %13265 = vmatprep.mubr.msk.f32.mxu1 %vm4917_vm4, %v17524_v31  ;;  %v5019_v51 = vld [vmem:[#allocation12 + $0x8] sm:$0xff] }
 0xd21   : > { %13263 = vmatprep.subr.msk.mxu1 %vm3023_vm1, %v5285_v60 }
 0xd24   : > { %13264 = vmatpush3.msk.msra.mxu1 %vm3023_vm1, %v5285_v60  ;;  %v5375_v60 = vld [vmem:[#allocation12 + $0x20] sm:$0xff] }
 0xd25   : > { %13266 = vmatmul.mubr.msk.f32.vlgmr.msra.gmra.mrb[38].mxu1 %vm4917_vm4, %v17526_v39  ;;  %14827 = vmatprep.subr.bf16.mxu1 %v14826_v55 }
 0xd26   : > { %13268 = vmatprep.mubr.msk.f32.mxu1 %vm4917_vm4, %v17532_v42  ;;  %14829 = vmatpush3.bf16.msra.mxu1 %v14826_v55 }
 0xd27   : > { %14831 = vmatprep.subr.bf16.mxu1 %v14830_v56 }
 0xd29   : > { %13269 = vmatmul.mubr.msk.f32.gmra.mrb[40].mxu1 %vm4917_vm4, %v17534_v43 }
 0xd2a   : > { %14833 = vmatpush3.bf16.msra.mxu1 %v14830_v56  ;;  %13292 = vmatprep.mubr.msk.f32.mxu1 %vm4917_vm4, %v17524_v31  ;;  %v5376_v56 = vld [vmem:[#allocation12 + $0x28] sm:$0xff] }
 0xd2b   : > { %13290 = vmatprep.subr.msk.mxu1 %vm3023_vm1, %v5465_v57 }
 0xd2e   : > { %13291 = vmatpush3.msk.msra.mxu1 %vm3023_vm1, %v5465_v57 }
 0xd2f   : > { %13293 = vmatmul.mubr.msk.f32.vlgmr.msra.gmra.mrb[42].mxu1 %vm4917_vm4, %v17526_v39  ;;  %14843 = vmatprep.subr.bf16.mxu1 %v14842_v62 }
 0xd30   : > { %13295 = vmatprep.mubr.msk.f32.mxu1 %vm4917_vm4, %v17532_v42  ;;  %14845 = vmatpush3.bf16.msra.mxu1 %v14842_v62  ;;  %v5556_v62 = vld [vmem:[#allocation12 + $0x38] sm:$0xff] }
 0xd31   : > { %14847 = vmatprep.subr.bf16.mxu1 %v14846_v8 }
 0xd33   : > { %13296 = vmatmul.mubr.msk.f32.gmra.mrb[44].mxu1 %vm4917_vm4, %v17534_v43 }
 0xd34   : > { %14849 = vmatpush3.bf16.msra.mxu1 %v14846_v8  ;;  %13319 = vmatprep.mubr.msk.f32.mxu1 %vm4917_vm4, %v17524_v31 }
 0xd35   : > { %13317 = vmatprep.subr.msk.mxu1 %vm3023_vm1, %v5645_v63 }
 0xd38   : > { %13318 = vmatpush3.msk.msra.mxu1 %vm3023_vm1, %v5645_v63  ;;  %v5735_v63 = vld [vmem:[#allocation12 + $0x40] sm:$0xff] }
 0xd39   : > { %13320 = vmatmul.mubr.msk.f32.vlgmr.msra.gmra.mrb[46].mxu1 %vm4917_vm4, %v17526_v39  ;;  %14859 = vmatprep.subr.bf16.mxu1 %v14858_v4 }
 0xd3a   : > { %13322 = vmatprep.mubr.msk.f32.mxu1 %vm4917_vm4, %v17532_v42  ;;  %14861 = vmatpush3.bf16.msra.mxu1 %v14858_v4  ;;  %v5736_v4 = vld [vmem:[#allocation12 + $0x48] sm:$0xff] }
 0xd3b   : > { %14863 = vmatprep.subr.bf16.mxu1 %v14862_v5 }
 0xd3d   : > { %13323 = vmatmul.mubr.msk.f32.gmra.mrb[48].mxu1 %vm4917_vm4, %v17534_v43 }
 0xd3e   : > { %14865 = vmatpush3.bf16.msra.mxu1 %v14862_v5  ;;  %13346 = vmatprep.mubr.msk.f32.mxu1 %vm4917_vm4, %v17524_v31 }
 0xd3f   : > { %13344 = vmatprep.subr.msk.mxu1 %vm3023_vm1, %v5825_v6 }
 0xd42   : > { %13345 = vmatpush3.msk.msra.mxu1 %vm3023_vm1, %v5825_v6  ;;  %v5915_v6 = vld [vmem:[#allocation12 + $0x50] sm:$0xff] }
 0xd43   : > { %13347 = vmatmul.mubr.msk.f32.vlgmr.msra.gmra.mrb[50].mxu1 %vm4917_vm4, %v17526_v39  ;;  %14875 = vmatprep.subr.bf16.mxu1 %v14874_v11 }
 0xd44   : > { %13349 = vmatprep.mubr.msk.f32.mxu1 %vm4917_vm4, %v17532_v42  ;;  %14877 = vmatpush3.bf16.msra.mxu1 %v14874_v11 }
 0xd45   : > { %14879 = vmatprep.subr.bf16.mxu1 %v14878_v14 }
 0xd47   : > { %13350 = vmatmul.mubr.msk.f32.gmra.mrb[52].mxu1 %vm4917_vm4, %v17534_v43 }
 0xd48   : > { %14881 = vmatpush3.bf16.msra.mxu1 %v14878_v14  ;;  %13373 = vmatprep.mubr.msk.f32.mxu1 %vm4917_vm4, %v17524_v31  ;;  %v6095_v14 = vld [vmem:[#allocation12 + $0x60] sm:$0xff] }
 0xd49   : > { %13371 = vmatprep.subr.msk.mxu1 %vm3023_vm1, %v6005_v16 }
 0xd4c   : > { %13372 = vmatpush3.msk.msra.mxu1 %vm3023_vm1, %v6005_v16 }
 0xd4d   : > { %13374 = vmatmul.mubr.msk.f32.vlgmr.msra.gmra.mrb[54].mxu1 %vm4917_vm4, %v17526_v39  ;;  %14907 = vmatprep.subr.bf16.mxu1 %v14906_v21 }
 0xd4e   : > { %13376 = vmatprep.mubr.msk.f32.mxu1 %vm4917_vm4, %v17532_v42  ;;  %14909 = vmatpush3.bf16.msra.mxu1 %v14906_v21 }
 0xd4f   : > { %14911 = vmatprep.subr.bf16.mxu1 %v14910_v22 }
 0xd51   : > { %13377 = vmatmul.mubr.msk.f32.gmra.mrb[56].mxu1 %vm4917_vm4, %v17534_v43 }
 0xd52   : > { %14913 = vmatpush3.bf16.msra.mxu1 %v14910_v22  ;;  %13427 = vmatprep.mubr.msk.f32.mxu1 %vm4917_vm4, %v17524_v31 }
 0xd53   : > { %13425 = vmatprep.subr.msk.mxu1 %vm3023_vm1, %v6365_v1 }
 0xd56   : > { %13426 = vmatpush3.msk.msra.mxu1 %vm3023_vm1, %v6365_v1  ;;  %v14890_v1 = vpack.c.bf16 %v6182_v7, %v6181_v19 }
 0xd57   : > { %13428 = vmatmul.mubr.msk.f32.vlgmr.msra.gmra.mrb[58].mxu1 %vm4917_vm4, %v17526_v39 }
 0xd58   : > { %13430 = vmatprep.mubr.msk.f32.mxu1 %vm4917_vm4, %v17532_v42 }
 0xd5b   : > { %13431 = vmatmul.mubr.msk.f32.gmra.mrb[60].mxu1 %vm4917_vm4, %v17534_v43 }
 0xde4   : > { %v13213_v24 = vpop.f32.mrb[30].mxu1 }
 0xde5   : > { %v4999_v25 = vpop.f32.mrb[31].mxu1 }
 0xde6   : > { %v14802_v26 = vpack.c.bf16 %v13213_v24, %v4999_v25  ;;  %v6184_v24 = vld [vmem:[#allocation15 + $0x130] sm:$0xff]  ;;  %v6096_v25 = vld [vmem:[#allocation12 + $0x68] sm:$0xff] }
 0xde8   : > { %v13216_v27 = vpop.f32.mrb[32].mxu1 }
 0xde9   : > { %v5009_v28 = vpop.f32.mrb[33].mxu1 }
 0xdea   : > { %v14806_v29 = vpack.c.bf16 %v13216_v27, %v5009_v28  ;;  %v14894_v27 = vpack.c.bf16 %v6184_v24, %v6183_v23 }
 0xdee   : > { %v13229_v33 = vpop.f32.mrb[34].mxu1 }
 0xdef   : > { %v5095_v30 = vpop.f32.mrb[35].mxu1 }
 0xdf0   : > { %v14794_v36 = vpack.c.bf16 %v13229_v33, %v5095_v30 }
 0xdf2   : > { %v13232_v37 = vpop.f32.mrb[36].mxu1  ;;  %14795 = vmatprep.subr.bf16.mxu0 %v14794_v36 }
 0xdf3   : > { %v5105_v13 = vpop.f32.mrb[37].mxu1  ;;  %14797 = vmatpush3.bf16.msra.mxu0 %v14794_v36  ;;  %v6185_v36 = vld [vmem:[#allocation15 + $0x138] sm:$0xf] }
 0xdf4   : > { %v14798_v32 = vpack.c.bf16 %v13232_v37, %v5105_v13 }
 0xdf6   : > { %14799 = vmatprep.subr.bf16.mxu0 %v14798_v32 }
 0xdf7   : > { %14801 = vmatpush3.bf16.msra.mxu0 %v14798_v32 }
 0xdf8   : > { %14803 = vmatprep.subr.bf16.mxu0 %v14802_v26  ;;  %v13267_v41 = vpop.f32.mrb[38].mxu1 }
 0xdf9   : > { %v5355_v45 = vpop.f32.mrb[39].mxu1 }
 0xdfa   : > { %v14818_v46 = vpack.c.bf16 %v13267_v41, %v5355_v45  ;;  %13242 = vmatmul.mubr.msk.f32.vlgmr.msra.gmra.mrb[32].mxu0 %vm5117_vm5, %v5116_v40 }
 0xdfb   : > { %14805 = vmatpush3.bf16.msra.mxu0 %v14802_v26  ;;  %13252 = vmatprep.mubr.msk.f32.mxu0 %vm5117_vm5, %v5018_v44 }
 0xdfc   : > { %14807 = vmatprep.subr.bf16.mxu0 %v14806_v29  ;;  %v13270_v47 = vpop.f32.mrb[40].mxu1 }
 0xdfd   : > { %v5365_v48 = vpop.f32.mrb[41].mxu1 }
 0xdfe   : > { %v14822_v49 = vpack.c.bf16 %v13270_v47, %v5365_v48  ;;  %v6839_v47 = vld [vmem:[#allocation16 + $0xc] sm:$0xf]  ;;  %v6653_v48 = vld [vmem:[#allocation16 + $0x4] sm:$0xf] }
 0xdff   : > { %14809 = vmatpush3.bf16.msra.mxu0 %v14806_v29 }
 0xe00   : > { %14819 = vmatprep.subr.bf16.mxu0 %v14818_v46 }
 0xe02   : > { %v13294_v52 = vpop.f32.mrb[42].mxu1  ;;  %13253 = vmatmul.mubr.msk.f32.vlgmr.msra.gmra.mrb[32].mxu0 %vm5117_vm5, %v5019_v51 }
 0xe03   : > { %14821 = vmatpush3.bf16.msra.mxu0 %v14818_v46  ;;  %v5535_v0 = vpop.f32.mrb[43].mxu1  ;;  %13279 = vmatprep.mubr.msk.f32.mxu0 %vm5117_vm5, %v5375_v60  ;;  %v6455_v46 = vld [vmem:[#allocation12 + $0x80] sm:$0xff]  ;;  %v6545_v60 = vpop.permute.xlu0 %6544 }
 0xe04   : > { %v14834_v53 = vpack.c.bf16 %v13294_v52, %v5535_v0  ;;  %14823 = vmatprep.subr.bf16.mxu0 %v14822_v49 }
 0xe06   : > { %v13297_v54 = vpop.f32.mrb[44].mxu1 }
 0xe07   : > { %14825 = vmatpush3.bf16.msra.mxu0 %v14822_v49  ;;  %v5545_v55 = vpop.f32.mrb[45].mxu1  ;;  %v6550_v49 = vpop.permute.xlu1 %6549 }
 0xe08   : > { %v14838_v57 = vpack.c.bf16 %v13297_v54, %v5545_v55  ;;  %14835 = vmatprep.subr.bf16.mxu0 %v14834_v53 }
 0xe0a   : > { %13280 = vmatmul.mubr.msk.f32.vlgmr.msra.gmra.mrb[32].mxu0 %vm5117_vm5, %v5376_v56  ;;  %v6746_v56 = vld [vmem:[#allocation16 + $0x8] sm:$0xf] }
 0xe0b   : > { %14837 = vmatpush3.bf16.msra.mxu0 %v14834_v53  ;;  %13306 = vmatprep.mubr.msk.f32.mxu0 %vm5117_vm5, %v5555_v58  ;;  %v6932_v58 = vld [vmem:[#allocation22 + $0x8] sm:$0x1] }
 0xe0c   : > { %14839 = vmatprep.subr.bf16.mxu0 %v14838_v57  ;;  %v13321_v35 = vpop.f32.mrb[46].mxu1 }
 0xe0d   : > { %v5715_v59 = vpop.f32.mrb[47].mxu1 }
 0xe0e   : > { %v14850_v61 = vpack.c.bf16 %v13321_v35, %v5715_v59  ;;  %v7024_v35 = vld [vmem:[#allocation22 + $0x10] sm:$0xff] }
 0xe0f   : > { %14841 = vmatpush3.bf16.msra.mxu0 %v14838_v57  ;;  %v6931_v57 = vld [vmem:[#allocation22] sm:$0xff] }
 0xe10   : > { %v13324_v8 = vpop.f32.mrb[48].mxu1  ;;  %14851 = vmatprep.subr.bf16.mxu0 %v14850_v61  ;;  %v14922_v59 = vpack.c.bf16 %v6932_v58, %v6931_v57  ;;  %v8427_v57 = vld [vmem:[#allocation22 + $0x88] sm:$0x1] }
 0xe11   : > { %v5725_v15 = vpop.f32.mrb[49].mxu1 }
 0xe12   : > { %v14854_v2 = vpack.c.bf16 %v13324_v8, %v5725_v15  ;;  %13307 = vmatmul.mubr.msk.f32.vlgmr.msra.gmra.mrb[32].mxu0 %vm5117_vm5, %v5556_v62  ;;  %v7305_v15 = vld [vmem:[#allocation22 + $0x28] sm:$0x1] }
 0xe13   : > { %14853 = vmatpush3.bf16.msra.mxu0 %v14850_v61  ;;  %13333 = vmatprep.mubr.msk.f32.mxu0 %vm5117_vm5, %v5735_v63  ;;  %v7025_v61 = vld [vmem:[#allocation22 + $0x18] sm:$0x1]  ;;  %v7304_v63 = vld [vmem:[#allocation22 + $0x20] sm:$0xff]  ;;  %v11754_v62 = vld [vmem:[#allocation28 + $0x38] sm:$0xff] }
 0xe14   : > { %14855 = vmatprep.subr.bf16.mxu0 %v14854_v2  ;;  %v14928_v8 = vpack.c.bf16 %v7025_v61, %v7024_v35  ;;  %v7105_v35 = vld [vmem:[#allocation19 + $0x20] sm:$0xff]  ;;  %v8645_v61 = vld [vmem:[#allocation27 + $0x8] sm:$0xff] }
 0xe16   : > { %v13348_v17 = vpop.f32.mrb[50].mxu1 }
 0xe17   : > { %14857 = vmatpush3.bf16.msra.mxu0 %v14854_v2  ;;  %v5895_v3 = vpop.f32.mrb[51].mxu1  ;;  %v14942_v2 = vpack.c.bf16 %v7305_v15, %v7304_v63 }
 0xe18   : > { %v14866_v5 = vpack.c.bf16 %v13348_v17, %v5895_v3  ;;  %v6645_v17 = vlaneseq  ;;  %v6642_v3 = vld [vmem:[#allocation18] sm:$0x1] }
 0xe19   : > { %vm6643_vm10 = vcmp.gt.f32.partialorder %v6642_v3, 0.5 }
 0xe1a   : > { %v13351_v12 = vpop.f32.mrb[52].mxu1  ;;  %14867 = vmatprep.subr.bf16.mxu0 %v14866_v5  ;;  %13334 = vmatmul.mubr.msk.f32.vlgmr.msra.gmra.mrb[32].mxu0 %vm5117_vm5, %v5736_v4  ;;  %v6733_v4 = vld [vmem:[#allocation18 + $0x1] sm:$0x1] }
 0xe1b   : > { %v5905_v50 = vpop.f32.mrb[53].mxu1  ;;  %14869 = vmatpush3.bf16.msra.mxu0 %v14866_v5  ;;  %13360 = vmatprep.mubr.msk.f32.mxu0 %vm5117_vm5, %v5915_v6  ;;  %v17661_v5 = vshrl.u32 %v6645_v17, 7  ;;  %vm6734_vm11 = vcmp.gt.f32.partialorder %v6733_v4, 0.5  ;;  %v6826_v6 = vld [vmem:[#allocation18 + $0x2] sm:$0x1] }
 0xe1c   : > { %v14870_v9 = vpack.c.bf16 %v13351_v12, %v5905_v50  ;;  %v6644_v50 = vsel %vm6643_vm10, 1, %v16533_v34  ;;  %vm6827_vm12 = vcmp.gt.f32.partialorder %v6826_v6, 0.5 }
 0xe1d   : > { %v6647_v12 = vsub.s32 0, %v17661_v5 }
 0xe1e   : > { %14871 = vmatprep.subr.bf16.mxu0 %v14870_v9 }
 0xe1f   : > { %14873 = vmatpush3.bf16.msra.mxu0 %v14870_v9  ;;  %v6919_v9 = vld [vmem:[#allocation18 + $0x3] sm:$0x1] }
 0xe20   : > { %v13375_v11 = vpop.f32.mrb[54].mxu1  ;;  %vm6920_vm13 = vcmp.gt.f32.partialorder %v6919_v9, 0.5  ;;  %v7106_v9 = vld [vmem:[#allocation19 + $0x28] sm:$0xff] }
 0xe21   : > { %v6075_v16 = vpop.f32.mrb[55].mxu1  ;;  %v6921_v7 = vsel %vm6920_vm13, 1, %v16533_v34 }
 0xe22   : > { %v14882_v18 = vpack.c.bf16 %v13375_v11, %v6075_v16  ;;  %13361 = vmatmul.mubr.msk.f32.vlgmr.msra.gmra.mrb[32].mxu0 %vm5117_vm5, %v5916_v10  ;;  %v6735_v10 = vsel %vm6734_vm11, 1, %v16533_v34  ;;  %v6648_v11 = vrot.slane %v6644_v50, %v6647_v12  ;;  %v6828_v16 = vsel %vm6827_vm12, 1, %v16533_v34 }
 0xe23   : > { %13387 = vmatprep.mubr.msk.f32.mxu0 %vm5117_vm5, %v6095_v14  ;;  %v6739_v14 = vrot.slane %v6735_v10, %v6647_v12 }
 0xe24   : > { %v13378_v20 = vpop.f32.mrb[56].mxu1  ;;  %14883 = vmatprep.subr.bf16.mxu0 %v14882_v18  ;;  %vm6649_vm14 = vcmp.eq.s32.totalorder %v6648_v11, 1  ;;  %v7107_v11 = vld [vmem:[#allocation19 + $0x30] sm:$0xff] }
 0xe25   : > { %v6085_v21 = vpop.f32.mrb[57].mxu1  ;;  %14885 = vmatpush3.bf16.msra.mxu0 %v14882_v18  ;;  %vm6740_vm15 = vcmp.eq.s32.totalorder %v6739_v14, 1 }
 0xe26   : > { %v14886_v22 = vpack.c.bf16 %v13378_v20, %v6085_v21 }
 0xe28   : > { %14887 = vmatprep.subr.bf16.mxu0 %v14886_v22 }
 0xe29   : > { %14889 = vmatpush3.bf16.msra.mxu0 %v14886_v22  ;;  %v6832_v22 = vrot.slane %v6828_v16, %v6647_v12 }
 0xe2a   : > { %v13429_v26 = vpop.f32.mrb[58].mxu1  ;;  %14891 = vmatprep.subr.bf16.mxu0 %v14890_v1 }
 0xe2b   : > { %v6435_v28 = vpop.f32.mrb[59].mxu1  ;;  %vm6833_vm0 = vcmp.eq.s32.totalorder %v6832_v22, 1  ;;  %v7020_v22 = vld [vmem:[#allocation19 + $0x8] sm:$0xff] }
 0xe2c   : > { %v14914_v29 = vpack.c.bf16 %v13429_v26, %v6435_v28  ;;  %13388 = vmatmul.mubr.msk.f32.vlgmr.msra.gmra.mrb[32].mxu0 %vm5117_vm5, %v6096_v25 }
 0xe2d   : > { %14893 = vmatpush3.bf16.msra.mxu0 %v14890_v1  ;;  %13400 = vmatprep.mubr.msk.f32.mxu0 %vm4917_vm4, %v17524_v31  ;;  %v6275_v31 = vld [vmem:[#allocation12 + $0x70] sm:$0xff]  ;;  %v6925_v1 = vrot.slane %v6921_v7, %v6647_v12  ;;  %v7019_v7 = vld [vmem:[#allocation19] sm:$0xff] }
 0xe2e   : > { %v13432_v33 = vpop.f32.mrb[60].mxu1  ;;  %14895 = vmatprep.subr.bf16.mxu0 %v14894_v27 }
 0xe2f   : > { %v6445_v30 = vpop.f32.mrb[61].mxu1 }
 0xe30   : > { %v14918_v37 = vpack.c.bf16 %v13432_v33, %v6445_v30 }
 0xe31   : > { %14897 = vmatpush3.bf16.msra.mxu0 %v14894_v27 }
 0xe32   : > { %13398 = vmatprep.subr.msk.mxu0 %vm3023_vm1, %v6185_v36 }
 0xe35   : > { %13399 = vmatpush3.msk.msra.mxu0 %vm3023_vm1, %v6185_v36 }
 0xe36   : > { %13401 = vmatmul.mubr.msk.f32.vlgmr.msra.gmra.mrb[34].mxu0 %vm4917_vm4, %v17526_v39  ;;  %v6276_v39 = vld [vmem:[#allocation12 + $0x78] sm:$0xff] }
 0xe37   : > { %13403 = vmatprep.mubr.msk.f32.mxu0 %vm4917_vm4, %v17532_v42  ;;  %v6456_v42 = vld [vmem:[#allocation12 + $0x88] sm:$0xff] }
 0xe3a   : > { %13404 = vmatmul.mubr.msk.f32.gmra.mrb[36].mxu0 %vm4917_vm4, %v17534_v43  ;;  %v6556_v43 = vld [vmem:[#allocation16] sm:$0xf]  ;;  %vm8648_vm4 = vcmask 203776  }
 0xe3b   : > { %13414 = vmatprep.mubr.msk.f32.mxu0 %vm5117_vm5, %v6275_v31  ;;  %13444 = vmatprep.subr.msk.mxu1 %vm3023_vm1, %v6556_v43 }
 0xe3c   : > { %13445 = vmatpush3.msk.msra.mxu1 %vm3023_vm1, %v6556_v43  ;;  %v7679_v43 = vld [vmem:[#allocation22 + $0x48] sm:$0x1] }
 0xe3d   : > { %13449 = vmatprep.subr.msk.mxu1 %vm3023_vm1, %v6653_v48 }
 0xf09   : > { %v13402_v13 = vpop.f32.mrb[34].mxu0 }
 0xf0a   : > { %v6255_v32 = vpop.f32.mrb[35].mxu0 }
 0xf0b   : > { %v14898_v40 = vpack.c.bf16 %v13402_v13, %v6255_v32 }
 0xf0d   : > { %v13405_v41 = vpop.f32.mrb[36].mxu0  ;;  %14899 = vmatprep.subr.bf16.mxu0 %v14898_v40 }
 0xf0e   : > { %v6265_v44 = vpop.f32.mrb[37].mxu0  ;;  %14901 = vmatpush3.bf16.msra.mxu0 %v14898_v40  ;;  %v7491_v40 = vld [vmem:[#allocation22 + $0x30] sm:$0xff] }
 0xf0f   : > { %v14902_v45 = vpack.c.bf16 %v13405_v41, %v6265_v44  ;;  %v7492_v41 = vld [vmem:[#allocation22 + $0x38] sm:$0x1] }
 0xf11   : > { %14903 = vmatprep.subr.bf16.mxu0 %v14902_v45 }
 0xf12   : > { %14905 = vmatpush3.bf16.msra.mxu0 %v14902_v45 }
 0xf13   : > { %14915 = vmatprep.subr.bf16.mxu0 %v14914_v29 }
 0xf15   : > { %13415 = vmatmul.mubr.msk.f32.vlgmr.msra.gmra.mrb[32].mxu0 %vm5117_vm5, %v6276_v39 }
 0xf16   : > { %14917 = vmatpush3.bf16.msra.mxu0 %v14914_v29  ;;  %13441 = vmatprep.mubr.msk.f32.mxu0 %vm5117_vm5, %v6455_v46  ;;  %v14952_v46 = vpack.c.bf16 %v7492_v41, %v7491_v40  ;;  %v7572_v40 = vld [vmem:[#allocation19 + $0x60] sm:$0xff] }
 0xf17   : > { %14919 = vmatprep.subr.bf16.mxu0 %v14918_v37 }
 0xf1a   : > { %14921 = vmatpush3.bf16.msra.mxu0 %v14918_v37 }
 0xf1b   : > { %13459 = vmatprep.subr.msk.mxu0 %vm3023_vm1, %v6839_v47 }
 0xf1d   : > { %13442 = vmatmul.mubr.msk.f32.vlgmr.msra.gmra.mrb[32].mxu0 %vm5117_vm5, %v6456_v42  ;;  %v7678_v42 = vld [vmem:[#allocation22 + $0x40] sm:$0xff] }
 0xf1e   : > { %13460 = vmatpush3.msk.msra.mxu0 %vm3023_vm1, %v6839_v47  ;;  %v14962_v47 = vpack.c.bf16 %v7679_v43, %v7678_v42  ;;  %v7575_v42 = vld [vmem:[#allocation19 + $0x78] sm:$0xff]  ;;  %v7759_v43 = vld [vmem:[#allocation19 + $0x80] sm:$0xff] }
 0xf1f   : > { %14930 = vmatprep.subr.msk.bf16.mxu0 %vm17646_vm9, %v14928_v8 }
 0xff0   : > { %v13443_v51 = vpop.f32.mrb[32].mxu0 }
 0xff1   : > { %v6553_v52 = vadd.f32 %v13443_v51, %v6550_v49  ;;  %v6529_v0 = vpop.f32.mrb[33].mxu0  ;;  %v7866_v49 = vld [vmem:[#allocation22 + $0x58] sm:$0x1] }
 0xff2   : > { %v6552_v53 = vadd.f32 %v6545_v60, %v6529_v0  ;;  %v8052_v60 = vld [vmem:[#allocation22 + $0x60] sm:$0xff] }
 0xff3   : > { %v6555_v55 = vmax.f32 %v6553_v52, 0.0  ;;  %v8053_v52 = vld [vmem:[#allocation22 + $0x68] sm:$0x1] }
 0xff4   : > { %v6554_v54 = vmax.f32 %v6552_v53, 0.0  ;;  %v14982_v0 = vpack.c.bf16 %v8053_v52, %v8052_v60  ;;  %v8239_v53 = vld [vmem:[#allocation22 + $0x70] sm:$0xff]  ;;  %v7947_v60 = vld [vmem:[#allocation19 + $0xa8] sm:$0xff] }
 0xff5   : > { %v7948_v52 = vld [vmem:[#allocation19 + $0xb0] sm:$0xff] }
 0xff6   : > { %13446 = vmatprep.mubr.msk.f32.mxu1 %vm6557_vm6, %v6554_v54  ;;  %13461 = vmatprep.mubr.msk.f32.mxu0 %vm6557_vm6, %v6554_v54 }
 0xff7   : > { %13447 = vmatmul.mubr.msk.f32.vlgmr.msra.gmra.mrb[62].mxu1 %vm6557_vm6, %v6555_v55  ;;  %13462 = vmatmul.mubr.msk.f32.vlgmr.msra.gmra.mrb[38].mxu0 %vm6557_vm6, %v6555_v55 }
 0xff8   : > { %13451 = vmatprep.mubr.msk.f32.mxu1 %vm6557_vm6, %v6554_v54  ;;  %13450 = vmatpush3.msk.msra.mxu1 %vm3023_vm1, %v6653_v48  ;;  %v7865_v48 = vld [vmem:[#allocation22 + $0x50] sm:$0xff] }
 0xff9   : > { %13454 = vmatprep.subr.msk.mxu1 %vm3023_vm1, %v6746_v56  ;;  %14933 = vmatpush3.bf16.msk.msra.mxu0 %vm17646_vm9, %v14928_v8  ;;  %v14972_v51 = vpack.c.bf16 %v7866_v49, %v7865_v48  ;;  %v7761_v48 = vld [vmem:[#allocation19 + $0x90] sm:$0xff]  ;;  %v7762_v49 = vld [vmem:[#allocation19 + $0x98] sm:$0xff] }
 0xffa   : > { %14944 = vmatprep.subr.msk.bf16.mxu0 %vm17646_vm9, %v14942_v2 }
 0xffb   : > { %13452 = vmatmul.mubr.msk.f32.vlgmr.msra.gmra.mrb[64].mxu1 %vm6557_vm6, %v6555_v55 }
 0xffc   : > { %13456 = vmatprep.mubr.msk.f32.mxu1 %vm6557_vm6, %v6554_v54  ;;  %13455 = vmatpush3.msk.msra.mxu1 %vm3023_vm1, %v6746_v56  ;;  %vm6926_vm1 = vcmp.eq.s32.totalorder %v6925_v1, 1  ;;  %v8240_v54 = vld [vmem:[#allocation22 + $0x78] sm:$0x1]  ;;  %v8426_v56 = vld [vmem:[#allocation22 + $0x80] sm:$0xff] }
 0xffd   : > { %14924 = vmatprep.subr.msk.bf16.mxu1 %vm17646_vm9, %v14922_v59  ;;  %v15002_v58 = vpack.c.bf16 %v8427_v57, %v8426_v56  ;;  %v8136_v56 = vld [vmem:[#allocation19 + $0xd8] sm:$0xff]  ;;  %v8320_v57 = vld [vmem:[#allocation19 + $0xe0] sm:$0xff] }
 0xfff   : > { %13457 = vmatmul.mubr.msk.f32.vlgmr.msra.gmra.mrb[66].mxu1 %vm6557_vm6, %v6555_v55  ;;  %v14992_v55 = vpack.c.bf16 %v8240_v54, %v8239_v53  ;;  %v8133_v53 = vld [vmem:[#allocation19 + $0xc0] sm:$0xff]  ;;  %v8134_v54 = vld [vmem:[#allocation19 + $0xc8] sm:$0xff] }
0x1000   : > { %14927 = vmatpush3.bf16.msk.msra.mxu1 %vm17646_vm9, %v14922_v59  ;;  %v8644_v59 = vld [vmem:[#allocation27] sm:$0xff] }
0x1001   : > { %v15012_v8 = vpack.c.bf16 %v8645_v61, %v8644_v59  ;;  %v8321_v59 = vld [vmem:[#allocation19 + $0xe8] sm:$0xff]  ;;  %v8322_v61 = vld [vmem:[#allocation19 + $0xf0] sm:$0xff] }
0x10ca   : > { %v13448_v18 = vpop.f32.mrb[62].mxu1  ;;  %v13463_v19 = vpop.f32.mrb[38].mxu0 }
0x10cb   : > { %v6633_v20 = vpop.f32.mrb[63].mxu1  ;;  %v6909_v21 = vpop.f32.mrb[39].mxu0  ;;  %v6651_v24 = vsel %vm6649_vm14, %v13448_v18, -inf  ;;  %v6928_v13 = vsel %vm6926_vm1, %v13463_v19, -inf  ;;  %v7108_v18 = vld [vmem:[#allocation19 + $0x38] sm:$0xff] }
0x10cc   : > { %v6650_v27 = vsel %vm6649_vm14, %v6633_v20, -inf  ;;  %v6927_v44 = vsel %vm6926_vm1, %v6909_v21, -inf }
0x10ce   : > { %v13453_v23 = vpop.f32.mrb[64].mxu1 }
0x10cf   : > { %v6742_v25 = vsel %vm6740_vm15, %v13453_v23, -inf  ;;  %v6723_v26 = vpop.f32.mrb[65].mxu1  ;;  %v7021_v23 = vld [vmem:[#allocation19 + $0x10] sm:$0xff] }
0x10d0   : > { %v6744_v28 = vmax.f32 %v6651_v24, %v6742_v25  ;;  %v6741_v29 = vsel %vm6740_vm15, %v6723_v26, -inf  ;;  %v7022_v26 = vld [vmem:[#allocation19 + $0x18] sm:$0xff] }
0x10d1   : > { %v6743_v33 = vmax.f32 %v6650_v27, %v6741_v29 }
0x10d2   : > { %v13458_v30 = vpop.f32.mrb[66].mxu1 }
0x10d3   : > { %v6835_v36 = vsel %vm6833_vm0, %v13458_v30, -inf  ;;  %v6816_v37 = vpop.f32.mrb[67].mxu1  ;;  %v7386_v30 = vld [vmem:[#allocation19 + $0x48] sm:$0xff] }
0x10d4   : > { %v6837_v34 = vmax.f32 %v6744_v28, %v6835_v36  ;;  %v6834_v31 = vsel %vm6833_vm0, %v6816_v37, -inf  ;;  %v7385_v28 = vld [vmem:[#allocation19 + $0x40] sm:$0xff]  ;;  %v7387_v37 = vld [vmem:[#allocation19 + $0x50] sm:$0xff] }
0x10d5   : > { %v6836_v32 = vmax.f32 %v6743_v33, %v6834_v31 }
0x10d6   : > { %v6930_v45 = vmax.f32 %v6837_v34, %v6928_v13  ;;  %v7388_v13 = vld [vmem:[#allocation19 + $0x58] sm:$0xff] }
0x10d7   : > { %v6929_v39 = vmax.f32 %v6836_v32, %v6927_v44 }
0x10d9   : > { %13468 = vmatprep.mubr.msk.f32.mxu1 %vm6933_vm2, %v6929_v39  ;;  %13475 = vmatprep.mubr.msk.f32.mxu0 %vm6933_vm2, %v6929_v39 }
0x10da   : > { %13469 = vmatmul.mubr.msk.f32.vlgmr.msra.gmra.mrb[68].mxu1 %vm6933_vm2, %v6930_v45  ;;  %13476 = vmatmul.mubr.msk.f32.vlgmr.msra.gmra.mrb[40].mxu0 %vm6933_vm2, %v6930_v45 }
0x10db   : > { %14947 = vmatpush3.bf16.msk.msra.mxu0 %vm17646_vm9, %v14942_v2  ;;  %13502 = vmatprep.mubr.msk.f32.mxu0 %vm6933_vm2, %v6929_v39 }
0x10dc   : > { %14954 = vmatprep.subr.msk.bf16.mxu0 %vm17646_vm9, %v14952_v46  ;;  %13482 = vmatprep.mubr.msk.f32.mxu1 %vm3215_vm3, %v7105_v35  ;;  %v9190_v35 = vld [vmem:[#allocation27 + $0x68] sm:$0xff] }
0x10de   : > { %13503 = vmatmul.mubr.msk.f32.vlgmr.msra.gmra.mrb[42].mxu0 %vm6933_vm2, %v6930_v45 }
0x10df   : > { %14957 = vmatpush3.bf16.msk.msra.mxu0 %vm17646_vm9, %v14952_v46  ;;  %13519 = vmatprep.mubr.msk.f32.mxu0 %vm6933_vm2, %v6929_v39  ;;  %v7574_v46 = vld [vmem:[#allocation19 + $0x70] sm:$0xff] }
0x10e0   : > { %14964 = vmatprep.subr.msk.bf16.mxu0 %vm17646_vm9, %v14962_v47 }
0x10e2   : > { %13520 = vmatmul.mubr.msk.f32.vlgmr.msra.gmra.mrb[44].mxu0 %vm6933_vm2, %v6930_v45 }
0x10e3   : > { %14967 = vmatpush3.bf16.msk.msra.mxu0 %vm17646_vm9, %v14962_v47  ;;  %13536 = vmatprep.mubr.msk.f32.mxu0 %vm6933_vm2, %v6929_v39  ;;  %v7760_v47 = vld [vmem:[#allocation19 + $0x88] sm:$0xff] }
0x10e4   : > { %14974 = vmatprep.subr.msk.bf16.mxu0 %vm17646_vm9, %v14972_v51 }
0x10e6   : > { %13537 = vmatmul.mubr.msk.f32.vlgmr.msra.gmra.mrb[46].mxu0 %vm6933_vm2, %v6930_v45 }
0x10e7   : > { %14977 = vmatpush3.bf16.msk.msra.mxu0 %vm17646_vm9, %v14972_v51  ;;  %13553 = vmatprep.mubr.msk.f32.mxu0 %vm6933_vm2, %v6929_v39  ;;  %v7946_v51 = vld [vmem:[#allocation19 + $0xa0] sm:$0xff] }
0x10e8   : > { %14984 = vmatprep.subr.msk.bf16.mxu0 %vm17646_vm9, %v14982_v0 }
0x10ea   : > { %13554 = vmatmul.mubr.msk.f32.vlgmr.msra.gmra.mrb[48].mxu0 %vm6933_vm2, %v6930_v45 }
0x10eb   : > { %14987 = vmatpush3.bf16.msk.msra.mxu0 %vm17646_vm9, %v14982_v0  ;;  %13570 = vmatprep.mubr.msk.f32.mxu0 %vm6933_vm2, %v6929_v39  ;;  %v7949_v0 = vld [vmem:[#allocation19 + $0xb8] sm:$0xff] }
0x10ec   : > { %14994 = vmatprep.subr.msk.bf16.mxu0 %vm17646_vm9, %v14992_v55 }
0x10ee   : > { %13571 = vmatmul.mubr.msk.f32.vlgmr.msra.gmra.mrb[50].mxu0 %vm6933_vm2, %v6930_v45 }
0x10ef   : > { %14997 = vmatpush3.bf16.msk.msra.mxu0 %vm17646_vm9, %v14992_v55  ;;  %13587 = vmatprep.mubr.msk.f32.mxu0 %vm6933_vm2, %v6929_v39  ;;  %v8135_v55 = vld [vmem:[#allocation19 + $0xd0] sm:$0xff] }
0x10f0   : > { %15004 = vmatprep.subr.msk.bf16.mxu0 %vm17646_vm9, %v15002_v58 }
0x10f2   : > { %13588 = vmatmul.mubr.msk.f32.vlgmr.msra.gmra.mrb[52].mxu0 %vm6933_vm2, %v6930_v45 }
0x10f3   : > { %15007 = vmatpush3.bf16.msk.msra.mxu0 %vm17646_vm9, %v15002_v58  ;;  %13604 = vmatprep.mubr.msk.f32.mxu0 %vm6933_vm2, %v6929_v39  ;;  %v9189_v58 = vld [vmem:[#allocation27 + $0x60] sm:$0xff] }
0x10f4   : > { %15013 = vmatprep.subr.bf16.mxu0 %v15012_v8 }
0x10f6   : > { %13605 = vmatmul.mubr.msk.f32.vlgmr.msra.gmra.mrb[54].mxu0 %vm6933_vm2, %v6930_v45  ;;  %v7573_v45 = vld [vmem:[#allocation19 + $0x68] sm:$0xff] }
0x10f7   : > { %15015 = vmatpush3.bf16.msra.mxu0 %v15012_v8  ;;  %v15066_v8 = vpack.c.bf16 %v9190_v35, %v9189_v58  ;;  %v9908_v58 = vld [vmem:[#allocation27 + $0xf8] sm:$0x1] }
0x11ad   : > { %v13470_v63 = vpop.f32.mrb[68].mxu1  ;;  %v13477_v15 = vpop.f32.mrb[40].mxu0 }
0x11ae   : > { %v7010_v2 = vpop.f32.mrb[69].mxu1  ;;  %v7095_v3 = vpop.f32.mrb[41].mxu0 }
0x11af   : > { %v14938_v4 = vpack.c.bf16 %v13470_v63, %v7010_v2  ;;  %v14934_v6 = vpack.c.bf16 %v13477_v15, %v7095_v3  ;;  %v8323_v63 = vld [vmem:[#allocation19 + $0xf8] sm:$0xff]  ;;  %v8507_v15 = vld [vmem:[#allocation19 + $0x100] sm:$0xff]  ;;  %v8508_v2 = vld [vmem:[#allocation19 + $0x108] sm:$0xff] }
0x11b0   : > { %v8509_v3 = vld [vmem:[#allocation19 + $0x110] sm:$0xff] }
0x11b1   : > { %14935 = vmatprep.subr.bf16.mxu1 %v14934_v6  ;;  %v13504_v12 = vpop.f32.mrb[42].mxu0 }
0x11b2   : > { %14937 = vmatpush3.bf16.msra.mxu1 %v14934_v6  ;;  %v7375_v50 = vpop.f32.mrb[43].mxu0  ;;  %v8646_v6 = vld [vmem:[#allocation27 + $0x10] sm:$0xff] }
0x11b3   : > { %v14948_v10 = vpack.c.bf16 %v13504_v12, %v7375_v50  ;;  %14939 = vmatprep.subr.bf16.mxu1 %v14938_v4  ;;  %v8647_v12 = vld [vmem:[#allocation27 + $0x18] sm:$0x1]  ;;  %v9191_v50 = vld [vmem:[#allocation27 + $0x70] sm:$0xff] }
0x11b5   : > { %13483 = vmatmul.mubr.msk.f32.vlgmr.msra.gmra.mrb[70].mxu1 %vm3215_vm3, %v7106_v9  ;;  %v13521_v14 = vpop.f32.mrb[44].mxu0  ;;  %v15016_v9 = vpack.c.bf16 %v8647_v12, %v8646_v6 }
0x11b6   : > { %14941 = vmatpush3.bf16.msra.mxu1 %v14938_v4  ;;  %v7562_v16 = vpop.f32.mrb[45].mxu0  ;;  %13485 = vmatprep.mubr.msk.f32.mxu1 %vm3215_vm3, %v7107_v11  ;;  %v8510_v4 = vld [vmem:[#allocation19 + $0x118] sm:$0xff] }
0x11b7   : > { %v14958_v19 = vpack.c.bf16 %v13521_v14, %v7562_v16  ;;  %14949 = vmatprep.subr.bf16.mxu1 %v14948_v10  ;;  %15018 = vmatprep.subr.msk.bf16.mxu0 %vm17646_vm9, %v15016_v9  ;;  %v8752_v14 = vld [vmem:[#allocation27 + $0x20] sm:$0xff]  ;;  %v8753_v16 = vld [vmem:[#allocation27 + $0x28] sm:$0xff] }
0x11b8   : > { %15021 = vmatpush3.bf16.msk.msra.mxu0 %vm17646_vm9, %v15016_v9 }
0x11b9   : > { %13486 = vmatmul.mubr.msk.f32.gmra.mrb[72].mxu1 %vm3215_vm3, %v7108_v18  ;;  %v13538_v20 = vpop.f32.mrb[46].mxu0  ;;  %v9368_v18 = vld [vmem:[#allocation27 + $0x80] sm:$0xff] }
0x11ba   : > { %v7749_v21 = vpop.f32.mrb[47].mxu0  ;;  %13492 = vmatprep.mubr.msk.f32.mxu1 %vm3215_vm3, %v7019_v7  ;;  %v9369_v7 = vld [vmem:[#allocation27 + $0x88] sm:$0xff] }
0x11bb   : > { %v14968_v1 = vpack.c.bf16 %v13538_v20, %v7749_v21  ;;  %v15084_v20 = vpack.c.bf16 %v9369_v7, %v9368_v18  ;;  %v8624_v21 = vpop.permute.xlu1 %8623 }
0x11bd   : > { %13493 = vmatmul.mubr.msk.f32.vlgmr.msra.gmra.mrb[70].mxu1 %vm3215_vm3, %v7020_v22  ;;  %v13555_v24 = vpop.f32.mrb[48].mxu0  ;;  %v8619_v22 = vpop.permute.xlu0 %8618 }
0x11be   : > { %14951 = vmatpush3.bf16.msra.mxu1 %v14948_v10  ;;  %v7936_v25 = vpop.f32.mrb[49].mxu0  ;;  %13495 = vmatprep.mubr.msk.f32.mxu1 %vm3215_vm3, %v7021_v23  ;;  %v9192_v10 = vld [vmem:[#allocation27 + $0x78] sm:$0x1] }
0x11bf   : > { %14959 = vmatprep.subr.bf16.mxu1 %v14958_v19  ;;  %v14978_v27 = vpack.c.bf16 %v13555_v24, %v7936_v25  ;;  %v15070_v11 = vpack.c.bf16 %v9192_v10, %v9191_v50  ;;  %v8754_v25 = vld [vmem:[#allocation27 + $0x30] sm:$0xff] }
0x11c1   : > { %13496 = vmatmul.mubr.msk.f32.gmra.mrb[72].mxu1 %vm3215_vm3, %v7022_v26  ;;  %v13572_v29 = vpop.f32.mrb[50].mxu0 }
0x11c2   : > { %v8123_v33 = vpop.f32.mrb[51].mxu0  ;;  %13509 = vmatprep.mubr.msk.f32.mxu1 %vm3215_vm3, %v7385_v28  ;;  %v9370_v28 = vld [vmem:[#allocation27 + $0x90] sm:$0xff] }
0x11c3   : > { %v14988_v36 = vpack.c.bf16 %v13572_v29, %v8123_v33  ;;  %v9371_v29 = vld [vmem:[#allocation27 + $0x98] sm:$0x1]  ;;  %v8634_v33 = vpop.permute.xlu1 %8633 }
0x11c5   : > { %13510 = vmatmul.mubr.msk.f32.vlgmr.msra.gmra.mrb[70].mxu1 %vm3215_vm3, %v7386_v30  ;;  %v13589_v34 = vpop.f32.mrb[52].mxu0 }
0x11c6   : > { %14961 = vmatpush3.bf16.msra.mxu1 %v14958_v19  ;;  %v8310_v31 = vpop.f32.mrb[53].mxu0  ;;  %13512 = vmatprep.mubr.msk.f32.mxu1 %vm3215_vm3, %v7387_v37  ;;  %v15022_v19 = vpack.c.bf16 %v8753_v16, %v8752_v14  ;;  %v8629_v37 = vpop.permute.xlu0 %8628 }
0x11c7   : > { %14969 = vmatprep.subr.bf16.mxu1 %v14968_v1  ;;  %v14998_v32 = vpack.c.bf16 %v13589_v34, %v8310_v31 }
0x11c8   : > { %15023 = vmatprep.subr.bf16.mxu0 %v15022_v19 }
0x11c9   : > { %13513 = vmatmul.mubr.msk.f32.gmra.mrb[72].mxu1 %vm3215_vm3, %v7388_v13  ;;  %v13606_v41 = vpop.f32.mrb[54].mxu0 }
0x11ca   : > { %v8497_v44 = vpop.f32.mrb[55].mxu0  ;;  %13526 = vmatprep.mubr.msk.f32.mxu1 %vm3215_vm3, %v7572_v40  ;;  %v15088_v40 = vpack.c.bf16 %v9371_v29, %v9370_v28 }
0x11cb   : > { %v15008_v39 = vpack.c.bf16 %v13606_v41, %v8497_v44  ;;  %v9547_v44 = vld [vmem:[#allocation27 + $0xa0] sm:$0xff] }
0x11cd   : > { %13527 = vmatmul.mubr.msk.f32.vlgmr.msra.gmra.mrb[70].mxu1 %vm3215_vm3, %v7573_v45  ;;  %v9548_v45 = vld [vmem:[#allocation27 + $0xa8] sm:$0xff] }
0x11ce   : > { %14971 = vmatpush3.bf16.msra.mxu1 %v14968_v1  ;;  %13529 = vmatprep.mubr.msk.f32.mxu1 %vm3215_vm3, %v7574_v46 }
0x11cf   : > { %14979 = vmatprep.subr.bf16.mxu1 %v14978_v27 }
0x11d1   : > { %13530 = vmatmul.mubr.msk.f32.gmra.mrb[72].mxu1 %vm3215_vm3, %v7575_v42  ;;  %v15102_v42 = vpack.c.bf16 %v9548_v45, %v9547_v44 }
0x11d2   : > { %13543 = vmatprep.mubr.msk.f32.mxu1 %vm3215_vm3, %v7759_v43  ;;  %v9549_v43 = vld [vmem:[#allocation27 + $0xb0] sm:$0xff] }
0x11d5   : > { %13544 = vmatmul.mubr.msk.f32.vlgmr.msra.gmra.mrb[70].mxu1 %vm3215_vm3, %v7760_v47  ;;  %v9550_v47 = vld [vmem:[#allocation27 + $0xb8] sm:$0x1] }
0x11d6   : > { %14981 = vmatpush3.bf16.msra.mxu1 %v14978_v27  ;;  %13546 = vmatprep.mubr.msk.f32.mxu1 %vm3215_vm3, %v7761_v48  ;;  %v8755_v27 = vld [vmem:[#allocation27 + $0x38] sm:$0x1]  ;;  %v15106_v48 = vpack.c.bf16 %v9550_v47, %v9549_v43  ;;  %v9012_v47 = vld [vmem:[#allocation27 + $0x50] sm:$0xff] }
0x11d7   : > { %14989 = vmatprep.subr.bf16.mxu1 %v14988_v36 }
0x11d9   : > { %13547 = vmatmul.mubr.msk.f32.gmra.mrb[72].mxu1 %vm3215_vm3, %v7762_v49  ;;  %v9726_v49 = vld [vmem:[#allocation27 + $0xc0] sm:$0xff] }
0x11da   : > { %13560 = vmatprep.mubr.msk.f32.mxu1 %vm3215_vm3, %v7946_v51  ;;  %v9727_v51 = vld [vmem:[#allocation27 + $0xc8] sm:$0xff] }
0x11dd   : > { %13561 = vmatmul.mubr.msk.f32.vlgmr.msra.gmra.mrb[70].mxu1 %vm3215_vm3, %v7947_v60  ;;  %v15120_v60 = vpack.c.bf16 %v9727_v51, %v9726_v49  ;;  %v8750_v51 = vld [vmem:[#allocation24 + $0x8] sm:$0xff] }
0x11de   : > { %14991 = vmatpush3.bf16.msra.mxu1 %v14988_v36  ;;  %13563 = vmatprep.mubr.msk.f32.mxu1 %vm3215_vm3, %v7948_v52  ;;  %v9728_v52 = vld [vmem:[#allocation27 + $0xd0] sm:$0xff] }
0x11df   : > { %14999 = vmatprep.subr.bf16.mxu1 %v14998_v32 }
0x11e1   : > { %13564 = vmatmul.mubr.msk.f32.gmra.mrb[72].mxu1 %vm3215_vm3, %v7949_v0  ;;  %v9729_v0 = vld [vmem:[#allocation27 + $0xd8] sm:$0x1] }
0x11e2   : > { %13577 = vmatprep.mubr.msk.f32.mxu1 %vm3215_vm3, %v8133_v53  ;;  %v15124_v53 = vpack.c.bf16 %v9729_v0, %v9728_v52 }
0x11e5   : > { %13578 = vmatmul.mubr.msk.f32.vlgmr.msra.gmra.mrb[70].mxu1 %vm3215_vm3, %v8134_v54  ;;  %v9905_v54 = vld [vmem:[#allocation27 + $0xe0] sm:$0xff] }
0x11e6   : > { %15001 = vmatpush3.bf16.msra.mxu1 %v14998_v32  ;;  %13580 = vmatprep.mubr.msk.f32.mxu1 %vm3215_vm3, %v8135_v55  ;;  %v15026_v32 = vpack.c.bf16 %v8755_v27, %v8754_v25  ;;  %v9906_v55 = vld [vmem:[#allocation27 + $0xe8] sm:$0xff] }
0x11e7   : > { %15009 = vmatprep.subr.bf16.mxu1 %v15008_v39 }
0x11e9   : > { %13581 = vmatmul.mubr.msk.f32.gmra.mrb[72].mxu1 %vm3215_vm3, %v8136_v56  ;;  %v15138_v56 = vpack.c.bf16 %v9906_v55, %v9905_v54 }
0x11ea   : > { %13594 = vmatprep.mubr.msk.f32.mxu1 %vm3215_vm3, %v8320_v57  ;;  %v9907_v57 = vld [vmem:[#allocation27 + $0xf0] sm:$0xff] }
0x11eb   : > { %v15142_v35 = vpack.c.bf16 %v9908_v58, %v9907_v57 }
0x11ed   : > { %13595 = vmatmul.mubr.msk.f32.vlgmr.msra.gmra.mrb[70].mxu1 %vm3215_vm3, %v8321_v59  ;;  %v10084_v59 = vld [vmem:[#allocation27 + $0x100] sm:$0xff] }
0x11ee   : > { %15011 = vmatpush3.bf16.msra.mxu1 %v15008_v39  ;;  %13597 = vmatprep.mubr.msk.f32.mxu1 %vm3215_vm3, %v8322_v61  ;;  %v10085_v61 = vld [vmem:[#allocation27 + $0x108] sm:$0xff] }
0x11ef   : > { %15067 = vmatprep.subr.bf16.mxu1 %v15066_v8 }
0x11f1   : > { %13598 = vmatmul.mubr.msk.f32.gmra.mrb[72].mxu1 %vm3215_vm3, %v8323_v63  ;;  %v10086_v63 = vld [vmem:[#allocation27 + $0x110] sm:$0xff] }
0x11f2   : > { %13611 = vmatprep.mubr.msk.f32.mxu1 %vm3215_vm3, %v8507_v15  ;;  %v10087_v15 = vld [vmem:[#allocation27 + $0x118] sm:$0x1] }
0x11f5   : > { %13612 = vmatmul.mubr.msk.f32.vlgmr.msra.gmra.mrb[70].mxu1 %vm3215_vm3, %v8508_v2  ;;  %v15160_v2 = vpack.c.bf16 %v10087_v15, %v10086_v63 }
0x11f6   : > { %13614 = vmatprep.mubr.msk.f32.mxu1 %vm3215_vm3, %v8509_v3  ;;  %15069 = vmatpush3.bf16.msra.mxu1 %v15066_v8  ;;  %v15156_v8 = vpack.c.bf16 %v10085_v61, %v10084_v59  ;;  %v8845_v3 = vld [vmem:[#allocation24 + $0x10] sm:$0xff] }
0x11f7   : > { %15072 = vmatprep.subr.msk.bf16.mxu1 %vm17646_vm9, %v15070_v11 }
0x11f9   : > { %13615 = vmatmul.mubr.msk.f32.gmra.mrb[72].mxu1 %vm3215_vm3, %v8510_v4 }
0x11fa   : > { %15075 = vmatpush3.bf16.msk.msra.mxu1 %vm17646_vm9, %v15070_v11 }
0x11fb   : > { %15085 = vmatprep.subr.bf16.mxu1 %v15084_v20 }
0x12c8   : > { %v13613_v1 = vpop.f32.mrb[70].mxu1 }
0x12c9   : > { %v8637_v23 = vadd.f32 %v13613_v1, %v8624_v21  ;;  %v8589_v24 = vpop.f32.mrb[71].mxu1 }
0x12ca   : > { %v8636_v26 = vadd.f32 %v8619_v22, %v8589_v24 }
0x12cb   : > { %v17758_v34 = vmax.f32 %v8637_v23, 0.0 }
0x12cc   : > { %v17756_v30 = vmax.f32 %v8636_v26, 0.0  ;;  %v13616_v36 = vpop.f32.mrb[72].mxu1 }
0x12cd   : > { %v8639_v31 = vadd.f32 %v13616_v36, %v8634_v33  ;;  %v8599_v13 = vpop.f32.mrb[73].mxu1 }
0x12ce   : > { %v8638_v41 = vadd.f32 %v8629_v37, %v8599_v13  ;;  %13625 = vmatprep.mubr.msk.f32.mxu0 %vm8648_vm4, %v17756_v30  ;;  %13700 = vmatprep.mubr.msk.f32.mxu1 %vm8648_vm4, %v17756_v30  ;;  %v8846_v37 = vld [vmem:[#allocation24 + $0x18] sm:$0xff]  ;;  %v8749_v13 = vld [vmem:[#allocation24] sm:$0xff] }
0x12cf   : > { %13626 = vmatmul.mubr.msk.f32.vlgmr.msra.gmra.mrb[56].mxu0 %vm8648_vm4, %v17758_v34  ;;  %13701 = vmatmul.mubr.msk.f32.vlgmr.msra.gmra.mrb[74].mxu1 %vm8648_vm4, %v17758_v34  ;;  %v17770_v46 = vmax.f32 %v8639_v31, 0.0 }
0x12d0   : > { %v17768_v39 = vmax.f32 %v8638_v41, 0.0  ;;  %15025 = vmatpush3.bf16.msra.mxu0 %v15022_v19  ;;  %15087 = vmatpush3.bf16.msra.mxu1 %v15084_v20  ;;  %v9011_v41 = vld [vmem:[#allocation27 + $0x48] sm:$0xff] }
0x12d1   : > { %15028 = vmatprep.subr.msk.bf16.mxu0 %vm17646_vm9, %v15026_v32  ;;  %15090 = vmatprep.subr.msk.bf16.mxu1 %vm17646_vm9, %v15088_v40 }
0x12d2   : > { %13628 = vmatprep.mubr.msk.f32.mxu0 %vm8648_vm4, %v17768_v39  ;;  %13703 = vmatprep.mubr.msk.f32.mxu1 %vm8648_vm4, %v17768_v39 }
0x12d3   : > { %13629 = vmatmul.mubr.msk.f32.gmra.mrb[58].mxu0 %vm8648_vm4, %v17770_v46  ;;  %13704 = vmatmul.mubr.msk.f32.gmra.mrb[76].mxu1 %vm8648_vm4, %v17770_v46 }
0x12d4   : > { %15031 = vmatpush3.bf16.msk.msra.mxu0 %vm17646_vm9, %v15026_v32  ;;  %13639 = vmatprep.mubr.msk.f32.mxu0 %vm8648_vm4, %v17756_v30 }
0x12d5   : > { %15093 = vmatpush3.bf16.msk.msra.mxu1 %vm17646_vm9, %v15088_v40  ;;  %13725 = vmatprep.mubr.msk.f32.mxu1 %vm8648_vm4, %v17756_v30  ;;  %v9010_v40 = vld [vmem:[#allocation27 + $0x40] sm:$0xff] }
0x12d6   : > { %15103 = vmatprep.subr.bf16.mxu1 %v15102_v42 }
0x12d7   : > { %13640 = vmatmul.mubr.msk.f32.vlgmr.msra.gmra.mrb[60].mxu0 %vm8648_vm4, %v17758_v34 }
0x12d8   : > { %13726 = vmatmul.mubr.msk.f32.vlgmr.msra.gmra.mrb[78].mxu1 %vm8648_vm4, %v17758_v34  ;;  %13642 = vmatprep.mubr.msk.f32.mxu0 %vm8648_vm4, %v17768_v39 }
0x12d9   : > { %13728 = vmatprep.mubr.msk.f32.mxu1 %vm8648_vm4, %v17768_v39  ;;  %15105 = vmatpush3.bf16.msra.mxu1 %v15102_v42  ;;  %v15048_v42 = vpack.c.bf16 %v9011_v41, %v9010_v40  ;;  %v10294_v41 = vld [vmem:[#allocation31 + $0x80] sm:$0xff] }
0x12da   : > { %15108 = vmatprep.subr.msk.bf16.mxu1 %vm17646_vm9, %v15106_v48 }
0x12db   : > { %13643 = vmatmul.mubr.msk.f32.gmra.mrb[62].mxu0 %vm8648_vm4, %v17770_v46 }
0x12dc   : > { %13729 = vmatmul.mubr.msk.f32.gmra.mrb[80].mxu1 %vm8648_vm4, %v17770_v46  ;;  %13653 = vmatprep.mubr.msk.f32.mxu0 %vm5117_vm5, %v8845_v3 }
0x12dd   : > { %15111 = vmatpush3.bf16.msk.msra.mxu1 %vm17646_vm9, %v15106_v48  ;;  %13750 = vmatprep.mubr.msk.f32.mxu1 %vm8648_vm4, %v17756_v30  ;;  %v9013_v48 = vld [vmem:[#allocation27 + $0x58] sm:$0x1] }
0x12de   : > { %15121 = vmatprep.subr.bf16.mxu1 %v15120_v60  ;;  %v15052_v52 = vpack.c.bf16 %v9013_v48, %v9012_v47  ;;  %v10301_v47 = vld [vmem:[#allocation31 + $0xb8] sm:$0xff] }
0x12e0   : > { %13751 = vmatmul.mubr.msk.f32.vlgmr.msra.gmra.mrb[82].mxu1 %vm8648_vm4, %v17758_v34 }
0x12e1   : > { %13753 = vmatprep.mubr.msk.f32.mxu1 %vm8648_vm4, %v17768_v39  ;;  %15123 = vmatpush3.bf16.msra.mxu1 %v15120_v60 }
0x12e2   : > { %15126 = vmatprep.subr.msk.bf16.mxu1 %vm17646_vm9, %v15124_v53 }
0x12e4   : > { %13754 = vmatmul.mubr.msk.f32.gmra.mrb[84].mxu1 %vm8648_vm4, %v17770_v46 }
0x12e5   : > { %15129 = vmatpush3.bf16.msk.msra.mxu1 %vm17646_vm9, %v15124_v53  ;;  %13775 = vmatprep.mubr.msk.f32.mxu1 %vm8648_vm4, %v17756_v30 }
0x12e6   : > { %15139 = vmatprep.subr.bf16.mxu1 %v15138_v56 }
0x12e8   : > { %13776 = vmatmul.mubr.msk.f32.vlgmr.msra.gmra.mrb[86].mxu1 %vm8648_vm4, %v17758_v34 }
0x12e9   : > { %13778 = vmatprep.mubr.msk.f32.mxu1 %vm8648_vm4, %v17768_v39  ;;  %15141 = vmatpush3.bf16.msra.mxu1 %v15138_v56 }
0x12ea   : > { %15144 = vmatprep.subr.msk.bf16.mxu1 %vm17646_vm9, %v15142_v35 }
0x12ec   : > { %13779 = vmatmul.mubr.msk.f32.gmra.mrb[88].mxu1 %vm8648_vm4, %v17770_v46 }
0x12ed   : > { %15147 = vmatpush3.bf16.msk.msra.mxu1 %vm17646_vm9, %v15142_v35  ;;  %13800 = vmatprep.mubr.msk.f32.mxu1 %vm8648_vm4, %v17756_v30 }
0x12ee   : > { %15157 = vmatprep.subr.bf16.mxu1 %v15156_v8 }
0x12f0   : > { %13801 = vmatmul.mubr.msk.f32.vlgmr.msra.gmra.mrb[90].mxu1 %vm8648_vm4, %v17758_v34 }
0x12f1   : > { %13803 = vmatprep.mubr.msk.f32.mxu1 %vm8648_vm4, %v17768_v39  ;;  %15159 = vmatpush3.bf16.msra.mxu1 %v15156_v8 }
0x12f2   : > { %15162 = vmatprep.subr.msk.bf16.mxu1 %vm17646_vm9, %v15160_v2 }
0x12f4   : > { %13804 = vmatmul.mubr.msk.f32.gmra.mrb[92].mxu1 %vm8648_vm4, %v17770_v46 }
0x12f5   : > { %15165 = vmatpush3.bf16.msk.msra.mxu1 %vm17646_vm9, %v15160_v2  ;;  %13825 = vmatprep.mubr.msk.f32.mxu1 %vm8648_vm4, %v17756_v30 }
0x12f8   : > { %13826 = vmatmul.mubr.msk.f32.vlgmr.msra.gmra.mrb[94].mxu1 %vm8648_vm4, %v17758_v34 }
0x12f9   : > { %13828 = vmatprep.mubr.msk.f32.mxu1 %vm8648_vm4, %v17768_v39 }
0x12fc   : > { %13829 = vmatmul.mubr.msk.f32.gmra.mrb[96].mxu1 %vm8648_vm4, %v17770_v46 }
0x12fd   : > { %10387 = vmatprep.mubr.f32.mxu1 %v16532_v38 }
0x13a2   : > { %v13627_v4 = vpop.f32.mrb[56].mxu0  ;;  %v13702_v6 = vpop.f32.mrb[74].mxu1 }
0x13a3   : > { %v8730_v12 = vpop.f32.mrb[57].mxu0  ;;  %v9262_v50 = vpop.f32.mrb[75].mxu1 }
0x13a4   : > { %v15040_v9 = vpack.c.bf16 %v13627_v4, %v8730_v12  ;;  %v17854_v10 = vpack.c.bf16 %v13702_v6, %v9262_v50  ;;  %v9103_v4 = vld [vmem:[#allocation24 + $0x20] sm:$0xff]  ;;  %v10281_v6 = vld [vmem:[#allocation31 + $0x18] sm:$0xff]  ;;  %v10278_v12 = vld [vmem:[#allocation31] sm:$0xff] }
0x13a5   : > { %v10280_v50 = vld [vmem:[#allocation31 + $0x10] sm:$0xff] }
0x13a6   : > { %v13630_v11 = vpop.f32.mrb[58].mxu0  ;;  %v13705_v14 = vpop.f32.mrb[76].mxu1 }
0x13a7   : > { %v8740_v16 = vpop.f32.mrb[59].mxu0  ;;  %v9272_v18 = vpop.f32.mrb[77].mxu1 }
0x13a8   : > { %v15044_v19 = vpack.c.bf16 %v13630_v11, %v8740_v16  ;;  %v17856_v7 = vpack.c.bf16 %v13705_v14, %v9272_v18  ;;  %v10283_v11 = vld [vmem:[#allocation31 + $0x28] sm:$0xff]  ;;  %v10285_v14 = vld [vmem:[#allocation31 + $0x38] sm:$0xff]  ;;  %v10282_v16 = vld [vmem:[#allocation31 + $0x20] sm:$0xff] }
0x13a9   : > { %v10284_v18 = vld [vmem:[#allocation31 + $0x30] sm:$0xff] }
0x13aa   : > { %v13641_v20 = vpop.f32.mrb[60].mxu0 }
0x13ab   : > { %v13727_v21 = vpop.f32.mrb[78].mxu1  ;;  %v8825_v22 = vpop.f32.mrb[61].mxu0 }
0x13ac   : > { %v15032_v1 = vpack.c.bf16 %v13641_v20, %v8825_v22  ;;  %v9441_v23 = vpop.f32.mrb[79].mxu1  ;;  %v10287_v20 = vld [vmem:[#allocation31 + $0x48] sm:$0xff] }
0x13ad   : > { %v17858_v24 = vpack.c.bf16 %v13727_v21, %v9441_v23  ;;  %v10289_v21 = vld [vmem:[#allocation31 + $0x58] sm:$0xff]  ;;  %v10288_v23 = vld [vmem:[#allocation31 + $0x50] sm:$0xff] }
0x13ae   : > { %v13644_v25 = vpop.f32.mrb[62].mxu0  ;;  %15033 = vmatprep.subr.bf16.mxu0 %v15032_v1  ;;  %v15182_v22 = vpack.c.bf16 %v10289_v21, %v10287_v20  ;;  %v10406_v20 = vld [vmem:[#allocation31 + $0x120] sm:$0xff]  ;;  %v10408_v21 = vld [vmem:[#allocation31 + $0x130] sm:$0xff] }
0x13af   : > { %v13730_v26 = vpop.f32.mrb[80].mxu1  ;;  %v8835_v27 = vpop.f32.mrb[63].mxu0  ;;  %15035 = vmatpush3.bf16.msra.mxu0 %v15032_v1  ;;  %v10286_v1 = vld [vmem:[#allocation31 + $0x40] sm:$0xff] }
0x13b0   : > { %v15036_v28 = vpack.c.bf16 %v13644_v25, %v8835_v27  ;;  %v9451_v29 = vpop.f32.mrb[81].mxu1  ;;  %v15184_v25 = vpack.c.bf16 %v10288_v23, %v10286_v1  ;;  %v10293_v27 = vld [vmem:[#allocation31 + $0x78] sm:$0xff] }
0x13b1   : > { %v17860_v33 = vpack.c.bf16 %v13730_v26, %v9451_v29  ;;  %v10291_v26 = vld [vmem:[#allocation31 + $0x68] sm:$0xff]  ;;  %v10290_v29 = vld [vmem:[#allocation31 + $0x60] sm:$0xff]  ;;  %v10413_v1 = vld [vmem:[#allocation31 + $0x158] sm:$0xff] }
0x13b2   : > { %15037 = vmatprep.subr.bf16.mxu0 %v15036_v28 }
0x13b3   : > { %v13752_v36 = vpop.f32.mrb[82].mxu1  ;;  %15039 = vmatpush3.bf16.msra.mxu0 %v15036_v28  ;;  %v15186_v28 = vpack.c.bf16 %v10293_v27, %v10291_v26  ;;  %v10412_v26 = vld [vmem:[#allocation31 + $0x150] sm:$0xff]  ;;  %v10415_v27 = vld [vmem:[#allocation31 + $0x168] sm:$0xff] }
0x13b4   : > { %v9620_v31 = vpop.f32.mrb[83].mxu1  ;;  %15041 = vmatprep.subr.bf16.mxu0 %v15040_v9 }
0x13b5   : > { %v17862_v32 = vpack.c.bf16 %v13752_v36, %v9620_v31  ;;  %v10292_v36 = vld [vmem:[#allocation31 + $0x70] sm:$0xff]  ;;  %v10295_v31 = vld [vmem:[#allocation31 + $0x88] sm:$0xff] }
0x13b6   : > { %13654 = vmatmul.mubr.msk.f32.vlgmr.msra.gmra.mrb[64].mxu0 %vm5117_vm5, %v8846_v37  ;;  %v15188_v37 = vpack.c.bf16 %v10292_v36, %v10290_v29  ;;  %v10414_v36 = vld [vmem:[#allocation31 + $0x160] sm:$0xff] }
0x13b7   : > { %v13755_v44 = vpop.f32.mrb[84].mxu1  ;;  %15043 = vmatpush3.bf16.msra.mxu0 %v15040_v9  ;;  %13664 = vmatprep.mubr.msk.f32.mxu0 %vm5117_vm5, %v8749_v13  ;;  %v15176_v9 = vpack.c.bf16 %v10280_v50, %v10278_v12  ;;  %v10297_v13 = vld [vmem:[#allocation31 + $0x98] sm:$0xff]  ;;  %v9461_v12 = vld [vmem:[#allocation24 + $0x40] sm:$0xff]  ;;  %v9640_v50 = vld [vmem:[#allocation24 + $0x50] sm:$0xff] }
0x13b8   : > { %v9630_v45 = vpop.f32.mrb[85].mxu1  ;;  %15045 = vmatprep.subr.bf16.mxu0 %v15044_v19  ;;  %v15190_v40 = vpack.c.bf16 %v10297_v13, %v10295_v31  ;;  %v10419_v31 = vld [vmem:[#allocation31 + $0x188] sm:$0xff]  ;;  %v10421_v13 = vld [vmem:[#allocation31 + $0x198] sm:$0xff] }
0x13b9   : > { %v17866_v43 = vpack.c.bf16 %v13755_v44, %v9630_v45  ;;  %v10296_v44 = vld [vmem:[#allocation31 + $0x90] sm:$0xff] }
0x13ba   : > { %v15192_v45 = vpack.c.bf16 %v10296_v44, %v10294_v41  ;;  %v15224_v41 = vpack.c.bf16 %v10421_v13, %v10419_v31  ;;  %v10418_v44 = vld [vmem:[#allocation31 + $0x180] sm:$0xff]  ;;  %v10682_v13 = vld [vmem:[#allocation31 + $0x270] sm:$0xff] }
0x13bb   : > { %v13777_v49 = vpop.f32.mrb[86].mxu1  ;;  %15047 = vmatpush3.bf16.msra.mxu0 %v15044_v19  ;;  %v15180_v19 = vpack.c.bf16 %v10284_v18, %v10282_v16  ;;  %v10409_v16 = vld [vmem:[#allocation31 + $0x138] sm:$0xff]  ;;  %v10680_v31 = vld [vmem:[#allocation31 + $0x260] sm:$0xff] }
0x13bc   : > { %v9799_v60 = vpop.f32.mrb[87].mxu1  ;;  %15049 = vmatprep.subr.bf16.mxu0 %v15048_v42 }
0x13bd   : > { %v17868_v0 = vpack.c.bf16 %v13777_v49, %v9799_v60  ;;  %v10298_v49 = vld [vmem:[#allocation31 + $0xa0] sm:$0xff] }
0x13be   : > { %13665 = vmatmul.mubr.msk.f32.vlgmr.msra.gmra.mrb[64].mxu0 %vm5117_vm5, %v8750_v51  ;;  %v10300_v51 = vld [vmem:[#allocation31 + $0xb0] sm:$0xff] }
0x13bf   : > { %v13780_v53 = vpop.f32.mrb[88].mxu1  ;;  %15051 = vmatpush3.bf16.msra.mxu0 %v15048_v42  ;;  %13675 = vmatprep.mubr.msk.f32.mxu0 %vm8648_vm4, %v17756_v30  ;;  %v10299_v42 = vld [vmem:[#allocation31 + $0xa8] sm:$0xff]  ;;  %v15196_v60 = vpack.c.bf16 %v10300_v51, %v10298_v49  ;;  %v10422_v51 = vld [vmem:[#allocation31 + $0x1a0] sm:$0xff] }
0x13c0   : > { %v9809_v54 = vpop.f32.mrb[89].mxu1  ;;  %15054 = vmatprep.subr.msk.bf16.mxu0 %vm17646_vm9, %v15052_v52  ;;  %v15194_v48 = vpack.c.bf16 %v10301_v47, %v10299_v42  ;;  %v10423_v42 = vld [vmem:[#allocation31 + $0x1a8] sm:$0xff]  ;;  %v10425_v47 = vld [vmem:[#allocation31 + $0x1b8] sm:$0xff] }
0x13c1   : > { %v17875_v55 = vpack.c.bf16 %v13780_v53, %v9809_v54  ;;  %v10305_v53 = vld [vmem:[#allocation31 + $0xd8] sm:$0xff]  ;;  %v15228_v49 = vpack.c.bf16 %v10425_v47, %v10423_v42  ;;  %v10684_v42 = vld [vmem:[#allocation31 + $0x280] sm:$0xff]  ;;  %v10686_v47 = vld [vmem:[#allocation31 + $0x290] sm:$0xff] }
0x13c3   : > { %v13802_v56 = vpop.f32.mrb[90].mxu1  ;;  %15057 = vmatpush3.bf16.msk.msra.mxu0 %vm17646_vm9, %v15052_v52  ;;  %v10303_v52 = vld [vmem:[#allocation31 + $0xc8] sm:$0xff] }
0x13c4   : > { %v9978_v57 = vpop.f32.mrb[91].mxu1  ;;  %v15198_v54 = vpack.c.bf16 %v10305_v53, %v10303_v52  ;;  %v10427_v52 = vld [vmem:[#allocation31 + $0x1c8] sm:$0xff]  ;;  %v10429_v53 = vld [vmem:[#allocation31 + $0x1d8] sm:$0xff] }
0x13c5   : > { %v17879_v58 = vpack.c.bf16 %v13802_v56, %v9978_v57  ;;  %v10302_v56 = vld [vmem:[#allocation31 + $0xc0] sm:$0xff]  ;;  %v10304_v57 = vld [vmem:[#allocation31 + $0xd0] sm:$0xff] }
0x13c6   : > { %13676 = vmatmul.mubr.msk.f32.vlgmr.msra.gmra.mrb[66].mxu0 %vm8648_vm4, %v17758_v34  ;;  %v10279_v34 = vld [vmem:[#allocation31 + $0x8] sm:$0xff] }
0x13c7   : > { %v13805_v35 = vpop.f32.mrb[92].mxu1  ;;  %13678 = vmatprep.mubr.msk.f32.mxu0 %vm8648_vm4, %v17768_v39  ;;  %v15174_v39 = vpack.c.bf16 %v10281_v6, %v10279_v34  ;;  %v9104_v34 = vld [vmem:[#allocation24 + $0x28] sm:$0xff]  ;;  %v9282_v6 = vld [vmem:[#allocation24 + $0x30] sm:$0xff] }
0x13c8   : > { %v9988_v30 = vpop.f32.mrb[93].mxu1 }
0x13c9   : > { %v17885_v59 = vpack.c.bf16 %v13805_v35, %v9988_v30  ;;  %15175 = vmatprep.subr.bf16.mxu1 %v15174_v39  ;;  %v15200_v35 = vpack.c.bf16 %v10304_v57, %v10302_v56  ;;  %v9283_v39 = vld [vmem:[#allocation24 + $0x38] sm:$0xff]  ;;  %v15232_v56 = vpack.c.bf16 %v10429_v53, %v10427_v52  ;;  %v10426_v57 = vld [vmem:[#allocation31 + $0x1c0] sm:$0xff]  ;;  %v10690_v53 = vld [vmem:[#allocation31 + $0x2b0] sm:$0xff] }
0x13ca   : > { %13679 = vmatmul.mubr.msk.f32.gmra.mrb[68].mxu0 %vm8648_vm4, %v17770_v46  ;;  %v15178_v46 = vpack.c.bf16 %v10285_v14, %v10283_v11  ;;  %15177 = vmatpush1.bf16.msra.mxu1 %v15176_v9  ;;  %v10403_v9 = vld [vmem:[#allocation31 + $0x108] sm:$0xff]  ;;  %v10402_v11 = vld [vmem:[#allocation31 + $0x100] sm:$0xff]  ;;  %v10404_v14 = vld [vmem:[#allocation31 + $0x110] sm:$0xff] }
0x13cb   : > { %v13827_v61 = vpop.f32.mrb[94].mxu1  ;;  %13689 = vmatprep.mubr.msk.f32.mxu0 %vm5117_vm5, %v9103_v4  ;;  %v15210_v18 = vpack.c.bf16 %v10404_v14, %v10402_v11  ;;  %v10673_v11 = vld [vmem:[#allocation31 + $0x228] sm:$0xff]  ;;  %v10675_v14 = vld [vmem:[#allocation31 + $0x238] sm:$0xff]  ;;  %v10688_v52 = vld [vmem:[#allocation31 + $0x2a0] sm:$0xff] }
0x13cc   : > { %v10157_v8 = vpop.f32.mrb[95].mxu1  ;;  %15179 = vmatprep.subr.bf16.mxu1 %v15178_v46  ;;  %v10407_v46 = vld [vmem:[#allocation31 + $0x128] sm:$0xff] }
0x13cd   : > { %v17889_v63 = vpack.c.bf16 %v13827_v61, %v10157_v8 }
0x13ce   : > { %15181 = vmatpush1.bf16.msra.mxu1 %v15180_v19  ;;  %v15212_v19 = vpack.c.bf16 %v10409_v16, %v10407_v46  ;;  %v10272_v16 = vpop.permute.xlu1 %10271 }
0x13cf   : > { %v13830_v15 = vpop.f32.mrb[96].mxu1  ;;  %15183 = vmatprep.subr.bf16.mxu1 %v15182_v22  ;;  %v10411_v22 = vld [vmem:[#allocation31 + $0x148] sm:$0xff] }
0x13d0   : > { %v10167_v2 = vpop.f32.mrb[97].mxu1  ;;  %v15216_v23 = vpack.c.bf16 %v10413_v1, %v10411_v22  ;;  %v10674_v22 = vld [vmem:[#allocation31 + $0x230] sm:$0xff]  ;;  %v10677_v1 = vld [vmem:[#allocation31 + $0x248] sm:$0xff] }
0x13d1   : > { %v17891_v3 = vpack.c.bf16 %v13830_v15, %v10167_v2 }
0x13d2   : > { %15185 = vmatpush1.bf16.msra.mxu1 %v15184_v25  ;;  %v10410_v25 = vld [vmem:[#allocation31 + $0x140] sm:$0xff] }
0x13d3   : > { %15187 = vmatprep.subr.bf16.mxu1 %v15186_v28  ;;  %v15218_v28 = vpack.c.bf16 %v10412_v26, %v10410_v25 }
0x13d6   : > { %15189 = vmatpush1.bf16.msra.mxu1 %v15188_v37  ;;  %v10416_v37 = vld [vmem:[#allocation31 + $0x170] sm:$0xff] }
0x13d7   : > { %15191 = vmatprep.subr.bf16.mxu1 %v15190_v40  ;;  %v15222_v40 = vpack.c.bf16 %v10416_v37, %v10414_v36 }
0x13da   : > { %15193 = vmatpush1.bf16.msra.mxu1 %v15192_v45  ;;  %v10420_v45 = vld [vmem:[#allocation31 + $0x190] sm:$0xff] }
0x13db   : > { %15195 = vmatprep.subr.bf16.mxu1 %v15194_v48  ;;  %v15226_v48 = vpack.c.bf16 %v10420_v45, %v10418_v44  ;;  %v15264_v44 = vpack.c.bf16 %v10682_v13, %v10680_v31 }
0x13de   : > { %15197 = vmatpush1.bf16.msra.mxu1 %v15196_v60  ;;  %v10424_v60 = vld [vmem:[#allocation31 + $0x1b0] sm:$0xff] }
0x13df   : > { %15199 = vmatprep.subr.bf16.mxu1 %v15198_v54  ;;  %v15230_v54 = vpack.c.bf16 %v10424_v60, %v10422_v51  ;;  %v15268_v51 = vpack.c.bf16 %v10686_v47, %v10684_v42 }
0x13e2   : > { %15201 = vmatpush1.bf16.msra.mxu1 %v15200_v35  ;;  %v10428_v35 = vld [vmem:[#allocation31 + $0x1d0] sm:$0xff] }
0x1499   : > { %v13677_v30 = vpop.f32.mrb[66].mxu0 }
0x149a   : > { %v9083_v61 = vpop.f32.mrb[67].mxu0 }
0x149b   : > { %v15058_v8 = vpack.c.bf16 %v13677_v30, %v9083_v61  ;;  %v15234_v30 = vpack.c.bf16 %v10428_v35, %v10426_v57  ;;  %v10431_v61 = vld [vmem:[#allocation31 + $0x1e8] sm:$0xff]  ;;  %v15272_v57 = vpack.c.bf16 %v10690_v53, %v10688_v52 }
0x149d   : > { %v13680_v15 = vpop.f32.mrb[68].mxu0  ;;  %15059 = vmatprep.subr.bf16.mxu0 %v15058_v8 }
0x149e   : > { %v9093_v2 = vpop.f32.mrb[69].mxu0  ;;  %15061 = vmatpush3.bf16.msra.mxu0 %v15058_v8  ;;  %v10433_v8 = vld [vmem:[#allocation31 + $0x1f8] sm:$0x1] }
0x149f   : > { %v15062_v4 = vpack.c.bf16 %v13680_v15, %v9093_v2  ;;  %v15236_v15 = vpack.c.bf16 %v10433_v8, %v10431_v61  ;;  %v10307_v2 = vld [vmem:[#allocation31 + $0xe8] sm:$0xff]  ;;  %v10694_v61 = vld [vmem:[#allocation31 + $0x2d0] sm:$0xff] }
0x14a0   : > { %v10697_v8 = vld [vmem:[#allocation31 + $0x2e8] sm:$0xff] }
0x14a1   : > { %15063 = vmatprep.subr.bf16.mxu0 %v15062_v4 }
0x14a2   : > { %15065 = vmatpush3.bf16.msra.mxu0 %v15062_v4  ;;  %v10309_v4 = vld [vmem:[#allocation31 + $0xf8] sm:$0x1] }
0x14a3   : > { %15077 = vmatprep.subr.bf16.mxu0 %v17854_v10 }
0x14a5   : > { %13690 = vmatmul.mubr.msk.f32.vlgmr.msra.gmra.mrb[64].mxu0 %vm5117_vm5, %v9104_v34  ;;  %v10430_v34 = vld [vmem:[#allocation31 + $0x1e0] sm:$0xff] }
0x14a6   : > { %15079 = vmatpush3.bf16.msra.mxu0 %v17854_v10  ;;  %13714 = vmatprep.mubr.msk.f32.mxu0 %vm5117_vm5, %v9282_v6  ;;  %v9462_v10 = vld [vmem:[#allocation24 + $0x48] sm:$0xff]  ;;  %v15202_v6 = vpack.c.bf16 %v10309_v4, %v10307_v2 }
0x14a7   : > { %15081 = vmatprep.subr.bf16.mxu0 %v17856_v7 }
0x14a8   : > { %15204 = vmatprep.subr.msk.bf16.mxu1 %vm17646_vm9, %v15202_v6  ;;  %v10698_v6 = vld [vmem:[#allocation31 + $0x2f0] sm:$0x1] }
0x14aa   : > { %15083 = vmatpush3.bf16.msra.mxu0 %v17856_v7  ;;  %v9641_v7 = vld [vmem:[#allocation24 + $0x58] sm:$0xff] }
0x14ab   : > { %15095 = vmatprep.subr.bf16.mxu0 %v17858_v24 }
0x14ad   : > { %13715 = vmatmul.mubr.msk.f32.vlgmr.msra.gmra.mrb[64].mxu0 %vm5117_vm5, %v9283_v39  ;;  %v10432_v39 = vld [vmem:[#allocation31 + $0x1f0] sm:$0x1] }
0x14ae   : > { %15097 = vmatpush3.bf16.msra.mxu0 %v17858_v24  ;;  %13739 = vmatprep.mubr.msk.f32.mxu0 %vm5117_vm5, %v9461_v12  ;;  %v9819_v24 = vld [vmem:[#allocation24 + $0x60] sm:$0xff]  ;;  %v10306_v12 = vld [vmem:[#allocation31 + $0xe0] sm:$0xff] }
0x14af   : > { %15099 = vmatprep.subr.bf16.mxu0 %v17860_v33 }
0x14b2   : > { %15101 = vmatpush3.bf16.msra.mxu0 %v17860_v33  ;;  %v9820_v33 = vld [vmem:[#allocation24 + $0x68] sm:$0xff] }
0x14b3   : > { %15113 = vmatprep.subr.bf16.mxu0 %v17862_v32 }
0x14b5   : > { %13740 = vmatmul.mubr.msk.f32.vlgmr.msra.gmra.mrb[64].mxu0 %vm5117_vm5, %v9462_v10  ;;  %v10308_v10 = vld [vmem:[#allocation31 + $0xf0] sm:$0x1] }
0x14b6   : > { %15115 = vmatpush3.bf16.msra.mxu0 %v17862_v32  ;;  %13764 = vmatprep.mubr.msk.f32.mxu0 %vm5117_vm5, %v9640_v50  ;;  %v9998_v32 = vld [vmem:[#allocation24 + $0x70] sm:$0xff]  ;;  %v15239_v50 = vpack.c.bf16 %v10432_v39, %v10430_v34  ;;  %v11057_v39 = vld [vmem:[#allocation31 + $0x408] sm:$0xff] }
0x14b7   : > { %15117 = vmatprep.subr.bf16.mxu0 %v17866_v43  ;;  %v10696_v34 = vld [vmem:[#allocation31 + $0x2e0] sm:$0xff] }
0x14ba   : > { %15119 = vmatpush3.bf16.msra.mxu0 %v17866_v43  ;;  %v9999_v43 = vld [vmem:[#allocation24 + $0x78] sm:$0xff] }
0x14bb   : > { %15131 = vmatprep.subr.bf16.mxu0 %v17868_v0 }
0x14bd   : > { %13765 = vmatmul.mubr.msk.f32.vlgmr.msra.gmra.mrb[64].mxu0 %vm5117_vm5, %v9641_v7  ;;  %v15205_v7 = vpack.c.bf16 %v10308_v10, %v10306_v12  ;;  %v11059_v12 = vld [vmem:[#allocation31 + $0x418] sm:$0xff]  ;;  %v15281_v10 = vpack.c.bf16 %v10698_v6, %v10696_v34 }
0x14be   : > { %15133 = vmatpush3.bf16.msra.mxu0 %v17868_v0  ;;  %13789 = vmatprep.mubr.msk.f32.mxu0 %vm5117_vm5, %v9819_v24  ;;  %v10177_v0 = vld [vmem:[#allocation24 + $0x80] sm:$0xff]  ;;  %v10669_v24 = vld [vmem:[#allocation31 + $0x208] sm:$0xff] }
0x14bf   : > { %15135 = vmatprep.subr.bf16.mxu0 %v17875_v55  ;;  %15207 = vmatpush1.bf16.msk.msra.mxu1 %vm17646_vm9, %v15205_v7  ;;  %v11056_v7 = vld [vmem:[#allocation31 + $0x400] sm:$0xff] }
0x14c2   : > { %15137 = vmatpush3.bf16.msra.mxu0 %v17875_v55  ;;  %v10405_v55 = vld [vmem:[#allocation31 + $0x118] sm:$0xff] }
0x14c3   : > { %15149 = vmatprep.subr.bf16.mxu0 %v17879_v58 }
0x14c5   : > { %13790 = vmatmul.mubr.msk.f32.vlgmr.msra.gmra.mrb[64].mxu0 %vm5117_vm5, %v9820_v33  ;;  %v10671_v33 = vld [vmem:[#allocation31 + $0x218] sm:$0xff] }
0x14c6   : > { %15151 = vmatpush3.bf16.msra.mxu0 %v17879_v58  ;;  %13814 = vmatprep.mubr.msk.f32.mxu0 %vm5117_vm5, %v9998_v32  ;;  %v15208_v58 = vpack.c.bf16 %v10405_v55, %v10403_v9  ;;  %v15250_v32 = vpack.c.bf16 %v10671_v33, %v10669_v24  ;;  %v10670_v9 = vld [vmem:[#allocation31 + $0x210] sm:$0xff]  ;;  %v10267_v55 = vpop.permute.xlu0 %10266  ;;  %v11061_v33 = vld [vmem:[#allocation31 + $0x428] sm:$0xff] }
0x14c7   : > { %15153 = vmatprep.subr.bf16.mxu0 %v17885_v59  ;;  %v11058_v24 = vld [vmem:[#allocation31 + $0x410] sm:$0xff] }
0x14ca   : > { %15155 = vmatpush3.bf16.msra.mxu0 %v17885_v59  ;;  %v10178_v59 = vld [vmem:[#allocation24 + $0x88] sm:$0xff] }
0x14cb   : > { %15167 = vmatprep.subr.bf16.mxu0 %v17889_v63 }
0x14cd   : > { %13815 = vmatmul.mubr.msk.f32.vlgmr.msra.gmra.mrb[64].mxu0 %vm5117_vm5, %v9999_v43 }
0x14ce   : > { %15169 = vmatpush3.bf16.msra.mxu0 %v17889_v63  ;;  %13839 = vmatprep.mubr.msk.f32.mxu0 %vm5117_vm5, %v10177_v0  ;;  %v15214_v63 = vpack.c.bf16 %v10408_v21, %v10406_v20  ;;  %v10668_v0 = vld [vmem:[#allocation31 + $0x200] sm:$0xff]  ;;  %v15254_v20 = vpack.c.bf16 %v10675_v14, %v10673_v11  ;;  %v11067_v11 = vld [vmem:[#allocation31 + $0x458] sm:$0xff] }
0x14cf   : > { %15171 = vmatprep.subr.bf16.mxu0 %v17891_v3  ;;  %v10672_v21 = vld [vmem:[#allocation31 + $0x220] sm:$0xff] }
0x14d2   : > { %15173 = vmatpush3.bf16.msra.mxu0 %v17891_v3  ;;  %v10417_v3 = vld [vmem:[#allocation31 + $0x178] sm:$0xff] }
0x14d3   : > { %15209 = vmatprep.subr.bf16.mxu0 %v15208_v58  ;;  %v15220_v29 = vpack.c.bf16 %v10417_v3, %v10415_v27  ;;  %v10676_v27 = vld [vmem:[#allocation31 + $0x240] sm:$0xff]  ;;  %v10678_v3 = vld [vmem:[#allocation31 + $0x250] sm:$0xff] }
0x14d4   : > { %v15260_v36 = vpack.c.bf16 %v10678_v3, %v10676_v27 }
0x14d5   : > { %13840 = vmatmul.mubr.msk.f32.vlgmr.msra.gmra.mrb[64].mxu0 %vm5117_vm5, %v10178_v59  ;;  %vm10310_vm5 = vcmask 990208   ;;  %v15252_v59 = vpack.c.bf16 %v10670_v9, %v10668_v0  ;;  %v11060_v9 = vld [vmem:[#allocation31 + $0x420] sm:$0xff] }
0x14d6   : > { %15211 = vmatpush1.bf16.msra.mxu0 %v15210_v18  ;;  %10504 = vmatprep.mubr.f32.mxu0 %v16532_v38 }
0x14d7   : > { %15213 = vmatprep.subr.bf16.mxu0 %v15212_v19 }
0x14da   : > { %15215 = vmatpush1.bf16.msra.mxu0 %v15214_v63  ;;  %v10679_v63 = vld [vmem:[#allocation31 + $0x258] sm:$0xff] }
0x14db   : > { %15217 = vmatprep.subr.bf16.mxu0 %v15216_v23  ;;  %v15256_v23 = vpack.c.bf16 %v10674_v22, %v10672_v21  ;;  %v15258_v26 = vpack.c.bf16 %v10679_v63, %v10677_v1  ;;  %v11068_v1 = vld [vmem:[#allocation31 + $0x460] sm:$0xff]  ;;  %v11070_v63 = vld [vmem:[#allocation31 + $0x470] sm:$0xff] }
0x14dc   : > { %v15340_v27 = vpack.c.bf16 %v11070_v63, %v11068_v1 }
0x14de   : > { %15219 = vmatpush1.bf16.msra.mxu0 %v15218_v28  ;;  %v10681_v28 = vld [vmem:[#allocation31 + $0x268] sm:$0xff] }
0x14df   : > { %15221 = vmatprep.subr.bf16.mxu0 %v15220_v29  ;;  %v10683_v29 = vld [vmem:[#allocation31 + $0x278] sm:$0xff] }
0x14e0   : > { %v15262_v37 = vpack.c.bf16 %v10683_v29, %v10681_v28  ;;  %v11072_v28 = vld [vmem:[#allocation31 + $0x480] sm:$0xff]  ;;  %v11074_v29 = vld [vmem:[#allocation31 + $0x490] sm:$0xff] }
0x14e1   : > { %v15344_v31 = vpack.c.bf16 %v11074_v29, %v11072_v28 }
0x14e2   : > { %15223 = vmatpush1.bf16.msra.mxu0 %v15222_v40  ;;  %v10685_v40 = vld [vmem:[#allocation31 + $0x288] sm:$0xff] }
0x14e3   : > { %15225 = vmatprep.subr.bf16.mxu0 %v15224_v41  ;;  %v10687_v41 = vld [vmem:[#allocation31 + $0x298] sm:$0xff] }
0x14e4   : > { %v15266_v45 = vpack.c.bf16 %v10687_v41, %v10685_v40  ;;  %v11076_v40 = vld [vmem:[#allocation31 + $0x4a0] sm:$0xff]  ;;  %v11078_v41 = vld [vmem:[#allocation31 + $0x4b0] sm:$0xff] }
0x14e5   : > { %v15348_v42 = vpack.c.bf16 %v11078_v41, %v11076_v40 }
0x14e6   : > { %15227 = vmatpush1.bf16.msra.mxu0 %v15226_v48  ;;  %v10689_v48 = vld [vmem:[#allocation31 + $0x2a8] sm:$0xff] }
0x14e7   : > { %15229 = vmatprep.subr.bf16.mxu0 %v15228_v49  ;;  %v10691_v49 = vld [vmem:[#allocation31 + $0x2b8] sm:$0xff] }
0x14e8   : > { %v15270_v60 = vpack.c.bf16 %v10691_v49, %v10689_v48  ;;  %v11080_v48 = vld [vmem:[#allocation31 + $0x4c0] sm:$0xff]  ;;  %v11082_v49 = vld [vmem:[#allocation31 + $0x4d0] sm:$0xff] }
0x14e9   : > { %v15352_v52 = vpack.c.bf16 %v11082_v49, %v11080_v48 }
0x14ea   : > { %15231 = vmatpush1.bf16.msra.mxu0 %v15230_v54  ;;  %v10693_v54 = vld [vmem:[#allocation31 + $0x2c8] sm:$0xff] }
0x14eb   : > { %15233 = vmatprep.subr.bf16.mxu0 %v15232_v56  ;;  %v10695_v56 = vld [vmem:[#allocation31 + $0x2d8] sm:$0xff] }
0x14ec   : > { %v15274_v35 = vpack.c.bf16 %v10695_v56, %v10693_v54  ;;  %v11084_v54 = vld [vmem:[#allocation31 + $0x4e0] sm:$0xff]  ;;  %v11086_v56 = vld [vmem:[#allocation31 + $0x4f0] sm:$0x1] }
0x14ee   : > { %15235 = vmatpush1.bf16.msra.mxu0 %v15234_v30  ;;  %v10692_v30 = vld [vmem:[#allocation31 + $0x2c0] sm:$0xff] }
0x14ef   : > { %15238 = vmatprep.subr.msk.bf16.mxu0 %vm17646_vm9, %v15236_v15  ;;  %v10699_v15 = vld [vmem:[#allocation31 + $0x2f8] sm:$0x1]  ;;  %v15276_v2 = vpack.c.bf16 %v10694_v61, %v10692_v30  ;;  %v15357_v30 = vpack.c.bf16 %v11086_v56, %v11084_v54 }
0x14f0   : > { %v15278_v4 = vpack.c.bf16 %v10699_v15, %v10697_v8  ;;  %v11444_v8 = vld [vmem:[#allocation31 + $0x600] sm:$0xff]  ;;  %v11446_v15 = vld [vmem:[#allocation31 + $0x610] sm:$0xff] }
0x14f1   : > { %v15404_v34 = vpack.c.bf16 %v11446_v15, %v11444_v8 }
0x14f2   : > { %15241 = vmatpush1.bf16.msk.msra.mxu0 %vm17646_vm9, %v15239_v50  ;;  %v15326_v50 = vpack.c.bf16 %v11059_v12, %v11057_v39  ;;  %v11448_v39 = vld [vmem:[#allocation31 + $0x620] sm:$0xff]  ;;  %v11450_v12 = vld [vmem:[#allocation31 + $0x630] sm:$0xff] }
0x14f3   : > { %15251 = vmatprep.subr.bf16.mxu0 %v15250_v32  ;;  %v11063_v32 = vld [vmem:[#allocation31 + $0x438] sm:$0xff] }
0x14f4   : > { %v15330_v0 = vpack.c.bf16 %v11063_v32, %v11061_v33  ;;  %v11452_v33 = vld [vmem:[#allocation31 + $0x640] sm:$0xff]  ;;  %v11454_v32 = vld [vmem:[#allocation31 + $0x650] sm:$0xff] }
0x15a8   : > { %v13841_v43 = vpop.f32.mrb[64].mxu0 }
0x15a9   : > { %v10251_v58 = vpop.f32.mrb[65].mxu0  ;;  %v10275_v18 = vadd.f32 %v13841_v43, %v10272_v16  ;;  %v15328_v43 = vpack.c.bf16 %v11058_v24, %v11056_v7  ;;  %v11064_v16 = vld [vmem:[#allocation31 + $0x440] sm:$0xff]  ;;  %v15408_v7 = vpack.c.bf16 %v11450_v12, %v11448_v39 }
0x15aa   : > { %v10274_v46 = vadd.f32 %v10267_v55, %v10251_v58  ;;  %v11062_v55 = vld [vmem:[#allocation31 + $0x430] sm:$0xff]  ;;  %v11065_v58 = vld [vmem:[#allocation31 + $0x448] sm:$0xff] }
0x15ab   : > { %v17947_v25 = vmax.f32 %v10275_v18, 0.0  ;;  %v15332_v14 = vpack.c.bf16 %v11062_v55, %v11060_v9  ;;  %v11069_v18 = vld [vmem:[#allocation31 + $0x468] sm:$0xff]  ;;  %v15412_v9 = vpack.c.bf16 %v11454_v32, %v11452_v33 }
0x15ac   : > { %v17940_v19 = vmax.f32 %v10274_v46, 0.0  ;;  %v15334_v46 = vpack.c.bf16 %v11067_v11, %v11065_v58  ;;  %v11456_v58 = vld [vmem:[#allocation31 + $0x660] sm:$0xff]  ;;  %v11458_v11 = vld [vmem:[#allocation31 + $0x670] sm:$0xff] }
0x15ae   : > { %12646 = vmatmul.mubr.msk.f32.vlgmr.msra.gmra.mrb[98].mxu1 %vm10310_vm5, %v17940_v19  ;;  %12650 = vmatmul.mubr.msk.f32.vlgmr.msra.gmra.mrb[70].mxu0 %vm10310_vm5, %v17940_v19 }
0x15af   : > { %15253 = vmatpush1.bf16.msra.mxu0 %v15252_v59  ;;  %10393 = vmatprep.mubr.f32.mxu1 %v16532_v38  ;;  %v11066_v59 = vld [vmem:[#allocation31 + $0x450] sm:$0xff] }
0x15b0   : > { %10510 = vmatprep.mubr.f32.mxu0 %v16532_v38  ;;  %15255 = vmatprep.subr.bf16.mxu0 %v15254_v20  ;;  %v11071_v20 = vld [vmem:[#allocation31 + $0x478] sm:$0xff]  ;;  %v15336_v21 = vpack.c.bf16 %v11066_v59, %v11064_v16  ;;  %v15416_v16 = vpack.c.bf16 %v11458_v11, %v11456_v58 }
0x15b1   : > { %v15338_v22 = vpack.c.bf16 %v11071_v20, %v11069_v18  ;;  %v11460_v18 = vld [vmem:[#allocation31 + $0x680] sm:$0xff]  ;;  %v11462_v20 = vld [vmem:[#allocation31 + $0x690] sm:$0xff] }
0x15b2   : > { %12647 = vmatmul.mubr.msk.f32.gmra.mrb[100].mxu1 %vm10310_vm5, %v17947_v25  ;;  %12651 = vmatmul.mubr.msk.f32.gmra.mrb[72].mxu0 %vm10310_vm5, %v17947_v25  ;;  %v15420_v1 = vpack.c.bf16 %v11462_v20, %v11460_v18 }
0x15b3   : > { %15257 = vmatpush1.bf16.msra.mxu0 %v15256_v23  ;;  %10770 = vmatprep.mubr.f32.mxu0 %v16532_v38  ;;  %v11073_v23 = vld [vmem:[#allocation31 + $0x488] sm:$0xff] }
0x15b4   : > { %15259 = vmatprep.subr.bf16.mxu0 %v15258_v26  ;;  %10586 = vmatprep.mubr.f32.mxu1 %v16532_v38  ;;  %v11075_v26 = vld [vmem:[#allocation31 + $0x498] sm:$0xff] }
0x15b5   : > { %v15342_v3 = vpack.c.bf16 %v11075_v26, %v11073_v23  ;;  %v11464_v23 = vld [vmem:[#allocation31 + $0x6a0] sm:$0xff]  ;;  %v11466_v26 = vld [vmem:[#allocation31 + $0x6b0] sm:$0xff] }
0x15b6   : > { %v15424_v28 = vpack.c.bf16 %v11466_v26, %v11464_v23 }
0x15b7   : > { %15261 = vmatpush1.bf16.msra.mxu0 %v15260_v36  ;;  %v11077_v36 = vld [vmem:[#allocation31 + $0x4a8] sm:$0xff] }
0x15b8   : > { %15263 = vmatprep.subr.bf16.mxu0 %v15262_v37  ;;  %v11079_v37 = vld [vmem:[#allocation31 + $0x4b8] sm:$0xff] }
0x15b9   : > { %v15346_v13 = vpack.c.bf16 %v11079_v37, %v11077_v36  ;;  %v11468_v36 = vld [vmem:[#allocation31 + $0x6c0] sm:$0xff]  ;;  %v11470_v37 = vld [vmem:[#allocation31 + $0x6d0] sm:$0xff] }
0x15ba   : > { %v15428_v40 = vpack.c.bf16 %v11470_v37, %v11468_v36 }
0x15bb   : > { %15265 = vmatpush1.bf16.msra.mxu0 %v15264_v44  ;;  %v11081_v44 = vld [vmem:[#allocation31 + $0x4c8] sm:$0xff] }
0x15bc   : > { %15267 = vmatprep.subr.bf16.mxu0 %v15266_v45  ;;  %v11083_v45 = vld [vmem:[#allocation31 + $0x4d8] sm:$0xff] }
0x15bd   : > { %v15350_v47 = vpack.c.bf16 %v11083_v45, %v11081_v44  ;;  %v11472_v44 = vld [vmem:[#allocation31 + $0x6e0] sm:$0xff]  ;;  %v11474_v45 = vld [vmem:[#allocation31 + $0x6f0] sm:$0x1] }
0x15be   : > { %v15433_v48 = vpack.c.bf16 %v11474_v45, %v11472_v44 }
0x15bf   : > { %15269 = vmatpush1.bf16.msra.mxu0 %v15268_v51  ;;  %v11085_v51 = vld [vmem:[#allocation31 + $0x4e8] sm:$0xff] }
0x15c0   : > { %15271 = vmatprep.subr.bf16.mxu0 %v15270_v60  ;;  %v11087_v60 = vld [vmem:[#allocation31 + $0x4f8] sm:$0x1] }
0x15c1   : > { %v15354_v53 = vpack.c.bf16 %v11087_v60, %v11085_v51  ;;  %v11832_v51 = vld [vmem:[#allocation31 + $0x800] sm:$0xff]  ;;  %v11834_v60 = vld [vmem:[#allocation31 + $0x810] sm:$0xff] }
0x15c2   : > { %v15480_v54 = vpack.c.bf16 %v11834_v60, %v11832_v51  ;;  %v10400_v51 = vld [vmem:[#allocation28] sm:$0xff] }
0x15c3   : > { %15273 = vmatpush1.bf16.msra.mxu0 %v15272_v57  ;;  %v11445_v57 = vld [vmem:[#allocation31 + $0x608] sm:$0xff] }
0x15c4   : > { %15275 = vmatprep.subr.bf16.mxu0 %v15274_v35  ;;  %v11447_v35 = vld [vmem:[#allocation31 + $0x618] sm:$0xff] }
0x15c5   : > { %v15402_v61 = vpack.c.bf16 %v11447_v35, %v11445_v57  ;;  %v11836_v57 = vld [vmem:[#allocation31 + $0x820] sm:$0xff]  ;;  %v11838_v35 = vld [vmem:[#allocation31 + $0x830] sm:$0xff] }
0x15c6   : > { %v15484_v8 = vpack.c.bf16 %v11838_v35, %v11836_v57 }
0x15c7   : > { %15277 = vmatpush1.bf16.msra.mxu0 %v15276_v2  ;;  %v11449_v2 = vld [vmem:[#allocation31 + $0x628] sm:$0xff] }
0x15c8   : > { %15280 = vmatprep.subr.msk.bf16.mxu0 %vm17646_vm9, %v15278_v4  ;;  %v11451_v4 = vld [vmem:[#allocation31 + $0x638] sm:$0xff] }
0x15c9   : > { %v15406_v6 = vpack.c.bf16 %v11451_v4, %v11449_v2  ;;  %v11840_v2 = vld [vmem:[#allocation31 + $0x840] sm:$0xff]  ;;  %v11842_v4 = vld [vmem:[#allocation31 + $0x850] sm:$0xff] }
0x15ca   : > { %v15488_v39 = vpack.c.bf16 %v11842_v4, %v11840_v2  ;;  %v10867_v2 = vld [vmem:[#allocation31 + $0x328] sm:$0xff]  ;;  %v10869_v4 = vld [vmem:[#allocation31 + $0x338] sm:$0xff] }
0x15cb   : > { %15283 = vmatpush1.bf16.msk.msra.mxu0 %vm17646_vm9, %v15281_v10  ;;  %v11453_v10 = vld [vmem:[#allocation31 + $0x648] sm:$0xff] }
0x15cc   : > { %15327 = vmatprep.subr.bf16.mxu0 %v15326_v50  ;;  %v11455_v50 = vld [vmem:[#allocation31 + $0x658] sm:$0xff] }
0x15cd   : > { %v15410_v24 = vpack.c.bf16 %v11455_v50, %v11453_v10  ;;  %v11844_v10 = vld [vmem:[#allocation31 + $0x860] sm:$0xff]  ;;  %v11846_v50 = vld [vmem:[#allocation31 + $0x870] sm:$0xff] }
0x15ce   : > { %12656 = vmatmul.mubr.msk.f32.vlgmr.msra.gmra.mrb[74].mxu0 %vm10310_vm5, %v17940_v19  ;;  %v15492_v33 = vpack.c.bf16 %v11846_v50, %v11844_v10  ;;  %v10868_v10 = vld [vmem:[#allocation31 + $0x330] sm:$0xff]  ;;  %v10871_v50 = vld [vmem:[#allocation31 + $0x348] sm:$0xff] }
0x15cf   : > { %15329 = vmatpush1.bf16.msra.mxu0 %v15328_v43  ;;  %10776 = vmatprep.mubr.f32.mxu0 %v16532_v38  ;;  %v11457_v43 = vld [vmem:[#allocation31 + $0x668] sm:$0xff] }
0x15d0   : > { %15331 = vmatprep.subr.bf16.mxu0 %v15330_v0  ;;  %v11459_v0 = vld [vmem:[#allocation31 + $0x678] sm:$0xff] }
0x15d1   : > { %v15414_v55 = vpack.c.bf16 %v11459_v0, %v11457_v43  ;;  %v11848_v43 = vld [vmem:[#allocation31 + $0x880] sm:$0xff]  ;;  %v11850_v0 = vld [vmem:[#allocation31 + $0x890] sm:$0xff] }
0x15d2   : > { %12657 = vmatmul.mubr.msk.f32.gmra.mrb[76].mxu0 %vm10310_vm5, %v17947_v25  ;;  %v15496_v58 = vpack.c.bf16 %v11850_v0, %v11848_v43  ;;  %v10872_v43 = vld [vmem:[#allocation31 + $0x350] sm:$0xff]  ;;  %v10875_v0 = vld [vmem:[#allocation31 + $0x368] sm:$0xff] }
0x15d3   : > { %15333 = vmatpush1.bf16.msra.mxu0 %v15332_v14  ;;  %11158 = vmatprep.mubr.f32.mxu0 %v16532_v38  ;;  %v11461_v14 = vld [vmem:[#allocation31 + $0x688] sm:$0xff] }
0x15d4   : > { %15335 = vmatprep.subr.bf16.mxu0 %v15334_v46  ;;  %v11463_v46 = vld [vmem:[#allocation31 + $0x698] sm:$0xff] }
0x15d5   : > { %v15418_v59 = vpack.c.bf16 %v11463_v46, %v11461_v14  ;;  %v11852_v14 = vld [vmem:[#allocation31 + $0x8a0] sm:$0xff]  ;;  %v11854_v46 = vld [vmem:[#allocation31 + $0x8b0] sm:$0xff] }
0x15d6   : > { %v15500_v18 = vpack.c.bf16 %v11854_v46, %v11852_v14  ;;  %v10876_v14 = vld [vmem:[#allocation31 + $0x370] sm:$0xff]  ;;  %v10879_v46 = vld [vmem:[#allocation31 + $0x388] sm:$0xff] }
0x15d7   : > { %15337 = vmatpush1.bf16.msra.mxu0 %v15336_v21  ;;  %v11465_v21 = vld [vmem:[#allocation31 + $0x6a8] sm:$0xff] }
0x15d8   : > { %15339 = vmatprep.subr.bf16.mxu0 %v15338_v22  ;;  %v11467_v22 = vld [vmem:[#allocation31 + $0x6b8] sm:$0xff] }
0x15d9   : > { %v15422_v63 = vpack.c.bf16 %v11467_v22, %v11465_v21  ;;  %v11856_v21 = vld [vmem:[#allocation31 + $0x8c0] sm:$0xff]  ;;  %v11858_v22 = vld [vmem:[#allocation31 + $0x8d0] sm:$0xff] }
0x15da   : > { %v15504_v23 = vpack.c.bf16 %v11858_v22, %v11856_v21  ;;  %v10880_v21 = vld [vmem:[#allocation31 + $0x390] sm:$0xff]  ;;  %v10883_v22 = vld [vmem:[#allocation31 + $0x3a8] sm:$0xff] }
0x15db   : > { %15341 = vmatpush1.bf16.msra.mxu0 %v15340_v27  ;;  %v11469_v27 = vld [vmem:[#allocation31 + $0x6c8] sm:$0xff] }
0x15dc   : > { %15343 = vmatprep.subr.bf16.mxu0 %v15342_v3  ;;  %v11471_v3 = vld [vmem:[#allocation31 + $0x6d8] sm:$0xff] }
0x15dd   : > { %v15426_v29 = vpack.c.bf16 %v11471_v3, %v11469_v27  ;;  %v11860_v27 = vld [vmem:[#allocation31 + $0x8e0] sm:$0xff]  ;;  %v11862_v3 = vld [vmem:[#allocation31 + $0x8f0] sm:$0x1] }
0x15df   : > { %15345 = vmatpush1.bf16.msra.mxu0 %v15344_v31  ;;  %v11473_v31 = vld [vmem:[#allocation31 + $0x6e8] sm:$0xff] }
0x15e0   : > { %15347 = vmatprep.subr.bf16.mxu0 %v15346_v13  ;;  %v11475_v13 = vld [vmem:[#allocation31 + $0x6f8] sm:$0x1] }
0x15e1   : > { %v15430_v41 = vpack.c.bf16 %v11475_v13, %v11473_v31 }
0x15e3   : > { %15349 = vmatpush1.bf16.msra.mxu0 %v15348_v42  ;;  %v11833_v42 = vld [vmem:[#allocation31 + $0x808] sm:$0xff] }
0x15e4   : > { %15351 = vmatprep.subr.bf16.mxu0 %v15350_v47  ;;  %v11835_v47 = vld [vmem:[#allocation31 + $0x818] sm:$0xff] }
0x15e5   : > { %v15478_v49 = vpack.c.bf16 %v11835_v47, %v11833_v42 }
0x15e7   : > { %15353 = vmatpush1.bf16.msra.mxu0 %v15352_v52  ;;  %v11837_v52 = vld [vmem:[#allocation31 + $0x828] sm:$0xff] }
0x15e8   : > { %15356 = vmatprep.subr.msk.bf16.mxu0 %vm17646_vm9, %v15354_v53  ;;  %v11839_v53 = vld [vmem:[#allocation31 + $0x838] sm:$0xff] }
0x15e9   : > { %v15482_v56 = vpack.c.bf16 %v11839_v53, %v11837_v52  ;;  %v10863_v53 = vld [vmem:[#allocation31 + $0x308] sm:$0xff] }
0x15eb   : > { %15359 = vmatpush1.bf16.msk.msra.mxu0 %vm17646_vm9, %v15357_v30  ;;  %v11841_v30 = vld [vmem:[#allocation31 + $0x848] sm:$0xff] }
0x15ec   : > { %15403 = vmatprep.subr.bf16.mxu0 %v15402_v61  ;;  %v11843_v61 = vld [vmem:[#allocation31 + $0x858] sm:$0xff] }
0x15ed   : > { %v15486_v15 = vpack.c.bf16 %v11843_v61, %v11841_v30 }
0x15ee   : > { %12666 = vmatmul.mubr.msk.f32.vlgmr.msra.gmra.mrb[78].mxu0 %vm10310_vm5, %v17940_v19 }
0x15ef   : > { %15405 = vmatpush1.bf16.msra.mxu0 %v15404_v34  ;;  %11164 = vmatprep.mubr.f32.mxu0 %v16532_v38  ;;  %v11845_v34 = vld [vmem:[#allocation31 + $0x868] sm:$0xff] }
0x15f0   : > { %15407 = vmatprep.subr.bf16.mxu0 %v15406_v6  ;;  %v11847_v6 = vld [vmem:[#allocation31 + $0x878] sm:$0xff] }
0x15f1   : > { %v15490_v12 = vpack.c.bf16 %v11847_v6, %v11845_v34  ;;  %v10784_v34 = vld [vmem:[#allocation28 + $0x10] sm:$0xff] }
0x15f2   : > { %12667 = vmatmul.mubr.msk.f32.gmra.mrb[80].mxu0 %vm10310_vm5, %v17947_v25 }
0x15f3   : > { %15409 = vmatpush1.bf16.msra.mxu0 %v15408_v7  ;;  %11546 = vmatprep.mubr.f32.mxu0 %v16532_v38  ;;  %v11849_v7 = vld [vmem:[#allocation31 + $0x888] sm:$0xff] }
0x15f4   : > { %15411 = vmatprep.subr.bf16.mxu0 %v15410_v24  ;;  %v11851_v24 = vld [vmem:[#allocation31 + $0x898] sm:$0xff] }
0x15f5   : > { %v15494_v32 = vpack.c.bf16 %v11851_v24, %v11849_v7  ;;  %v10873_v7 = vld [vmem:[#allocation31 + $0x358] sm:$0xff] }
0x15f7   : > { %15413 = vmatpush1.bf16.msra.mxu0 %v15412_v9  ;;  %v11853_v9 = vld [vmem:[#allocation31 + $0x8a8] sm:$0xff] }
0x15f8   : > { %15415 = vmatprep.subr.bf16.mxu0 %v15414_v55  ;;  %v11855_v55 = vld [vmem:[#allocation31 + $0x8b8] sm:$0xff] }
0x15f9   : > { %v15498_v11 = vpack.c.bf16 %v11855_v55, %v11853_v9  ;;  %v10877_v9 = vld [vmem:[#allocation31 + $0x378] sm:$0xff] }
0x15fb   : > { %15417 = vmatpush1.bf16.msra.mxu0 %v15416_v16  ;;  %v11857_v16 = vld [vmem:[#allocation31 + $0x8c8] sm:$0xff] }
0x15fc   : > { %15419 = vmatprep.subr.bf16.mxu0 %v15418_v59  ;;  %v11859_v59 = vld [vmem:[#allocation31 + $0x8d8] sm:$0xff] }
0x15fd   : > { %v15502_v20 = vpack.c.bf16 %v11859_v59, %v11857_v16  ;;  %v10881_v16 = vld [vmem:[#allocation31 + $0x398] sm:$0xff] }
0x15ff   : > { %15421 = vmatpush1.bf16.msra.mxu0 %v15420_v1  ;;  %v11861_v1 = vld [vmem:[#allocation31 + $0x8e8] sm:$0xff] }
0x1600   : > { %15423 = vmatprep.subr.bf16.mxu0 %v15422_v63  ;;  %v11863_v63 = vld [vmem:[#allocation31 + $0x8f8] sm:$0x1] }
0x1601   : > { %v15506_v26 = vpack.c.bf16 %v11863_v63, %v11861_v1  ;;  %v10885_v1 = vld [vmem:[#allocation31 + $0x3b8] sm:$0xff] }
0x1603   : > { %15425 = vmatpush1.bf16.msra.mxu0 %v15424_v28  ;;  %v15509_v28 = vpack.c.bf16 %v11862_v3, %v11860_v27  ;;  %v10884_v27 = vld [vmem:[#allocation31 + $0x3b0] sm:$0xff]  ;;  %v10887_v3 = vld [vmem:[#allocation31 + $0x3c8] sm:$0xff] }
0x1604   : > { %15427 = vmatprep.subr.bf16.mxu0 %v15426_v29 }
0x1607   : > { %15429 = vmatpush1.bf16.msra.mxu0 %v15428_v40 }
0x1608   : > { %15432 = vmatprep.subr.msk.bf16.mxu0 %vm17646_vm9, %v15430_v41 }
0x160b   : > { %15435 = vmatpush1.bf16.msk.msra.mxu0 %vm17646_vm9, %v15433_v48 }
0x160c   : > { %15479 = vmatprep.subr.bf16.mxu0 %v15478_v49  ;;  %v10518_v49 = vld [vmem:[#allocation28 + $0x8] sm:$0xff] }
0x160e   : > { %12676 = vmatmul.mubr.msk.f32.vlgmr.msra.gmra.mrb[82].mxu0 %vm10310_vm5, %v17940_v19 }
0x160f   : > { %15481 = vmatpush1.bf16.msra.mxu0 %v15480_v54  ;;  %11552 = vmatprep.mubr.f32.mxu0 %v16532_v38  ;;  %v10865_v54 = vld [vmem:[#allocation31 + $0x318] sm:$0xff] }
0x1610   : > { %15483 = vmatprep.subr.bf16.mxu0 %v15482_v56  ;;  %v15288_v61 = vpack.c.bf16 %v10865_v54, %v10863_v53 }
0x1612   : > { %12677 = vmatmul.mubr.msk.f32.gmra.mrb[84].mxu0 %vm10310_vm5, %v17947_v25 }
0x1613   : > { %15485 = vmatpush1.bf16.msra.mxu0 %v15484_v8  ;;  %11934 = vmatprep.mubr.f32.mxu0 %v16532_v38  ;;  %v10862_v8 = vld [vmem:[#allocation31 + $0x300] sm:$0xff] }
0x1614   : > { %15487 = vmatprep.subr.bf16.mxu0 %v15486_v15  ;;  %v10864_v15 = vld [vmem:[#allocation31 + $0x310] sm:$0xff] }
0x1615   : > { %v15290_v6 = vpack.c.bf16 %v10864_v15, %v10862_v8 }
0x1617   : > { %15489 = vmatpush1.bf16.msra.mxu0 %v15488_v39  ;;  %v15292_v39 = vpack.c.bf16 %v10869_v4, %v10867_v2 }
0x1618   : > { %15491 = vmatprep.subr.bf16.mxu0 %v15490_v12  ;;  %v10866_v12 = vld [vmem:[#allocation31 + $0x320] sm:$0xff] }
0x1619   : > { %v15294_v24 = vpack.c.bf16 %v10868_v10, %v10866_v12 }
0x161b   : > { %15493 = vmatpush1.bf16.msra.mxu0 %v15492_v33  ;;  %v15296_v33 = vpack.c.bf16 %v10873_v7, %v10871_v50 }
0x161c   : > { %15495 = vmatprep.subr.bf16.mxu0 %v15494_v32  ;;  %v10870_v32 = vld [vmem:[#allocation31 + $0x340] sm:$0xff] }
0x161d   : > { %v15298_v55 = vpack.c.bf16 %v10872_v43, %v10870_v32  ;;  %v11253_v32 = vld [vmem:[#allocation31 + $0x518] sm:$0xff]  ;;  %v10978_v43 = vld [vmem:[#allocation28 + $0x18] sm:$0xff] }
0x161f   : > { %15497 = vmatpush1.bf16.msra.mxu0 %v15496_v58  ;;  %v15300_v58 = vpack.c.bf16 %v10877_v9, %v10875_v0  ;;  %v11250_v9 = vld [vmem:[#allocation31 + $0x500] sm:$0xff] }
0x1620   : > { %15499 = vmatprep.subr.bf16.mxu0 %v15498_v11  ;;  %v10874_v11 = vld [vmem:[#allocation31 + $0x360] sm:$0xff] }
0x1621   : > { %v15302_v59 = vpack.c.bf16 %v10876_v14, %v10874_v11  ;;  %v11257_v11 = vld [vmem:[#allocation31 + $0x538] sm:$0xff]  ;;  %v11172_v14 = vld [vmem:[#allocation28 + $0x20] sm:$0xff] }
0x1623   : > { %15501 = vmatpush1.bf16.msra.mxu0 %v15500_v18  ;;  %v15304_v18 = vpack.c.bf16 %v10881_v16, %v10879_v46 }
0x1624   : > { %15503 = vmatprep.subr.bf16.mxu0 %v15502_v20  ;;  %v10878_v20 = vld [vmem:[#allocation31 + $0x380] sm:$0xff] }
0x1625   : > { %v15306_v63 = vpack.c.bf16 %v10880_v21, %v10878_v20  ;;  %v11259_v20 = vld [vmem:[#allocation31 + $0x548] sm:$0xff]  ;;  %v11261_v21 = vld [vmem:[#allocation31 + $0x558] sm:$0xff] }
0x1627   : > { %15505 = vmatpush1.bf16.msra.mxu0 %v15504_v23  ;;  %v15308_v23 = vpack.c.bf16 %v10885_v1, %v10883_v22  ;;  %v15372_v1 = vpack.c.bf16 %v11261_v21, %v11259_v20  ;;  %v11638_v21 = vld [vmem:[#allocation31 + $0x700] sm:$0xff] }
0x1628   : > { %15508 = vmatprep.subr.msk.bf16.mxu0 %vm17646_vm9, %v15506_v26  ;;  %v10882_v26 = vld [vmem:[#allocation31 + $0x3a0] sm:$0xff] }
0x162b   : > { %15511 = vmatpush1.bf16.msk.msra.mxu0 %vm17646_vm9, %v15509_v28  ;;  %v10889_v28 = vld [vmem:[#allocation31 + $0x3d8] sm:$0xff] }
0x162e   : > { %12686 = vmatmul.mubr.msk.f32.vlgmr.msra.gmra.mrb[86].mxu0 %vm10310_vm5, %v17940_v19 }
0x162f   : > { %11940 = vmatprep.mubr.f32.mxu0 %v16532_v38 }
0x1632   : > { %12687 = vmatmul.mubr.msk.f32.gmra.mrb[88].mxu0 %vm10310_vm5, %v17947_v25 }
0x1681   : > { %v10389_v29 = vpop.f32.mrb[98].mxu1  ;;  %v10506_v36 = vpop.f32.mrb[70].mxu0 }
0x1682   : > { %v10391_v37 = vpop.f32.mrb[99].mxu1  ;;  %v10508_v31 = vpop.f32.mrb[71].mxu0 }
0x1685   : > { %v10395_v13 = vpop.f32.mrb[100].mxu1  ;;  %v10512_v40 = vpop.f32.mrb[72].mxu0 }
0x1686   : > { %v15248_v41 = vpack.c.bf16 %v10395_v13, %v10389_v29  ;;  %v15244_v44 = vpack.c.bf16 %v10512_v40, %v10506_v36  ;;  %v10397_v45 = vpop.f32.mrb[101].mxu1  ;;  %v10514_v42 = vpop.f32.mrb[73].mxu0  ;;  %v15310_v29 = vpack.c.bf16 %v10884_v27, %v10882_v26  ;;  %v15312_v36 = vpack.c.bf16 %v10889_v28, %v10887_v3  ;;  %v10891_v13 = vld [vmem:[#allocation31 + $0x3e8] sm:$0xff]  ;;  %v10893_v40 = vld [vmem:[#allocation31 + $0x3f8] sm:$0x1] }
0x1687   : > { %v15246_v47 = vpack.c.bf16 %v10397_v45, %v10391_v37  ;;  %v15242_v48 = vpack.c.bf16 %v10514_v42, %v10508_v31  ;;  %v10886_v37 = vld [vmem:[#allocation31 + $0x3c0] sm:$0xff]  ;;  %v10888_v31 = vld [vmem:[#allocation31 + $0x3d0] sm:$0xff]  ;;  %v15316_v42 = vpack.c.bf16 %v10893_v40, %v10891_v13  ;;  %v11263_v26 = vld [vmem:[#allocation31 + $0x568] sm:$0xff] }
0x1688   : > { %v15314_v45 = vpack.c.bf16 %v10888_v31, %v10886_v37  ;;  %v11265_v27 = vld [vmem:[#allocation31 + $0x578] sm:$0xff]  ;;  %v11267_v37 = vld [vmem:[#allocation31 + $0x588] sm:$0xff] }
0x1689   : > { %15243 = vmatprep.subr.bf16.mxu1 %v15242_v48  ;;  %v10892_v48 = vld [vmem:[#allocation31 + $0x3f0] sm:$0x1]  ;;  %v15376_v28 = vpack.c.bf16 %v11265_v27, %v11263_v26  ;;  %v11269_v31 = vld [vmem:[#allocation31 + $0x598] sm:$0xff] }
0x168a   : > { %15245 = vmatpush1.bf16.msra.mxu1 %v15244_v44  ;;  %v15380_v40 = vpack.c.bf16 %v11269_v31, %v11267_v37 }
0x168b   : > { %15247 = vmatprep.subr.bf16.mxu1 %v15246_v47  ;;  %v10890_v47 = vld [vmem:[#allocation31 + $0x3e0] sm:$0xff] }
0x168d   : > { %12652 = vmatmul.mubr.msk.f32.vlgmr.msra.gmra.mrb[102].mxu1 %vm3215_vm3, %v10518_v49 }
0x168e   : > { %15249 = vmatpush1.bf16.msra.mxu1 %v15248_v41  ;;  %10660 = vmatprep.mubr.f32.mxu1 %v16532_v38 }
0x1695   : > { %12653 = vmatmul.mubr.msk.f32.vlgmr.msra.gmra.mrb[102].mxu1 %vm3215_vm3, %v10400_v51 }
0x1696   : > { %10852 = vmatprep.mubr.f32.mxu1 %v16532_v38 }
0x16a1   : > { %v10772_v60 = vpop.f32.mrb[74].mxu0 }
0x16a2   : > { %v10774_v52 = vpop.f32.mrb[75].mxu0 }
0x16a5   : > { %v10778_v56 = vpop.f32.mrb[76].mxu0 }
0x16a6   : > { %v15286_v57 = vpack.c.bf16 %v10778_v56, %v10772_v60  ;;  %v10780_v35 = vpop.f32.mrb[77].mxu0 }
0x16a7   : > { %v15284_v30 = vpack.c.bf16 %v10780_v35, %v10774_v52  ;;  %v15319_v52 = vpack.c.bf16 %v10892_v48, %v10890_v47 }
0x16a9   : > { %15285 = vmatprep.subr.bf16.mxu1 %v15284_v30 }
0x16aa   : > { %15287 = vmatpush1.bf16.msra.mxu1 %v15286_v57 }
0x16ab   : > { %15289 = vmatprep.subr.bf16.mxu1 %v15288_v61 }
0x16ad   : > { %12658 = vmatmul.mubr.msk.f32.vlgmr.msra.gmra.mrb[102].mxu1 %vm3215_vm3, %v10784_v34 }
0x16ae   : > { %15291 = vmatpush1.bf16.msra.mxu1 %v15290_v6  ;;  %10964 = vmatprep.mubr.f32.mxu1 %v16532_v38 }
0x16af   : > { %15293 = vmatprep.subr.bf16.mxu1 %v15292_v39 }
0x16b2   : > { %15295 = vmatpush1.bf16.msra.mxu1 %v15294_v24 }
0x16b3   : > { %15297 = vmatprep.subr.bf16.mxu1 %v15296_v33  ;;  %v11251_v33 = vld [vmem:[#allocation31 + $0x508] sm:$0xff] }
0x16b4   : > { %v15364_v0 = vpack.c.bf16 %v11253_v32, %v11251_v33  ;;  %v11278_v32 = vld [vmem:[#allocation31 + $0x5e0] sm:$0xff] }
0x16b6   : > { %15299 = vmatpush1.bf16.msra.mxu1 %v15298_v55  ;;  %v11252_v55 = vld [vmem:[#allocation31 + $0x510] sm:$0xff] }
0x16b7   : > { %15301 = vmatprep.subr.bf16.mxu1 %v15300_v58  ;;  %v11255_v58 = vld [vmem:[#allocation31 + $0x528] sm:$0xff]  ;;  %v15366_v46 = vpack.c.bf16 %v11252_v55, %v11250_v9 }
0x16b8   : > { %v15368_v16 = vpack.c.bf16 %v11257_v11, %v11255_v58 }
0x16ba   : > { %15303 = vmatpush1.bf16.msra.mxu1 %v15302_v59  ;;  %v11254_v59 = vld [vmem:[#allocation31 + $0x520] sm:$0xff] }
0x16bb   : > { %15305 = vmatprep.subr.bf16.mxu1 %v15304_v18  ;;  %v11256_v18 = vld [vmem:[#allocation31 + $0x530] sm:$0xff] }
0x16bc   : > { %v15370_v22 = vpack.c.bf16 %v11256_v18, %v11254_v59  ;;  %v11641_v59 = vld [vmem:[#allocation31 + $0x718] sm:$0xff] }
0x16bd   : > { %v11366_v18 = vld [vmem:[#allocation28 + $0x28] sm:$0xff] }
0x16be   : > { %15307 = vmatpush1.bf16.msra.mxu1 %v15306_v63  ;;  %v11258_v63 = vld [vmem:[#allocation31 + $0x540] sm:$0xff] }
0x16bf   : > { %15309 = vmatprep.subr.bf16.mxu1 %v15308_v23  ;;  %v11260_v23 = vld [vmem:[#allocation31 + $0x550] sm:$0xff] }
0x16c0   : > { %v15374_v3 = vpack.c.bf16 %v11260_v23, %v11258_v63  ;;  %v11645_v63 = vld [vmem:[#allocation31 + $0x738] sm:$0xff]  ;;  %v11560_v23 = vld [vmem:[#allocation28 + $0x30] sm:$0xff] }
0x16c1   : > { %v11160_v41 = vpop.f32.mrb[78].mxu0 }
0x16c2   : > { %15311 = vmatpush1.bf16.msra.mxu1 %v15310_v29  ;;  %v11162_v44 = vpop.f32.mrb[79].mxu0  ;;  %v11262_v29 = vld [vmem:[#allocation31 + $0x560] sm:$0xff] }
0x16c3   : > { %15313 = vmatprep.subr.bf16.mxu1 %v15312_v36  ;;  %v11264_v36 = vld [vmem:[#allocation31 + $0x570] sm:$0xff] }
0x16c4   : > { %v15378_v13 = vpack.c.bf16 %v11264_v36, %v11262_v29  ;;  %v11651_v29 = vld [vmem:[#allocation31 + $0x768] sm:$0xff]  ;;  %v11653_v36 = vld [vmem:[#allocation31 + $0x778] sm:$0xff] }
0x16c5   : > { %v11166_v49 = vpop.f32.mrb[80].mxu0  ;;  %v15452_v31 = vpack.c.bf16 %v11653_v36, %v11651_v29 }
0x16c6   : > { %v15362_v51 = vpack.c.bf16 %v11166_v49, %v11160_v41  ;;  %15315 = vmatpush1.bf16.msra.mxu1 %v15314_v45  ;;  %v11168_v60 = vpop.f32.mrb[81].mxu0  ;;  %v11266_v41 = vld [vmem:[#allocation31 + $0x580] sm:$0xff]  ;;  %v11271_v45 = vld [vmem:[#allocation31 + $0x5a8] sm:$0xff] }
0x16c7   : > { %v15360_v53 = vpack.c.bf16 %v11168_v60, %v11162_v44  ;;  %15318 = vmatprep.subr.msk.bf16.mxu1 %vm17646_vm9, %v15316_v42  ;;  %v11268_v44 = vld [vmem:[#allocation31 + $0x590] sm:$0xff]  ;;  %v11273_v42 = vld [vmem:[#allocation31 + $0x5b8] sm:$0xff]  ;;  %v11270_v49 = vld [vmem:[#allocation31 + $0x5a0] sm:$0xff] }
0x16c8   : > { %v15382_v47 = vpack.c.bf16 %v11268_v44, %v11266_v41  ;;  %v15384_v48 = vpack.c.bf16 %v11273_v42, %v11271_v45  ;;  %v11275_v60 = vld [vmem:[#allocation31 + $0x5c8] sm:$0xff]  ;;  %v11657_v44 = vld [vmem:[#allocation31 + $0x798] sm:$0xff] }
0x16c9   : > { %v11655_v41 = vld [vmem:[#allocation31 + $0x788] sm:$0xff] }
0x16ca   : > { %15321 = vmatpush1.bf16.msk.msra.mxu1 %vm17646_vm9, %v15319_v52  ;;  %v11277_v52 = vld [vmem:[#allocation31 + $0x5d8] sm:$0xff]  ;;  %v15456_v42 = vpack.c.bf16 %v11657_v44, %v11655_v41 }
0x16cd   : > { %12661 = vmatmul.mubr.msk.f32.vlgmr.msra.gmra.mrb[104].mxu1 %vm10310_vm5, %v17940_v19 }
0x16ce   : > { %10970 = vmatprep.mubr.f32.mxu1 %v16532_v38 }
0x16d1   : > { %12662 = vmatmul.mubr.msk.f32.gmra.mrb[106].mxu1 %vm10310_vm5, %v17947_v25 }
0x16d2   : > { %11046 = vmatprep.mubr.f32.mxu1 %v16532_v38 }
0x16e1   : > { %v18011_v54 = vpop.f32.mrb[82].mxu0 }
0x16e2   : > { %v18013_v56 = vpop.f32.mrb[83].mxu0 }
0x16e5   : > { %v18015_v57 = vpop.f32.mrb[84].mxu0 }
0x16e6   : > { %v15438_v35 = vpack.c.bf16 %v18015_v57, %v18011_v54  ;;  %v18019_v30 = vpop.f32.mrb[85].mxu0  ;;  %v11646_v57 = vld [vmem:[#allocation31 + $0x740] sm:$0xff] }
0x16e7   : > { %v15436_v61 = vpack.c.bf16 %v18019_v30, %v18013_v56  ;;  %v11644_v56 = vld [vmem:[#allocation31 + $0x730] sm:$0xff]  ;;  %v11647_v30 = vld [vmem:[#allocation31 + $0x748] sm:$0xff] }
0x1701   : > { %v18023_v8 = vpop.f32.mrb[86].mxu0 }
0x1702   : > { %v18025_v15 = vpop.f32.mrb[87].mxu0 }
0x1705   : > { %v18027_v2 = vpop.f32.mrb[88].mxu0 }
0x1706   : > { %v15514_v4 = vpack.c.bf16 %v18027_v2, %v18023_v8  ;;  %v18031_v34 = vpop.f32.mrb[89].mxu0 }
0x1707   : > { %v15512_v6 = vpack.c.bf16 %v18031_v34, %v18025_v15 }
0x17a0   : > { %v10966_v39 = vpop.f32.mrb[104].mxu1 }
0x17a1   : > { %v10968_v12 = vpop.f32.mrb[105].mxu1 }
0x17a4   : > { %v10972_v10 = vpop.f32.mrb[106].mxu1 }
0x17a5   : > { %v15324_v50 = vpack.c.bf16 %v10972_v10, %v10966_v39  ;;  %v10974_v7 = vpop.f32.mrb[107].mxu1  ;;  %v15388_v39 = vpack.c.bf16 %v11277_v52, %v11275_v60  ;;  %v11276_v10 = vld [vmem:[#allocation31 + $0x5d0] sm:$0xff] }
0x17a6   : > { %v15322_v24 = vpack.c.bf16 %v10974_v7, %v10968_v12  ;;  %v11274_v12 = vld [vmem:[#allocation31 + $0x5c0] sm:$0xff]  ;;  %v11281_v7 = vld [vmem:[#allocation31 + $0x5f8] sm:$0x1] }
0x17a8   : > { %15323 = vmatprep.subr.bf16.mxu1 %v15322_v24  ;;  %v15390_v24 = vpack.c.bf16 %v11276_v10, %v11274_v12  ;;  %v11663_v12 = vld [vmem:[#allocation31 + $0x7c8] sm:$0xff]  ;;  %v11665_v10 = vld [vmem:[#allocation31 + $0x7d8] sm:$0xff] }
0x17a9   : > { %15325 = vmatpush1.bf16.msra.mxu1 %v15324_v50  ;;  %v11279_v50 = vld [vmem:[#allocation31 + $0x5e8] sm:$0xff] }
0x17aa   : > { %15361 = vmatprep.subr.bf16.mxu1 %v15360_v53  ;;  %v15392_v33 = vpack.c.bf16 %v11281_v7, %v11279_v50  ;;  %v15464_v7 = vpack.c.bf16 %v11665_v10, %v11663_v12 }
0x17ac   : > { %12663 = vmatmul.mubr.msk.f32.vlgmr.msra.gmra.mrb[102].mxu1 %vm3215_vm3, %v10978_v43  ;;  %v11280_v43 = vld [vmem:[#allocation31 + $0x5f0] sm:$0x1] }
0x17ad   : > { %15363 = vmatpush1.bf16.msra.mxu1 %v15362_v51  ;;  %11240 = vmatprep.mubr.f32.mxu1 %v16532_v38  ;;  %v11272_v51 = vld [vmem:[#allocation31 + $0x5b0] sm:$0xff] }
0x17ae   : > { %15365 = vmatprep.subr.bf16.mxu1 %v15364_v0  ;;  %v15386_v53 = vpack.c.bf16 %v11272_v51, %v11270_v49  ;;  %v15395_v0 = vpack.c.bf16 %v11280_v43, %v11278_v32  ;;  %v11659_v49 = vld [vmem:[#allocation31 + $0x7a8] sm:$0xff]  ;;  %v11661_v51 = vld [vmem:[#allocation31 + $0x7b8] sm:$0xff] }
0x17af   : > { %v15460_v52 = vpack.c.bf16 %v11661_v51, %v11659_v49  ;;  %v11667_v32 = vld [vmem:[#allocation31 + $0x7e8] sm:$0xff]  ;;  %v11669_v43 = vld [vmem:[#allocation31 + $0x7f8] sm:$0x1] }
0x17b4   : > { %12668 = vmatmul.mubr.msk.f32.vlgmr.msra.gmra.mrb[102].mxu1 %vm3215_vm3, %v11172_v14 }
0x17b5   : > { %15367 = vmatpush1.bf16.msra.mxu1 %v15366_v46  ;;  %11352 = vmatprep.mubr.f32.mxu1 %v16532_v38 }
0x17b6   : > { %15369 = vmatprep.subr.bf16.mxu1 %v15368_v16  ;;  %v11639_v16 = vld [vmem:[#allocation31 + $0x708] sm:$0xff] }
0x17b7   : > { %v15440_v20 = vpack.c.bf16 %v11641_v59, %v11639_v16 }
0x17b9   : > { %15371 = vmatpush1.bf16.msra.mxu1 %v15370_v22  ;;  %v11640_v22 = vld [vmem:[#allocation31 + $0x710] sm:$0xff] }
0x17ba   : > { %15373 = vmatprep.subr.bf16.mxu1 %v15372_v1  ;;  %v11643_v1 = vld [vmem:[#allocation31 + $0x728] sm:$0xff]  ;;  %v15442_v26 = vpack.c.bf16 %v11640_v22, %v11638_v21 }
0x17bb   : > { %v15444_v27 = vpack.c.bf16 %v11645_v63, %v11643_v1 }
0x17bd   : > { %15375 = vmatpush1.bf16.msra.mxu1 %v15374_v3  ;;  %v11642_v3 = vld [vmem:[#allocation31 + $0x720] sm:$0xff] }
0x17be   : > { %15377 = vmatprep.subr.bf16.mxu1 %v15376_v28  ;;  %v15446_v28 = vpack.c.bf16 %v11644_v56, %v11642_v3 }
0x17c1   : > { %15379 = vmatpush1.bf16.msra.mxu1 %v15378_v13  ;;  %v11650_v13 = vld [vmem:[#allocation31 + $0x760] sm:$0xff] }
0x17c2   : > { %15381 = vmatprep.subr.bf16.mxu1 %v15380_v40  ;;  %v11652_v40 = vld [vmem:[#allocation31 + $0x770] sm:$0xff] }
0x17c3   : > { %v15454_v45 = vpack.c.bf16 %v11652_v40, %v11650_v13 }
0x17c5   : > { %15383 = vmatpush1.bf16.msra.mxu1 %v15382_v47  ;;  %v11654_v47 = vld [vmem:[#allocation31 + $0x780] sm:$0xff] }
0x17c6   : > { %15385 = vmatprep.subr.bf16.mxu1 %v15384_v48  ;;  %v11656_v48 = vld [vmem:[#allocation31 + $0x790] sm:$0xff] }
0x17c7   : > { %v15458_v60 = vpack.c.bf16 %v11656_v48, %v11654_v47 }
0x17c9   : > { %15387 = vmatpush1.bf16.msra.mxu1 %v15386_v53  ;;  %v11658_v53 = vld [vmem:[#allocation31 + $0x7a0] sm:$0xff] }
0x17ca   : > { %15389 = vmatprep.subr.bf16.mxu1 %v15388_v39  ;;  %v11660_v39 = vld [vmem:[#allocation31 + $0x7b0] sm:$0xff] }
0x17cb   : > { %v15462_v50 = vpack.c.bf16 %v11660_v39, %v11658_v53 }
0x17cd   : > { %15391 = vmatpush1.bf16.msra.mxu1 %v15390_v24  ;;  %v11662_v24 = vld [vmem:[#allocation31 + $0x7c0] sm:$0xff] }
0x17ce   : > { %15394 = vmatprep.subr.msk.bf16.mxu1 %vm17646_vm9, %v15392_v33  ;;  %v11664_v33 = vld [vmem:[#allocation31 + $0x7d0] sm:$0xff] }
0x17d1   : > { %15397 = vmatpush1.bf16.msk.msra.mxu1 %vm17646_vm9, %v15395_v0  ;;  %v15466_v0 = vpack.c.bf16 %v11664_v33, %v11662_v24 }
0x17d4   : > { %12671 = vmatmul.mubr.msk.f32.vlgmr.msra.gmra.mrb[108].mxu1 %vm10310_vm5, %v17940_v19 }
0x17d5   : > { %11358 = vmatprep.mubr.f32.mxu1 %v16532_v38 }
0x17d8   : > { %12672 = vmatmul.mubr.msk.f32.gmra.mrb[110].mxu1 %vm10310_vm5, %v17947_v25 }
0x17d9   : > { %11434 = vmatprep.mubr.f32.mxu1 %v16532_v38 }
0x18a7   : > { %v11354_v9 = vpop.f32.mrb[108].mxu1 }
0x18a8   : > { %v11356_v55 = vpop.f32.mrb[109].mxu1 }
0x18ab   : > { %v11360_v58 = vpop.f32.mrb[110].mxu1 }
0x18ac   : > { %v15400_v11 = vpack.c.bf16 %v11360_v58, %v11354_v9  ;;  %v11362_v14 = vpop.f32.mrb[111].mxu1  ;;  %v15468_v9 = vpack.c.bf16 %v11669_v43, %v11667_v32  ;;  %v11668_v58 = vld [vmem:[#allocation31 + $0x7f0] sm:$0x1] }
0x18ad   : > { %v15398_v46 = vpack.c.bf16 %v11362_v14, %v11356_v55  ;;  %v11666_v55 = vld [vmem:[#allocation31 + $0x7e0] sm:$0xff] }
0x18af   : > { %15399 = vmatprep.subr.bf16.mxu1 %v15398_v46 }
0x18b0   : > { %15401 = vmatpush1.bf16.msra.mxu1 %v15400_v11  ;;  %v15471_v11 = vpack.c.bf16 %v11668_v58, %v11666_v55 }
0x18b1   : > { %15437 = vmatprep.subr.bf16.mxu1 %v15436_v61  ;;  %v11649_v61 = vld [vmem:[#allocation31 + $0x758] sm:$0xff] }
0x18b2   : > { %v15448_v54 = vpack.c.bf16 %v11649_v61, %v11647_v30 }
0x18b3   : > { %12673 = vmatmul.mubr.msk.f32.vlgmr.msra.gmra.mrb[102].mxu1 %vm3215_vm3, %v11366_v18 }
0x18b4   : > { %15439 = vmatpush1.bf16.msra.mxu1 %v15438_v35  ;;  %11628 = vmatprep.mubr.f32.mxu1 %v16532_v38  ;;  %v11648_v35 = vld [vmem:[#allocation31 + $0x750] sm:$0xff] }
0x18b5   : > { %15441 = vmatprep.subr.bf16.mxu1 %v15440_v20  ;;  %v15450_v37 = vpack.c.bf16 %v11648_v35, %v11646_v57 }
0x18bb   : > { %12678 = vmatmul.mubr.msk.f32.vlgmr.msra.gmra.mrb[102].mxu1 %vm3215_vm3, %v11560_v23 }
0x18bc   : > { %15443 = vmatpush1.bf16.msra.mxu1 %v15442_v26  ;;  %11740 = vmatprep.mubr.f32.mxu1 %v16532_v38 }
0x18bd   : > { %15445 = vmatprep.subr.bf16.mxu1 %v15444_v27 }
0x18c0   : > { %15447 = vmatpush1.bf16.msra.mxu1 %v15446_v28 }
0x18c1   : > { %15449 = vmatprep.subr.bf16.mxu1 %v15448_v54 }
0x18c4   : > { %15451 = vmatpush1.bf16.msra.mxu1 %v15450_v37 }
0x18c5   : > { %15453 = vmatprep.subr.bf16.mxu1 %v15452_v31 }
0x18c8   : > { %15455 = vmatpush1.bf16.msra.mxu1 %v15454_v45 }
0x18c9   : > { %15457 = vmatprep.subr.bf16.mxu1 %v15456_v42 }
0x18cc   : > { %15459 = vmatpush1.bf16.msra.mxu1 %v15458_v60 }
0x18cd   : > { %15461 = vmatprep.subr.bf16.mxu1 %v15460_v52 }
0x18d0   : > { %15463 = vmatpush1.bf16.msra.mxu1 %v15462_v50 }
0x18d1   : > { %15465 = vmatprep.subr.bf16.mxu1 %v15464_v7 }
0x18d4   : > { %15467 = vmatpush1.bf16.msra.mxu1 %v15466_v0 }
0x18d5   : > { %15470 = vmatprep.subr.msk.bf16.mxu1 %vm17646_vm9, %v15468_v9 }
0x18d8   : > { %15473 = vmatpush1.bf16.msk.msra.mxu1 %vm17646_vm9, %v15471_v11 }
0x18db   : > { %12681 = vmatmul.mubr.msk.f32.vlgmr.msra.gmra.mrb[112].mxu1 %vm10310_vm5, %v17940_v19  ;;  %v11948_v19 = vld [vmem:[#allocation28 + $0x40] sm:$0xff] }
0x18dc   : > { %11746 = vmatprep.mubr.f32.mxu1 %v16532_v38 }
0x18df   : > { %12682 = vmatmul.mubr.msk.f32.gmra.mrb[114].mxu1 %vm10310_vm5, %v17947_v25  ;;  %v12029_v25 = vpop.permute.xlu0 %12028 }
0x18e0   : > { %11822 = vmatprep.mubr.f32.mxu1 %v16532_v38 }
0x19ae   : > { %v11742_v14 = vpop.f32.mrb[112].mxu1 }
0x19af   : > { %v11744_v46 = vpop.f32.mrb[113].mxu1 }
0x19b2   : > { %v11748_v16 = vpop.f32.mrb[114].mxu1 }
0x19b3   : > { %v15476_v59 = vpack.c.bf16 %v11748_v16, %v11742_v14  ;;  %v11750_v18 = vpop.f32.mrb[115].mxu1 }
0x19b4   : > { %v15474_v20 = vpack.c.bf16 %v11750_v18, %v11744_v46 }
0x19b6   : > { %15475 = vmatprep.subr.bf16.mxu1 %v15474_v20 }
0x19b7   : > { %15477 = vmatpush1.bf16.msra.mxu1 %v15476_v59 }
0x19b8   : > { %15513 = vmatprep.subr.bf16.mxu1 %v15512_v6 }
0x19ba   : > { %12683 = vmatmul.mubr.msk.f32.vlgmr.msra.gmra.mrb[102].mxu1 %vm3215_vm3, %v11754_v62 }
0x19bb   : > { %15515 = vmatpush1.bf16.msra.mxu1 %v15514_v4  ;;  %12016 = vmatprep.mubr.f32.mxu1 %v16532_v38  ;;  %v16536_v38 = vmov 1966171168  }
0x19bc   : > { %v12049_v2 = vunpack.c.l.s4 %v16536_v38 }
0x19be   : > { %v12050_v4 = vunpack.c.0.s8 %v12049_v2 }
0x19c0   : > { %v12053_v3 = vsub.s32 %v12050_v4, %v17661_v5 }
0x19c2   : > { %12688 = vmatmul.mubr.msk.f32.vlgmr.msra.gmra.mrb[102].mxu1 %vm3215_vm3, %v11948_v19  ;;  %vm12065_vm3 = vcmp.lt.s32.totalorder %v6645_v17, 169 }
0x1a95   : > { %v12018_v21 = vpop.f32.mrb[102].mxu1 }
0x1a96   : > { %v12031_v22 = vadd.f32 %v12029_v25, %v12018_v21  ;;  %v12020_v1 = vpop.f32.mrb[103].mxu1 }
0x1a97   : > { %v12032_v63 = vadd.f32 %v12029_v25, %v12020_v1 }
0x1a98   : > { %v12689_v23 = vmul.f32 -1.442695, %v12031_v22 }
0x1a99   : > { %v12690_v15 = vmul.f32 -1.442695, %v12032_v63 }
0x1a9a   : > { %15883 = vpow2.f32 %v12689_v23 }
0x1a9b   : > { %15885 = vpow2.f32 %v12690_v15 }
0x1aa4   : > { %v15884_v34 = vpop.eup %15883 }
0x1aa5   : > { %v15886_v6 = vpop.eup %15885  ;;  %v12039_v26 = vadd.f32 1.0, %v15884_v34 }
0x1aa6   : > { %v12040_v8 = vadd.f32 1.0, %v15886_v6 }
0x1aa7   : > { %15887 = vrcp.f32 %v12039_v26 }
0x1aa8   : > { %15889 = vrcp.f32 %v12040_v8 }
0x1ab1   : > { %v15888_v27 = vpop.eup %15887 }
0x1ab2   : > { %v15890_v56 = vpop.eup %15889 }
0x1ab3   : > { %v12047_v30 = vcombine.low %v15888_v27, %v15890_v56 }
0x1ab5   : > { %v12054_v61 = vrot.slane %v12047_v30, %v12053_v3 }
0x1ab7   : > { %v12061_v28 = vrot.slane %v12054_v61, %v12053_v3 }
0x1ab9   : > { %12067 = vst.msk [vmem:[%s943_s4] sm:$0x3] %vm12065_vm3, %v12061_v28 }
0x1aba PF: > { %s18192_s6 = sld [smem:[#allocation44_spill]] }
0x1ac0   : > { %s42_s2 = sadd.s32 1, %s18192_s6  }
0x1ac1   : > { %p39_p9 = scmp.ge.s32.totalorder %s42_s2, 4  }
0x1ac3   :  { %41 = sbr.rel (!%p39_p9) target bundleno = 26 (0x1a), region = 317 }
0x1aca   :  { %12087 = vsyncpa [#allocation3], 1 }
0x1acb   :  { %12089 = vsyncpa [#allocation3 + $0x1], 1 }
0x1acc   :  { %12090 = vsyncpa [#allocation5], 1 }
0x1acd   :  { %12091 = vsyncpa [#allocation8], 1 }
0x1ace   :  { %12092 = vsyncpa [#allocation11], 1 }
0x1acf   :  { %12093 = vsyncpa [#allocation14], 1 }
0x1ad0   :  { %12094 = vsyncpa [#allocation17], 1 }
0x1ad1   :  { %12095 = vsyncpa [#allocation20], 1 }
0x1ad2   :  { %12096 = vsyncpa [#allocation23], 1 }
0x1ad3   :  { %12097 = vsyncpa [#allocation26], 1 }
0x1ad4   :  { %12098 = vsyncpa [#allocation29], 1 }
0x1ad5   :  { %12099 = vsyncpa [#allocation32], 1 }

</bundles_post_ra>
